<compile_context>
chip_gen: v6e
topology: v6e:2x2x1
jax: 0.10.0
libtpu: 0.0.40
codegen_flags: <defaults>
</compile_context>

<pallas_src>
import numpy as np
import jax
import jax.numpy as jnp
from jax.experimental import pallas as pl
from jax.experimental.pallas import tpu as pltpu


# ----------------------------- Pallas kernel --------------------------------

def _core_cnn_kernel(x_ref, w1_ref, b1_ref, wdw_ref, bdw_ref, w3_ref, b3_ref,
                     wse1_ref, wse2_ref, wm_ref, bm_ref, shift_ref, o_ref):
    # x_ref:    (Bb, Cin, HW)             o_ref:   (Bb, Cout, HW)
    # w1/b1:    (Cout, Cin) / (Cout, 1)   conv1 with BN1 folded
    # wdw/bdw:  (9, Cout, 1) / (Cout, 1)  depthwise 3x3, tap-major, BN2 folded
    # w3/b3:    (Cout, 9*Cout) / (Cout,1) dense 3x3 (col = t*Cout + c), BN3 folded
    # wse1/2:   (Chid, Cout) / (Cout, Chid)   SE linears (bias-free)
    # wm/bm:    (Cout, Cin) / (Cout, 1)   match 1x1 conv with BN folded
    # shift:    (9, HW, HW)               0/1 shift+zero-pad gather matrices
    bb = x_ref.shape[0]
    n_taps = shift_ref.shape[0]
    inv_hw = 1.0 / x_ref.shape[-1]
    f32 = jnp.float32

    for i in range(bb):                        # static unroll: images per block
        x = x_ref[i]                           # (Cin, HW)

        # conv1 (1x1) + folded BN1 + ReLU  -- a single channel matmul.
        a1 = jnp.dot(w1_ref[...], x, preferred_element_type=f32) + b1_ref[...]
        a1 = jnp.maximum(a1, 0.0)              # (Cout, HW)

        # 9 zero-padded spatial shifts of a1 (gather-as-matmul, lane-dense).
        sh1 = [jnp.dot(a1, shift_ref[t], preferred_element_type=f32)
               for t in range(n_taps)]

        # conv2: 3x3 depthwise + folded BN2 + ReLU (per-channel weighted taps).
        a2 = wdw_ref[0] * sh1[0]
        for t in range(1, n_taps):
            a2 = a2 + wdw_ref[t] * sh1[t]
        a2 = jnp.maximum(a2 + bdw_ref[...], 0.0)          # (Cout, HW)

        # conv3: dense 3x3 + folded BN3 as ONE matmul over the tap-stacked input.
        sh2 = [jnp.dot(a2, shift_ref[t], preferred_element_type=f32)
               for t in range(n_taps)]
        stack = jnp.concatenate(sh2, axis=0)               # (9*Cout, HW)
        a3 = jnp.dot(w3_ref[...], stack, preferred_element_type=f32) + b3_ref[...]

        # SE block: global average pool -> FC -> ReLU -> FC -> sigmoid -> scale.
        pooled = jnp.sum(a3, axis=1, keepdims=True) * inv_hw          # (Cout, 1)
        z = jnp.maximum(
            jnp.dot(wse1_ref[...], pooled, preferred_element_type=f32), 0.0)
        gate = jax.nn.sigmoid(
            jnp.dot(wse2_ref[...], z, preferred_element_type=f32))    # (Cout, 1)
        a3 = a3 * gate

        # Residual match branch (1x1 conv, no bias, + folded BN) and output ReLU.
        res = jnp.dot(wm_ref[...], x, preferred_element_type=f32) + bm_ref[...]
        o_ref[i] = jnp.maximum(a3 + res, 0.0)


# ------------------------------- wrapper -------------------------------------

def _shift_matrices(H, W):
    """(9, HW, HW) 0/1 matrices: (a @ S[t])[c, p] = a[c, p + d_t] with zero pad."""
    HW = H * W
    p = np.arange(HW)
    h, w = p // W, p % W
    mats = np.zeros((9, HW, HW), np.float32)
    t = 0
    for dh in (-1, 0, 1):
        for dw in (-1, 0, 1):
            valid = (h + dh >= 0) & (h + dh < H) & (w + dw >= 0) & (w + dw < W)
            q = (h + dh) * W + (w + dw)
            mats[t, q[valid], p[valid]] = 1.0
            t += 1
    return jnp.asarray(mats)


def core_cnn_block(x_nchw, params, *, batch_block=None):
    B, Cin, H, W = x_nchw.shape
    Cout = params["conv1_w"].shape[0]
    HW = H * W
    eps = 1e-5

    # Fold the whole (tiny) batch into one grid step; for large B pick a
    # batch_block that keeps >=2 blocks so v7x's two TensorCores both work.
    bb = B if batch_block is None else batch_block
    assert B % bb == 0
    G = B // bb

    # ---- fold eval-mode BatchNorms into the conv weights / biases ----------
    def fold(w, b, pre):
        scale = params[pre + "_g"] / jnp.sqrt(params[pre + "_v"] + eps)
        shift = params[pre + "_b"] - params[pre + "_m"] * scale
        w_f = w * scale.reshape((-1,) + (1,) * (w.ndim - 1))
        b0 = jnp.zeros((w.shape[0],), w.dtype) if b is None else b
        b_f = scale * b0 + shift
        return w_f, b_f

    w1, b1 = fold(params["conv1_w"][:, :, 0, 0], params["conv1_b"], "bn1")
    wdw, bdw = fold(params["conv2_w"], params["conv2_b"], "bn2")
    w3, b3 = fold(params["conv3_w"], params["conv3_b"], "bn3")
    wm, bm = fold(params["match_w"][:, :, 0, 0], None, "bnm")

    # ---- re-layout for the kernel ------------------------------------------
    wdw_k = wdw.reshape(Cout, 9).T.reshape(9, Cout, 1)          # tap-major
    w3_k = jnp.transpose(w3, (0, 2, 3, 1)).reshape(Cout, 9 * Cout)  # col=t*Cout+c
    b1_k = b1.reshape(Cout, 1)
    bdw_k = bdw.reshape(Cout, 1)
    b3_k = b3.reshape(Cout, 1)
    bm_k = bm.reshape(Cout, 1)
    S = _shift_matrices(H, W)                                   # (9, HW, HW)

    x_flat = x_nchw.reshape(B, Cin, HW)       # NCHW flatten: no transpose needed

    def full(shape):
        nd = len(shape)
        return pl.BlockSpec(shape, lambda g, _n=nd: (0,) * _n)

    grid_spec = pltpu.PrefetchScalarGridSpec(
        num_scalar_prefetch=0,
        grid=(G,),
        in_specs=[
            pl.BlockSpec((bb, Cin, HW), lambda g: (g, 0, 0)),
            full((Cout, Cin)), full((Cout, 1)),
            full((9, Cout, 1)), full((Cout, 1)),
            full((Cout, 9 * Cout)), full((Cout, 1)),
            full(params["se_w1"].shape), full(params["se_w2"].shape),
            full((Cout, Cin)), full((Cout, 1)),
            full((9, HW, HW)),
        ],
        out_specs=pl.BlockSpec((bb, Cout, HW), lambda g: (g, 0, 0)),
    )

    out = pl.pallas_call(
        _core_cnn_kernel,
        out_shape=jax.ShapeDtypeStruct((B, Cout, HW), jnp.float32),
        grid_spec=grid_spec,
        compiler_params=pltpu.CompilerParams(
            dimension_semantics=("parallel",)),
    )(x_flat, w1, b1_k, wdw_k, bdw_k, w3_k, b3_k,
      params["se_w1"], params["se_w2"], wm, bm_k, S)

    return out.reshape(B, Cout, H, W)


# ------------------------- deterministic parameters --------------------------

def init_params(key, cin, cout, reduction=16):
    chid = max(cout // reduction, 1)
    ks = jax.random.split(key, 16)

    def nrm(k, shape, s=0.2):
        return s * jax.random.normal(k, shape, jnp.float32)

    p = {
        "conv1_w": nrm(ks[0], (cout, cin, 1, 1)),
        "conv1_b": nrm(ks[1], (cout,), 0.1),
        "conv2_w": nrm(ks[2], (cout, 1, 3, 3)),          # depthwise (groups=cout)
        "conv2_b": nrm(ks[3], (cout,), 0.1),
        "conv3_w": nrm(ks[4], (cout, cout, 3, 3)),
        "conv3_b": nrm(ks[5], (cout,), 0.1),
        "match_w": nrm(ks[6], (cout, cin, 1, 1)),        # bias-free 1x1 conv
        "se_w1": nrm(ks[7], (chid, cout)),               # Linear(C -> C/r), no bias
        "se_w2": nrm(ks[8], (cout, chid)),               # Linear(C/r -> C), no bias
    }
    for name, kk in (("bn1", ks[9]), ("bn2", ks[10]),
                     ("bn3", ks[11]), ("bnm", ks[12])):
        k1, k2, k3, k4 = jax.random.split(kk, 4)
        p[name + "_g"] = 1.0 + 0.1 * jax.random.normal(k1, (cout,), jnp.float32)
        p[name + "_b"] = 0.1 * jax.random.normal(k2, (cout,), jnp.float32)
        p[name + "_m"] = 0.1 * jax.random.normal(k3, (cout,), jnp.float32)
        p[name + "_v"] = jax.random.uniform(k4, (cout,), jnp.float32, 0.5, 1.5)
    return p


# ------------------------------ pure-JAX reference ---------------------------

def reference(x, p, eps=1e-5):
    P = jax.lax.Precision.HIGHEST

    def bn(z, pre):
        s = p[pre + "_g"] / jnp.sqrt(p[pre + "_v"] + eps)
        sh = p[pre + "_b"] - p[pre + "_m"] * s
        return z * s[None, :, None, None] + sh[None, :, None, None]

    def conv(z, w, b=None, groups=1):
        ph, pw = w.shape[2] // 2, w.shape[3] // 2
        y = jax.lax.conv_general_dilated(
            z, w, (1, 1), ((ph, ph), (pw, pw)),
            dimension_numbers=("NCHW", "OIHW", "NCHW"),
            feature_group_count=groups, precision=P)
        if b is not None:
            y = y + b[None, :, None, None]
        return y

    identity = x
    y = jax.nn.relu(bn(conv(x, p["conv1_w"], p["conv1_b"]), "bn1"))
    y = jax.nn.relu(bn(conv(y, p["conv2_w"], p["conv2_b"],
                            groups=p["conv2_w"].shape[0]), "bn2"))
    y = bn(conv(y, p["conv3_w"], p["conv3_b"]), "bn3")
    pooled = y.mean(axis=(2, 3))                                   # (B, C)
    z = jax.nn.relu(jnp.einsum("bc,hc->bh", pooled, p["se_w1"], precision=P))
    gate = jax.nn.sigmoid(jnp.einsum("bh,ch->bc", z, p["se_w2"], precision=P))
    y = y * gate[:, :, None, None]
    res = bn(conv(identity, p["match_w"]), "bnm")
    return jax.nn.relu(y + res)


# ---------------------------------- main --------------------------------------

if __name__ == "__main__":
    key = jax.random.PRNGKey(0)
    kx, kp = jax.random.split(key)

    # in_channels=8, out_channels=32 (so SE hidden = 32 // 16 = 2), 16x16 images.
    B, Cin, Cout, H, W = 2, 8, 32, 16, 16
    x = jax.random.normal(kx, (B, Cin, H, W), jnp.float32)
    params = init_params(kp, Cin, Cout)

    out = core_cnn_block(x, params)
    out = jax.block_until_ready(out)

    ref = reference(x, params)
    assert out.shape == (B, Cout, H, W)
    max_err = float(jnp.max(jnp.abs(out - ref)))
    assert jnp.allclose(out, ref, atol=2e-4, rtol=2e-4), f"max abs err {max_err}"

    print("KERNEL_OK")
</pallas_src>

<mosaic_0001>
module attributes {stable_mosaic.version = 11 : i64} {
  func.func @_core_cnn_kernel(%arg0: i32, %arg1: memref<2x8x256xf32, #tpu.memory_space<vmem>>, %arg2: memref<32x8xf32, #tpu.memory_space<vmem>>, %arg3: memref<32x1xf32, #tpu.memory_space<vmem>>, %arg4: memref<9x32x1xf32, #tpu.memory_space<vmem>>, %arg5: memref<32x1xf32, #tpu.memory_space<vmem>>, %arg6: memref<32x288xf32, #tpu.memory_space<vmem>>, %arg7: memref<32x1xf32, #tpu.memory_space<vmem>>, %arg8: memref<2x32xf32, #tpu.memory_space<vmem>>, %arg9: memref<32x2xf32, #tpu.memory_space<vmem>>, %arg10: memref<32x8xf32, #tpu.memory_space<vmem>>, %arg11: memref<32x1xf32, #tpu.memory_space<vmem>>, %arg12: memref<9x256x256xf32, #tpu.memory_space<vmem>>, %arg13: memref<2x32x256xf32, #tpu.memory_space<vmem>>) attributes {dimension_semantics = [#tpu.dimension_semantics<parallel>], iteration_bounds = array<i64: 1>, scalar_prefetch = 0 : i64, scratch_operands = 0 : i64, tpu.core_type = #tpu.core_type<tc>, window_params = [{transform_indices = @transform_0, window_bounds = array<i64: 2, 8, 256>}, {pipeline_mode = #tpu.pipeline_mode<synchronous>, transform_indices = @transform_1, window_bounds = array<i64: 32, 8>}, {pipeline_mode = #tpu.pipeline_mode<synchronous>, transform_indices = @transform_2, window_bounds = array<i64: 32, 1>}, {pipeline_mode = #tpu.pipeline_mode<synchronous>, transform_indices = @transform_3, window_bounds = array<i64: 9, 32, 1>}, {pipeline_mode = #tpu.pipeline_mode<synchronous>, transform_indices = @transform_4, window_bounds = array<i64: 32, 1>}, {pipeline_mode = #tpu.pipeline_mode<synchronous>, transform_indices = @transform_5, window_bounds = array<i64: 32, 288>}, {pipeline_mode = #tpu.pipeline_mode<synchronous>, transform_indices = @transform_6, window_bounds = array<i64: 32, 1>}, {pipeline_mode = #tpu.pipeline_mode<synchronous>, transform_indices = @transform_7, window_bounds = array<i64: 2, 32>}, {pipeline_mode = #tpu.pipeline_mode<synchronous>, transform_indices = @transform_8, window_bounds = array<i64: 32, 2>}, {pipeline_mode = #tpu.pipeline_mode<synchronous>, transform_indices = @transform_9, window_bounds = array<i64: 32, 8>}, {pipeline_mode = #tpu.pipeline_mode<synchronous>, transform_indices = @transform_10, window_bounds = array<i64: 32, 1>}, {pipeline_mode = #tpu.pipeline_mode<synchronous>, transform_indices = @transform_11, window_bounds = array<i64: 9, 256, 256>}, {transform_indices = @transform_12, window_bounds = array<i64: 2, 32, 256>}]} {
    %c0 = arith.constant 0 : index
    %c0_0 = arith.constant 0 : index
    %c0_1 = arith.constant 0 : index
    %0 = vector.load %arg1[%c0, %c0_0, %c0_1] : memref<2x8x256xf32, #tpu.memory_space<vmem>>, vector<1x8x256xf32>
    %1 = vector.shape_cast %0 : vector<1x8x256xf32> to vector<8x256xf32>
    %c0_2 = arith.constant 0 : index
    %c0_3 = arith.constant 0 : index
    %2 = vector.load %arg2[%c0_2, %c0_3] : memref<32x8xf32, #tpu.memory_space<vmem>>, vector<32x8xf32>
    %cst = arith.constant dense<0.000000e+00> : vector<32x256xf32>
    %3 = tpu.matmul %2, %1, %cst {dimension_numbers = #tpu.dot_dimension_numbers<[1], [0], [0], [1], [0, 0, 1, 1], [], []>} : vector<32x8xf32>, vector<8x256xf32>, vector<32x256xf32> -> vector<32x256xf32>
    %c0_4 = arith.constant 0 : index
    %c0_5 = arith.constant 0 : index
    %4 = vector.load %arg3[%c0_4, %c0_5] : memref<32x1xf32, #tpu.memory_space<vmem>>, vector<32x1xf32>
    %5 = vector.broadcast %4 : vector<32x1xf32> to vector<32x256xf32>
    %6 = arith.addf %3, %5 : vector<32x256xf32>
    %cst_6 = arith.constant 0.000000e+00 : f32
    %7 = vector.broadcast %cst_6 : f32 to vector<32x256xf32>
    %8 = arith.maximumf %6, %7 : vector<32x256xf32>
    %c0_7 = arith.constant 0 : index
    %c0_8 = arith.constant 0 : index
    %c0_9 = arith.constant 0 : index
    %9 = vector.load %arg12[%c0_7, %c0_8, %c0_9] : memref<9x256x256xf32, #tpu.memory_space<vmem>>, vector<1x256x256xf32>
    %10 = vector.shape_cast %9 : vector<1x256x256xf32> to vector<256x256xf32>
    %cst_10 = arith.constant dense<0.000000e+00> : vector<32x256xf32>
    %11 = tpu.matmul %8, %10, %cst_10 {dimension_numbers = #tpu.dot_dimension_numbers<[1], [0], [0], [1], [0, 0, 1, 1], [], []>} : vector<32x256xf32>, vector<256x256xf32>, vector<32x256xf32> -> vector<32x256xf32>
    %c1 = arith.constant 1 : index
    %c0_11 = arith.constant 0 : index
    %c0_12 = arith.constant 0 : index
    %12 = vector.load %arg12[%c1, %c0_11, %c0_12] : memref<9x256x256xf32, #tpu.memory_space<vmem>>, vector<1x256x256xf32>
    %13 = vector.shape_cast %12 : vector<1x256x256xf32> to vector<256x256xf32>
    %cst_13 = arith.constant dense<0.000000e+00> : vector<32x256xf32>
    %14 = tpu.matmul %8, %13, %cst_13 {dimension_numbers = #tpu.dot_dimension_numbers<[1], [0], [0], [1], [0, 0, 1, 1], [], []>} : vector<32x256xf32>, vector<256x256xf32>, vector<32x256xf32> -> vector<32x256xf32>
    %c2 = arith.constant 2 : index
    %c0_14 = arith.constant 0 : index
    %c0_15 = arith.constant 0 : index
    %15 = vector.load %arg12[%c2, %c0_14, %c0_15] : memref<9x256x256xf32, #tpu.memory_space<vmem>>, vector<1x256x256xf32>
    %16 = vector.shape_cast %15 : vector<1x256x256xf32> to vector<256x256xf32>
    %cst_16 = arith.constant dense<0.000000e+00> : vector<32x256xf32>
    %17 = tpu.matmul %8, %16, %cst_16 {dimension_numbers = #tpu.dot_dimension_numbers<[1], [0], [0], [1], [0, 0, 1, 1], [], []>} : vector<32x256xf32>, vector<256x256xf32>, vector<32x256xf32> -> vector<32x256xf32>
    %c3 = arith.constant 3 : index
    %c0_17 = arith.constant 0 : index
    %c0_18 = arith.constant 0 : index
    %18 = vector.load %arg12[%c3, %c0_17, %c0_18] : memref<9x256x256xf32, #tpu.memory_space<vmem>>, vector<1x256x256xf32>
    %19 = vector.shape_cast %18 : vector<1x256x256xf32> to vector<256x256xf32>
    %cst_19 = arith.constant dense<0.000000e+00> : vector<32x256xf32>
    %20 = tpu.matmul %8, %19, %cst_19 {dimension_numbers = #tpu.dot_dimension_numbers<[1], [0], [0], [1], [0, 0, 1, 1], [], []>} : vector<32x256xf32>, vector<256x256xf32>, vector<32x256xf32> -> vector<32x256xf32>
    %c4 = arith.constant 4 : index
    %c0_20 = arith.constant 0 : index
    %c0_21 = arith.constant 0 : index
    %21 = vector.load %arg12[%c4, %c0_20, %c0_21] : memref<9x256x256xf32, #tpu.memory_space<vmem>>, vector<1x256x256xf32>
    %22 = vector.shape_cast %21 : vector<1x256x256xf32> to vector<256x256xf32>
    %cst_22 = arith.constant dense<0.000000e+00> : vector<32x256xf32>
    %23 = tpu.matmul %8, %22, %cst_22 {dimension_numbers = #tpu.dot_dimension_numbers<[1], [0], [0], [1], [0, 0, 1, 1], [], []>} : vector<32x256xf32>, vector<256x256xf32>, vector<32x256xf32> -> vector<32x256xf32>
    %c5 = arith.constant 5 : index
    %c0_23 = arith.constant 0 : index
    %c0_24 = arith.constant 0 : index
    %24 = vector.load %arg12[%c5, %c0_23, %c0_24] : memref<9x256x256xf32, #tpu.memory_space<vmem>>, vector<1x256x256xf32>
    %25 = vector.shape_cast %24 : vector<1x256x256xf32> to vector<256x256xf32>
    %cst_25 = arith.constant dense<0.000000e+00> : vector<32x256xf32>
    %26 = tpu.matmul %8, %25, %cst_25 {dimension_numbers = #tpu.dot_dimension_numbers<[1], [0], [0], [1], [0, 0, 1, 1], [], []>} : vector<32x256xf32>, vector<256x256xf32>, vector<32x256xf32> -> vector<32x256xf32>
    %c6 = arith.constant 6 : index
    %c0_26 = arith.constant 0 : index
    %c0_27 = arith.constant 0 : index
    %27 = vector.load %arg12[%c6, %c0_26, %c0_27] : memref<9x256x256xf32, #tpu.memory_space<vmem>>, vector<1x256x256xf32>
    %28 = vector.shape_cast %27 : vector<1x256x256xf32> to vector<256x256xf32>
    %cst_28 = arith.constant dense<0.000000e+00> : vector<32x256xf32>
    %29 = tpu.matmul %8, %28, %cst_28 {dimension_numbers = #tpu.dot_dimension_numbers<[1], [0], [0], [1], [0, 0, 1, 1], [], []>} : vector<32x256xf32>, vector<256x256xf32>, vector<32x256xf32> -> vector<32x256xf32>
    %c7 = arith.constant 7 : index
    %c0_29 = arith.constant 0 : index
    %c0_30 = arith.constant 0 : index
    %30 = vector.load %arg12[%c7, %c0_29, %c0_30] : memref<9x256x256xf32, #tpu.memory_space<vmem>>, vector<1x256x256xf32>
    %31 = vector.shape_cast %30 : vector<1x256x256xf32> to vector<256x256xf32>
    %cst_31 = arith.constant dense<0.000000e+00> : vector<32x256xf32>
    %32 = tpu.matmul %8, %31, %cst_31 {dimension_numbers = #tpu.dot_dimension_numbers<[1], [0], [0], [1], [0, 0, 1, 1], [], []>} : vector<32x256xf32>, vector<256x256xf32>, vector<32x256xf32> -> vector<32x256xf32>
    %c8 = arith.constant 8 : index
    %c0_32 = arith.constant 0 : index
    %c0_33 = arith.constant 0 : index
    %33 = vector.load %arg12[%c8, %c0_32, %c0_33] : memref<9x256x256xf32, #tpu.memory_space<vmem>>, vector<1x256x256xf32>
    %34 = vector.shape_cast %33 : vector<1x256x256xf32> to vector<256x256xf32>
    %cst_34 = arith.constant dense<0.000000e+00> : vector<32x256xf32>
    %35 = tpu.matmul %8, %34, %cst_34 {dimension_numbers = #tpu.dot_dimension_numbers<[1], [0], [0], [1], [0, 0, 1, 1], [], []>} : vector<32x256xf32>, vector<256x256xf32>, vector<32x256xf32> -> vector<32x256xf32>
    %c0_35 = arith.constant 0 : index
    %c0_36 = arith.constant 0 : index
    %c0_37 = arith.constant 0 : index
    %36 = vector.load %arg4[%c0_35, %c0_36, %c0_37] : memref<9x32x1xf32, #tpu.memory_space<vmem>>, vector<1x32x1xf32>
    %37 = vector.shape_cast %36 : vector<1x32x1xf32> to vector<32x1xf32>
    %38 = vector.broadcast %37 : vector<32x1xf32> to vector<32x256xf32>
    %39 = arith.mulf %38, %11 : vector<32x256xf32>
    %c1_38 = arith.constant 1 : index
    %c0_39 = arith.constant 0 : index
    %c0_40 = arith.constant 0 : index
    %40 = vector.load %arg4[%c1_38, %c0_39, %c0_40] : memref<9x32x1xf32, #tpu.memory_space<vmem>>, vector<1x32x1xf32>
    %41 = vector.shape_cast %40 : vector<1x32x1xf32> to vector<32x1xf32>
    %42 = vector.broadcast %41 : vector<32x1xf32> to vector<32x256xf32>
    %43 = arith.mulf %42, %14 : vector<32x256xf32>
    %44 = arith.addf %39, %43 : vector<32x256xf32>
    %c2_41 = arith.constant 2 : index
    %c0_42 = arith.constant 0 : index
    %c0_43 = arith.constant 0 : index
    %45 = vector.load %arg4[%c2_41, %c0_42, %c0_43] : memref<9x32x1xf32, #tpu.memory_space<vmem>>, vector<1x32x1xf32>
    %46 = vector.shape_cast %45 : vector<1x32x1xf32> to vector<32x1xf32>
    %47 = vector.broadcast %46 : vector<32x1xf32> to vector<32x256xf32>
    %48 = arith.mulf %47, %17 : vector<32x256xf32>
    %49 = arith.addf %44, %48 : vector<32x256xf32>
    %c3_44 = arith.constant 3 : index
    %c0_45 = arith.constant 0 : index
    %c0_46 = arith.constant 0 : index
    %50 = vector.load %arg4[%c3_44, %c0_45, %c0_46] : memref<9x32x1xf32, #tpu.memory_space<vmem>>, vector<1x32x1xf32>
    %51 = vector.shape_cast %50 : vector<1x32x1xf32> to vector<32x1xf32>
    %52 = vector.broadcast %51 : vector<32x1xf32> to vector<32x256xf32>
    %53 = arith.mulf %52, %20 : vector<32x256xf32>
    %54 = arith.addf %49, %53 : vector<32x256xf32>
    %c4_47 = arith.constant 4 : index
    %c0_48 = arith.constant 0 : index
    %c0_49 = arith.constant 0 : index
    %55 = vector.load %arg4[%c4_47, %c0_48, %c0_49] : memref<9x32x1xf32, #tpu.memory_space<vmem>>, vector<1x32x1xf32>
    %56 = vector.shape_cast %55 : vector<1x32x1xf32> to vector<32x1xf32>
    %57 = vector.broadcast %56 : vector<32x1xf32> to vector<32x256xf32>
    %58 = arith.mulf %57, %23 : vector<32x256xf32>
    %59 = arith.addf %54, %58 : vector<32x256xf32>
    %c5_50 = arith.constant 5 : index
    %c0_51 = arith.constant 0 : index
    %c0_52 = arith.constant 0 : index
    %60 = vector.load %arg4[%c5_50, %c0_51, %c0_52] : memref<9x32x1xf32, #tpu.memory_space<vmem>>, vector<1x32x1xf32>
    %61 = vector.shape_cast %60 : vector<1x32x1xf32> to vector<32x1xf32>
    %62 = vector.broadcast %61 : vector<32x1xf32> to vector<32x256xf32>
    %63 = arith.mulf %62, %26 : vector<32x256xf32>
    %64 = arith.addf %59, %63 : vector<32x256xf32>
    %c6_53 = arith.constant 6 : index
    %c0_54 = arith.constant 0 : index
    %c0_55 = arith.constant 0 : index
    %65 = vector.load %arg4[%c6_53, %c0_54, %c0_55] : memref<9x32x1xf32, #tpu.memory_space<vmem>>, vector<1x32x1xf32>
    %66 = vector.shape_cast %65 : vector<1x32x1xf32> to vector<32x1xf32>
    %67 = vector.broadcast %66 : vector<32x1xf32> to vector<32x256xf32>
    %68 = arith.mulf %67, %29 : vector<32x256xf32>
    %69 = arith.addf %64, %68 : vector<32x256xf32>
    %c7_56 = arith.constant 7 : index
    %c0_57 = arith.constant 0 : index
    %c0_58 = arith.constant 0 : index
    %70 = vector.load %arg4[%c7_56, %c0_57, %c0_58] : memref<9x32x1xf32, #tpu.memory_space<vmem>>, vector<1x32x1xf32>
    %71 = vector.shape_cast %70 : vector<1x32x1xf32> to vector<32x1xf32>
    %72 = vector.broadcast %71 : vector<32x1xf32> to vector<32x256xf32>
    %73 = arith.mulf %72, %32 : vector<32x256xf32>
    %74 = arith.addf %69, %73 : vector<32x256xf32>
    %c8_59 = arith.constant 8 : index
    %c0_60 = arith.constant 0 : index
    %c0_61 = arith.constant 0 : index
    %75 = vector.load %arg4[%c8_59, %c0_60, %c0_61] : memref<9x32x1xf32, #tpu.memory_space<vmem>>, vector<1x32x1xf32>
    %76 = vector.shape_cast %75 : vector<1x32x1xf32> to vector<32x1xf32>
    %77 = vector.broadcast %76 : vector<32x1xf32> to vector<32x256xf32>
    %78 = arith.mulf %77, %35 : vector<32x256xf32>
    %79 = arith.addf %74, %78 : vector<32x256xf32>
    %c0_62 = arith.constant 0 : index
    %c0_63 = arith.constant 0 : index
    %80 = vector.load %arg5[%c0_62, %c0_63] : memref<32x1xf32, #tpu.memory_space<vmem>>, vector<32x1xf32>
    %81 = vector.broadcast %80 : vector<32x1xf32> to vector<32x256xf32>
    %82 = arith.addf %79, %81 : vector<32x256xf32>
    %cst_64 = arith.constant 0.000000e+00 : f32
    %83 = vector.broadcast %cst_64 : f32 to vector<32x256xf32>
    %84 = arith.maximumf %82, %83 : vector<32x256xf32>
    %c0_65 = arith.constant 0 : index
    %c0_66 = arith.constant 0 : index
    %c0_67 = arith.constant 0 : index
    %85 = vector.load %arg12[%c0_65, %c0_66, %c0_67] : memref<9x256x256xf32, #tpu.memory_space<vmem>>, vector<1x256x256xf32>
    %86 = vector.shape_cast %85 : vector<1x256x256xf32> to vector<256x256xf32>
    %cst_68 = arith.constant dense<0.000000e+00> : vector<32x256xf32>
    %87 = tpu.matmul %84, %86, %cst_68 {dimension_numbers = #tpu.dot_dimension_numbers<[1], [0], [0], [1], [0, 0, 1, 1], [], []>} : vector<32x256xf32>, vector<256x256xf32>, vector<32x256xf32> -> vector<32x256xf32>
    %c1_69 = arith.constant 1 : index
    %c0_70 = arith.constant 0 : index
    %c0_71 = arith.constant 0 : index
    %88 = vector.load %arg12[%c1_69, %c0_70, %c0_71] : memref<9x256x256xf32, #tpu.memory_space<vmem>>, vector<1x256x256xf32>
    %89 = vector.shape_cast %88 : vector<1x256x256xf32> to vector<256x256xf32>
    %cst_72 = arith.constant dense<0.000000e+00> : vector<32x256xf32>
    %90 = tpu.matmul %84, %89, %cst_72 {dimension_numbers = #tpu.dot_dimension_numbers<[1], [0], [0], [1], [0, 0, 1, 1], [], []>} : vector<32x256xf32>, vector<256x256xf32>, vector<32x256xf32> -> vector<32x256xf32>
    %c2_73 = arith.constant 2 : index
    %c0_74 = arith.constant 0 : index
    %c0_75 = arith.constant 0 : index
    %91 = vector.load %arg12[%c2_73, %c0_74, %c0_75] : memref<9x256x256xf32, #tpu.memory_space<vmem>>, vector<1x256x256xf32>
    %92 = vector.shape_cast %91 : vector<1x256x256xf32> to vector<256x256xf32>
    %cst_76 = arith.constant dense<0.000000e+00> : vector<32x256xf32>
    %93 = tpu.matmul %84, %92, %cst_76 {dimension_numbers = #tpu.dot_dimension_numbers<[1], [0], [0], [1], [0, 0, 1, 1], [], []>} : vector<32x256xf32>, vector<256x256xf32>, vector<32x256xf32> -> vector<32x256xf32>
    %c3_77 = arith.constant 3 : index
    %c0_78 = arith.constant 0 : index
    %c0_79 = arith.constant 0 : index
    %94 = vector.load %arg12[%c3_77, %c0_78, %c0_79] : memref<9x256x256xf32, #tpu.memory_space<vmem>>, vector<1x256x256xf32>
    %95 = vector.shape_cast %94 : vector<1x256x256xf32> to vector<256x256xf32>
    %cst_80 = arith.constant dense<0.000000e+00> : vector<32x256xf32>
    %96 = tpu.matmul %84, %95, %cst_80 {dimension_numbers = #tpu.dot_dimension_numbers<[1], [0], [0], [1], [0, 0, 1, 1], [], []>} : vector<32x256xf32>, vector<256x256xf32>, vector<32x256xf32> -> vector<32x256xf32>
    %c4_81 = arith.constant 4 : index
    %c0_82 = arith.constant 0 : index
    %c0_83 = arith.constant 0 : index
    %97 = vector.load %arg12[%c4_81, %c0_82, %c0_83] : memref<9x256x256xf32, #tpu.memory_space<vmem>>, vector<1x256x256xf32>
    %98 = vector.shape_cast %97 : vector<1x256x256xf32> to vector<256x256xf32>
    %cst_84 = arith.constant dense<0.000000e+00> : vector<32x256xf32>
    %99 = tpu.matmul %84, %98, %cst_84 {dimension_numbers = #tpu.dot_dimension_numbers<[1], [0], [0], [1], [0, 0, 1, 1], [], []>} : vector<32x256xf32>, vector<256x256xf32>, vector<32x256xf32> -> vector<32x256xf32>
    %c5_85 = arith.constant 5 : index
    %c0_86 = arith.constant 0 : index
    %c0_87 = arith.constant 0 : index
    %100 = vector.load %arg12[%c5_85, %c0_86, %c0_87] : memref<9x256x256xf32, #tpu.memory_space<vmem>>, vector<1x256x256xf32>
    %101 = vector.shape_cast %100 : vector<1x256x256xf32> to vector<256x256xf32>
    %cst_88 = arith.constant dense<0.000000e+00> : vector<32x256xf32>
    %102 = tpu.matmul %84, %101, %cst_88 {dimension_numbers = #tpu.dot_dimension_numbers<[1], [0], [0], [1], [0, 0, 1, 1], [], []>} : vector<32x256xf32>, vector<256x256xf32>, vector<32x256xf32> -> vector<32x256xf32>
    %c6_89 = arith.constant 6 : index
    %c0_90 = arith.constant 0 : index
    %c0_91 = arith.constant 0 : index
    %103 = vector.load %arg12[%c6_89, %c0_90, %c0_91] : memref<9x256x256xf32, #tpu.memory_space<vmem>>, vector<1x256x256xf32>
    %104 = vector.shape_cast %103 : vector<1x256x256xf32> to vector<256x256xf32>
    %cst_92 = arith.constant dense<0.000000e+00> : vector<32x256xf32>
    %105 = tpu.matmul %84, %104, %cst_92 {dimension_numbers = #tpu.dot_dimension_numbers<[1], [0], [0], [1], [0, 0, 1, 1], [], []>} : vector<32x256xf32>, vector<256x256xf32>, vector<32x256xf32> -> vector<32x256xf32>
    %c7_93 = arith.constant 7 : index
    %c0_94 = arith.constant 0 : index
    %c0_95 = arith.constant 0 : index
    %106 = vector.load %arg12[%c7_93, %c0_94, %c0_95] : memref<9x256x256xf32, #tpu.memory_space<vmem>>, vector<1x256x256xf32>
    %107 = vector.shape_cast %106 : vector<1x256x256xf32> to vector<256x256xf32>
    %cst_96 = arith.constant dense<0.000000e+00> : vector<32x256xf32>
    %108 = tpu.matmul %84, %107, %cst_96 {dimension_numbers = #tpu.dot_dimension_numbers<[1], [0], [0], [1], [0, 0, 1, 1], [], []>} : vector<32x256xf32>, vector<256x256xf32>, vector<32x256xf32> -> vector<32x256xf32>
    %c8_97 = arith.constant 8 : index
    %c0_98 = arith.constant 0 : index
    %c0_99 = arith.constant 0 : index
    %109 = vector.load %arg12[%c8_97, %c0_98, %c0_99] : memref<9x256x256xf32, #tpu.memory_space<vmem>>, vector<1x256x256xf32>
    %110 = vector.shape_cast %109 : vector<1x256x256xf32> to vector<256x256xf32>
    %cst_100 = arith.constant dense<0.000000e+00> : vector<32x256xf32>
    %111 = tpu.matmul %84, %110, %cst_100 {dimension_numbers = #tpu.dot_dimension_numbers<[1], [0], [0], [1], [0, 0, 1, 1], [], []>} : vector<32x256xf32>, vector<256x256xf32>, vector<32x256xf32> -> vector<32x256xf32>
    %112 = tpu.concatenate %87, %90, %93, %96, %99, %102, %105, %108, %111 in 0 : vector<32x256xf32>, vector<32x256xf32>, vector<32x256xf32>, vector<32x256xf32>, vector<32x256xf32>, vector<32x256xf32>, vector<32x256xf32>, vector<32x256xf32>, vector<32x256xf32> -> vector<288x256xf32>
    %c0_101 = arith.constant 0 : index
    %c0_102 = arith.constant 0 : index
    %113 = vector.load %arg6[%c0_101, %c0_102] : memref<32x288xf32, #tpu.memory_space<vmem>>, vector<32x288xf32>
    %cst_103 = arith.constant dense<0.000000e+00> : vector<32x256xf32>
    %114 = tpu.matmul %113, %112, %cst_103 {dimension_numbers = #tpu.dot_dimension_numbers<[1], [0], [0], [1], [0, 0, 1, 1], [], []>} : vector<32x288xf32>, vector<288x256xf32>, vector<32x256xf32> -> vector<32x256xf32>
    %c0_104 = arith.constant 0 : index
    %c0_105 = arith.constant 0 : index
    %115 = vector.load %arg7[%c0_104, %c0_105] : memref<32x1xf32, #tpu.memory_space<vmem>>, vector<32x1xf32>
    %116 = vector.broadcast %115 : vector<32x1xf32> to vector<32x256xf32>
    %117 = arith.addf %114, %116 : vector<32x256xf32>
    %cst_106 = arith.constant dense<0.000000e+00> : vector<32xf32>
    %118 = vector.multi_reduction <add>, %117, %cst_106 [1] : vector<32x256xf32> to vector<32xf32>
    %119 = vector.shape_cast %118 : vector<32xf32> to vector<32x1xf32>
    %cst_107 = arith.constant 3.906250e-03 : f32
    %120 = vector.broadcast %cst_107 : f32 to vector<32x1xf32>
    %121 = arith.mulf %119, %120 : vector<32x1xf32>
    %c0_108 = arith.constant 0 : index
    %c0_109 = arith.constant 0 : index
    %122 = vector.load %arg8[%c0_108, %c0_109] : memref<2x32xf32, #tpu.memory_space<vmem>>, vector<2x32xf32>
    %cst_110 = arith.constant dense<0.000000e+00> : vector<2x1xf32>
    %123 = tpu.matmul %122, %121, %cst_110 {dimension_numbers = #tpu.dot_dimension_numbers<[1], [0], [0], [1], [0, 0, 1, 1], [], []>} : vector<2x32xf32>, vector<32x1xf32>, vector<2x1xf32> -> vector<2x1xf32>
    %cst_111 = arith.constant 0.000000e+00 : f32
    %124 = vector.broadcast %cst_111 : f32 to vector<2x1xf32>
    %125 = arith.maximumf %123, %124 : vector<2x1xf32>
    %c0_112 = arith.constant 0 : index
    %c0_113 = arith.constant 0 : index
    %126 = vector.load %arg9[%c0_112, %c0_113] : memref<32x2xf32, #tpu.memory_space<vmem>>, vector<32x2xf32>
    %cst_114 = arith.constant dense<0.000000e+00> : vector<32x1xf32>
    %127 = tpu.matmul %126, %125, %cst_114 {dimension_numbers = #tpu.dot_dimension_numbers<[1], [0], [0], [1], [0, 0, 1, 1], [], []>} : vector<32x2xf32>, vector<2x1xf32>, vector<32x1xf32> -> vector<32x1xf32>
    %128 = arith.negf %127 : vector<32x1xf32>
    %129 = math.exp %128 : vector<32x1xf32>
    %cst_115 = arith.constant 1.000000e+00 : f32
    %130 = vector.broadcast %cst_115 : f32 to vector<32x1xf32>
    %131 = arith.addf %130, %129 : vector<32x1xf32>
    %132 = arith.divf %130, %131 : vector<32x1xf32>
    %133 = vector.broadcast %132 : vector<32x1xf32> to vector<32x256xf32>
    %134 = arith.mulf %117, %133 : vector<32x256xf32>
    %c0_116 = arith.constant 0 : index
    %c0_117 = arith.constant 0 : index
    %135 = vector.load %arg10[%c0_116, %c0_117] : memref<32x8xf32, #tpu.memory_space<vmem>>, vector<32x8xf32>
    %cst_118 = arith.constant dense<0.000000e+00> : vector<32x256xf32>
    %136 = tpu.matmul %135, %1, %cst_118 {dimension_numbers = #tpu.dot_dimension_numbers<[1], [0], [0], [1], [0, 0, 1, 1], [], []>} : vector<32x8xf32>, vector<8x256xf32>, vector<32x256xf32> -> vector<32x256xf32>
    %c0_119 = arith.constant 0 : index
    %c0_120 = arith.constant 0 : index
    %137 = vector.load %arg11[%c0_119, %c0_120] : memref<32x1xf32, #tpu.memory_space<vmem>>, vector<32x1xf32>
    %138 = vector.broadcast %137 : vector<32x1xf32> to vector<32x256xf32>
    %139 = arith.addf %136, %138 : vector<32x256xf32>
    %140 = arith.addf %134, %139 : vector<32x256xf32>
    %cst_121 = arith.constant 0.000000e+00 : f32
    %141 = vector.broadcast %cst_121 : f32 to vector<32x256xf32>
    %142 = arith.maximumf %140, %141 : vector<32x256xf32>
    %c0_122 = arith.constant 0 : index
    %c0_123 = arith.constant 0 : index
    %c0_124 = arith.constant 0 : index
    %143 = vector.load %arg13[%c0_122, %c0_123, %c0_124] : memref<2x32x256xf32, #tpu.memory_space<vmem>>, vector<1x32x256xf32>
    %144 = vector.shape_cast %143 : vector<1x32x256xf32> to vector<32x256xf32>
    %145 = vector.shape_cast %142 : vector<32x256xf32> to vector<1x32x256xf32>
    tpu.vector_store %arg13[%c0_122, %c0_123, %c0_124], %145 {strides = array<i32>} : memref<2x32x256xf32, #tpu.memory_space<vmem>>, vector<1x32x256xf32>,
    %c1_125 = arith.constant 1 : index
    %c0_126 = arith.constant 0 : index
    %c0_127 = arith.constant 0 : index
    %146 = vector.load %arg1[%c1_125, %c0_126, %c0_127] : memref<2x8x256xf32, #tpu.memory_space<vmem>>, vector<1x8x256xf32>
    %147 = vector.shape_cast %146 : vector<1x8x256xf32> to vector<8x256xf32>
    %c0_128 = arith.constant 0 : index
    %c0_129 = arith.constant 0 : index
    %148 = vector.load %arg2[%c0_128, %c0_129] : memref<32x8xf32, #tpu.memory_space<vmem>>, vector<32x8xf32>
    %cst_130 = arith.constant dense<0.000000e+00> : vector<32x256xf32>
    %149 = tpu.matmul %148, %147, %cst_130 {dimension_numbers = #tpu.dot_dimension_numbers<[1], [0], [0], [1], [0, 0, 1, 1], [], []>} : vector<32x8xf32>, vector<8x256xf32>, vector<32x256xf32> -> vector<32x256xf32>
    %c0_131 = arith.constant 0 : index
    %c0_132 = arith.constant 0 : index
    %150 = vector.load %arg3[%c0_131, %c0_132] : memref<32x1xf32, #tpu.memory_space<vmem>>, vector<32x1xf32>
    %151 = vector.broadcast %150 : vector<32x1xf32> to vector<32x256xf32>
    %152 = arith.addf %149, %151 : vector<32x256xf32>
    %cst_133 = arith.constant 0.000000e+00 : f32
    %153 = vector.broadcast %cst_133 : f32 to vector<32x256xf32>
    %154 = arith.maximumf %152, %153 : vector<32x256xf32>
    %c0_134 = arith.constant 0 : index
    %c0_135 = arith.constant 0 : index
    %c0_136 = arith.constant 0 : index
    %155 = vector.load %arg12[%c0_134, %c0_135, %c0_136] : memref<9x256x256xf32, #tpu.memory_space<vmem>>, vector<1x256x256xf32>
    %156 = vector.shape_cast %155 : vector<1x256x256xf32> to vector<256x256xf32>
    %cst_137 = arith.constant dense<0.000000e+00> : vector<32x256xf32>
    %157 = tpu.matmul %154, %156, %cst_137 {dimension_numbers = #tpu.dot_dimension_numbers<[1], [0], [0], [1], [0, 0, 1, 1], [], []>} : vector<32x256xf32>, vector<256x256xf32>, vector<32x256xf32> -> vector<32x256xf32>
    %c1_138 = arith.constant 1 : index
    %c0_139 = arith.constant 0 : index
    %c0_140 = arith.constant 0 : index
    %158 = vector.load %arg12[%c1_138, %c0_139, %c0_140] : memref<9x256x256xf32, #tpu.memory_space<vmem>>, vector<1x256x256xf32>
    %159 = vector.shape_cast %158 : vector<1x256x256xf32> to vector<256x256xf32>
    %cst_141 = arith.constant dense<0.000000e+00> : vector<32x256xf32>
    %160 = tpu.matmul %154, %159, %cst_141 {dimension_numbers = #tpu.dot_dimension_numbers<[1], [0], [0], [1], [0, 0, 1, 1], [], []>} : vector<32x256xf32>, vector<256x256xf32>, vector<32x256xf32> -> vector<32x256xf32>
    %c2_142 = arith.constant 2 : index
    %c0_143 = arith.constant 0 : index
    %c0_144 = arith.constant 0 : index
    %161 = vector.load %arg12[%c2_142, %c0_143, %c0_144] : memref<9x256x256xf32, #tpu.memory_space<vmem>>, vector<1x256x256xf32>
    %162 = vector.shape_cast %161 : vector<1x256x256xf32> to vector<256x256xf32>
    %cst_145 = arith.constant dense<0.000000e+00> : vector<32x256xf32>
    %163 = tpu.matmul %154, %162, %cst_145 {dimension_numbers = #tpu.dot_dimension_numbers<[1], [0], [0], [1], [0, 0, 1, 1], [], []>} : vector<32x256xf32>, vector<256x256xf32>, vector<32x256xf32> -> vector<32x256xf32>
    %c3_146 = arith.constant 3 : index
    %c0_147 = arith.constant 0 : index
    %c0_148 = arith.constant 0 : index
    %164 = vector.load %arg12[%c3_146, %c0_147, %c0_148] : memref<9x256x256xf32, #tpu.memory_space<vmem>>, vector<1x256x256xf32>
    %165 = vector.shape_cast %164 : vector<1x256x256xf32> to vector<256x256xf32>
    %cst_149 = arith.constant dense<0.000000e+00> : vector<32x256xf32>
    %166 = tpu.matmul %154, %165, %cst_149 {dimension_numbers = #tpu.dot_dimension_numbers<[1], [0], [0], [1], [0, 0, 1, 1], [], []>} : vector<32x256xf32>, vector<256x256xf32>, vector<32x256xf32> -> vector<32x256xf32>
    %c4_150 = arith.constant 4 : index
    %c0_151 = arith.constant 0 : index
    %c0_152 = arith.constant 0 : index
    %167 = vector.load %arg12[%c4_150, %c0_151, %c0_152] : memref<9x256x256xf32, #tpu.memory_space<vmem>>, vector<1x256x256xf32>
    %168 = vector.shape_cast %167 : vector<1x256x256xf32> to vector<256x256xf32>
    %cst_153 = arith.constant dense<0.000000e+00> : vector<32x256xf32>
    %169 = tpu.matmul %154, %168, %cst_153 {dimension_numbers = #tpu.dot_dimension_numbers<[1], [0], [0], [1], [0, 0, 1, 1], [], []>} : vector<32x256xf32>, vector<256x256xf32>, vector<32x256xf32> -> vector<32x256xf32>
    %c5_154 = arith.constant 5 : index
    %c0_155 = arith.constant 0 : index
    %c0_156 = arith.constant 0 : index
    %170 = vector.load %arg12[%c5_154, %c0_155, %c0_156] : memref<9x256x256xf32, #tpu.memory_space<vmem>>, vector<1x256x256xf32>
    %171 = vector.shape_cast %170 : vector<1x256x256xf32> to vector<256x256xf32>
    %cst_157 = arith.constant dense<0.000000e+00> : vector<32x256xf32>
    %172 = tpu.matmul %154, %171, %cst_157 {dimension_numbers = #tpu.dot_dimension_numbers<[1], [0], [0], [1], [0, 0, 1, 1], [], []>} : vector<32x256xf32>, vector<256x256xf32>, vector<32x256xf32> -> vector<32x256xf32>
    %c6_158 = arith.constant 6 : index
    %c0_159 = arith.constant 0 : index
    %c0_160 = arith.constant 0 : index
    %173 = vector.load %arg12[%c6_158, %c0_159, %c0_160] : memref<9x256x256xf32, #tpu.memory_space<vmem>>, vector<1x256x256xf32>
    %174 = vector.shape_cast %173 : vector<1x256x256xf32> to vector<256x256xf32>
    %cst_161 = arith.constant dense<0.000000e+00> : vector<32x256xf32>
    %175 = tpu.matmul %154, %174, %cst_161 {dimension_numbers = #tpu.dot_dimension_numbers<[1], [0], [0], [1], [0, 0, 1, 1], [], []>} : vector<32x256xf32>, vector<256x256xf32>, vector<32x256xf32> -> vector<32x256xf32>
    %c7_162 = arith.constant 7 : index
    %c0_163 = arith.constant 0 : index
    %c0_164 = arith.constant 0 : index
    %176 = vector.load %arg12[%c7_162, %c0_163, %c0_164] : memref<9x256x256xf32, #tpu.memory_space<vmem>>, vector<1x256x256xf32>
    %177 = vector.shape_cast %176 : vector<1x256x256xf32> to vector<256x256xf32>
    %cst_165 = arith.constant dense<0.000000e+00> : vector<32x256xf32>
    %178 = tpu.matmul %154, %177, %cst_165 {dimension_numbers = #tpu.dot_dimension_numbers<[1], [0], [0], [1], [0, 0, 1, 1], [], []>} : vector<32x256xf32>, vector<256x256xf32>, vector<32x256xf32> -> vector<32x256xf32>
    %c8_166 = arith.constant 8 : index
    %c0_167 = arith.constant 0 : index
    %c0_168 = arith.constant 0 : index
    %179 = vector.load %arg12[%c8_166, %c0_167, %c0_168] : memref<9x256x256xf32, #tpu.memory_space<vmem>>, vector<1x256x256xf32>
    %180 = vector.shape_cast %179 : vector<1x256x256xf32> to vector<256x256xf32>
    %cst_169 = arith.constant dense<0.000000e+00> : vector<32x256xf32>
    %181 = tpu.matmul %154, %180, %cst_169 {dimension_numbers = #tpu.dot_dimension_numbers<[1], [0], [0], [1], [0, 0, 1, 1], [], []>} : vector<32x256xf32>, vector<256x256xf32>, vector<32x256xf32> -> vector<32x256xf32>
    %c0_170 = arith.constant 0 : index
    %c0_171 = arith.constant 0 : index
    %c0_172 = arith.constant 0 : index
    %182 = vector.load %arg4[%c0_170, %c0_171, %c0_172] : memref<9x32x1xf32, #tpu.memory_space<vmem>>, vector<1x32x1xf32>
    %183 = vector.shape_cast %182 : vector<1x32x1xf32> to vector<32x1xf32>
    %184 = vector.broadcast %183 : vector<32x1xf32> to vector<32x256xf32>
    %185 = arith.mulf %184, %157 : vector<32x256xf32>
    %c1_173 = arith.constant 1 : index
    %c0_174 = arith.constant 0 : index
    %c0_175 = arith.constant 0 : index
    %186 = vector.load %arg4[%c1_173, %c0_174, %c0_175] : memref<9x32x1xf32, #tpu.memory_space<vmem>>, vector<1x32x1xf32>
    %187 = vector.shape_cast %186 : vector<1x32x1xf32> to vector<32x1xf32>
    %188 = vector.broadcast %187 : vector<32x1xf32> to vector<32x256xf32>
    %189 = arith.mulf %188, %160 : vector<32x256xf32>
    %190 = arith.addf %185, %189 : vector<32x256xf32>
    %c2_176 = arith.constant 2 : index
    %c0_177 = arith.constant 0 : index
    %c0_178 = arith.constant 0 : index
    %191 = vector.load %arg4[%c2_176, %c0_177, %c0_178] : memref<9x32x1xf32, #tpu.memory_space<vmem>>, vector<1x32x1xf32>
    %192 = vector.shape_cast %191 : vector<1x32x1xf32> to vector<32x1xf32>
    %193 = vector.broadcast %192 : vector<32x1xf32> to vector<32x256xf32>
    %194 = arith.mulf %193, %163 : vector<32x256xf32>
    %195 = arith.addf %190, %194 : vector<32x256xf32>
    %c3_179 = arith.constant 3 : index
    %c0_180 = arith.constant 0 : index
    %c0_181 = arith.constant 0 : index
    %196 = vector.load %arg4[%c3_179, %c0_180, %c0_181] : memref<9x32x1xf32, #tpu.memory_space<vmem>>, vector<1x32x1xf32>
    %197 = vector.shape_cast %196 : vector<1x32x1xf32> to vector<32x1xf32>
    %198 = vector.broadcast %197 : vector<32x1xf32> to vector<32x256xf32>
    %199 = arith.mulf %198, %166 : vector<32x256xf32>
    %200 = arith.addf %195, %199 : vector<32x256xf32>
    %c4_182 = arith.constant 4 : index
    %c0_183 = arith.constant 0 : index
    %c0_184 = arith.constant 0 : index
    %201 = vector.load %arg4[%c4_182, %c0_183, %c0_184] : memref<9x32x1xf32, #tpu.memory_space<vmem>>, vector<1x32x1xf32>
    %202 = vector.shape_cast %201 : vector<1x32x1xf32> to vector<32x1xf32>
    %203 = vector.broadcast %202 : vector<32x1xf32> to vector<32x256xf32>
    %204 = arith.mulf %203, %169 : vector<32x256xf32>
    %205 = arith.addf %200, %204 : vector<32x256xf32>
    %c5_185 = arith.constant 5 : index
    %c0_186 = arith.constant 0 : index
    %c0_187 = arith.constant 0 : index
    %206 = vector.load %arg4[%c5_185, %c0_186, %c0_187] : memref<9x32x1xf32, #tpu.memory_space<vmem>>, vector<1x32x1xf32>
    %207 = vector.shape_cast %206 : vector<1x32x1xf32> to vector<32x1xf32>
    %208 = vector.broadcast %207 : vector<32x1xf32> to vector<32x256xf32>
    %209 = arith.mulf %208, %172 : vector<32x256xf32>
    %210 = arith.addf %205, %209 : vector<32x256xf32>
    %c6_188 = arith.constant 6 : index
    %c0_189 = arith.constant 0 : index
    %c0_190 = arith.constant 0 : index
    %211 = vector.load %arg4[%c6_188, %c0_189, %c0_190] : memref<9x32x1xf32, #tpu.memory_space<vmem>>, vector<1x32x1xf32>
    %212 = vector.shape_cast %211 : vector<1x32x1xf32> to vector<32x1xf32>
    %213 = vector.broadcast %212 : vector<32x1xf32> to vector<32x256xf32>
    %214 = arith.mulf %213, %175 : vector<32x256xf32>
    %215 = arith.addf %210, %214 : vector<32x256xf32>
    %c7_191 = arith.constant 7 : index
    %c0_192 = arith.constant 0 : index
    %c0_193 = arith.constant 0 : index
    %216 = vector.load %arg4[%c7_191, %c0_192, %c0_193] : memref<9x32x1xf32, #tpu.memory_space<vmem>>, vector<1x32x1xf32>
    %217 = vector.shape_cast %216 : vector<1x32x1xf32> to vector<32x1xf32>
    %218 = vector.broadcast %217 : vector<32x1xf32> to vector<32x256xf32>
    %219 = arith.mulf %218, %178 : vector<32x256xf32>
    %220 = arith.addf %215, %219 : vector<32x256xf32>
    %c8_194 = arith.constant 8 : index
    %c0_195 = arith.constant 0 : index
    %c0_196 = arith.constant 0 : index
    %221 = vector.load %arg4[%c8_194, %c0_195, %c0_196] : memref<9x32x1xf32, #tpu.memory_space<vmem>>, vector<1x32x1xf32>
    %222 = vector.shape_cast %221 : vector<1x32x1xf32> to vector<32x1xf32>
    %223 = vector.broadcast %222 : vector<32x1xf32> to vector<32x256xf32>
    %224 = arith.mulf %223, %181 : vector<32x256xf32>
    %225 = arith.addf %220, %224 : vector<32x256xf32>
    %c0_197 = arith.constant 0 : index
    %c0_198 = arith.constant 0 : index
    %226 = vector.load %arg5[%c0_197, %c0_198] : memref<32x1xf32, #tpu.memory_space<vmem>>, vector<32x1xf32>
    %227 = vector.broadcast %226 : vector<32x1xf32> to vector<32x256xf32>
    %228 = arith.addf %225, %227 : vector<32x256xf32>
    %cst_199 = arith.constant 0.000000e+00 : f32
    %229 = vector.broadcast %cst_199 : f32 to vector<32x256xf32>
    %230 = arith.maximumf %228, %229 : vector<32x256xf32>
    %c0_200 = arith.constant 0 : index
    %c0_201 = arith.constant 0 : index
    %c0_202 = arith.constant 0 : index
    %231 = vector.load %arg12[%c0_200, %c0_201, %c0_202] : memref<9x256x256xf32, #tpu.memory_space<vmem>>, vector<1x256x256xf32>
    %232 = vector.shape_cast %231 : vector<1x256x256xf32> to vector<256x256xf32>
    %cst_203 = arith.constant dense<0.000000e+00> : vector<32x256xf32>
    %233 = tpu.matmul %230, %232, %cst_203 {dimension_numbers = #tpu.dot_dimension_numbers<[1], [0], [0], [1], [0, 0, 1, 1], [], []>} : vector<32x256xf32>, vector<256x256xf32>, vector<32x256xf32> -> vector<32x256xf32>
    %c1_204 = arith.constant 1 : index
    %c0_205 = arith.constant 0 : index
    %c0_206 = arith.constant 0 : index
    %234 = vector.load %arg12[%c1_204, %c0_205, %c0_206] : memref<9x256x256xf32, #tpu.memory_space<vmem>>, vector<1x256x256xf32>
    %235 = vector.shape_cast %234 : vector<1x256x256xf32> to vector<256x256xf32>
    %cst_207 = arith.constant dense<0.000000e+00> : vector<32x256xf32>
    %236 = tpu.matmul %230, %235, %cst_207 {dimension_numbers = #tpu.dot_dimension_numbers<[1], [0], [0], [1], [0, 0, 1, 1], [], []>} : vector<32x256xf32>, vector<256x256xf32>, vector<32x256xf32> -> vector<32x256xf32>
    %c2_208 = arith.constant 2 : index
    %c0_209 = arith.constant 0 : index
    %c0_210 = arith.constant 0 : index
    %237 = vector.load %arg12[%c2_208, %c0_209, %c0_210] : memref<9x256x256xf32, #tpu.memory_space<vmem>>, vector<1x256x256xf32>
    %238 = vector.shape_cast %237 : vector<1x256x256xf32> to vector<256x256xf32>
    %cst_211 = arith.constant dense<0.000000e+00> : vector<32x256xf32>
    %239 = tpu.matmul %230, %238, %cst_211 {dimension_numbers = #tpu.dot_dimension_numbers<[1], [0], [0], [1], [0, 0, 1, 1], [], []>} : vector<32x256xf32>, vector<256x256xf32>, vector<32x256xf32> -> vector<32x256xf32>
    %c3_212 = arith.constant 3 : index
    %c0_213 = arith.constant 0 : index
    %c0_214 = arith.constant 0 : index
    %240 = vector.load %arg12[%c3_212, %c0_213, %c0_214] : memref<9x256x256xf32, #tpu.memory_space<vmem>>, vector<1x256x256xf32>
    %241 = vector.shape_cast %240 : vector<1x256x256xf32> to vector<256x256xf32>
    %cst_215 = arith.constant dense<0.000000e+00> : vector<32x256xf32>
    %242 = tpu.matmul %230, %241, %cst_215 {dimension_numbers = #tpu.dot_dimension_numbers<[1], [0], [0], [1], [0, 0, 1, 1], [], []>} : vector<32x256xf32>, vector<256x256xf32>, vector<32x256xf32> -> vector<32x256xf32>
    %c4_216 = arith.constant 4 : index
    %c0_217 = arith.constant 0 : index
    %c0_218 = arith.constant 0 : index
    %243 = vector.load %arg12[%c4_216, %c0_217, %c0_218] : memref<9x256x256xf32, #tpu.memory_space<vmem>>, vector<1x256x256xf32>
    %244 = vector.shape_cast %243 : vector<1x256x256xf32> to vector<256x256xf32>
    %cst_219 = arith.constant dense<0.000000e+00> : vector<32x256xf32>
    %245 = tpu.matmul %230, %244, %cst_219 {dimension_numbers = #tpu.dot_dimension_numbers<[1], [0], [0], [1], [0, 0, 1, 1], [], []>} : vector<32x256xf32>, vector<256x256xf32>, vector<32x256xf32> -> vector<32x256xf32>
    %c5_220 = arith.constant 5 : index
    %c0_221 = arith.constant 0 : index
    %c0_222 = arith.constant 0 : index
    %246 = vector.load %arg12[%c5_220, %c0_221, %c0_222] : memref<9x256x256xf32, #tpu.memory_space<vmem>>, vector<1x256x256xf32>
    %247 = vector.shape_cast %246 : vector<1x256x256xf32> to vector<256x256xf32>
    %cst_223 = arith.constant dense<0.000000e+00> : vector<32x256xf32>
    %248 = tpu.matmul %230, %247, %cst_223 {dimension_numbers = #tpu.dot_dimension_numbers<[1], [0], [0], [1], [0, 0, 1, 1], [], []>} : vector<32x256xf32>, vector<256x256xf32>, vector<32x256xf32> -> vector<32x256xf32>
    %c6_224 = arith.constant 6 : index
    %c0_225 = arith.constant 0 : index
    %c0_226 = arith.constant 0 : index
    %249 = vector.load %arg12[%c6_224, %c0_225, %c0_226] : memref<9x256x256xf32, #tpu.memory_space<vmem>>, vector<1x256x256xf32>
    %250 = vector.shape_cast %249 : vector<1x256x256xf32> to vector<256x256xf32>
    %cst_227 = arith.constant dense<0.000000e+00> : vector<32x256xf32>
    %251 = tpu.matmul %230, %250, %cst_227 {dimension_numbers = #tpu.dot_dimension_numbers<[1], [0], [0], [1], [0, 0, 1, 1], [], []>} : vector<32x256xf32>, vector<256x256xf32>, vector<32x256xf32> -> vector<32x256xf32>
    %c7_228 = arith.constant 7 : index
    %c0_229 = arith.constant 0 : index
    %c0_230 = arith.constant 0 : index
    %252 = vector.load %arg12[%c7_228, %c0_229, %c0_230] : memref<9x256x256xf32, #tpu.memory_space<vmem>>, vector<1x256x256xf32>
    %253 = vector.shape_cast %252 : vector<1x256x256xf32> to vector<256x256xf32>
    %cst_231 = arith.constant dense<0.000000e+00> : vector<32x256xf32>
    %254 = tpu.matmul %230, %253, %cst_231 {dimension_numbers = #tpu.dot_dimension_numbers<[1], [0], [0], [1], [0, 0, 1, 1], [], []>} : vector<32x256xf32>, vector<256x256xf32>, vector<32x256xf32> -> vector<32x256xf32>
    %c8_232 = arith.constant 8 : index
    %c0_233 = arith.constant 0 : index
    %c0_234 = arith.constant 0 : index
    %255 = vector.load %arg12[%c8_232, %c0_233, %c0_234] : memref<9x256x256xf32, #tpu.memory_space<vmem>>, vector<1x256x256xf32>
    %256 = vector.shape_cast %255 : vector<1x256x256xf32> to vector<256x256xf32>
    %cst_235 = arith.constant dense<0.000000e+00> : vector<32x256xf32>
    %257 = tpu.matmul %230, %256, %cst_235 {dimension_numbers = #tpu.dot_dimension_numbers<[1], [0], [0], [1], [0, 0, 1, 1], [], []>} : vector<32x256xf32>, vector<256x256xf32>, vector<32x256xf32> -> vector<32x256xf32>
    %258 = tpu.concatenate %233, %236, %239, %242, %245, %248, %251, %254, %257 in 0 : vector<32x256xf32>, vector<32x256xf32>, vector<32x256xf32>, vector<32x256xf32>, vector<32x256xf32>, vector<32x256xf32>, vector<32x256xf32>, vector<32x256xf32>, vector<32x256xf32> -> vector<288x256xf32>
    %c0_236 = arith.constant 0 : index
    %c0_237 = arith.constant 0 : index
    %259 = vector.load %arg6[%c0_236, %c0_237] : memref<32x288xf32, #tpu.memory_space<vmem>>, vector<32x288xf32>
    %cst_238 = arith.constant dense<0.000000e+00> : vector<32x256xf32>
    %260 = tpu.matmul %259, %258, %cst_238 {dimension_numbers = #tpu.dot_dimension_numbers<[1], [0], [0], [1], [0, 0, 1, 1], [], []>} : vector<32x288xf32>, vector<288x256xf32>, vector<32x256xf32> -> vector<32x256xf32>
    %c0_239 = arith.constant 0 : index
    %c0_240 = arith.constant 0 : index
    %261 = vector.load %arg7[%c0_239, %c0_240] : memref<32x1xf32, #tpu.memory_space<vmem>>, vector<32x1xf32>
    %262 = vector.broadcast %261 : vector<32x1xf32> to vector<32x256xf32>
    %263 = arith.addf %260, %262 : vector<32x256xf32>
    %cst_241 = arith.constant dense<0.000000e+00> : vector<32xf32>
    %264 = vector.multi_reduction <add>, %263, %cst_241 [1] : vector<32x256xf32> to vector<32xf32>
    %265 = vector.shape_cast %264 : vector<32xf32> to vector<32x1xf32>
    %cst_242 = arith.constant 3.906250e-03 : f32
    %266 = vector.broadcast %cst_242 : f32 to vector<32x1xf32>
    %267 = arith.mulf %265, %266 : vector<32x1xf32>
    %c0_243 = arith.constant 0 : index
    %c0_244 = arith.constant 0 : index
    %268 = vector.load %arg8[%c0_243, %c0_244] : memref<2x32xf32, #tpu.memory_space<vmem>>, vector<2x32xf32>
    %cst_245 = arith.constant dense<0.000000e+00> : vector<2x1xf32>
    %269 = tpu.matmul %268, %267, %cst_245 {dimension_numbers = #tpu.dot_dimension_numbers<[1], [0], [0], [1], [0, 0, 1, 1], [], []>} : vector<2x32xf32>, vector<32x1xf32>, vector<2x1xf32> -> vector<2x1xf32>
    %cst_246 = arith.constant 0.000000e+00 : f32
    %270 = vector.broadcast %cst_246 : f32 to vector<2x1xf32>
    %271 = arith.maximumf %269, %270 : vector<2x1xf32>
    %c0_247 = arith.constant 0 : index
    %c0_248 = arith.constant 0 : index
    %272 = vector.load %arg9[%c0_247, %c0_248] : memref<32x2xf32, #tpu.memory_space<vmem>>, vector<32x2xf32>
    %cst_249 = arith.constant dense<0.000000e+00> : vector<32x1xf32>
    %273 = tpu.matmul %272, %271, %cst_249 {dimension_numbers = #tpu.dot_dimension_numbers<[1], [0], [0], [1], [0, 0, 1, 1], [], []>} : vector<32x2xf32>, vector<2x1xf32>, vector<32x1xf32> -> vector<32x1xf32>
    %274 = arith.negf %273 : vector<32x1xf32>
    %275 = math.exp %274 : vector<32x1xf32>
    %cst_250 = arith.constant 1.000000e+00 : f32
    %276 = vector.broadcast %cst_250 : f32 to vector<32x1xf32>
    %277 = arith.addf %276, %275 : vector<32x1xf32>
    %278 = arith.divf %276, %277 : vector<32x1xf32>
    %279 = vector.broadcast %278 : vector<32x1xf32> to vector<32x256xf32>
    %280 = arith.mulf %263, %279 : vector<32x256xf32>
    %c0_251 = arith.constant 0 : index
    %c0_252 = arith.constant 0 : index
    %281 = vector.load %arg10[%c0_251, %c0_252] : memref<32x8xf32, #tpu.memory_space<vmem>>, vector<32x8xf32>
    %cst_253 = arith.constant dense<0.000000e+00> : vector<32x256xf32>
    %282 = tpu.matmul %281, %147, %cst_253 {dimension_numbers = #tpu.dot_dimension_numbers<[1], [0], [0], [1], [0, 0, 1, 1], [], []>} : vector<32x8xf32>, vector<8x256xf32>, vector<32x256xf32> -> vector<32x256xf32>
    %c0_254 = arith.constant 0 : index
    %c0_255 = arith.constant 0 : index
    %283 = vector.load %arg11[%c0_254, %c0_255] : memref<32x1xf32, #tpu.memory_space<vmem>>, vector<32x1xf32>
    %284 = vector.broadcast %283 : vector<32x1xf32> to vector<32x256xf32>
    %285 = arith.addf %282, %284 : vector<32x256xf32>
    %286 = arith.addf %280, %285 : vector<32x256xf32>
    %cst_256 = arith.constant 0.000000e+00 : f32
    %287 = vector.broadcast %cst_256 : f32 to vector<32x256xf32>
    %288 = arith.maximumf %286, %287 : vector<32x256xf32>
    %c1_257 = arith.constant 1 : index
    %c0_258 = arith.constant 0 : index
    %c0_259 = arith.constant 0 : index
    %289 = vector.load %arg13[%c1_257, %c0_258, %c0_259] : memref<2x32x256xf32, #tpu.memory_space<vmem>>, vector<1x32x256xf32>
    %290 = vector.shape_cast %289 : vector<1x32x256xf32> to vector<32x256xf32>
    %291 = vector.shape_cast %288 : vector<32x256xf32> to vector<1x32x256xf32>
    tpu.vector_store %arg13[%c1_257, %c0_258, %c0_259], %291 {strides = array<i32>} : memref<2x32x256xf32, #tpu.memory_space<vmem>>, vector<1x32x256xf32>,
    return
  }
  func.func @transform_0(%arg0: i32) -> (i32, i32, i32) {
    %c0_i32 = arith.constant 0 : i32
    %c0_i32_0 = arith.constant 0 : i32
    %c0_i32_1 = arith.constant 0 : i32
    return %arg0, %c0_i32, %c0_i32_0 : i32, i32, i32
  }
  func.func @transform_1(%arg0: i32) -> (i32, i32) {
    %c0_i32 = arith.constant 0 : i32
    %c0_i32_0 = arith.constant 0 : i32
    %c0_i32_1 = arith.constant 0 : i32
    return %c0_i32, %c0_i32_0 : i32, i32
  }
  func.func @transform_2(%arg0: i32) -> (i32, i32) {
    %c0_i32 = arith.constant 0 : i32
    %c0_i32_0 = arith.constant 0 : i32
    %c0_i32_1 = arith.constant 0 : i32
    return %c0_i32, %c0_i32_0 : i32, i32
  }
  func.func @transform_3(%arg0: i32) -> (i32, i32, i32) {
    %c0_i32 = arith.constant 0 : i32
    %c0_i32_0 = arith.constant 0 : i32
    %c0_i32_1 = arith.constant 0 : i32
    %c0_i32_2 = arith.constant 0 : i32
    return %c0_i32, %c0_i32_0, %c0_i32_1 : i32, i32, i32
  }
  func.func @transform_4(%arg0: i32) -> (i32, i32) {
    %c0_i32 = arith.constant 0 : i32
    %c0_i32_0 = arith.constant 0 : i32
    %c0_i32_1 = arith.constant 0 : i32
    return %c0_i32, %c0_i32_0 : i32, i32
  }
  func.func @transform_5(%arg0: i32) -> (i32, i32) {
    %c0_i32 = arith.constant 0 : i32
    %c0_i32_0 = arith.constant 0 : i32
    %c0_i32_1 = arith.constant 0 : i32
    return %c0_i32, %c0_i32_0 : i32, i32
  }
  func.func @transform_6(%arg0: i32) -> (i32, i32) {
    %c0_i32 = arith.constant 0 : i32
    %c0_i32_0 = arith.constant 0 : i32
    %c0_i32_1 = arith.constant 0 : i32
    return %c0_i32, %c0_i32_0 : i32, i32
  }
  func.func @transform_7(%arg0: i32) -> (i32, i32) {
    %c0_i32 = arith.constant 0 : i32
    %c0_i32_0 = arith.constant 0 : i32
    %c0_i32_1 = arith.constant 0 : i32
    return %c0_i32, %c0_i32_0 : i32, i32
  }
  func.func @transform_8(%arg0: i32) -> (i32, i32) {
    %c0_i32 = arith.constant 0 : i32
    %c0_i32_0 = arith.constant 0 : i32
    %c0_i32_1 = arith.constant 0 : i32
    return %c0_i32, %c0_i32_0 : i32, i32
  }
  func.func @transform_9(%arg0: i32) -> (i32, i32) {
    %c0_i32 = arith.constant 0 : i32
    %c0_i32_0 = arith.constant 0 : i32
    %c0_i32_1 = arith.constant 0 : i32
    return %c0_i32, %c0_i32_0 : i32, i32
  }
  func.func @transform_10(%arg0: i32) -> (i32, i32) {
    %c0_i32 = arith.constant 0 : i32
    %c0_i32_0 = arith.constant 0 : i32
    %c0_i32_1 = arith.constant 0 : i32
    return %c0_i32, %c0_i32_0 : i32, i32
  }
  func.func @transform_11(%arg0: i32) -> (i32, i32, i32) {
    %c0_i32 = arith.constant 0 : i32
    %c0_i32_0 = arith.constant 0 : i32
    %c0_i32_1 = arith.constant 0 : i32
    %c0_i32_2 = arith.constant 0 : i32
    return %c0_i32, %c0_i32_0, %c0_i32_1 : i32, i32, i32
  }
  func.func @transform_12(%arg0: i32) -> (i32, i32, i32) {
    %c0_i32 = arith.constant 0 : i32
    %c0_i32_0 = arith.constant 0 : i32
    %c0_i32_1 = arith.constant 0 : i32
    return %arg0, %c0_i32, %c0_i32_0 : i32, i32, i32
  }
}

</mosaic_0001>

<bundles_post_ra>
// kernel: tpu_custom_call.1
= control target key start
LH: loop header
LB: loop body
LE: loop exit
PB: predicated region body
PF: predicated region fallthrough
CT: control target
= control target key end

     0   :  { %17 = vsyncpa [#allocation3], 0  ;;  %s9939_s0 = inlined_call_operand.hbm [shape: f32[2,8,256], index: 0, kind: input, shape index: {}]   ;;  %s9940_s1 = inlined_call_operand.vmem [shape: f32[32,8], index: 1, kind: input, shape index: {}]   ;;  %s9941_s2 = inlined_call_operand.vmem [shape: f32[32,1], index: 2, kind: input, shape index: {}]   ;;  %s9942_s3 = inlined_call_operand.vmem [shape: f32[9,32,1], index: 3, kind: input, shape index: {}]   ;;  %s9943_s4 = inlined_call_operand.vmem [shape: f32[32,1], index: 4, kind: input, shape index: {}]   ;;  %s9944_s5 = inlined_call_operand.hbm [shape: f32[32,288], index: 5, kind: input, shape index: {}]   ;;  %s9945_s6 = inlined_call_operand.vmem [shape: f32[32,1], index: 6, kind: input, shape index: {}]   ;;  %s9946_s7 = inlined_call_operand.hbm [shape: f32[2,32], index: 7, kind: input, shape index: {}]   ;;  %s9947_s8 = inlined_call_operand.vmem [shape: f32[32,2], index: 8, kind: input, shape index: {}]   ;;  %s9948_s9 = inlined_call_operand.vmem [shape: f32[32,8], index: 9, kind: input, shape index: {}]   ;;  %s9949_s10 = inlined_call_operand.vmem [shape: f32[32,1], index: 10, kind: input, shape index: {}]   ;;  %s9950_s11 = inlined_call_operand.hbm [shape: f32[9,256,256], index: 11, kind: input, shape index: {}]   ;;  %s9951_s12 = inlined_call_operand.hbm [shape: f32[2,32,256], index: 12, kind: output, shape index: {}]  }
   0x1   :  { %18 = vsyncpa [#allocation6], 0 }
   0x2   :  { %19 = vsyncpa [#allocation9], 0 }
   0x3   :  { %20 = vsyncpa [#allocation4], 0  ;;  %s8282_s21 = smov [#allocation5]  }
   0x4   :  { %s46_s22 = sshll.u32 %s8282_s21, 4  ;;  %s47_s22 = int_to_ptr.vmem [resolvable:$true] %s46_s22 }
   0x5   :  { %s8182_s23 = scalar_lea.vmem %s47_s22, 1536  ;;  %p8187_p1 = scmp.lt.s32.totalorder %s47_s22, %s47_s22 }
   0x6   :  { %p8183_p0 = scmp.ne.s32.totalorder %s47_s22, %s8182_s23  ;;  %p8188_p2 = scmp.lt.s32.totalorder %s8182_s23, %s8182_s23 }
   0x8   :  { %p8189_p3 = por %p8188_p2, %p8187_p1 }
   0xa   :  { %p8190_p4 = pnand %p8189_p3, %p8183_p0 }
   0xc   :  { %8193 = shalt.err (!%p8190_p4)
}
   0xd   :  { %s8283_s24 = smov 384   ;;  %s8284_s25 = smov 24  }
   0xe   :  { %52 = dma.hbm_to_vmem [thread:$0]  %s9944_s5, 1536, %s47_s22, [#allocation6], %s8283_s24, %s8283_s24, %s8284_s25  }
   0xf   :  { %s8285_s28 = smov [#allocation2]  }
  0x10   :  { %s26_s29 = sshll.u32 %s8285_s28, 4  ;;  %s27_s29 = int_to_ptr.vmem [resolvable:$true] %s26_s29 }
  0x11   :  { %s8202_s30 = scalar_lea.vmem %s27_s29, 512  ;;  %p8207_p6 = scmp.lt.s32.totalorder %s27_s29, %s27_s29 }
  0x12   :  { %p8203_p5 = scmp.ne.s32.totalorder %s27_s29, %s8202_s30  ;;  %p8208_p7 = scmp.lt.s32.totalorder %s8202_s30, %s8202_s30 }
  0x14   :  { %p8209_p8 = por %p8208_p7, %p8207_p6 }
  0x16   :  { %p8210_p9 = pnand %p8209_p8, %p8203_p5 }
  0x18   :  { %8213 = shalt.err (!%p8210_p9)
}
  0x19   :  { %s8286_s13 = smov 256   ;;  %s8287_s14 = smov 16  }
  0x1a   :  { %32 = dma.hbm_to_vmem [thread:$0]  %s9939_s0, 512, %s27_s29, [#allocation3], %s8286_s13, %s8286_s13, %s8287_s14  }
  0x1b   :  { %s8288_s5 = smov [#allocation7]   ;;  %s8289_s18 = smov [#allocation8]  }
  0x1c   :  { %s61_s17 = sshll.u32 %s8288_s5, 4  ;;  %s76_s19 = sshll.u32 %s8289_s18, 4  ;;  %s62_s17 = int_to_ptr.vmem [resolvable:$true] %s61_s17  ;;  %s77_s19 = int_to_ptr.vmem [resolvable:$true] %s76_s19 }
  0x1d   :  { %s8222_s20 = scalar_lea.vmem %s62_s17, 32  ;;  %p8227_p11 = scmp.lt.s32.totalorder %s62_s17, %s62_s17 }
  0x1e   :  { %p8223_p10 = scmp.ne.s32.totalorder %s62_s17, %s8222_s20  ;;  %p8228_p12 = scmp.lt.s32.totalorder %s8222_s20, %s8222_s20 }
  0x20   :  { %p8229_p13 = por %p8228_p12, %p8227_p11 }
  0x22   :  { %p8230_p0 = pnand %p8229_p13, %p8223_p10 }
  0x24   :  { %8233 = shalt.err (!%p8230_p0)
}
  0x25   :  { %64 = dma.hbm_to_vmem [thread:$0]  %s9946_s7, 32, %s62_s17, [#allocation6]  }
  0x26   :  { %s8242_s23 = scalar_lea.vmem %s77_s19, 73728  ;;  %p8247_p2 = scmp.lt.s32.totalorder %s77_s19, %s77_s19 }
  0x27   :  { %p8243_p1 = scmp.ne.s32.totalorder %s77_s19, %s8242_s23  ;;  %p8248_p3 = scmp.lt.s32.totalorder %s8242_s23, %s8242_s23 }
  0x29   :  { %p8249_p4 = por %p8248_p3, %p8247_p2 }
  0x2b   :  { %p8250_p5 = pnand %p8249_p4, %p8243_p1 }
  0x2d   :  { %8253 = shalt.err (!%p8250_p5)
}
  0x2e   :  { %82 = dma.hbm_to_vmem [thread:$0]  %s9950_s11, 73728, %s77_s19, [#allocation9], %s8286_s13, %s8286_s13, %s8287_s14  }
  0x2f   :  { %8274 = dma.done.wait [#allocation3], 512  }
  0x30   :  { %8275 = vsyncadd [#allocation3], 4294966784 }
  0x31   :  { %8276 = dma.done.wait [#allocation6], 1568  }
  0x32   :  { %8277 = vsyncadd [#allocation6], 4294965728 }
  0x33   :  { %8278 = dma.done.wait [#allocation9], 73728  }
  0x34   :  { %8279 = vsyncadd [#allocation9], 4294893568  ;;  %v8290_v0 = vmov 0   ;;  %v9952_v1 = vmov 0.0   ;;  %v101_v2 = vld [vmem:[%s9941_s2] sm:$0xff]  ;;  %v96_v3 = vld [vmem:[#allocation2 + $0x8] sm:$0xff] }
  0x35   :  { %6984 = vset.pattern.permute.xlu0 %v8290_v0  ;;  %202 = vmatprep.mubr.f32.mxu1 %v9952_v1  ;;  %v95_v4 = vld [vmem:[#allocation2] sm:$0xff]  ;;  %vm125_vm0 = vcmask 64512   ;;  %v102_v6 = vld [vmem:[%s9941_s2 + $0x8] sm:$0xff]  ;;  %v103_v8 = vld [vmem:[%s9941_s2 + $0x10] sm:$0xff]  ;;  %vm2857_vm1 = vcmask 261120   ;;  %vm8292_vm2 = vmmov 0  }
  0x36   :  { %6985 = vset.pattern.permute.xlu1 %v8290_v0  ;;  %107 = vperm.xlu0 %6984, %v101_v2   ;;  %v97_v5 = vld [vmem:[%s9940_s1] sm:$0xff]  ;;  %v98_v7 = vld [vmem:[%s9940_s1 + $0x8] sm:$0xff]  ;;  %v104_v10 = vld [vmem:[%s9941_s2 + $0x18] sm:$0xff]  ;;  %vm3143_vm3 = vcmask 15360   ;;  %vm3156_vm4 = vcmask 1041408  }
  0x37   :  { %168 = vmatprep.subr.mxu1 %v96_v3  ;;  %v1620_v9 = vld [vmem:[%s9942_s3] sm:$0xff]  ;;  %117 = vperm.xlu1 %6985, %v103_v8   ;;  %v99_v11 = vld [vmem:[%s9940_s1 + $0x10] sm:$0xff]  ;;  %v100_v14 = vld [vmem:[%s9940_s1 + $0x18] sm:$0xff] }
  0x38   :  { %169 = vmatpush1.msra.mxu1 %v95_v4  ;;  %v6814_v12 = vld [vmem:[%s9942_s3 + $0x40] sm:$0xff]  ;;  %v265_v21 = vld [vmem:[#allocation8 + $0xf0] sm:$0xff]  ;;  %v418_v23 = vld [vmem:[#allocation8 + $0x2e8] sm:$0xff] }
  0x39   :  { %6806 = vmatmul.mubr.msk.f32.vlgmr.msra.gmra.mxu1 %vm125_vm0, %v97_v5  ;;  %v6810_v13 = vld [vmem:[%s9942_s3 + $0x20] sm:$0xff]  ;;  %v419_v22 = vld [vmem:[#allocation8 + $0x2f0] sm:$0xff]  ;;  %v264_v24 = vld [vmem:[#allocation8 + $0xe8] sm:$0xff] }
  0x3a   :  { %208 = vmatprep.mubr.f32.mxu1 %v9952_v1  ;;  %112 = vperm.xlu0 %6984, %v102_v6   ;;  %v6822_v15 = vld [vmem:[%s9942_s3 + $0x80] sm:$0xff]  ;;  %v261_v30 = vld [vmem:[#allocation8 + $0xd0] sm:$0xff]  ;;  %v414_v33 = vld [vmem:[#allocation8 + $0x2c8] sm:$0xff] }
  0x3b   :  { %122 = vperm.xlu1 %6985, %v104_v10   ;;  %v6818_v16 = vld [vmem:[%s9942_s3 + $0x60] sm:$0xff]  ;;  %v415_v32 = vld [vmem:[#allocation8 + $0x2d0] sm:$0xff]  ;;  %v260_v34 = vld [vmem:[#allocation8 + $0xc8] sm:$0xff] }
  0x3c   :  { %v6830_v17 = vld [vmem:[%s9942_s3 + $0xc0] sm:$0xff]  ;;  %v1621_v37 = vld [vmem:[%s9942_s3 + $0x8] sm:$0xff]  ;;  %v257_v41 = vld [vmem:[#allocation8 + $0xb0] sm:$0xff] }
  0x3d   :  { %6807 = vmatmul.mubr.msk.f32.gmra.mxu1 %vm125_vm0, %v98_v7  ;;  %v6826_v18 = vld [vmem:[%s9942_s3 + $0xa0] sm:$0xff]  ;;  %v411_v42 = vld [vmem:[#allocation8 + $0x2b0] sm:$0xff]  ;;  %v410_v43 = vld [vmem:[#allocation8 + $0x2a8] sm:$0xff] }
  0x3e   :  { %214 = vmatprep.mubr.f32.mxu1 %v9952_v1  ;;  %1626 = vperm.xlu0 %6984, %v1620_v9   ;;  %v266_v19 = vld [vmem:[#allocation8 + $0xf8] sm:$0xff]  ;;  %v263_v25 = vld [vmem:[#allocation8 + $0xe0] sm:$0xff]  ;;  %v256_v44 = vld [vmem:[#allocation8 + $0xa8] sm:$0xff] }
  0x3f   :  { %1659 = vperm.xlu1 %6985, %v6810_v13   ;;  %v420_v20 = vld [vmem:[#allocation8 + $0x2f8] sm:$0xff]  ;;  %299 = vmatprep.subr.mxu1 %v266_v19  ;;  %v417_v26 = vld [vmem:[#allocation8 + $0x2e0] sm:$0xff]  ;;  %v253_v51 = vld [vmem:[#allocation8 + $0x90] sm:$0xff] }
  0x40   :  { %453 = vmatprep.subr.mxu0 %v420_v20  ;;  %300 = vmatpush1.msra.mxu1 %v265_v21  ;;  %v262_v27 = vld [vmem:[#allocation8 + $0xd8] sm:$0xff]  ;;  %v259_v35 = vld [vmem:[#allocation8 + $0xc0] sm:$0xff]  ;;  %v407_v52 = vld [vmem:[#allocation8 + $0x290] sm:$0xff] }
  0x41   :  { %6808 = vmatmul.mubr.msk.f32.gmra.mxu1 %vm125_vm0, %v99_v11  ;;  %454 = vmatpush1.msra.mxu0 %v419_v22  ;;  %v416_v28 = vld [vmem:[#allocation8 + $0x2d8] sm:$0xff]  ;;  %v413_v36 = vld [vmem:[#allocation8 + $0x2c0] sm:$0xff]  ;;  %v6812_v53 = vld [vmem:[%s9942_s3 + $0x30] sm:$0xff] }
  0x42   :  { %220 = vmatprep.mubr.f32.mxu1 %v9952_v1  ;;  %1700 = vperm.xlu0 %6984, %v6814_v12   ;;  %v6838_v29 = vld [vmem:[%s9942_s3 + $0x100] sm:$0xff]  ;;  %v6815_v45 = vld [vmem:[%s9942_s3 + $0x48] sm:$0xff]  ;;  %v1622_v55 = vld [vmem:[%s9942_s3 + $0x10] sm:$0xff] }
  0x43   :  { %1741 = vperm.xlu1 %6985, %v6818_v16   ;;  %455 = vmatprep.subr.mxu0 %v418_v23  ;;  %v6834_v31 = vld [vmem:[%s9942_s3 + $0xe0] sm:$0xff]  ;;  %v6811_v47 = vld [vmem:[%s9942_s3 + $0x28] sm:$0xff]  ;;  %v6816_v61 = vld [vmem:[%s9942_s3 + $0x50] sm:$0xff] }
  0x44   :  { %301 = vmatprep.subr.mxu1 %v264_v24  ;;  %456 = vmatpush1.msra.mxu0 %v417_v26  ;;  %v258_v38 = vld [vmem:[#allocation8 + $0xb8] sm:$0xff]  ;;  %v255_v46 = vld [vmem:[#allocation8 + $0xa0] sm:$0xff]  ;;  %v406_v54 = vld [vmem:[#allocation8 + $0x288] sm:$0xff] }
  0x45   :  { %6809 = vmatmul.mubr.msk.f32.gmra.mxu1 %vm125_vm0, %v100_v14  ;;  %457 = vmatprep.subr.mxu0 %v416_v28  ;;  %v1980_v39 = vld [vmem:[%s9943_s4] sm:$0xff]  ;;  %v252_v56 = vld [vmem:[#allocation8 + $0x88] sm:$0xff]  ;;  %v249_v62 = vld [vmem:[#allocation8 + $0x70] sm:$0xff] }
  0x46   :  { %1782 = vperm.xlu0 %6984, %v6822_v15   ;;  %302 = vmatpush1.msra.mxu1 %v263_v25  ;;  %v412_v40 = vld [vmem:[#allocation8 + $0x2b8] sm:$0xff]  ;;  %v409_v48 = vld [vmem:[#allocation8 + $0x2a0] sm:$0xff]  ;;  %v403_v0 = vld [vmem:[#allocation8 + $0x270] sm:$0xff] }
  0x47   :  { %1823 = vperm.xlu1 %6985, %v6826_v18   ;;  %303 = vmatprep.subr.mxu1 %v262_v27  ;;  %v254_v49 = vld [vmem:[#allocation8 + $0x98] sm:$0xff]  ;;  %v251_v57 = vld [vmem:[#allocation8 + $0x80] sm:$0xff]  ;;  %v402_v2 = vld [vmem:[#allocation8 + $0x268] sm:$0xff] }
  0x48   :  { %304 = vmatpush1.msra.mxu1 %v261_v30  ;;  %458 = vmatpush1.msra.mxu0 %v415_v32  ;;  %v408_v50 = vld [vmem:[#allocation8 + $0x298] sm:$0xff]  ;;  %v405_v58 = vld [vmem:[#allocation8 + $0x280] sm:$0xff]  ;;  %v248_v3 = vld [vmem:[#allocation8 + $0x68] sm:$0xff] }
  0x49   :  { %459 = vmatprep.subr.mxu0 %v414_v33  ;;  %305 = vmatprep.subr.mxu1 %v260_v34  ;;  %v250_v59 = vld [vmem:[#allocation8 + $0x78] sm:$0xff]  ;;  %v6819_v63 = vld [vmem:[%s9942_s3 + $0x68] sm:$0xff]  ;;  %v245_v10 = vld [vmem:[#allocation8 + $0x50] sm:$0xff] }
  0x4a   :  { %1864 = vperm.xlu0 %6984, %v6830_v17   ;;  %306 = vmatpush1.msra.mxu1 %v259_v35  ;;  %v404_v60 = vld [vmem:[#allocation8 + $0x278] sm:$0xff]  ;;  %v247_v4 = vld [vmem:[#allocation8 + $0x60] sm:$0xff]  ;;  %v399_v11 = vld [vmem:[#allocation8 + $0x250] sm:$0xff] }
  0x4b   :  { %1905 = vperm.xlu1 %6985, %v6834_v31   ;;  %460 = vmatpush1.msra.mxu0 %v413_v36  ;;  %v401_v5 = vld [vmem:[#allocation8 + $0x260] sm:$0xff]  ;;  %v1623_v6 = vld [vmem:[%s9942_s3 + $0x18] sm:$0xff]  ;;  %v398_v12 = vld [vmem:[#allocation8 + $0x248] sm:$0xff] }
  0x4c   :  { %307 = vmatprep.subr.mxu1 %v258_v38  ;;  %461 = vmatprep.subr.mxu0 %v412_v40  ;;  %v246_v7 = vld [vmem:[#allocation8 + $0x58] sm:$0xff]  ;;  %v6823_v8 = vld [vmem:[%s9942_s3 + $0x88] sm:$0xff]  ;;  %v6820_v14 = vld [vmem:[%s9942_s3 + $0x70] sm:$0xff] }
  0x4d   :  { %308 = vmatpush1.msra.mxu1 %v257_v41  ;;  %462 = vmatpush1.msra.mxu0 %v411_v42  ;;  %v400_v9 = vld [vmem:[#allocation8 + $0x258] sm:$0xff]  ;;  %v244_v13 = vld [vmem:[#allocation8 + $0x48] sm:$0xff]  ;;  %v397_v15 = vld [vmem:[#allocation8 + $0x240] sm:$0xff] }
  0x4e   :  { %1946 = vperm.xlu0 %6984, %v6838_v29   ;;  %463 = vmatprep.subr.mxu0 %v410_v43  ;;  %v6813_v16 = vld [vmem:[%s9942_s3 + $0x38] sm:$0xff]  ;;  %v243_v17 = vld [vmem:[#allocation8 + $0x40] sm:$0xff]  ;;  %v394_v23 = vld [vmem:[#allocation8 + $0x228] sm:$0xff] }
  0x4f   :  { %1986 = vperm.xlu1 %6985, %v1980_v39   ;;  %309 = vmatprep.subr.mxu1 %v256_v44  ;;  %v242_v18 = vld [vmem:[#allocation8 + $0x38] sm:$0xff]  ;;  %v241_v20 = vld [vmem:[#allocation8 + $0x30] sm:$0xff]  ;;  %v6827_v24 = vld [vmem:[%s9942_s3 + $0xa8] sm:$0xff] }
  0x50   :  { %310 = vmatpush1.msra.mxu1 %v255_v46  ;;  %464 = vmatpush1.msra.mxu0 %v409_v48  ;;  %v396_v19 = vld [vmem:[#allocation8 + $0x238] sm:$0xff]  ;;  %v395_v21 = vld [vmem:[#allocation8 + $0x230] sm:$0xff]  ;;  %v240_v25 = vld [vmem:[#allocation8 + $0x28] sm:$0xff] }
  0x51   :  { %311 = vmatprep.subr.mxu1 %v254_v49  ;;  %465 = vmatprep.subr.mxu0 %v408_v50  ;;  %v6817_v22 = vld [vmem:[%s9942_s3 + $0x58] sm:$0xff]  ;;  %v393_v26 = vld [vmem:[#allocation8 + $0x220] sm:$0xff]  ;;  %v6824_v32 = vld [vmem:[%s9942_s3 + $0x90] sm:$0xff] }
  0x52   :  { %1631 = vperm.xlu0 %6984, %v1621_v37   ;;  %312 = vmatpush1.msra.mxu1 %v253_v51  ;;  %v239_v27 = vld [vmem:[#allocation8 + $0x20] sm:$0xff]  ;;  %v238_v28 = vld [vmem:[#allocation8 + $0x18] sm:$0xff]  ;;  %v237_v31 = vld [vmem:[#allocation8 + $0x10] sm:$0xff] }
  0x53   :  { %1664 = vperm.xlu1 %6985, %v6811_v47   ;;  %466 = vmatpush1.msra.mxu0 %v407_v52  ;;  %v392_v29 = vld [vmem:[#allocation8 + $0x218] sm:$0xff]  ;;  %v6831_v30 = vld [vmem:[%s9942_s3 + $0xc8] sm:$0xff]  ;;  %v391_v33 = vld [vmem:[#allocation8 + $0x210] sm:$0xff] }
  0x54   :  { %467 = vmatprep.subr.mxu0 %v406_v54  ;;  %313 = vmatprep.subr.mxu1 %v252_v56  ;;  %v390_v34 = vld [vmem:[#allocation8 + $0x208] sm:$0xff]  ;;  %v389_v36 = vld [vmem:[#allocation8 + $0x200] sm:$0xff]  ;;  %v298_v39 = vld [vmem:[#allocation8 + $0x1f8] sm:$0xff] }
  0x55   :  { %314 = vmatpush1.msra.mxu1 %v251_v57  ;;  %468 = vmatpush1.msra.mxu0 %v405_v58  ;;  %v236_v35 = vld [vmem:[#allocation8 + $0x8] sm:$0xff]  ;;  %v235_v37 = vld [vmem:[#allocation8] sm:$0xff]  ;;  %v6821_v40 = vld [vmem:[%s9942_s3 + $0x78] sm:$0xff] }
  0x56   :  { %1705 = vperm.xlu0 %6984, %v6815_v45   ;;  %315 = vmatprep.subr.mxu1 %v250_v59  ;;  %v6828_v38 = vld [vmem:[%s9942_s3 + $0xb0] sm:$0xff]  ;;  %v452_v41 = vld [vmem:[#allocation8 + $0x3f8] sm:$0xff]  ;;  %v449_v47 = vld [vmem:[#allocation8 + $0x3e0] sm:$0xff] }
  0x57   :  { %1636 = vperm.xlu1 %6985, %v1622_v55   ;;  %469 = vmatprep.subr.mxu0 %v404_v60  ;;  %v297_v42 = vld [vmem:[#allocation8 + $0x1f0] sm:$0xff]  ;;  %v450_v44 = vld [vmem:[#allocation8 + $0x3e8] sm:$0xff]  ;;  %v295_v49 = vld [vmem:[#allocation8 + $0x1e0] sm:$0xff] }
  0x58   :  { %316 = vmatpush1.msra.mxu1 %v249_v62  ;;  %470 = vmatpush1.msra.mxu0 %v403_v0  ;;  %v451_v43 = vld [vmem:[#allocation8 + $0x3f0] sm:$0xff]  ;;  %v296_v45 = vld [vmem:[#allocation8 + $0x1e8] sm:$0xff]  ;;  %v294_v50 = vld [vmem:[#allocation8 + $0x1d8] sm:$0xff] }
  0x59   :  { %471 = vmatprep.subr.mxu0 %v402_v2  ;;  %317 = vmatprep.subr.mxu1 %v248_v3  ;;  %v6825_v46 = vld [vmem:[%s9942_s3 + $0x98] sm:$0xff]  ;;  %v6835_v48 = vld [vmem:[%s9942_s3 + $0xe8] sm:$0xff]  ;;  %v6832_v56 = vld [vmem:[%s9942_s3 + $0xd0] sm:$0xff] }
  0x5a   :  { %1669 = vperm.xlu0 %6984, %v6812_v53   ;;  %318 = vmatpush1.msra.mxu1 %v247_v4  ;;  %v448_v51 = vld [vmem:[#allocation8 + $0x3d8] sm:$0xff]  ;;  %v293_v52 = vld [vmem:[#allocation8 + $0x1d0] sm:$0xff]  ;;  %v6839_v54 = vld [vmem:[%s9942_s3 + $0x108] sm:$0xff] }
  0x5b   :  { %1746 = vperm.xlu1 %6985, %v6819_v63   ;;  %472 = vmatpush1.msra.mxu0 %v401_v5  ;;  %v447_v53 = vld [vmem:[#allocation8 + $0x3d0] sm:$0xff]  ;;  %v446_v55 = vld [vmem:[#allocation8 + $0x3c8] sm:$0xff]  ;;  %v445_v58 = vld [vmem:[#allocation8 + $0x3c0] sm:$0xff] }
  0x5c   :  { %319 = vmatprep.subr.mxu1 %v246_v7  ;;  %473 = vmatprep.subr.mxu0 %v400_v9  ;;  %v292_v57 = vld [vmem:[#allocation8 + $0x1c8] sm:$0xff]  ;;  %v291_v59 = vld [vmem:[#allocation8 + $0x1c0] sm:$0xff]  ;;  %v290_v60 = vld [vmem:[#allocation8 + $0x1b8] sm:$0xff] }
  0x5d   :  { %320 = vmatpush1.msra.mxu1 %v245_v10  ;;  %474 = vmatpush1.msra.mxu0 %v399_v11  ;;  %v6836_v62 = vld [vmem:[%s9942_s3 + $0xf0] sm:$0xff]  ;;  %v6829_v0 = vld [vmem:[%s9942_s3 + $0xb8] sm:$0xff]  ;;  %v441_v5 = vld [vmem:[#allocation8 + $0x3a0] sm:$0xff] }
  0x5e   :  { %1710 = vperm.xlu0 %6984, %v6816_v61   ;;  %475 = vmatprep.subr.mxu0 %v398_v12  ;;  %v444_v61 = vld [vmem:[#allocation8 + $0x3b8] sm:$0xff]  ;;  %v289_v63 = vld [vmem:[#allocation8 + $0x1b0] sm:$0xff]  ;;  %v442_v3 = vld [vmem:[#allocation8 + $0x3a8] sm:$0xff] }
  0x5f   :  { %1787 = vperm.xlu1 %6985, %v6823_v8   ;;  %321 = vmatprep.subr.mxu1 %v244_v13  ;;  %v443_v2 = vld [vmem:[#allocation8 + $0x3b0] sm:$0xff]  ;;  %v288_v4 = vld [vmem:[#allocation8 + $0x1a8] sm:$0xff]  ;;  %v286_v8 = vld [vmem:[#allocation8 + $0x198] sm:$0xff] }
  0x60   :  { %476 = vmatpush1.msra.mxu0 %v397_v15  ;;  %322 = vmatpush1.msra.mxu1 %v243_v17  ;;  %v6840_v7 = vld [vmem:[%s9942_s3 + $0x110] sm:$0xff]  ;;  %v6833_v9 = vld [vmem:[%s9942_s3 + $0xd8] sm:$0xff]  ;;  %v1981_v17 = vld [vmem:[%s9943_s4 + $0x8] sm:$0xff] }
  0x61   :  { %323 = vmatprep.subr.mxu1 %v242_v18  ;;  %477 = vmatprep.subr.mxu0 %v396_v19  ;;  %v440_v10 = vld [vmem:[#allocation8 + $0x398] sm:$0xff]  ;;  %v285_v11 = vld [vmem:[#allocation8 + $0x190] sm:$0xff]  ;;  %v438_v13 = vld [vmem:[#allocation8 + $0x388] sm:$0xff] }
  0x62   :  { %1641 = vperm.xlu0 %6984, %v1623_v6   ;;  %324 = vmatpush1.msra.mxu1 %v241_v20  ;;  %v287_v6 = vld [vmem:[#allocation8 + $0x1a0] sm:$0xff]  ;;  %v439_v12 = vld [vmem:[#allocation8 + $0x390] sm:$0xff]  ;;  %v282_v19 = vld [vmem:[#allocation8 + $0x178] sm:$0xff] }
  0x63   :  { %1674 = vperm.xlu1 %6985, %v6813_v16   ;;  %478 = vmatpush1.msra.mxu0 %v395_v21  ;;  %v6837_v15 = vld [vmem:[%s9942_s3 + $0xf8] sm:$0xff]  ;;  %v437_v16 = vld [vmem:[#allocation8 + $0x380] sm:$0xff] }
  0x64   :  { %479 = vmatprep.subr.mxu0 %v394_v23  ;;  %325 = vmatprep.subr.mxu1 %v240_v25  ;;  %v283_v18 = vld [vmem:[#allocation8 + $0x180] sm:$0xff]  ;;  %v436_v20 = vld [vmem:[#allocation8 + $0x378] sm:$0xff]  ;;  %v281_v21 = vld [vmem:[#allocation8 + $0x170] sm:$0xff] }
  0x65   :  { %480 = vmatpush1.msra.mxu0 %v393_v26  ;;  %326 = vmatpush1.msra.mxu1 %v239_v27  ;;  %v1982_v23 = vld [vmem:[%s9943_s4 + $0x10] sm:$0xff]  ;;  %v6841_v25 = vld [vmem:[%s9942_s3 + $0x118] sm:$0xff]  ;;  %v433_v27 = vld [vmem:[#allocation8 + $0x360] sm:$0xff] }
  0x66   :  { %1751 = vperm.xlu0 %6984, %v6820_v14   ;;  %327 = vmatprep.subr.mxu1 %v238_v28  ;;  %v284_v14 = vld [vmem:[#allocation8 + $0x188] sm:$0xff]  ;;  %v279_v28 = vld [vmem:[#allocation8 + $0x160] sm:$0xff] }
  0x67   :  { %1828 = vperm.xlu1 %6985, %v6827_v24   ;;  %481 = vmatprep.subr.mxu0 %v392_v29  ;;  %v434_v24 = vld [vmem:[#allocation8 + $0x368] sm:$0xff]  ;;  %v278_v29 = vld [vmem:[#allocation8 + $0x158] sm:$0xff] }
  0x68   :  { %328 = vmatpush1.msra.mxu1 %v237_v31  ;;  %482 = vmatpush1.msra.mxu0 %v391_v33  ;;  %v280_v26 = vld [vmem:[#allocation8 + $0x168] sm:$0xff]  ;;  %v2836_v31 = vld [vmem:[%s9945_s6 + $0x18] sm:$0xff] }
  0x69   :  { %483 = vmatprep.subr.mxu0 %v390_v34  ;;  %329 = vmatprep.subr.mxu1 %v236_v35  ;;  %v1983_v33 = vld [vmem:[%s9943_s4 + $0x18] sm:$0xff]  ;;  %v430_v35 = vld [vmem:[#allocation8 + $0x348] sm:$0xff] }
  0x6a   :  { %1715 = vperm.xlu0 %6984, %v6817_v22   ;;  %484 = vmatpush1.msra.mxu0 %v389_v36  ;;  %v435_v22 = vld [vmem:[#allocation8 + $0x370] sm:$0xff]  ;;  %v276_v36 = vld [vmem:[#allocation8 + $0x148] sm:$0xff] }
  0x6b   :  { %1792 = vperm.xlu1 %6985, %v6824_v32   ;;  %330 = vmatpush1.msra.mxu1 %v235_v37  ;;  %v277_v32 = vld [vmem:[#allocation8 + $0x150] sm:$0xff]  ;;  %v429_v37 = vld [vmem:[#allocation8 + $0x340] sm:$0xff] }
  0x6c   :  { %331 = vmatprep.subr.mxu1 %v298_v39  ;;  %485 = vmatprep.subr.mxu0 %v452_v41  ;;  %v431_v34 = vld [vmem:[#allocation8 + $0x350] sm:$0xff]  ;;  %v2834_v39 = vld [vmem:[%s9945_s6 + $0x8] sm:$0xff] }
  0x6d   :  { %332 = vmatpush2.msra.mxu1 %v297_v42  ;;  %486 = vmatpush2.msra.mxu0 %v451_v43  ;;  %v2835_v41 = vld [vmem:[%s9945_s6 + $0x10] sm:$0xff]  ;;  %v428_v42 = vld [vmem:[#allocation8 + $0x338] sm:$0xff] }
  0x6e   :  { %1869 = vperm.xlu0 %6984, %v6831_v30   ;;  %487 = vmatprep.subr.mxu0 %v450_v44  ;;  %v432_v30 = vld [vmem:[#allocation8 + $0x358] sm:$0xff]  ;;  %v273_v43 = vld [vmem:[#allocation8 + $0x130] sm:$0xff] }
  0x6f   :  { %1756 = vperm.xlu1 %6985, %v6821_v40   ;;  %333 = vmatprep.subr.mxu1 %v296_v45  ;;  %v274_v40 = vld [vmem:[#allocation8 + $0x138] sm:$0xff]  ;;  %v427_v44 = vld [vmem:[#allocation8 + $0x330] sm:$0xff]  ;;  %v426_v45 = vld [vmem:[#allocation8 + $0x328] sm:$0xff] }
  0x70   :  { %488 = vmatpush2.msra.mxu0 %v449_v47  ;;  %334 = vmatpush2.msra.mxu1 %v295_v49  ;;  %v425_v47 = vld [vmem:[#allocation8 + $0x320] sm:$0xff] }
  0x71   :  { %335 = vmatprep.subr.mxu1 %v294_v50  ;;  %489 = vmatprep.subr.mxu0 %v448_v51  ;;  %v2833_v49 = vld [vmem:[%s9945_s6] sm:$0xff] }
  0x72   :  { %1833 = vperm.xlu0 %6984, %v6828_v38   ;;  %336 = vmatpush2.msra.mxu1 %v293_v52  ;;  %v275_v38 = vld [vmem:[#allocation8 + $0x140] sm:$0xff]  ;;  %v270_v50 = vld [vmem:[#allocation8 + $0x118] sm:$0xff]  ;;  %v269_v52 = vld [vmem:[#allocation8 + $0x110] sm:$0xff] }
  0x73   :  { %1910 = vperm.xlu1 %6985, %v6835_v48   ;;  %490 = vmatpush2.msra.mxu0 %v447_v53  ;;  %v271_v48 = vld [vmem:[#allocation8 + $0x120] sm:$0xff]  ;;  %v424_v51 = vld [vmem:[#allocation8 + $0x318] sm:$0xff]  ;;  %v423_v53 = vld [vmem:[#allocation8 + $0x310] sm:$0xff] }
  0x74   :  { %491 = vmatprep.subr.mxu0 %v446_v55  ;;  %337 = vmatprep.subr.mxu1 %v292_v57  ;;  %v422_v55 = vld [vmem:[#allocation8 + $0x308] sm:$0xff]  ;;  %v421_v57 = vld [vmem:[#allocation8 + $0x300] sm:$0xff] }
  0x75   :  { %492 = vmatpush2.msra.mxu0 %v445_v58  ;;  %338 = vmatpush2.msra.mxu1 %v291_v59  ;;  %v574_v58 = vld [vmem:[#allocation8 + $0x4f8] sm:$0xff] }
  0x76   :  { %1797 = vperm.xlu0 %6984, %v6825_v46   ;;  %339 = vmatprep.subr.mxu1 %v290_v60  ;;  %v272_v46 = vld [vmem:[#allocation8 + $0x128] sm:$0xff]  ;;  %v728_v59 = vld [vmem:[#allocation8 + $0x6f8] sm:$0xff] }
  0x77   :  { %1874 = vperm.xlu1 %6985, %v6832_v56   ;;  %493 = vmatprep.subr.mxu0 %v444_v61  ;;  %v267_v56 = vld [vmem:[#allocation8 + $0x100] sm:$0xff] }
  0x78   :  { %340 = vmatpush2.msra.mxu1 %v289_v63  ;;  %494 = vmatpush2.msra.mxu0 %v443_v2 }
  0x79   :  { %495 = vmatprep.subr.mxu0 %v442_v3  ;;  %341 = vmatprep.subr.mxu1 %v288_v4 }
  0x7a   :  { %1951 = vperm.xlu0 %6984, %v6839_v54   ;;  %496 = vmatpush2.msra.mxu0 %v441_v5  ;;  %v268_v54 = vld [vmem:[#allocation8 + $0x108] sm:$0xff] }
  0x7b   :  { %1838 = vperm.xlu1 %6985, %v6829_v0   ;;  %342 = vmatpush2.msra.mxu1 %v287_v6 }
  0x7c   :  { %343 = vmatprep.subr.mxu1 %v286_v8  ;;  %497 = vmatprep.subr.mxu0 %v440_v10  ;;  %v727_v8 = vld [vmem:[#allocation8 + $0x6f0] sm:$0xff]  ;;  %v572_v10 = vld [vmem:[#allocation8 + $0x4e8] sm:$0xff] }
  0x7d   :  { %344 = vmatpush2.msra.mxu1 %v285_v11  ;;  %498 = vmatpush2.msra.mxu0 %v439_v12  ;;  %v726_v11 = vld [vmem:[#allocation8 + $0x6e8] sm:$0xff] }
  0x7e   :  { %1915 = vperm.xlu0 %6984, %v6836_v62   ;;  %499 = vmatprep.subr.mxu0 %v438_v13 }
  0x7f   :  { %1879 = vperm.xlu1 %6985, %v6833_v9   ;;  %345 = vmatprep.subr.mxu1 %v284_v14  ;;  %v571_v14 = vld [vmem:[#allocation8 + $0x4e0] sm:$0xff] }
  0x80   :  { %500 = vmatpush2.msra.mxu0 %v437_v16  ;;  %346 = vmatpush2.msra.mxu1 %v283_v18 }
  0x81   :  { %347 = vmatprep.subr.mxu1 %v282_v19  ;;  %501 = vmatprep.subr.mxu0 %v436_v20  ;;  %v570_v19 = vld [vmem:[#allocation8 + $0x4d8] sm:$0xff] }
  0x82   :  { %1956 = vperm.xlu0 %6984, %v6840_v7   ;;  %348 = vmatpush2.msra.mxu1 %v281_v21  ;;  %v573_v7 = vld [vmem:[#allocation8 + $0x4f0] sm:$0xff]  ;;  %v724_v20 = vld [vmem:[#allocation8 + $0x6d8] sm:$0xff] }
  0x83   :  { %1991 = vperm.xlu1 %6985, %v1981_v17   ;;  %502 = vmatpush2.msra.mxu0 %v435_v22 }
  0x84   :  { %503 = vmatprep.subr.mxu0 %v434_v24  ;;  %349 = vmatprep.subr.mxu1 %v280_v26  ;;  %v723_v26 = vld [vmem:[#allocation8 + $0x6d0] sm:$0xff] }
  0x85   :  { %504 = vmatpush2.msra.mxu0 %v433_v27  ;;  %350 = vmatpush2.msra.mxu1 %v279_v28  ;;  %v568_v27 = vld [vmem:[#allocation8 + $0x4c8] sm:$0xff] }
  0x86   :  { %1920 = vperm.xlu0 %6984, %v6837_v15   ;;  %351 = vmatprep.subr.mxu1 %v278_v29  ;;  %v725_v15 = vld [vmem:[#allocation8 + $0x6e0] sm:$0xff]  ;;  %v722_v28 = vld [vmem:[#allocation8 + $0x6c8] sm:$0xff] }
  0x87   :  { %1961 = vperm.xlu1 %6985, %v6841_v25   ;;  %505 = vmatprep.subr.mxu0 %v432_v30  ;;  %v569_v25 = vld [vmem:[#allocation8 + $0x4d0] sm:$0xff] }
  0x88   :  { %352 = vmatpush2.msra.mxu1 %v277_v32  ;;  %506 = vmatpush2.msra.mxu0 %v431_v34  ;;  %v721_v32 = vld [vmem:[#allocation8 + $0x6c0] sm:$0xff] }
  0x89   :  { %507 = vmatprep.subr.mxu0 %v430_v35  ;;  %353 = vmatprep.subr.mxu1 %v276_v36  ;;  %v566_v36 = vld [vmem:[#allocation8 + $0x4b8] sm:$0xff] }
  0x8a   :  { %1996 = vperm.xlu0 %6984, %v1982_v23   ;;  %508 = vmatpush2.msra.mxu0 %v429_v37  ;;  %v720_v37 = vld [vmem:[#allocation8 + $0x6b8] sm:$0xff] }
  0x8b   :  { %2001 = vperm.xlu1 %6985, %v1983_v33   ;;  %354 = vmatpush2.msra.mxu1 %v275_v38 }
  0x8c   :  { %355 = vmatprep.subr.mxu1 %v274_v40  ;;  %509 = vmatprep.subr.mxu0 %v428_v42  ;;  %v719_v40 = vld [vmem:[#allocation8 + $0x6b0] sm:$0xff]  ;;  %v718_v42 = vld [vmem:[#allocation8 + $0x6a8] sm:$0xff] }
  0x8d   :  { %356 = vmatpush2.msra.mxu1 %v273_v43  ;;  %510 = vmatpush2.msra.mxu0 %v427_v44  ;;  %v563_v44 = vld [vmem:[#allocation8 + $0x4a0] sm:$0xff] }
  0x8e   :  { %2854 = vperm.xlu0 %6984, %v2836_v31   ;;  %511 = vmatprep.subr.mxu0 %v426_v45  ;;  %v567_v31 = vld [vmem:[#allocation8 + $0x4c0] sm:$0xff] }
  0x8f   :  { %2849 = vperm.xlu1 %6985, %v2835_v41   ;;  %357 = vmatprep.subr.mxu1 %v272_v46  ;;  %v564_v41 = vld [vmem:[#allocation8 + $0x4a8] sm:$0xff]  ;;  %v717_v45 = vld [vmem:[#allocation8 + $0x6a0] sm:$0xff] }
  0x90   :  { %512 = vmatpush2.msra.mxu0 %v425_v47  ;;  %358 = vmatpush2.msra.mxu1 %v271_v48  ;;  %v562_v47 = vld [vmem:[#allocation8 + $0x498] sm:$0xff] }
  0x91   :  { %359 = vmatprep.subr.mxu1 %v270_v50  ;;  %513 = vmatprep.subr.mxu0 %v424_v51  ;;  %v716_v48 = vld [vmem:[#allocation8 + $0x698] sm:$0xff]  ;;  %v715_v50 = vld [vmem:[#allocation8 + $0x690] sm:$0xff]  ;;  %v560_v51 = vld [vmem:[#allocation8 + $0x488] sm:$0xff] }
  0x92   :  { %2844 = vperm.xlu0 %6984, %v2834_v39   ;;  %360 = vmatpush2.msra.mxu1 %v269_v52  ;;  %v565_v39 = vld [vmem:[#allocation8 + $0x4b0] sm:$0xff]  ;;  %v714_v52 = vld [vmem:[#allocation8 + $0x688] sm:$0xff] }
  0x93   :  { %2839 = vperm.xlu1 %6985, %v2833_v49   ;;  %514 = vmatpush2.msra.mxu0 %v423_v53  ;;  %v561_v49 = vld [vmem:[#allocation8 + $0x490] sm:$0xff]  ;;  %v559_v53 = vld [vmem:[#allocation8 + $0x480] sm:$0xff] }
  0x94   :  { %361 = vmatprep.subr.mxu1 %v268_v54  ;;  %515 = vmatprep.subr.mxu0 %v422_v55  ;;  %v713_v54 = vld [vmem:[#allocation8 + $0x680] sm:$0xff]  ;;  %v558_v55 = vld [vmem:[#allocation8 + $0x478] sm:$0xff] }
  0x95   :  { %362 = vmatpush2.msra.mxu1 %v267_v56  ;;  %516 = vmatpush2.msra.mxu0 %v421_v57  ;;  %v712_v56 = vld [vmem:[#allocation8 + $0x678] sm:$0xff]  ;;  %v557_v57 = vld [vmem:[#allocation8 + $0x470] sm:$0xff] }
  0x96   :  { %607 = vmatprep.subr.mxu1 %v574_v58  ;;  %761 = vmatprep.subr.mxu0 %v728_v59  ;;  %v711_v58 = vld [vmem:[#allocation8 + $0x670] sm:$0xff]  ;;  %v556_v59 = vld [vmem:[#allocation8 + $0x468] sm:$0xff] }
  0xb1   :  { %v108_v60 = vpop.permute.xlu0 %107 }
  0xb2   :  { %v118_v16 = vpop.permute.xlu1 %117 }
  0xb5   :  { %v113_v4 = vpop.permute.xlu0 %112 }
  0xb6   :  { %v123_v33 = vpop.permute.xlu1 %122 }
  0xf9   :  { %v204_v61 = vpop.f32.mrf.mxu1 }
  0xfa   :  { %v205_v62 = vadd.f32 %v204_v61, %v108_v60  ;;  %v555_v61 = vld [vmem:[#allocation8 + $0x460] sm:$0xff] }
  0xfb   :  { %v206_v63 = vpop.f32.mrf.mxu1 }
  0xfc   :  { %v207_v0 = vadd.f32 %v206_v63, %v108_v60  ;;  %v8543_v5 = vmax.f32 %v205_v62, 0.0  ;;  %v710_v60 = vld [vmem:[#allocation8 + $0x668] sm:$0xff]  ;;  %v709_v62 = vld [vmem:[#allocation8 + $0x660] sm:$0xff]  ;;  %v554_v63 = vld [vmem:[#allocation8 + $0x458] sm:$0xff] }
  0xfd   :  { %v210_v2 = vpop.f32.mrf.mxu1 }
  0xfe   :  { %v8541_v3 = vmax.f32 %v207_v0, 0.0  ;;  %v211_v12 = vadd.f32 %v210_v2, %v113_v4  ;;  %v708_v0 = vld [vmem:[#allocation8 + $0x658] sm:$0xff]  ;;  %v553_v2 = vld [vmem:[#allocation8 + $0x450] sm:$0xff] }
  0xff   :  { %v212_v6 = vpop.f32.mrf.mxu1 }
 0x100   :  { %v213_v9 = vadd.f32 %v212_v6, %v113_v4  ;;  %363 = vmatprep.mubr.f32.mxu1 %v8541_v3  ;;  %517 = vmatprep.mubr.f32.mxu0 %v8541_v3  ;;  %v8551_v22 = vmax.f32 %v211_v12, 0.0  ;;  %v707_v4 = vld [vmem:[#allocation8 + $0x650] sm:$0xff]  ;;  %v552_v6 = vld [vmem:[#allocation8 + $0x448] sm:$0xff] }
 0x101   :  { %v216_v13 = vpop.f32.mrf.mxu1  ;;  %364 = vmatmul.mubr.f32.vlgmr.msra.gmra.mxu1 %v8543_v5  ;;  %518 = vmatmul.mubr.f32.vlgmr.msra.gmra.mxu0 %v8543_v5  ;;  %v549_v12 = vld [vmem:[#allocation8 + $0x430] sm:$0xff] }
 0x102   :  { %v8549_v17 = vmax.f32 %v213_v9, 0.0  ;;  %608 = vmatpush1.msra.mxu1 %v573_v7  ;;  %762 = vmatpush1.msra.mxu0 %v727_v8  ;;  %v217_v23 = vadd.f32 %v216_v13, %v118_v16  ;;  %v706_v7 = vld [vmem:[#allocation8 + $0x648] sm:$0xff]  ;;  %v551_v8 = vld [vmem:[#allocation8 + $0x440] sm:$0xff]  ;;  %v703_v13 = vld [vmem:[#allocation8 + $0x630] sm:$0xff] }
 0x103   :  { %609 = vmatprep.subr.mxu1 %v572_v10  ;;  %763 = vmatprep.subr.mxu0 %v726_v11  ;;  %v218_v18 = vpop.f32.mrf.mxu1  ;;  %v705_v9 = vld [vmem:[#allocation8 + $0x640] sm:$0xff]  ;;  %v550_v10 = vld [vmem:[#allocation8 + $0x438] sm:$0xff] }
 0x104   :  { %v219_v21 = vadd.f32 %v218_v18, %v118_v16  ;;  %610 = vmatpush1.msra.mxu1 %v571_v14  ;;  %764 = vmatpush1.msra.mxu0 %v725_v15  ;;  %v8559_v34 = vmax.f32 %v217_v23, 0.0  ;;  %v704_v11 = vld [vmem:[#allocation8 + $0x638] sm:$0xff]  ;;  %v548_v14 = vld [vmem:[#allocation8 + $0x428] sm:$0xff]  ;;  %v547_v16 = vld [vmem:[#allocation8 + $0x420] sm:$0xff] }
 0x105   :  { %369 = vmatprep.mubr.f32.mxu1 %v8549_v17  ;;  %523 = vmatprep.mubr.f32.mxu0 %v8549_v17  ;;  %v222_v24 = vpop.f32.mrf.mxu1  ;;  %v702_v15 = vld [vmem:[#allocation8 + $0x628] sm:$0xff]  ;;  %v701_v18 = vld [vmem:[#allocation8 + $0x620] sm:$0xff]  ;;  %v699_v23 = vld [vmem:[#allocation8 + $0x610] sm:$0xff] }
 0x106   :  { %611 = vmatprep.subr.mxu1 %v570_v19  ;;  %765 = vmatprep.subr.mxu0 %v724_v20  ;;  %v8555_v29 = vmax.f32 %v219_v21, 0.0  ;;  %v223_v38 = vadd.f32 %v222_v24, %v123_v33  ;;  %v546_v19 = vld [vmem:[#allocation8 + $0x418] sm:$0xff]  ;;  %v545_v21 = vld [vmem:[#allocation8 + $0x410] sm:$0xff]  ;;  %v544_v24 = vld [vmem:[#allocation8 + $0x408] sm:$0xff] }
 0x107   :  { %370 = vmatmul.mubr.f32.gmra.mxu1 %v8551_v22  ;;  %524 = vmatmul.mubr.f32.gmra.mxu0 %v8551_v22  ;;  %v224_v30 = vpop.f32.mrf.mxu1  ;;  %v700_v20 = vld [vmem:[#allocation8 + $0x618] sm:$0xff] }
 0x108   :  { %612 = vmatpush1.msra.mxu1 %v569_v25  ;;  %766 = vmatpush1.msra.mxu0 %v723_v26  ;;  %v225_v35 = vadd.f32 %v224_v30, %v123_v33  ;;  %v8567_v46 = vmax.f32 %v223_v38, 0.0  ;;  %v698_v25 = vld [vmem:[#allocation8 + $0x608] sm:$0xff]  ;;  %v543_v26 = vld [vmem:[#allocation8 + $0x400] sm:$0xff]  ;;  %v760_v30 = vld [vmem:[#allocation8 + $0x7f8] sm:$0xff] }
 0x109   :  { %613 = vmatprep.subr.mxu1 %v568_v27  ;;  %767 = vmatprep.subr.mxu0 %v722_v28  ;;  %v697_v27 = vld [vmem:[#allocation8 + $0x600] sm:$0xff]  ;;  %v606_v28 = vld [vmem:[#allocation8 + $0x5f8] sm:$0xff]  ;;  %v604_v33 = vld [vmem:[#allocation8 + $0x5e8] sm:$0xff] }
 0x10a   :  { %614 = vmatpush1.msra.mxu1 %v567_v31  ;;  %768 = vmatpush1.msra.mxu0 %v721_v32  ;;  %v8563_v43 = vmax.f32 %v225_v35, 0.0  ;;  %v605_v31 = vld [vmem:[#allocation8 + $0x5f0] sm:$0xff]  ;;  %v758_v35 = vld [vmem:[#allocation8 + $0x7e8] sm:$0xff]  ;;  %v602_v38 = vld [vmem:[#allocation8 + $0x5d8] sm:$0xff] }
 0x10b   :  { %375 = vmatprep.mubr.f32.mxu1 %v8555_v29  ;;  %529 = vmatprep.mubr.f32.mxu0 %v8555_v29  ;;  %v759_v32 = vld [vmem:[#allocation8 + $0x7f0] sm:$0xff] }
 0x10c   :  { %615 = vmatprep.subr.mxu1 %v566_v36  ;;  %769 = vmatprep.subr.mxu0 %v720_v37  ;;  %v603_v36 = vld [vmem:[#allocation8 + $0x5e0] sm:$0xff] }
 0x10d   :  { %376 = vmatmul.mubr.f32.gmra.mxu1 %v8559_v34  ;;  %530 = vmatmul.mubr.f32.gmra.mxu0 %v8559_v34  ;;  %v757_v37 = vld [vmem:[#allocation8 + $0x7e0] sm:$0xff] }
 0x10e   :  { %616 = vmatpush1.msra.mxu1 %v565_v39  ;;  %770 = vmatpush1.msra.mxu0 %v719_v40  ;;  %v756_v39 = vld [vmem:[#allocation8 + $0x7d8] sm:$0xff]  ;;  %v601_v40 = vld [vmem:[#allocation8 + $0x5d0] sm:$0xff] }
 0x10f   :  { %617 = vmatprep.subr.mxu1 %v564_v41  ;;  %771 = vmatprep.subr.mxu0 %v718_v42  ;;  %v755_v41 = vld [vmem:[#allocation8 + $0x7d0] sm:$0xff]  ;;  %v600_v42 = vld [vmem:[#allocation8 + $0x5c8] sm:$0xff] }
 0x110   :  { %618 = vmatpush1.msra.mxu1 %v563_v44  ;;  %772 = vmatpush1.msra.mxu0 %v717_v45  ;;  %v754_v44 = vld [vmem:[#allocation8 + $0x7c8] sm:$0xff]  ;;  %v599_v45 = vld [vmem:[#allocation8 + $0x5c0] sm:$0xff] }
 0x111   :  { %381 = vmatprep.mubr.f32.mxu1 %v8563_v43  ;;  %535 = vmatprep.mubr.f32.mxu0 %v8563_v43 }
 0x112   :  { %619 = vmatprep.subr.mxu1 %v562_v47  ;;  %773 = vmatprep.subr.mxu0 %v716_v48  ;;  %v753_v47 = vld [vmem:[#allocation8 + $0x7c0] sm:$0xff]  ;;  %v598_v48 = vld [vmem:[#allocation8 + $0x5b8] sm:$0xff] }
 0x113   :  { %382 = vmatmul.mubr.f32.gmra.mxu1 %v8567_v46  ;;  %536 = vmatmul.mubr.f32.gmra.mxu0 %v8567_v46 }
 0x114   :  { %620 = vmatpush1.msra.mxu1 %v561_v49  ;;  %774 = vmatpush1.msra.mxu0 %v715_v50  ;;  %v752_v49 = vld [vmem:[#allocation8 + $0x7b8] sm:$0xff]  ;;  %v597_v50 = vld [vmem:[#allocation8 + $0x5b0] sm:$0xff] }
 0x115   :  { %621 = vmatprep.subr.mxu1 %v560_v51  ;;  %671 = vmatprep.mubr.f32.mxu1 %v8541_v3  ;;  %v751_v51 = vld [vmem:[#allocation8 + $0x7b0] sm:$0xff] }
 0x116   :  { %775 = vmatprep.subr.mxu0 %v714_v52  ;;  %825 = vmatprep.mubr.f32.mxu0 %v8541_v3  ;;  %v596_v52 = vld [vmem:[#allocation8 + $0x5a8] sm:$0xff] }
 0x117   :  { %622 = vmatpush1.msra.mxu1 %v559_v53  ;;  %776 = vmatpush1.msra.mxu0 %v713_v54  ;;  %v750_v53 = vld [vmem:[#allocation8 + $0x7a8] sm:$0xff]  ;;  %v595_v54 = vld [vmem:[#allocation8 + $0x5a0] sm:$0xff] }
 0x118   :  { %623 = vmatprep.subr.mxu1 %v558_v55  ;;  %777 = vmatprep.subr.mxu0 %v712_v56  ;;  %v749_v55 = vld [vmem:[#allocation8 + $0x7a0] sm:$0xff]  ;;  %v594_v56 = vld [vmem:[#allocation8 + $0x598] sm:$0xff] }
 0x119   :  { %624 = vmatpush1.msra.mxu1 %v557_v57  ;;  %778 = vmatpush1.msra.mxu0 %v711_v58  ;;  %v748_v57 = vld [vmem:[#allocation8 + $0x798] sm:$0xff]  ;;  %v593_v58 = vld [vmem:[#allocation8 + $0x590] sm:$0xff] }
 0x11a   :  { %625 = vmatprep.subr.mxu1 %v556_v59  ;;  %779 = vmatprep.subr.mxu0 %v710_v60  ;;  %v747_v59 = vld [vmem:[#allocation8 + $0x790] sm:$0xff]  ;;  %v592_v60 = vld [vmem:[#allocation8 + $0x588] sm:$0xff] }
 0x11b   :  { %626 = vmatpush1.msra.mxu1 %v555_v61  ;;  %780 = vmatpush1.msra.mxu0 %v709_v62  ;;  %v746_v61 = vld [vmem:[#allocation8 + $0x788] sm:$0xff]  ;;  %v591_v62 = vld [vmem:[#allocation8 + $0x580] sm:$0xff] }
 0x11c   :  { %627 = vmatprep.subr.mxu1 %v554_v63  ;;  %781 = vmatprep.subr.mxu0 %v708_v0  ;;  %v745_v63 = vld [vmem:[#allocation8 + $0x780] sm:$0xff]  ;;  %v590_v0 = vld [vmem:[#allocation8 + $0x578] sm:$0xff] }
 0x11d   :  { %628 = vmatpush1.msra.mxu1 %v553_v2  ;;  %782 = vmatpush1.msra.mxu0 %v707_v4  ;;  %v744_v2 = vld [vmem:[#allocation8 + $0x778] sm:$0xff]  ;;  %v589_v4 = vld [vmem:[#allocation8 + $0x570] sm:$0xff] }
 0x11e   :  { %629 = vmatprep.subr.mxu1 %v552_v6  ;;  %783 = vmatprep.subr.mxu0 %v706_v7  ;;  %v743_v6 = vld [vmem:[#allocation8 + $0x770] sm:$0xff]  ;;  %v588_v7 = vld [vmem:[#allocation8 + $0x568] sm:$0xff] }
 0x11f   :  { %630 = vmatpush1.msra.mxu1 %v551_v8  ;;  %784 = vmatpush1.msra.mxu0 %v705_v9  ;;  %v742_v8 = vld [vmem:[#allocation8 + $0x768] sm:$0xff]  ;;  %v587_v9 = vld [vmem:[#allocation8 + $0x560] sm:$0xff] }
 0x120   :  { %631 = vmatprep.subr.mxu1 %v550_v10  ;;  %785 = vmatprep.subr.mxu0 %v704_v11  ;;  %v741_v10 = vld [vmem:[#allocation8 + $0x760] sm:$0xff]  ;;  %v586_v11 = vld [vmem:[#allocation8 + $0x558] sm:$0xff] }
 0x121   :  { %632 = vmatpush1.msra.mxu1 %v549_v12  ;;  %786 = vmatpush1.msra.mxu0 %v703_v13  ;;  %v740_v12 = vld [vmem:[#allocation8 + $0x758] sm:$0xff]  ;;  %v585_v13 = vld [vmem:[#allocation8 + $0x550] sm:$0xff] }
 0x122   :  { %633 = vmatprep.subr.mxu1 %v548_v14  ;;  %787 = vmatprep.subr.mxu0 %v702_v15  ;;  %v739_v14 = vld [vmem:[#allocation8 + $0x750] sm:$0xff]  ;;  %v584_v15 = vld [vmem:[#allocation8 + $0x548] sm:$0xff] }
 0x123   :  { %634 = vmatpush1.msra.mxu1 %v547_v16  ;;  %788 = vmatpush1.msra.mxu0 %v701_v18  ;;  %v738_v16 = vld [vmem:[#allocation8 + $0x748] sm:$0xff]  ;;  %v583_v18 = vld [vmem:[#allocation8 + $0x540] sm:$0xff] }
 0x124   :  { %635 = vmatprep.subr.mxu1 %v546_v19  ;;  %789 = vmatprep.subr.mxu0 %v700_v20  ;;  %v737_v19 = vld [vmem:[#allocation8 + $0x740] sm:$0xff]  ;;  %v582_v20 = vld [vmem:[#allocation8 + $0x538] sm:$0xff] }
 0x125   :  { %636 = vmatpush1.msra.mxu1 %v545_v21  ;;  %790 = vmatpush1.msra.mxu0 %v699_v23  ;;  %v736_v21 = vld [vmem:[#allocation8 + $0x738] sm:$0xff]  ;;  %v581_v23 = vld [vmem:[#allocation8 + $0x530] sm:$0xff] }
 0x126   :  { %637 = vmatprep.subr.mxu1 %v544_v24  ;;  %791 = vmatprep.subr.mxu0 %v698_v25  ;;  %v735_v24 = vld [vmem:[#allocation8 + $0x730] sm:$0xff]  ;;  %v580_v25 = vld [vmem:[#allocation8 + $0x528] sm:$0xff] }
 0x127   :  { %638 = vmatpush1.msra.mxu1 %v543_v26  ;;  %792 = vmatpush1.msra.mxu0 %v697_v27  ;;  %v734_v26 = vld [vmem:[#allocation8 + $0x728] sm:$0xff]  ;;  %v579_v27 = vld [vmem:[#allocation8 + $0x520] sm:$0xff] }
 0x128   :  { %639 = vmatprep.subr.mxu1 %v606_v28  ;;  %793 = vmatprep.subr.mxu0 %v760_v30  ;;  %v733_v28 = vld [vmem:[#allocation8 + $0x720] sm:$0xff]  ;;  %v578_v30 = vld [vmem:[#allocation8 + $0x518] sm:$0xff] }
 0x129   :  { %640 = vmatpush2.msra.mxu1 %v605_v31  ;;  %794 = vmatpush2.msra.mxu0 %v759_v32  ;;  %v732_v31 = vld [vmem:[#allocation8 + $0x718] sm:$0xff]  ;;  %v577_v32 = vld [vmem:[#allocation8 + $0x510] sm:$0xff] }
 0x12a   :  { %641 = vmatprep.subr.mxu1 %v604_v33  ;;  %795 = vmatprep.subr.mxu0 %v758_v35  ;;  %v731_v33 = vld [vmem:[#allocation8 + $0x710] sm:$0xff]  ;;  %v576_v35 = vld [vmem:[#allocation8 + $0x508] sm:$0xff] }
 0x12b   :  { %642 = vmatpush2.msra.mxu1 %v603_v36  ;;  %796 = vmatpush2.msra.mxu0 %v757_v37  ;;  %v730_v36 = vld [vmem:[#allocation8 + $0x708] sm:$0xff]  ;;  %v575_v37 = vld [vmem:[#allocation8 + $0x500] sm:$0xff] }
 0x12c   :  { %643 = vmatprep.subr.mxu1 %v602_v38  ;;  %797 = vmatprep.subr.mxu0 %v756_v39  ;;  %v729_v38 = vld [vmem:[#allocation8 + $0x700] sm:$0xff]  ;;  %v882_v39 = vld [vmem:[#allocation8 + $0x8f8] sm:$0xff] }
 0x12d   :  { %644 = vmatpush2.msra.mxu1 %v601_v40  ;;  %798 = vmatpush2.msra.mxu0 %v755_v41  ;;  %v1036_v40 = vld [vmem:[#allocation8 + $0xaf8] sm:$0xff]  ;;  %v881_v41 = vld [vmem:[#allocation8 + $0x8f0] sm:$0xff] }
 0x12e   :  { %645 = vmatprep.subr.mxu1 %v600_v42  ;;  %799 = vmatprep.subr.mxu0 %v754_v44  ;;  %v1035_v42 = vld [vmem:[#allocation8 + $0xaf0] sm:$0xff]  ;;  %v880_v44 = vld [vmem:[#allocation8 + $0x8e8] sm:$0xff] }
 0x12f   :  { %646 = vmatpush2.msra.mxu1 %v599_v45  ;;  %800 = vmatpush2.msra.mxu0 %v753_v47  ;;  %v1034_v45 = vld [vmem:[#allocation8 + $0xae8] sm:$0xff]  ;;  %v879_v47 = vld [vmem:[#allocation8 + $0x8e0] sm:$0xff] }
 0x130   :  { %647 = vmatprep.subr.mxu1 %v598_v48  ;;  %801 = vmatprep.subr.mxu0 %v752_v49  ;;  %v1033_v48 = vld [vmem:[#allocation8 + $0xae0] sm:$0xff]  ;;  %v878_v49 = vld [vmem:[#allocation8 + $0x8d8] sm:$0xff] }
 0x131   :  { %648 = vmatpush2.msra.mxu1 %v597_v50  ;;  %802 = vmatpush2.msra.mxu0 %v751_v51  ;;  %v1032_v50 = vld [vmem:[#allocation8 + $0xad8] sm:$0xff]  ;;  %v877_v51 = vld [vmem:[#allocation8 + $0x8d0] sm:$0xff] }
 0x132   :  { %649 = vmatprep.subr.mxu1 %v596_v52  ;;  %803 = vmatprep.subr.mxu0 %v750_v53  ;;  %v1031_v52 = vld [vmem:[#allocation8 + $0xad0] sm:$0xff]  ;;  %v876_v53 = vld [vmem:[#allocation8 + $0x8c8] sm:$0xff] }
 0x133   :  { %650 = vmatpush2.msra.mxu1 %v595_v54  ;;  %804 = vmatpush2.msra.mxu0 %v749_v55  ;;  %v1030_v54 = vld [vmem:[#allocation8 + $0xac8] sm:$0xff]  ;;  %v875_v55 = vld [vmem:[#allocation8 + $0x8c0] sm:$0xff] }
 0x134   :  { %651 = vmatprep.subr.mxu1 %v594_v56  ;;  %805 = vmatprep.subr.mxu0 %v748_v57  ;;  %v1029_v56 = vld [vmem:[#allocation8 + $0xac0] sm:$0xff]  ;;  %v874_v57 = vld [vmem:[#allocation8 + $0x8b8] sm:$0xff] }
 0x135   :  { %652 = vmatpush2.msra.mxu1 %v593_v58  ;;  %806 = vmatpush2.msra.mxu0 %v747_v59  ;;  %v1028_v58 = vld [vmem:[#allocation8 + $0xab8] sm:$0xff]  ;;  %v873_v59 = vld [vmem:[#allocation8 + $0x8b0] sm:$0xff] }
 0x136   :  { %653 = vmatprep.subr.mxu1 %v592_v60  ;;  %807 = vmatprep.subr.mxu0 %v746_v61  ;;  %v1027_v60 = vld [vmem:[#allocation8 + $0xab0] sm:$0xff]  ;;  %v872_v61 = vld [vmem:[#allocation8 + $0x8a8] sm:$0xff] }
 0x137   :  { %654 = vmatpush2.msra.mxu1 %v591_v62  ;;  %808 = vmatpush2.msra.mxu0 %v745_v63  ;;  %v1026_v62 = vld [vmem:[#allocation8 + $0xaa8] sm:$0xff]  ;;  %v871_v63 = vld [vmem:[#allocation8 + $0x8a0] sm:$0xff] }
 0x138   :  { %655 = vmatprep.subr.mxu1 %v590_v0  ;;  %809 = vmatprep.subr.mxu0 %v744_v2  ;;  %v1025_v0 = vld [vmem:[#allocation8 + $0xaa0] sm:$0xff]  ;;  %v870_v2 = vld [vmem:[#allocation8 + $0x898] sm:$0xff] }
 0x139   :  { %656 = vmatpush2.msra.mxu1 %v589_v4  ;;  %810 = vmatpush2.msra.mxu0 %v743_v6  ;;  %v1024_v4 = vld [vmem:[#allocation8 + $0xa98] sm:$0xff]  ;;  %v869_v6 = vld [vmem:[#allocation8 + $0x890] sm:$0xff] }
 0x13a   :  { %657 = vmatprep.subr.mxu1 %v588_v7  ;;  %811 = vmatprep.subr.mxu0 %v742_v8  ;;  %v1023_v7 = vld [vmem:[#allocation8 + $0xa90] sm:$0xff]  ;;  %v868_v8 = vld [vmem:[#allocation8 + $0x888] sm:$0xff] }
 0x13b   :  { %658 = vmatpush2.msra.mxu1 %v587_v9  ;;  %812 = vmatpush2.msra.mxu0 %v741_v10  ;;  %v1022_v9 = vld [vmem:[#allocation8 + $0xa88] sm:$0xff]  ;;  %v867_v10 = vld [vmem:[#allocation8 + $0x880] sm:$0xff] }
 0x13c   :  { %659 = vmatprep.subr.mxu1 %v586_v11  ;;  %813 = vmatprep.subr.mxu0 %v740_v12  ;;  %v1021_v11 = vld [vmem:[#allocation8 + $0xa80] sm:$0xff]  ;;  %v866_v12 = vld [vmem:[#allocation8 + $0x878] sm:$0xff] }
 0x13d   :  { %660 = vmatpush2.msra.mxu1 %v585_v13  ;;  %814 = vmatpush2.msra.mxu0 %v739_v14  ;;  %v1020_v13 = vld [vmem:[#allocation8 + $0xa78] sm:$0xff]  ;;  %v865_v14 = vld [vmem:[#allocation8 + $0x870] sm:$0xff] }
 0x13e   :  { %661 = vmatprep.subr.mxu1 %v584_v15  ;;  %815 = vmatprep.subr.mxu0 %v738_v16  ;;  %v1019_v15 = vld [vmem:[#allocation8 + $0xa70] sm:$0xff]  ;;  %v864_v16 = vld [vmem:[#allocation8 + $0x868] sm:$0xff] }
 0x13f   :  { %662 = vmatpush2.msra.mxu1 %v583_v18  ;;  %816 = vmatpush2.msra.mxu0 %v737_v19  ;;  %v1018_v18 = vld [vmem:[#allocation8 + $0xa68] sm:$0xff]  ;;  %v863_v19 = vld [vmem:[#allocation8 + $0x860] sm:$0xff] }
 0x140   :  { %663 = vmatprep.subr.mxu1 %v582_v20  ;;  %817 = vmatprep.subr.mxu0 %v736_v21  ;;  %v1017_v20 = vld [vmem:[#allocation8 + $0xa60] sm:$0xff]  ;;  %v862_v21 = vld [vmem:[#allocation8 + $0x858] sm:$0xff] }
 0x141   :  { %664 = vmatpush2.msra.mxu1 %v581_v23  ;;  %818 = vmatpush2.msra.mxu0 %v735_v24  ;;  %v1016_v23 = vld [vmem:[#allocation8 + $0xa58] sm:$0xff]  ;;  %v861_v24 = vld [vmem:[#allocation8 + $0x850] sm:$0xff] }
 0x142   :  { %665 = vmatprep.subr.mxu1 %v580_v25  ;;  %819 = vmatprep.subr.mxu0 %v734_v26  ;;  %v1015_v25 = vld [vmem:[#allocation8 + $0xa50] sm:$0xff]  ;;  %v860_v26 = vld [vmem:[#allocation8 + $0x848] sm:$0xff] }
 0x143   :  { %666 = vmatpush2.msra.mxu1 %v579_v27  ;;  %820 = vmatpush2.msra.mxu0 %v733_v28  ;;  %v1014_v27 = vld [vmem:[#allocation8 + $0xa48] sm:$0xff]  ;;  %v859_v28 = vld [vmem:[#allocation8 + $0x840] sm:$0xff] }
 0x144   :  { %667 = vmatprep.subr.mxu1 %v578_v30  ;;  %821 = vmatprep.subr.mxu0 %v732_v31  ;;  %v1013_v30 = vld [vmem:[#allocation8 + $0xa40] sm:$0xff]  ;;  %v858_v31 = vld [vmem:[#allocation8 + $0x838] sm:$0xff] }
 0x145   :  { %668 = vmatpush2.msra.mxu1 %v577_v32  ;;  %822 = vmatpush2.msra.mxu0 %v731_v33  ;;  %v1012_v32 = vld [vmem:[#allocation8 + $0xa38] sm:$0xff]  ;;  %v857_v33 = vld [vmem:[#allocation8 + $0x830] sm:$0xff] }
 0x146   :  { %669 = vmatprep.subr.mxu1 %v576_v35  ;;  %823 = vmatprep.subr.mxu0 %v730_v36  ;;  %v1011_v35 = vld [vmem:[#allocation8 + $0xa30] sm:$0xff]  ;;  %v856_v36 = vld [vmem:[#allocation8 + $0x828] sm:$0xff] }
 0x147   :  { %670 = vmatpush2.msra.mxu1 %v575_v37  ;;  %824 = vmatpush2.msra.mxu0 %v729_v38  ;;  %v1010_v37 = vld [vmem:[#allocation8 + $0xa28] sm:$0xff]  ;;  %v855_v38 = vld [vmem:[#allocation8 + $0x820] sm:$0xff] }
 0x148   :  { %672 = vmatmul.mubr.f32.vlgmr.msra.gmra.mxu1 %v8543_v5  ;;  %826 = vmatmul.mubr.f32.vlgmr.msra.gmra.mxu0 %v8543_v5 }
 0x149   :  { %915 = vmatprep.subr.mxu1 %v882_v39  ;;  %1069 = vmatprep.subr.mxu0 %v1036_v40  ;;  %v1009_v39 = vld [vmem:[#allocation8 + $0xa20] sm:$0xff]  ;;  %v854_v40 = vld [vmem:[#allocation8 + $0x818] sm:$0xff] }
 0x14a   :  { %677 = vmatprep.mubr.f32.mxu1 %v8549_v17  ;;  %831 = vmatprep.mubr.f32.mxu0 %v8549_v17 }
 0x14b   :  { %916 = vmatpush1.msra.mxu1 %v881_v41  ;;  %1070 = vmatpush1.msra.mxu0 %v1035_v42  ;;  %v1008_v41 = vld [vmem:[#allocation8 + $0xa18] sm:$0xff]  ;;  %v853_v42 = vld [vmem:[#allocation8 + $0x810] sm:$0xff] }
 0x14c   :  { %917 = vmatprep.subr.mxu1 %v880_v44  ;;  %1071 = vmatprep.subr.mxu0 %v1034_v45  ;;  %v1007_v44 = vld [vmem:[#allocation8 + $0xa10] sm:$0xff]  ;;  %v852_v45 = vld [vmem:[#allocation8 + $0x808] sm:$0xff] }
 0x14d   :  { %918 = vmatpush1.msra.mxu1 %v879_v47  ;;  %1072 = vmatpush1.msra.mxu0 %v1033_v48  ;;  %v1006_v47 = vld [vmem:[#allocation8 + $0xa08] sm:$0xff]  ;;  %v851_v48 = vld [vmem:[#allocation8 + $0x800] sm:$0xff] }
 0x14e   :  { %678 = vmatmul.mubr.f32.gmra.mxu1 %v8551_v22  ;;  %832 = vmatmul.mubr.f32.gmra.mxu0 %v8551_v22 }
 0x14f   :  { %919 = vmatprep.subr.mxu1 %v878_v49  ;;  %1073 = vmatprep.subr.mxu0 %v1032_v50  ;;  %v1005_v49 = vld [vmem:[#allocation8 + $0xa00] sm:$0xff]  ;;  %v914_v50 = vld [vmem:[#allocation8 + $0x9f8] sm:$0xff] }
 0x150   :  { %683 = vmatprep.mubr.f32.mxu1 %v8555_v29  ;;  %837 = vmatprep.mubr.f32.mxu0 %v8555_v29 }
 0x151   :  { %920 = vmatpush1.msra.mxu1 %v877_v51  ;;  %1074 = vmatpush1.msra.mxu0 %v1031_v52  ;;  %v1068_v51 = vld [vmem:[#allocation8 + $0xbf8] sm:$0xff]  ;;  %v913_v52 = vld [vmem:[#allocation8 + $0x9f0] sm:$0xff] }
 0x152   :  { %921 = vmatprep.subr.mxu1 %v876_v53  ;;  %1075 = vmatprep.subr.mxu0 %v1030_v54  ;;  %v1067_v53 = vld [vmem:[#allocation8 + $0xbf0] sm:$0xff]  ;;  %v912_v54 = vld [vmem:[#allocation8 + $0x9e8] sm:$0xff] }
 0x153   :  { %922 = vmatpush1.msra.mxu1 %v875_v55  ;;  %1076 = vmatpush1.msra.mxu0 %v1029_v56  ;;  %v1066_v55 = vld [vmem:[#allocation8 + $0xbe8] sm:$0xff]  ;;  %v911_v56 = vld [vmem:[#allocation8 + $0x9e0] sm:$0xff] }
 0x154   :  { %684 = vmatmul.mubr.f32.gmra.mxu1 %v8559_v34  ;;  %838 = vmatmul.mubr.f32.gmra.mxu0 %v8559_v34 }
 0x155   :  { %923 = vmatprep.subr.mxu1 %v874_v57  ;;  %1077 = vmatprep.subr.mxu0 %v1028_v58  ;;  %v1065_v57 = vld [vmem:[#allocation8 + $0xbe0] sm:$0xff]  ;;  %v910_v58 = vld [vmem:[#allocation8 + $0x9d8] sm:$0xff] }
 0x156   :  { %689 = vmatprep.mubr.f32.mxu1 %v8563_v43  ;;  %843 = vmatprep.mubr.f32.mxu0 %v8563_v43 }
 0x157   :  { %924 = vmatpush1.msra.mxu1 %v873_v59  ;;  %1078 = vmatpush1.msra.mxu0 %v1027_v60  ;;  %v1064_v59 = vld [vmem:[#allocation8 + $0xbd8] sm:$0xff]  ;;  %v909_v60 = vld [vmem:[#allocation8 + $0x9d0] sm:$0xff] }
 0x158   :  { %925 = vmatprep.subr.mxu1 %v872_v61  ;;  %1079 = vmatprep.subr.mxu0 %v1026_v62  ;;  %v1063_v61 = vld [vmem:[#allocation8 + $0xbd0] sm:$0xff]  ;;  %v908_v62 = vld [vmem:[#allocation8 + $0x9c8] sm:$0xff] }
 0x159   :  { %926 = vmatpush1.msra.mxu1 %v871_v63  ;;  %1080 = vmatpush1.msra.mxu0 %v1025_v0  ;;  %v1062_v63 = vld [vmem:[#allocation8 + $0xbc8] sm:$0xff]  ;;  %v907_v0 = vld [vmem:[#allocation8 + $0x9c0] sm:$0xff] }
 0x15a   :  { %690 = vmatmul.mubr.f32.gmra.mxu1 %v8567_v46  ;;  %844 = vmatmul.mubr.f32.gmra.mxu0 %v8567_v46 }
 0x15b   :  { %927 = vmatprep.subr.mxu1 %v870_v2  ;;  %1081 = vmatprep.subr.mxu0 %v1024_v4  ;;  %v1061_v2 = vld [vmem:[#allocation8 + $0xbc0] sm:$0xff]  ;;  %v906_v4 = vld [vmem:[#allocation8 + $0x9b8] sm:$0xff] }
 0x15c   :  { %928 = vmatpush1.msra.mxu1 %v869_v6  ;;  %979 = vmatprep.mubr.f32.mxu1 %v8541_v3  ;;  %v1060_v6 = vld [vmem:[#allocation8 + $0xbb8] sm:$0xff] }
 0x15d   :  { %1082 = vmatpush1.msra.mxu0 %v1023_v7  ;;  %1133 = vmatprep.mubr.f32.mxu0 %v8541_v3  ;;  %v905_v7 = vld [vmem:[#allocation8 + $0x9b0] sm:$0xff] }
 0x15e   :  { %929 = vmatprep.subr.mxu1 %v868_v8  ;;  %1083 = vmatprep.subr.mxu0 %v1022_v9  ;;  %v1059_v8 = vld [vmem:[#allocation8 + $0xbb0] sm:$0xff]  ;;  %v904_v9 = vld [vmem:[#allocation8 + $0x9a8] sm:$0xff] }
 0x15f   :  { %930 = vmatpush1.msra.mxu1 %v867_v10  ;;  %1084 = vmatpush1.msra.mxu0 %v1021_v11  ;;  %v1058_v10 = vld [vmem:[#allocation8 + $0xba8] sm:$0xff]  ;;  %v903_v11 = vld [vmem:[#allocation8 + $0x9a0] sm:$0xff] }
 0x160   :  { %931 = vmatprep.subr.mxu1 %v866_v12  ;;  %1085 = vmatprep.subr.mxu0 %v1020_v13  ;;  %v1057_v12 = vld [vmem:[#allocation8 + $0xba0] sm:$0xff]  ;;  %v902_v13 = vld [vmem:[#allocation8 + $0x998] sm:$0xff] }
 0x161   :  { %932 = vmatpush1.msra.mxu1 %v865_v14  ;;  %1086 = vmatpush1.msra.mxu0 %v1019_v15  ;;  %v1056_v14 = vld [vmem:[#allocation8 + $0xb98] sm:$0xff]  ;;  %v901_v15 = vld [vmem:[#allocation8 + $0x990] sm:$0xff] }
 0x162   :  { %933 = vmatprep.subr.mxu1 %v864_v16  ;;  %1087 = vmatprep.subr.mxu0 %v1018_v18  ;;  %v1055_v16 = vld [vmem:[#allocation8 + $0xb90] sm:$0xff]  ;;  %v900_v18 = vld [vmem:[#allocation8 + $0x988] sm:$0xff] }
 0x163   :  { %934 = vmatpush1.msra.mxu1 %v863_v19  ;;  %1088 = vmatpush1.msra.mxu0 %v1017_v20  ;;  %v1054_v19 = vld [vmem:[#allocation8 + $0xb88] sm:$0xff]  ;;  %v899_v20 = vld [vmem:[#allocation8 + $0x980] sm:$0xff] }
 0x164   :  { %935 = vmatprep.subr.mxu1 %v862_v21  ;;  %1089 = vmatprep.subr.mxu0 %v1016_v23  ;;  %v1053_v21 = vld [vmem:[#allocation8 + $0xb80] sm:$0xff]  ;;  %v898_v23 = vld [vmem:[#allocation8 + $0x978] sm:$0xff] }
 0x165   :  { %936 = vmatpush1.msra.mxu1 %v861_v24  ;;  %1090 = vmatpush1.msra.mxu0 %v1015_v25  ;;  %v1052_v24 = vld [vmem:[#allocation8 + $0xb78] sm:$0xff]  ;;  %v897_v25 = vld [vmem:[#allocation8 + $0x970] sm:$0xff] }
 0x166   :  { %937 = vmatprep.subr.mxu1 %v860_v26  ;;  %1091 = vmatprep.subr.mxu0 %v1014_v27  ;;  %v1051_v26 = vld [vmem:[#allocation8 + $0xb70] sm:$0xff]  ;;  %v896_v27 = vld [vmem:[#allocation8 + $0x968] sm:$0xff] }
 0x167   :  { %938 = vmatpush1.msra.mxu1 %v859_v28  ;;  %1092 = vmatpush1.msra.mxu0 %v1013_v30  ;;  %v1050_v28 = vld [vmem:[#allocation8 + $0xb68] sm:$0xff]  ;;  %v895_v30 = vld [vmem:[#allocation8 + $0x960] sm:$0xff] }
 0x168   :  { %939 = vmatprep.subr.mxu1 %v858_v31  ;;  %1093 = vmatprep.subr.mxu0 %v1012_v32  ;;  %v1049_v31 = vld [vmem:[#allocation8 + $0xb60] sm:$0xff]  ;;  %v894_v32 = vld [vmem:[#allocation8 + $0x958] sm:$0xff] }
 0x169   :  { %940 = vmatpush1.msra.mxu1 %v857_v33  ;;  %1094 = vmatpush1.msra.mxu0 %v1011_v35  ;;  %v1048_v33 = vld [vmem:[#allocation8 + $0xb58] sm:$0xff]  ;;  %v893_v35 = vld [vmem:[#allocation8 + $0x950] sm:$0xff] }
 0x16a   :  { %941 = vmatprep.subr.mxu1 %v856_v36  ;;  %1095 = vmatprep.subr.mxu0 %v1010_v37  ;;  %v1047_v36 = vld [vmem:[#allocation8 + $0xb50] sm:$0xff]  ;;  %v892_v37 = vld [vmem:[#allocation8 + $0x948] sm:$0xff] }
 0x16b   :  { %942 = vmatpush1.msra.mxu1 %v855_v38  ;;  %1096 = vmatpush1.msra.mxu0 %v1009_v39  ;;  %v1046_v38 = vld [vmem:[#allocation8 + $0xb48] sm:$0xff]  ;;  %v891_v39 = vld [vmem:[#allocation8 + $0x940] sm:$0xff] }
 0x16c   :  { %943 = vmatprep.subr.mxu1 %v854_v40  ;;  %1097 = vmatprep.subr.mxu0 %v1008_v41  ;;  %v1045_v40 = vld [vmem:[#allocation8 + $0xb40] sm:$0xff]  ;;  %v890_v41 = vld [vmem:[#allocation8 + $0x938] sm:$0xff] }
 0x16d   :  { %944 = vmatpush1.msra.mxu1 %v853_v42  ;;  %1098 = vmatpush1.msra.mxu0 %v1007_v44  ;;  %v1044_v42 = vld [vmem:[#allocation8 + $0xb38] sm:$0xff]  ;;  %v889_v44 = vld [vmem:[#allocation8 + $0x930] sm:$0xff] }
 0x16e   :  { %945 = vmatprep.subr.mxu1 %v852_v45  ;;  %1099 = vmatprep.subr.mxu0 %v1006_v47  ;;  %v1043_v45 = vld [vmem:[#allocation8 + $0xb30] sm:$0xff]  ;;  %v888_v47 = vld [vmem:[#allocation8 + $0x928] sm:$0xff] }
 0x16f   :  { %946 = vmatpush1.msra.mxu1 %v851_v48  ;;  %1100 = vmatpush1.msra.mxu0 %v1005_v49  ;;  %v1042_v48 = vld [vmem:[#allocation8 + $0xb28] sm:$0xff]  ;;  %v887_v49 = vld [vmem:[#allocation8 + $0x920] sm:$0xff] }
 0x170   :  { %947 = vmatprep.subr.mxu1 %v914_v50  ;;  %1101 = vmatprep.subr.mxu0 %v1068_v51  ;;  %v1041_v50 = vld [vmem:[#allocation8 + $0xb20] sm:$0xff]  ;;  %v886_v51 = vld [vmem:[#allocation8 + $0x918] sm:$0xff] }
 0x171   :  { %948 = vmatpush2.msra.mxu1 %v913_v52  ;;  %1102 = vmatpush2.msra.mxu0 %v1067_v53  ;;  %v1040_v52 = vld [vmem:[#allocation8 + $0xb18] sm:$0xff]  ;;  %v885_v53 = vld [vmem:[#allocation8 + $0x910] sm:$0xff] }
 0x172   :  { %949 = vmatprep.subr.mxu1 %v912_v54  ;;  %1103 = vmatprep.subr.mxu0 %v1066_v55  ;;  %v1039_v54 = vld [vmem:[#allocation8 + $0xb10] sm:$0xff]  ;;  %v884_v55 = vld [vmem:[#allocation8 + $0x908] sm:$0xff] }
 0x173   :  { %950 = vmatpush2.msra.mxu1 %v911_v56  ;;  %1104 = vmatpush2.msra.mxu0 %v1065_v57  ;;  %v1038_v56 = vld [vmem:[#allocation8 + $0xb08] sm:$0xff]  ;;  %v883_v57 = vld [vmem:[#allocation8 + $0x900] sm:$0xff] }
 0x174   :  { %951 = vmatprep.subr.mxu1 %v910_v58  ;;  %1105 = vmatprep.subr.mxu0 %v1064_v59  ;;  %v1037_v58 = vld [vmem:[#allocation8 + $0xb00] sm:$0xff]  ;;  %v1190_v59 = vld [vmem:[#allocation8 + $0xcf8] sm:$0xff] }
 0x175   :  { %952 = vmatpush2.msra.mxu1 %v909_v60  ;;  %1106 = vmatpush2.msra.mxu0 %v1063_v61  ;;  %v1344_v60 = vld [vmem:[#allocation8 + $0xef8] sm:$0xff]  ;;  %v1189_v61 = vld [vmem:[#allocation8 + $0xcf0] sm:$0xff] }
 0x176   :  { %953 = vmatprep.subr.mxu1 %v908_v62  ;;  %1107 = vmatprep.subr.mxu0 %v1062_v63  ;;  %v1343_v62 = vld [vmem:[#allocation8 + $0xef0] sm:$0xff]  ;;  %v1188_v63 = vld [vmem:[#allocation8 + $0xce8] sm:$0xff] }
 0x177   :  { %954 = vmatpush2.msra.mxu1 %v907_v0  ;;  %1108 = vmatpush2.msra.mxu0 %v1061_v2  ;;  %v1342_v0 = vld [vmem:[#allocation8 + $0xee8] sm:$0xff]  ;;  %v1187_v2 = vld [vmem:[#allocation8 + $0xce0] sm:$0xff] }
 0x178   :  { %955 = vmatprep.subr.mxu1 %v906_v4  ;;  %1109 = vmatprep.subr.mxu0 %v1060_v6  ;;  %v1341_v4 = vld [vmem:[#allocation8 + $0xee0] sm:$0xff]  ;;  %v1186_v6 = vld [vmem:[#allocation8 + $0xcd8] sm:$0xff] }
 0x179   :  { %956 = vmatpush2.msra.mxu1 %v905_v7  ;;  %1110 = vmatpush2.msra.mxu0 %v1059_v8  ;;  %v1340_v7 = vld [vmem:[#allocation8 + $0xed8] sm:$0xff]  ;;  %v1185_v8 = vld [vmem:[#allocation8 + $0xcd0] sm:$0xff] }
 0x17a   :  { %957 = vmatprep.subr.mxu1 %v904_v9  ;;  %1111 = vmatprep.subr.mxu0 %v1058_v10  ;;  %v1339_v9 = vld [vmem:[#allocation8 + $0xed0] sm:$0xff]  ;;  %v1184_v10 = vld [vmem:[#allocation8 + $0xcc8] sm:$0xff] }
 0x17b   :  { %958 = vmatpush2.msra.mxu1 %v903_v11  ;;  %1112 = vmatpush2.msra.mxu0 %v1057_v12  ;;  %v1338_v11 = vld [vmem:[#allocation8 + $0xec8] sm:$0xff]  ;;  %v1183_v12 = vld [vmem:[#allocation8 + $0xcc0] sm:$0xff] }
 0x17c   :  { %959 = vmatprep.subr.mxu1 %v902_v13  ;;  %1113 = vmatprep.subr.mxu0 %v1056_v14  ;;  %v1337_v13 = vld [vmem:[#allocation8 + $0xec0] sm:$0xff]  ;;  %v1182_v14 = vld [vmem:[#allocation8 + $0xcb8] sm:$0xff] }
 0x17d   :  { %960 = vmatpush2.msra.mxu1 %v901_v15  ;;  %1114 = vmatpush2.msra.mxu0 %v1055_v16  ;;  %v1336_v15 = vld [vmem:[#allocation8 + $0xeb8] sm:$0xff]  ;;  %v1181_v16 = vld [vmem:[#allocation8 + $0xcb0] sm:$0xff] }
 0x17e   :  { %961 = vmatprep.subr.mxu1 %v900_v18  ;;  %1115 = vmatprep.subr.mxu0 %v1054_v19  ;;  %v1335_v18 = vld [vmem:[#allocation8 + $0xeb0] sm:$0xff]  ;;  %v1180_v19 = vld [vmem:[#allocation8 + $0xca8] sm:$0xff] }
 0x17f   :  { %962 = vmatpush2.msra.mxu1 %v899_v20  ;;  %1116 = vmatpush2.msra.mxu0 %v1053_v21  ;;  %v1334_v20 = vld [vmem:[#allocation8 + $0xea8] sm:$0xff]  ;;  %v1179_v21 = vld [vmem:[#allocation8 + $0xca0] sm:$0xff] }
 0x180   :  { %963 = vmatprep.subr.mxu1 %v898_v23  ;;  %1117 = vmatprep.subr.mxu0 %v1052_v24  ;;  %v1333_v23 = vld [vmem:[#allocation8 + $0xea0] sm:$0xff]  ;;  %v1178_v24 = vld [vmem:[#allocation8 + $0xc98] sm:$0xff] }
 0x181   :  { %964 = vmatpush2.msra.mxu1 %v897_v25  ;;  %1118 = vmatpush2.msra.mxu0 %v1051_v26  ;;  %v1332_v25 = vld [vmem:[#allocation8 + $0xe98] sm:$0xff]  ;;  %v1177_v26 = vld [vmem:[#allocation8 + $0xc90] sm:$0xff] }
 0x182   :  { %965 = vmatprep.subr.mxu1 %v896_v27  ;;  %1119 = vmatprep.subr.mxu0 %v1050_v28  ;;  %v1331_v27 = vld [vmem:[#allocation8 + $0xe90] sm:$0xff]  ;;  %v1176_v28 = vld [vmem:[#allocation8 + $0xc88] sm:$0xff] }
 0x183   :  { %966 = vmatpush2.msra.mxu1 %v895_v30  ;;  %1120 = vmatpush2.msra.mxu0 %v1049_v31  ;;  %v1330_v30 = vld [vmem:[#allocation8 + $0xe88] sm:$0xff]  ;;  %v1175_v31 = vld [vmem:[#allocation8 + $0xc80] sm:$0xff] }
 0x184   :  { %967 = vmatprep.subr.mxu1 %v894_v32  ;;  %1121 = vmatprep.subr.mxu0 %v1048_v33  ;;  %v1329_v32 = vld [vmem:[#allocation8 + $0xe80] sm:$0xff]  ;;  %v1174_v33 = vld [vmem:[#allocation8 + $0xc78] sm:$0xff] }
 0x185   :  { %968 = vmatpush2.msra.mxu1 %v893_v35  ;;  %1122 = vmatpush2.msra.mxu0 %v1047_v36  ;;  %v1328_v35 = vld [vmem:[#allocation8 + $0xe78] sm:$0xff]  ;;  %v1173_v36 = vld [vmem:[#allocation8 + $0xc70] sm:$0xff] }
 0x186   :  { %969 = vmatprep.subr.mxu1 %v892_v37  ;;  %1123 = vmatprep.subr.mxu0 %v1046_v38  ;;  %v1327_v37 = vld [vmem:[#allocation8 + $0xe70] sm:$0xff]  ;;  %v1172_v38 = vld [vmem:[#allocation8 + $0xc68] sm:$0xff] }
 0x187   :  { %970 = vmatpush2.msra.mxu1 %v891_v39  ;;  %1124 = vmatpush2.msra.mxu0 %v1045_v40  ;;  %v1326_v39 = vld [vmem:[#allocation8 + $0xe68] sm:$0xff]  ;;  %v1171_v40 = vld [vmem:[#allocation8 + $0xc60] sm:$0xff] }
 0x188   :  { %971 = vmatprep.subr.mxu1 %v890_v41  ;;  %1125 = vmatprep.subr.mxu0 %v1044_v42  ;;  %v1325_v41 = vld [vmem:[#allocation8 + $0xe60] sm:$0xff]  ;;  %v1170_v42 = vld [vmem:[#allocation8 + $0xc58] sm:$0xff] }
 0x189   :  { %972 = vmatpush2.msra.mxu1 %v889_v44  ;;  %1126 = vmatpush2.msra.mxu0 %v1043_v45  ;;  %v1324_v44 = vld [vmem:[#allocation8 + $0xe58] sm:$0xff]  ;;  %v1169_v45 = vld [vmem:[#allocation8 + $0xc50] sm:$0xff] }
 0x18a   :  { %973 = vmatprep.subr.mxu1 %v888_v47  ;;  %1127 = vmatprep.subr.mxu0 %v1042_v48  ;;  %v1323_v47 = vld [vmem:[#allocation8 + $0xe50] sm:$0xff]  ;;  %v1168_v48 = vld [vmem:[#allocation8 + $0xc48] sm:$0xff] }
 0x18b   :  { %974 = vmatpush2.msra.mxu1 %v887_v49  ;;  %1128 = vmatpush2.msra.mxu0 %v1041_v50  ;;  %v1322_v49 = vld [vmem:[#allocation8 + $0xe48] sm:$0xff]  ;;  %v1167_v50 = vld [vmem:[#allocation8 + $0xc40] sm:$0xff] }
 0x18c   :  { %975 = vmatprep.subr.mxu1 %v886_v51  ;;  %1129 = vmatprep.subr.mxu0 %v1040_v52  ;;  %v1321_v51 = vld [vmem:[#allocation8 + $0xe40] sm:$0xff]  ;;  %v1166_v52 = vld [vmem:[#allocation8 + $0xc38] sm:$0xff] }
 0x18d   :  { %976 = vmatpush2.msra.mxu1 %v885_v53  ;;  %1130 = vmatpush2.msra.mxu0 %v1039_v54  ;;  %v1320_v53 = vld [vmem:[#allocation8 + $0xe38] sm:$0xff]  ;;  %v1165_v54 = vld [vmem:[#allocation8 + $0xc30] sm:$0xff] }
 0x18e   :  { %977 = vmatprep.subr.mxu1 %v884_v55  ;;  %1131 = vmatprep.subr.mxu0 %v1038_v56  ;;  %v1319_v55 = vld [vmem:[#allocation8 + $0xe30] sm:$0xff]  ;;  %v1164_v56 = vld [vmem:[#allocation8 + $0xc28] sm:$0xff] }
 0x18f   :  { %978 = vmatpush2.msra.mxu1 %v883_v57  ;;  %1132 = vmatpush2.msra.mxu0 %v1037_v58  ;;  %v1318_v57 = vld [vmem:[#allocation8 + $0xe28] sm:$0xff]  ;;  %v1163_v58 = vld [vmem:[#allocation8 + $0xc20] sm:$0xff] }
 0x190   :  { %980 = vmatmul.mubr.f32.vlgmr.msra.gmra.mxu1 %v8543_v5  ;;  %1134 = vmatmul.mubr.f32.vlgmr.msra.gmra.mxu0 %v8543_v5 }
 0x191   :  { %1223 = vmatprep.subr.mxu1 %v1190_v59  ;;  %1377 = vmatprep.subr.mxu0 %v1344_v60  ;;  %v1317_v59 = vld [vmem:[#allocation8 + $0xe20] sm:$0xff]  ;;  %v1162_v60 = vld [vmem:[#allocation8 + $0xc18] sm:$0xff] }
 0x192   :  { %985 = vmatprep.mubr.f32.mxu1 %v8549_v17  ;;  %1139 = vmatprep.mubr.f32.mxu0 %v8549_v17 }
 0x193   :  { %1224 = vmatpush1.msra.mxu1 %v1189_v61  ;;  %1378 = vmatpush1.msra.mxu0 %v1343_v62  ;;  %v1316_v61 = vld [vmem:[#allocation8 + $0xe18] sm:$0xff]  ;;  %v1161_v62 = vld [vmem:[#allocation8 + $0xc10] sm:$0xff] }
 0x194   :  { %1225 = vmatprep.subr.mxu1 %v1188_v63  ;;  %1379 = vmatprep.subr.mxu0 %v1342_v0  ;;  %v1315_v63 = vld [vmem:[#allocation8 + $0xe10] sm:$0xff]  ;;  %v1160_v0 = vld [vmem:[#allocation8 + $0xc08] sm:$0xff] }
 0x195   :  { %1226 = vmatpush1.msra.mxu1 %v1187_v2  ;;  %1380 = vmatpush1.msra.mxu0 %v1341_v4  ;;  %v1314_v2 = vld [vmem:[#allocation8 + $0xe08] sm:$0xff]  ;;  %v1159_v4 = vld [vmem:[#allocation8 + $0xc00] sm:$0xff] }
 0x196   :  { %986 = vmatmul.mubr.f32.gmra.mxu1 %v8551_v22  ;;  %1140 = vmatmul.mubr.f32.gmra.mxu0 %v8551_v22 }
 0x197   :  { %1227 = vmatprep.subr.mxu1 %v1186_v6  ;;  %1381 = vmatprep.subr.mxu0 %v1340_v7  ;;  %v1313_v6 = vld [vmem:[#allocation8 + $0xe00] sm:$0xff]  ;;  %v1222_v7 = vld [vmem:[#allocation8 + $0xdf8] sm:$0xff] }
 0x198   :  { %991 = vmatprep.mubr.f32.mxu1 %v8555_v29  ;;  %1145 = vmatprep.mubr.f32.mxu0 %v8555_v29 }
 0x199   :  { %1228 = vmatpush1.msra.mxu1 %v1185_v8  ;;  %1382 = vmatpush1.msra.mxu0 %v1339_v9  ;;  %v1376_v8 = vld [vmem:[#allocation8 + $0xff8] sm:$0xff]  ;;  %v1221_v9 = vld [vmem:[#allocation8 + $0xdf0] sm:$0xff] }
 0x19a   :  { %1229 = vmatprep.subr.mxu1 %v1184_v10  ;;  %1383 = vmatprep.subr.mxu0 %v1338_v11  ;;  %v1375_v10 = vld [vmem:[#allocation8 + $0xff0] sm:$0xff]  ;;  %v1220_v11 = vld [vmem:[#allocation8 + $0xde8] sm:$0xff] }
 0x19b   :  { %1230 = vmatpush1.msra.mxu1 %v1183_v12  ;;  %1384 = vmatpush1.msra.mxu0 %v1337_v13  ;;  %v1374_v12 = vld [vmem:[#allocation8 + $0xfe8] sm:$0xff]  ;;  %v1219_v13 = vld [vmem:[#allocation8 + $0xde0] sm:$0xff] }
 0x19c   :  { %992 = vmatmul.mubr.f32.gmra.mxu1 %v8559_v34  ;;  %1146 = vmatmul.mubr.f32.gmra.mxu0 %v8559_v34 }
 0x19d   :  { %1231 = vmatprep.subr.mxu1 %v1182_v14  ;;  %1385 = vmatprep.subr.mxu0 %v1336_v15  ;;  %v1373_v14 = vld [vmem:[#allocation8 + $0xfe0] sm:$0xff]  ;;  %v1218_v15 = vld [vmem:[#allocation8 + $0xdd8] sm:$0xff] }
 0x19e   :  { %997 = vmatprep.mubr.f32.mxu1 %v8563_v43  ;;  %1151 = vmatprep.mubr.f32.mxu0 %v8563_v43 }
 0x19f   :  { %1232 = vmatpush1.msra.mxu1 %v1181_v16  ;;  %1386 = vmatpush1.msra.mxu0 %v1335_v18  ;;  %v1372_v16 = vld [vmem:[#allocation8 + $0xfd8] sm:$0xff]  ;;  %v1217_v18 = vld [vmem:[#allocation8 + $0xdd0] sm:$0xff] }
 0x1a0   :  { %1233 = vmatprep.subr.mxu1 %v1180_v19  ;;  %1387 = vmatprep.subr.mxu0 %v1334_v20  ;;  %v1371_v19 = vld [vmem:[#allocation8 + $0xfd0] sm:$0xff]  ;;  %v1216_v20 = vld [vmem:[#allocation8 + $0xdc8] sm:$0xff] }
 0x1a1   :  { %1234 = vmatpush1.msra.mxu1 %v1179_v21  ;;  %1388 = vmatpush1.msra.mxu0 %v1333_v23  ;;  %v1370_v21 = vld [vmem:[#allocation8 + $0xfc8] sm:$0xff]  ;;  %v1215_v23 = vld [vmem:[#allocation8 + $0xdc0] sm:$0xff] }
 0x1a2   :  { %998 = vmatmul.mubr.f32.gmra.mxu1 %v8567_v46  ;;  %1152 = vmatmul.mubr.f32.gmra.mxu0 %v8567_v46 }
 0x1a3   :  { %1235 = vmatprep.subr.mxu1 %v1178_v24  ;;  %1389 = vmatprep.subr.mxu0 %v1332_v25  ;;  %v1369_v24 = vld [vmem:[#allocation8 + $0xfc0] sm:$0xff]  ;;  %v1214_v25 = vld [vmem:[#allocation8 + $0xdb8] sm:$0xff] }
 0x1a4   :  { %1236 = vmatpush1.msra.mxu1 %v1177_v26  ;;  %1287 = vmatprep.mubr.f32.mxu1 %v8541_v3  ;;  %v1368_v26 = vld [vmem:[#allocation8 + $0xfb8] sm:$0xff] }
 0x1a5   :  { %1390 = vmatpush1.msra.mxu0 %v1331_v27  ;;  %1441 = vmatprep.mubr.f32.mxu0 %v8541_v3  ;;  %v1213_v27 = vld [vmem:[#allocation8 + $0xdb0] sm:$0xff] }
 0x1a6   :  { %1237 = vmatprep.subr.mxu1 %v1176_v28  ;;  %1391 = vmatprep.subr.mxu0 %v1330_v30  ;;  %v1367_v28 = vld [vmem:[#allocation8 + $0xfb0] sm:$0xff]  ;;  %v1212_v30 = vld [vmem:[#allocation8 + $0xda8] sm:$0xff] }
 0x1a7   :  { %1238 = vmatpush1.msra.mxu1 %v1175_v31  ;;  %1392 = vmatpush1.msra.mxu0 %v1329_v32  ;;  %v1366_v31 = vld [vmem:[#allocation8 + $0xfa8] sm:$0xff]  ;;  %v1211_v32 = vld [vmem:[#allocation8 + $0xda0] sm:$0xff] }
 0x1a8   :  { %1239 = vmatprep.subr.mxu1 %v1174_v33  ;;  %1393 = vmatprep.subr.mxu0 %v1328_v35  ;;  %v1365_v33 = vld [vmem:[#allocation8 + $0xfa0] sm:$0xff]  ;;  %v1210_v35 = vld [vmem:[#allocation8 + $0xd98] sm:$0xff] }
 0x1a9   :  { %1240 = vmatpush1.msra.mxu1 %v1173_v36  ;;  %1394 = vmatpush1.msra.mxu0 %v1327_v37  ;;  %v1364_v36 = vld [vmem:[#allocation8 + $0xf98] sm:$0xff]  ;;  %v1209_v37 = vld [vmem:[#allocation8 + $0xd90] sm:$0xff] }
 0x1aa   :  { %1241 = vmatprep.subr.mxu1 %v1172_v38  ;;  %1395 = vmatprep.subr.mxu0 %v1326_v39  ;;  %v1363_v38 = vld [vmem:[#allocation8 + $0xf90] sm:$0xff]  ;;  %v1208_v39 = vld [vmem:[#allocation8 + $0xd88] sm:$0xff] }
 0x1ab   :  { %1242 = vmatpush1.msra.mxu1 %v1171_v40  ;;  %1396 = vmatpush1.msra.mxu0 %v1325_v41  ;;  %v1362_v40 = vld [vmem:[#allocation8 + $0xf88] sm:$0xff]  ;;  %v1207_v41 = vld [vmem:[#allocation8 + $0xd80] sm:$0xff] }
 0x1ac   :  { %1243 = vmatprep.subr.mxu1 %v1170_v42  ;;  %1397 = vmatprep.subr.mxu0 %v1324_v44  ;;  %v1361_v42 = vld [vmem:[#allocation8 + $0xf80] sm:$0xff]  ;;  %v1206_v44 = vld [vmem:[#allocation8 + $0xd78] sm:$0xff] }
 0x1ad   :  { %1244 = vmatpush1.msra.mxu1 %v1169_v45  ;;  %1398 = vmatpush1.msra.mxu0 %v1323_v47  ;;  %v1360_v45 = vld [vmem:[#allocation8 + $0xf78] sm:$0xff]  ;;  %v1205_v47 = vld [vmem:[#allocation8 + $0xd70] sm:$0xff] }
 0x1ae   :  { %1245 = vmatprep.subr.mxu1 %v1168_v48  ;;  %1399 = vmatprep.subr.mxu0 %v1322_v49  ;;  %v1359_v48 = vld [vmem:[#allocation8 + $0xf70] sm:$0xff]  ;;  %v1204_v49 = vld [vmem:[#allocation8 + $0xd68] sm:$0xff] }
 0x1af   :  { %1246 = vmatpush1.msra.mxu1 %v1167_v50  ;;  %1400 = vmatpush1.msra.mxu0 %v1321_v51  ;;  %v1358_v50 = vld [vmem:[#allocation8 + $0xf68] sm:$0xff]  ;;  %v1203_v51 = vld [vmem:[#allocation8 + $0xd60] sm:$0xff] }
 0x1b0   :  { %1247 = vmatprep.subr.mxu1 %v1166_v52  ;;  %1401 = vmatprep.subr.mxu0 %v1320_v53  ;;  %v1357_v52 = vld [vmem:[#allocation8 + $0xf60] sm:$0xff]  ;;  %v1202_v53 = vld [vmem:[#allocation8 + $0xd58] sm:$0xff] }
 0x1b1   :  { %1248 = vmatpush1.msra.mxu1 %v1165_v54  ;;  %1402 = vmatpush1.msra.mxu0 %v1319_v55  ;;  %v1356_v54 = vld [vmem:[#allocation8 + $0xf58] sm:$0xff]  ;;  %v1201_v55 = vld [vmem:[#allocation8 + $0xd50] sm:$0xff] }
 0x1b2   :  { %1249 = vmatprep.subr.mxu1 %v1164_v56  ;;  %1403 = vmatprep.subr.mxu0 %v1318_v57  ;;  %v1355_v56 = vld [vmem:[#allocation8 + $0xf50] sm:$0xff]  ;;  %v1200_v57 = vld [vmem:[#allocation8 + $0xd48] sm:$0xff] }
 0x1b3   :  { %1250 = vmatpush1.msra.mxu1 %v1163_v58  ;;  %1404 = vmatpush1.msra.mxu0 %v1317_v59  ;;  %v1354_v58 = vld [vmem:[#allocation8 + $0xf48] sm:$0xff]  ;;  %v1199_v59 = vld [vmem:[#allocation8 + $0xd40] sm:$0xff] }
 0x1b4   :  { %1251 = vmatprep.subr.mxu1 %v1162_v60  ;;  %1405 = vmatprep.subr.mxu0 %v1316_v61  ;;  %v1353_v60 = vld [vmem:[#allocation8 + $0xf40] sm:$0xff]  ;;  %v1198_v61 = vld [vmem:[#allocation8 + $0xd38] sm:$0xff] }
 0x1b5   :  { %1252 = vmatpush1.msra.mxu1 %v1161_v62  ;;  %1406 = vmatpush1.msra.mxu0 %v1315_v63  ;;  %v1352_v62 = vld [vmem:[#allocation8 + $0xf38] sm:$0xff]  ;;  %v1197_v63 = vld [vmem:[#allocation8 + $0xd30] sm:$0xff] }
 0x1b6   :  { %1253 = vmatprep.subr.mxu1 %v1160_v0  ;;  %1407 = vmatprep.subr.mxu0 %v1314_v2  ;;  %v1351_v0 = vld [vmem:[#allocation8 + $0xf30] sm:$0xff]  ;;  %v1196_v2 = vld [vmem:[#allocation8 + $0xd28] sm:$0xff] }
 0x1b7   :  { %1254 = vmatpush1.msra.mxu1 %v1159_v4  ;;  %1408 = vmatpush1.msra.mxu0 %v1313_v6  ;;  %v1350_v4 = vld [vmem:[#allocation8 + $0xf28] sm:$0xff]  ;;  %v1195_v6 = vld [vmem:[#allocation8 + $0xd20] sm:$0xff] }
 0x1b8   :  { %1255 = vmatprep.subr.mxu1 %v1222_v7  ;;  %1409 = vmatprep.subr.mxu0 %v1376_v8  ;;  %v1349_v7 = vld [vmem:[#allocation8 + $0xf20] sm:$0xff]  ;;  %v1194_v8 = vld [vmem:[#allocation8 + $0xd18] sm:$0xff] }
 0x1b9   :  { %1256 = vmatpush2.msra.mxu1 %v1221_v9  ;;  %1410 = vmatpush2.msra.mxu0 %v1375_v10  ;;  %v1348_v9 = vld [vmem:[#allocation8 + $0xf18] sm:$0xff]  ;;  %v1193_v10 = vld [vmem:[#allocation8 + $0xd10] sm:$0xff] }
 0x1ba   :  { %1257 = vmatprep.subr.mxu1 %v1220_v11  ;;  %1411 = vmatprep.subr.mxu0 %v1374_v12  ;;  %v1347_v11 = vld [vmem:[#allocation8 + $0xf10] sm:$0xff]  ;;  %v1192_v12 = vld [vmem:[#allocation8 + $0xd08] sm:$0xff] }
 0x1bb   :  { %1258 = vmatpush2.msra.mxu1 %v1219_v13  ;;  %1412 = vmatpush2.msra.mxu0 %v1373_v14  ;;  %v1346_v13 = vld [vmem:[#allocation8 + $0xf08] sm:$0xff]  ;;  %v1191_v14 = vld [vmem:[#allocation8 + $0xd00] sm:$0xff] }
 0x1bc   :  { %1259 = vmatprep.subr.mxu1 %v1218_v15  ;;  %1413 = vmatprep.subr.mxu0 %v1372_v16  ;;  %v1345_v15 = vld [vmem:[#allocation8 + $0xf00] sm:$0xff]  ;;  %v1498_v16 = vld [vmem:[#allocation8 + $0x10f8] sm:$0xff] }
 0x1bd   :  { %1260 = vmatpush2.msra.mxu1 %v1217_v18  ;;  %1414 = vmatpush2.msra.mxu0 %v1371_v19  ;;  %v1497_v18 = vld [vmem:[#allocation8 + $0x10f0] sm:$0xff]  ;;  %v1496_v19 = vld [vmem:[#allocation8 + $0x10e8] sm:$0xff] }
 0x1be   :  { %1261 = vmatprep.subr.mxu1 %v1216_v20  ;;  %1415 = vmatprep.subr.mxu0 %v1370_v21  ;;  %v1495_v20 = vld [vmem:[#allocation8 + $0x10e0] sm:$0xff]  ;;  %v1494_v21 = vld [vmem:[#allocation8 + $0x10d8] sm:$0xff] }
 0x1bf   :  { %1262 = vmatpush2.msra.mxu1 %v1215_v23  ;;  %1416 = vmatpush2.msra.mxu0 %v1369_v24  ;;  %v7018_v23 = vld [vmem:[#allocation8 + $0xf8] sm:$0xff]  ;;  %v1493_v24 = vld [vmem:[#allocation8 + $0x10d0] sm:$0xff] }
 0x1c0   :  { %1263 = vmatprep.subr.mxu1 %v1214_v25  ;;  %1417 = vmatprep.subr.mxu0 %v1368_v26  ;;  %v1492_v25 = vld [vmem:[#allocation8 + $0x10c8] sm:$0xff]  ;;  %v1491_v26 = vld [vmem:[#allocation8 + $0x10c0] sm:$0xff] }
 0x1c1   :  { %1264 = vmatpush2.msra.mxu1 %v1213_v27  ;;  %1418 = vmatpush2.msra.mxu0 %v1367_v28  ;;  %v1490_v27 = vld [vmem:[#allocation8 + $0x10b8] sm:$0xff]  ;;  %v7019_v28 = vld [vmem:[#allocation8 + $0xf0] sm:$0xff] }
 0x1c2   :  { %1265 = vmatprep.subr.mxu1 %v1212_v30  ;;  %1419 = vmatprep.subr.mxu0 %v1366_v31  ;;  %v1489_v30 = vld [vmem:[#allocation8 + $0x10b0] sm:$0xff]  ;;  %v1488_v31 = vld [vmem:[#allocation8 + $0x10a8] sm:$0xff] }
 0x1c3   :  { %1266 = vmatpush2.msra.mxu1 %v1211_v32  ;;  %1420 = vmatpush2.msra.mxu0 %v1365_v33  ;;  %v1487_v32 = vld [vmem:[#allocation8 + $0x10a0] sm:$0xff]  ;;  %v1486_v33 = vld [vmem:[#allocation8 + $0x1098] sm:$0xff] }
 0x1c4   :  { %1267 = vmatprep.subr.mxu1 %v1210_v35  ;;  %1421 = vmatprep.subr.mxu0 %v1364_v36  ;;  %v1485_v35 = vld [vmem:[#allocation8 + $0x1090] sm:$0xff]  ;;  %v1484_v36 = vld [vmem:[#allocation8 + $0x1088] sm:$0xff] }
 0x1c5   :  { %1268 = vmatpush2.msra.mxu1 %v1209_v37  ;;  %1422 = vmatpush2.msra.mxu0 %v1363_v38  ;;  %v7020_v37 = vld [vmem:[#allocation8 + $0xe8] sm:$0xff]  ;;  %v1483_v38 = vld [vmem:[#allocation8 + $0x1080] sm:$0xff] }
 0x1c6   :  { %1269 = vmatprep.subr.mxu1 %v1208_v39  ;;  %1423 = vmatprep.subr.mxu0 %v1362_v40  ;;  %v1482_v39 = vld [vmem:[#allocation8 + $0x1078] sm:$0xff]  ;;  %v1481_v40 = vld [vmem:[#allocation8 + $0x1070] sm:$0xff] }
 0x1c7   :  { %1270 = vmatpush2.msra.mxu1 %v1207_v41  ;;  %1424 = vmatpush2.msra.mxu0 %v1361_v42  ;;  %v7021_v41 = vld [vmem:[#allocation8 + $0xe0] sm:$0xff]  ;;  %v1480_v42 = vld [vmem:[#allocation8 + $0x1068] sm:$0xff] }
 0x1c8   :  { %1271 = vmatprep.subr.mxu1 %v1206_v44  ;;  %1425 = vmatprep.subr.mxu0 %v1360_v45  ;;  %v7022_v44 = vld [vmem:[#allocation8 + $0xd8] sm:$0xff]  ;;  %v1479_v45 = vld [vmem:[#allocation8 + $0x1060] sm:$0xff] }
 0x1c9   :  { %1272 = vmatpush2.msra.mxu1 %v1205_v47  ;;  %1426 = vmatpush2.msra.mxu0 %v1359_v48  ;;  %v7023_v47 = vld [vmem:[#allocation8 + $0xd0] sm:$0xff]  ;;  %v1478_v48 = vld [vmem:[#allocation8 + $0x1058] sm:$0xff] }
 0x1ca   :  { %1273 = vmatprep.subr.mxu1 %v1204_v49  ;;  %1427 = vmatprep.subr.mxu0 %v1358_v50  ;;  %v7024_v49 = vld [vmem:[#allocation8 + $0xc8] sm:$0xff]  ;;  %v1477_v50 = vld [vmem:[#allocation8 + $0x1050] sm:$0xff] }
 0x1cb   :  { %1274 = vmatpush2.msra.mxu1 %v1203_v51  ;;  %1428 = vmatpush2.msra.mxu0 %v1357_v52  ;;  %v1476_v51 = vld [vmem:[#allocation8 + $0x1048] sm:$0xff]  ;;  %v7026_v52 = vld [vmem:[#allocation8 + $0xb8] sm:$0xff] }
 0x1cc   :  { %1275 = vmatprep.subr.mxu1 %v1202_v53  ;;  %1429 = vmatprep.subr.mxu0 %v1356_v54  ;;  %v1475_v53 = vld [vmem:[#allocation8 + $0x1040] sm:$0xff]  ;;  %v7027_v54 = vld [vmem:[#allocation8 + $0xb0] sm:$0xff] }
 0x1cd   :  { %1276 = vmatpush2.msra.mxu1 %v1201_v55  ;;  %1430 = vmatpush2.msra.mxu0 %v1355_v56  ;;  %v1474_v55 = vld [vmem:[#allocation8 + $0x1038] sm:$0xff]  ;;  %v7028_v56 = vld [vmem:[#allocation8 + $0xa8] sm:$0xff] }
 0x1ce   :  { %1277 = vmatprep.subr.mxu1 %v1200_v57  ;;  %1431 = vmatprep.subr.mxu0 %v1354_v58  ;;  %v1473_v57 = vld [vmem:[#allocation8 + $0x1030] sm:$0xff]  ;;  %v7029_v58 = vld [vmem:[#allocation8 + $0xa0] sm:$0xff] }
 0x1cf   :  { %1278 = vmatpush2.msra.mxu1 %v1199_v59  ;;  %1432 = vmatpush2.msra.mxu0 %v1353_v60  ;;  %v1472_v59 = vld [vmem:[#allocation8 + $0x1028] sm:$0xff]  ;;  %v7030_v60 = vld [vmem:[#allocation8 + $0x98] sm:$0xff] }
 0x1d0   :  { %1279 = vmatprep.subr.mxu1 %v1198_v61  ;;  %1433 = vmatprep.subr.mxu0 %v1352_v62  ;;  %v1471_v61 = vld [vmem:[#allocation8 + $0x1020] sm:$0xff]  ;;  %v7031_v62 = vld [vmem:[#allocation8 + $0x90] sm:$0xff] }
 0x1d1   :  { %1280 = vmatpush2.msra.mxu1 %v1197_v63  ;;  %1434 = vmatpush2.msra.mxu0 %v1351_v0  ;;  %v1470_v63 = vld [vmem:[#allocation8 + $0x1018] sm:$0xff]  ;;  %v7032_v0 = vld [vmem:[#allocation8 + $0x88] sm:$0xff] }
 0x1d2   :  { %1281 = vmatprep.subr.mxu1 %v1196_v2  ;;  %1435 = vmatprep.subr.mxu0 %v1350_v4  ;;  %v1469_v2 = vld [vmem:[#allocation8 + $0x1010] sm:$0xff]  ;;  %v7033_v4 = vld [vmem:[#allocation8 + $0x80] sm:$0xff] }
 0x1d3   :  { %1282 = vmatpush2.msra.mxu1 %v1195_v6  ;;  %1436 = vmatpush2.msra.mxu0 %v1349_v7  ;;  %v1468_v6 = vld [vmem:[#allocation8 + $0x1008] sm:$0xff]  ;;  %v7034_v7 = vld [vmem:[#allocation8 + $0x78] sm:$0xff] }
 0x1d4   :  { %1283 = vmatprep.subr.mxu1 %v1194_v8  ;;  %1437 = vmatprep.subr.mxu0 %v1348_v9  ;;  %v1467_v8 = vld [vmem:[#allocation8 + $0x1000] sm:$0xff]  ;;  %v7035_v9 = vld [vmem:[#allocation8 + $0x70] sm:$0xff] }
 0x1d5   :  { %1284 = vmatpush2.msra.mxu1 %v1193_v10  ;;  %1438 = vmatpush2.msra.mxu0 %v1347_v11  ;;  %v1530_v10 = vld [vmem:[#allocation8 + $0x11f8] sm:$0xff]  ;;  %v7036_v11 = vld [vmem:[#allocation8 + $0x68] sm:$0xff] }
 0x1d6   :  { %1285 = vmatprep.subr.mxu1 %v1192_v12  ;;  %1439 = vmatprep.subr.mxu0 %v1346_v13  ;;  %v1529_v12 = vld [vmem:[#allocation8 + $0x11f0] sm:$0xff]  ;;  %v7037_v13 = vld [vmem:[#allocation8 + $0x60] sm:$0xff] }
 0x1d7   :  { %1286 = vmatpush2.msra.mxu1 %v1191_v14  ;;  %1440 = vmatpush2.msra.mxu0 %v1345_v15  ;;  %v1528_v14 = vld [vmem:[#allocation8 + $0x11e8] sm:$0xff]  ;;  %v7038_v15 = vld [vmem:[#allocation8 + $0x58] sm:$0xff] }
 0x1d8   :  { %1288 = vmatmul.mubr.f32.vlgmr.msra.gmra.mxu1 %v8543_v5  ;;  %1442 = vmatmul.mubr.f32.vlgmr.msra.gmra.mxu0 %v8543_v5 }
 0x1d9   :  { %1531 = vmatprep.subr.mxu1 %v1498_v16  ;;  %1293 = vmatprep.mubr.f32.mxu1 %v8549_v17  ;;  %v1527_v16 = vld [vmem:[#allocation8 + $0x11e0] sm:$0xff] }
 0x1da   :  { %1447 = vmatprep.mubr.f32.mxu0 %v8549_v17  ;;  %1532 = vmatpush1.msra.mxu1 %v1497_v18  ;;  %v7039_v18 = vld [vmem:[#allocation8 + $0x50] sm:$0xff] }
 0x1db   :  { %1533 = vmatprep.subr.mxu1 %v1496_v19  ;;  %2020 = vmatprep.subr.mxu0 %v7018_v23  ;;  %v1526_v19 = vld [vmem:[#allocation8 + $0x11d8] sm:$0xff]  ;;  %v7041_v23 = vld [vmem:[#allocation8 + $0x40] sm:$0xff] }
 0x1dc   :  { %1534 = vmatpush1.msra.mxu1 %v1495_v20  ;;  %1448 = vmatmul.mubr.f32.gmra.mxu0 %v8551_v22  ;;  %v7040_v20 = vld [vmem:[#allocation8 + $0x48] sm:$0xff] }
 0x1dd   :  { %1294 = vmatmul.mubr.f32.gmra.mxu1 %v8551_v22  ;;  %1535 = vmatprep.subr.mxu1 %v1494_v21  ;;  %v1525_v21 = vld [vmem:[#allocation8 + $0x11d0] sm:$0xff] }
 0x1de   :  { %1299 = vmatprep.mubr.f32.mxu1 %v8555_v29  ;;  %1453 = vmatprep.mubr.f32.mxu0 %v8555_v29 }
 0x1df   :  { %1536 = vmatpush1.msra.mxu1 %v1493_v24  ;;  %2021 = vmatpush1.msra.mxu0 %v7019_v28  ;;  %v1524_v24 = vld [vmem:[#allocation8 + $0x11c8] sm:$0xff]  ;;  %v1522_v28 = vld [vmem:[#allocation8 + $0x11b8] sm:$0xff] }
 0x1e0   :  { %1537 = vmatprep.subr.mxu1 %v1492_v25  ;;  %1454 = vmatmul.mubr.f32.gmra.mxu0 %v8559_v34  ;;  %v7042_v25 = vld [vmem:[#allocation8 + $0x38] sm:$0xff] }
 0x1e1   :  { %1538 = vmatpush1.msra.mxu1 %v1491_v26  ;;  %1459 = vmatprep.mubr.f32.mxu0 %v8563_v43  ;;  %v1523_v26 = vld [vmem:[#allocation8 + $0x11c0] sm:$0xff] }
 0x1e2   :  { %1300 = vmatmul.mubr.f32.gmra.mxu1 %v8559_v34  ;;  %1539 = vmatprep.subr.mxu1 %v1490_v27  ;;  %v7043_v27 = vld [vmem:[#allocation8 + $0x30] sm:$0xff] }
 0x1e3   :  { %1305 = vmatprep.mubr.f32.mxu1 %v8563_v43  ;;  %1540 = vmatpush1.msra.mxu1 %v1489_v30  ;;  %v7044_v30 = vld [vmem:[#allocation8 + $0x28] sm:$0xff] }
 0x1e4   :  { %1541 = vmatprep.subr.mxu1 %v1488_v31  ;;  %1460 = vmatmul.mubr.f32.gmra.mxu0 %v8567_v46  ;;  %v1521_v31 = vld [vmem:[#allocation8 + $0x11b0] sm:$0xff] }
 0x1e5   :  { %1542 = vmatpush1.msra.mxu1 %v1487_v32  ;;  %2022 = vmatprep.subr.mxu0 %v7020_v37  ;;  %v7045_v32 = vld [vmem:[#allocation8 + $0x20] sm:$0xff]  ;;  %v7047_v37 = vld [vmem:[#allocation8 + $0x10] sm:$0xff] }
 0x1e6   :  { %1306 = vmatmul.mubr.f32.gmra.mxu1 %v8567_v46  ;;  %1543 = vmatprep.subr.mxu1 %v1486_v33  ;;  %v1520_v33 = vld [vmem:[#allocation8 + $0x11a8] sm:$0xff] }
 0x1e7   :  { %1544 = vmatpush1.msra.mxu1 %v1485_v35  ;;  %1595 = vmatprep.mubr.f32.mxu1 %v8541_v3  ;;  %v7025_v3 = vld [vmem:[#allocation8 + $0xc0] sm:$0xff]  ;;  %v7046_v35 = vld [vmem:[#allocation8 + $0x18] sm:$0xff] }
 0x1e8   :  { %1545 = vmatprep.subr.mxu1 %v1484_v36  ;;  %2023 = vmatpush1.msra.mxu0 %v7021_v41  ;;  %v1519_v36 = vld [vmem:[#allocation8 + $0x11a0] sm:$0xff] }
 0x1e9   :  { %1546 = vmatpush1.msra.mxu1 %v1483_v38  ;;  %2024 = vmatprep.subr.mxu0 %v7022_v44  ;;  %v1518_v38 = vld [vmem:[#allocation8 + $0x1198] sm:$0xff]  ;;  %v7049_v41 = vld [vmem:[#allocation8] sm:$0xff] }
 0x1ea   :  { %1547 = vmatprep.subr.mxu1 %v1482_v39  ;;  %2025 = vmatpush1.msra.mxu0 %v7023_v47  ;;  %v7048_v39 = vld [vmem:[#allocation8 + $0x8] sm:$0xff]  ;;  %v7050_v44 = vld [vmem:[#allocation8 + $0x1f8] sm:$0xff]  ;;  %v7051_v47 = vld [vmem:[#allocation8 + $0x1f0] sm:$0xff] }
 0x1eb   :  { %1548 = vmatpush1.msra.mxu1 %v1481_v40  ;;  %2026 = vmatprep.subr.mxu0 %v7024_v49  ;;  %v1517_v40 = vld [vmem:[#allocation8 + $0x1190] sm:$0xff]  ;;  %v7052_v49 = vld [vmem:[#allocation8 + $0x1e8] sm:$0xff] }
 0x1ec   :  { %1549 = vmatprep.subr.mxu1 %v1480_v42  ;;  %2027 = vmatpush1.msra.mxu0 %v7025_v3  ;;  %v1516_v42 = vld [vmem:[#allocation8 + $0x1188] sm:$0xff]  ;;  %v7053_v3 = vld [vmem:[#allocation8 + $0x1e0] sm:$0xff] }
 0x1ed   :  { %1550 = vmatpush1.msra.mxu1 %v1479_v45  ;;  %2028 = vmatprep.subr.mxu0 %v7026_v52  ;;  %v1515_v45 = vld [vmem:[#allocation8 + $0x1180] sm:$0xff]  ;;  %v7054_v52 = vld [vmem:[#allocation8 + $0x1d8] sm:$0xff] }
 0x1ee   :  { %1551 = vmatprep.subr.mxu1 %v1478_v48  ;;  %2029 = vmatpush1.msra.mxu0 %v7027_v54  ;;  %v1514_v48 = vld [vmem:[#allocation8 + $0x1178] sm:$0xff]  ;;  %v7055_v54 = vld [vmem:[#allocation8 + $0x1d0] sm:$0xff] }
 0x1ef   :  { %1552 = vmatpush1.msra.mxu1 %v1477_v50  ;;  %2030 = vmatprep.subr.mxu0 %v7028_v56  ;;  %v1513_v50 = vld [vmem:[#allocation8 + $0x1170] sm:$0xff]  ;;  %v7056_v56 = vld [vmem:[#allocation8 + $0x1c8] sm:$0xff] }
 0x1f0   :  { %1553 = vmatprep.subr.mxu1 %v1476_v51  ;;  %2031 = vmatpush1.msra.mxu0 %v7029_v58  ;;  %v1512_v51 = vld [vmem:[#allocation8 + $0x1168] sm:$0xff]  ;;  %v7057_v58 = vld [vmem:[#allocation8 + $0x1c0] sm:$0xff] }
 0x1f1   :  { %1554 = vmatpush1.msra.mxu1 %v1475_v53  ;;  %2032 = vmatprep.subr.mxu0 %v7030_v60  ;;  %v1511_v53 = vld [vmem:[#allocation8 + $0x1160] sm:$0xff]  ;;  %v7058_v60 = vld [vmem:[#allocation8 + $0x1b8] sm:$0xff] }
 0x1f2   :  { %1555 = vmatprep.subr.mxu1 %v1474_v55  ;;  %2033 = vmatpush1.msra.mxu0 %v7031_v62  ;;  %v1510_v55 = vld [vmem:[#allocation8 + $0x1158] sm:$0xff]  ;;  %v7059_v62 = vld [vmem:[#allocation8 + $0x1b0] sm:$0xff] }
 0x1f3   :  { %1556 = vmatpush1.msra.mxu1 %v1473_v57  ;;  %2034 = vmatprep.subr.mxu0 %v7032_v0  ;;  %v1509_v57 = vld [vmem:[#allocation8 + $0x1150] sm:$0xff]  ;;  %v7060_v0 = vld [vmem:[#allocation8 + $0x1a8] sm:$0xff] }
 0x1f4   :  { %1557 = vmatprep.subr.mxu1 %v1472_v59  ;;  %2035 = vmatpush1.msra.mxu0 %v7033_v4  ;;  %v1508_v59 = vld [vmem:[#allocation8 + $0x1148] sm:$0xff]  ;;  %v7061_v4 = vld [vmem:[#allocation8 + $0x1a0] sm:$0xff] }
 0x1f5   :  { %1558 = vmatpush1.msra.mxu1 %v1471_v61  ;;  %2036 = vmatprep.subr.mxu0 %v7034_v7  ;;  %v1507_v61 = vld [vmem:[#allocation8 + $0x1140] sm:$0xff]  ;;  %v7062_v7 = vld [vmem:[#allocation8 + $0x198] sm:$0xff] }
 0x1f6   :  { %1559 = vmatprep.subr.mxu1 %v1470_v63  ;;  %2037 = vmatpush1.msra.mxu0 %v7035_v9  ;;  %v1506_v63 = vld [vmem:[#allocation8 + $0x1138] sm:$0xff]  ;;  %v7063_v9 = vld [vmem:[#allocation8 + $0x190] sm:$0xff] }
 0x1f7   :  { %1560 = vmatpush1.msra.mxu1 %v1469_v2  ;;  %2038 = vmatprep.subr.mxu0 %v7036_v11  ;;  %v1505_v2 = vld [vmem:[#allocation8 + $0x1130] sm:$0xff]  ;;  %v7064_v11 = vld [vmem:[#allocation8 + $0x188] sm:$0xff] }
 0x1f8   :  { %1561 = vmatprep.subr.mxu1 %v1468_v6  ;;  %2039 = vmatpush1.msra.mxu0 %v7037_v13  ;;  %v1504_v6 = vld [vmem:[#allocation8 + $0x1128] sm:$0xff]  ;;  %v7065_v13 = vld [vmem:[#allocation8 + $0x180] sm:$0xff] }
 0x1f9   :  { %1562 = vmatpush1.msra.mxu1 %v1467_v8  ;;  %2040 = vmatprep.subr.mxu0 %v7038_v15  ;;  %v1503_v8 = vld [vmem:[#allocation8 + $0x1120] sm:$0xff]  ;;  %v7066_v15 = vld [vmem:[#allocation8 + $0x178] sm:$0xff] }
 0x1fa   :  { %1563 = vmatprep.subr.mxu1 %v1530_v10  ;;  %2041 = vmatpush1.msra.mxu0 %v7039_v18  ;;  %v1502_v10 = vld [vmem:[#allocation8 + $0x1118] sm:$0xff]  ;;  %v7067_v18 = vld [vmem:[#allocation8 + $0x170] sm:$0xff] }
 0x1fb   :  { %1564 = vmatpush2.msra.mxu1 %v1529_v12  ;;  %2042 = vmatprep.subr.mxu0 %v7040_v20  ;;  %v1501_v12 = vld [vmem:[#allocation8 + $0x1110] sm:$0xff]  ;;  %v7069_v20 = vld [vmem:[#allocation8 + $0x160] sm:$0xff] }
 0x1fc   :  { %1565 = vmatprep.subr.mxu1 %v1528_v14  ;;  %2043 = vmatpush1.msra.mxu0 %v7041_v23  ;;  %v1500_v14 = vld [vmem:[#allocation8 + $0x1108] sm:$0xff]  ;;  %v7071_v23 = vld [vmem:[#allocation8 + $0x2f8] sm:$0xff] }
 0x1fd   :  { %1566 = vmatpush2.msra.mxu1 %v1527_v16  ;;  %2044 = vmatprep.subr.mxu0 %v7042_v25  ;;  %v1499_v16 = vld [vmem:[#allocation8 + $0x1100] sm:$0xff]  ;;  %v7073_v25 = vld [vmem:[#allocation8 + $0x2e8] sm:$0xff] }
 0x1fe   :  { %1567 = vmatprep.subr.mxu1 %v1526_v19  ;;  %2045 = vmatpush1.msra.mxu0 %v7043_v27  ;;  %v7068_v19 = vld [vmem:[#allocation8 + $0x168] sm:$0xff]  ;;  %v7075_v27 = vld [vmem:[#allocation8 + $0x2e0] sm:$0xff] }
 0x1ff   :  { %1568 = vmatpush2.msra.mxu1 %v1525_v21  ;;  %2046 = vmatprep.subr.mxu0 %v7044_v30  ;;  %v7070_v21 = vld [vmem:[#allocation8 + $0x158] sm:$0xff] }
 0x200   :  { %1569 = vmatprep.subr.mxu1 %v1524_v24  ;;  %2047 = vmatpush1.msra.mxu0 %v7045_v32  ;;  %v7072_v24 = vld [vmem:[#allocation8 + $0x2f0] sm:$0xff]  ;;  %v7077_v30 = vld [vmem:[#allocation8 + $0x2d8] sm:$0xff]  ;;  %v7081_v32 = vld [vmem:[#allocation8 + $0x2c0] sm:$0xff] }
 0x201   :  { %1570 = vmatpush2.msra.mxu1 %v1523_v26  ;;  %2048 = vmatprep.subr.mxu0 %v7046_v35  ;;  %v7074_v26 = vld [vmem:[#allocation8 + $0x150] sm:$0xff]  ;;  %v7083_v35 = vld [vmem:[#allocation8 + $0x2b8] sm:$0xff] }
 0x202   :  { %1571 = vmatprep.subr.mxu1 %v1522_v28  ;;  %2049 = vmatpush1.msra.mxu0 %v7047_v37  ;;  %v7076_v28 = vld [vmem:[#allocation8 + $0x148] sm:$0xff]  ;;  %v7087_v37 = vld [vmem:[#allocation8 + $0x2a0] sm:$0xff] }
 0x203   :  { %1572 = vmatpush2.msra.mxu1 %v1521_v31  ;;  %2050 = vmatprep.subr.mxu0 %v7048_v39  ;;  %v7079_v31 = vld [vmem:[#allocation8 + $0x2c8] sm:$0xff]  ;;  %v7089_v39 = vld [vmem:[#allocation8 + $0x298] sm:$0xff] }
 0x204   :  { %1573 = vmatprep.subr.mxu1 %v1520_v33  ;;  %2051 = vmatpush1.msra.mxu0 %v7049_v41  ;;  %v7082_v33 = vld [vmem:[#allocation8 + $0x138] sm:$0xff]  ;;  %v7092_v41 = vld [vmem:[#allocation8 + $0x288] sm:$0xff] }
 0x205   :  { %1574 = vmatpush2.msra.mxu1 %v1519_v36  ;;  %2052 = vmatprep.subr.mxu0 %v7050_v44  ;;  %v7085_v36 = vld [vmem:[#allocation8 + $0x2a8] sm:$0xff]  ;;  %v7095_v44 = vld [vmem:[#allocation8 + $0x110] sm:$0xff] }
 0x206   :  { %1575 = vmatprep.subr.mxu1 %v1518_v38  ;;  %2053 = vmatpush2.msra.mxu0 %v7051_v47  ;;  %v7088_v38 = vld [vmem:[#allocation8 + $0x128] sm:$0xff] }
 0x207   :  { %1576 = vmatpush2.msra.mxu1 %v1517_v40  ;;  %2054 = vmatprep.subr.mxu0 %v7052_v49  ;;  %v7090_v40 = vld [vmem:[#allocation8 + $0x290] sm:$0xff]  ;;  %v7097_v47 = vld [vmem:[#allocation8 + $0x108] sm:$0xff] }
 0x208   :  { %1577 = vmatprep.subr.mxu1 %v1516_v42  ;;  %2055 = vmatpush2.msra.mxu0 %v7053_v3  ;;  %v7094_v42 = vld [vmem:[#allocation8 + $0x280] sm:$0xff]  ;;  %v7100_v49 = vld [vmem:[#allocation8 + $0x268] sm:$0xff] }
 0x209   :  { %1578 = vmatpush2.msra.mxu1 %v1515_v45  ;;  %2056 = vmatprep.subr.mxu0 %v7054_v52  ;;  %v7096_v45 = vld [vmem:[#allocation8 + $0x278] sm:$0xff]  ;;  %v7102_v3 = vld [vmem:[#allocation8 + $0x260] sm:$0xff]  ;;  %v7104_v52 = vld [vmem:[#allocation8 + $0x250] sm:$0xff] }
 0x20a   :  { %1579 = vmatprep.subr.mxu1 %v1514_v48  ;;  %2057 = vmatpush2.msra.mxu0 %v7055_v54  ;;  %v7098_v48 = vld [vmem:[#allocation8 + $0x270] sm:$0xff]  ;;  %v7106_v54 = vld [vmem:[#allocation8 + $0x240] sm:$0xff] }
 0x20b   :  { %1580 = vmatpush2.msra.mxu1 %v1513_v50  ;;  %2058 = vmatprep.subr.mxu0 %v7056_v56  ;;  %v7101_v50 = vld [vmem:[#allocation8 + $0x4f8] sm:$0xff]  ;;  %v7108_v56 = vld [vmem:[#allocation8 + $0x230] sm:$0xff] }
 0x20c   :  { %1581 = vmatprep.subr.mxu1 %v1512_v51  ;;  %2059 = vmatpush2.msra.mxu0 %v7057_v58  ;;  %v7103_v51 = vld [vmem:[#allocation8 + $0x258] sm:$0xff]  ;;  %v7110_v58 = vld [vmem:[#allocation8 + $0x220] sm:$0xff] }
 0x20d   :  { %1582 = vmatpush2.msra.mxu1 %v1511_v53  ;;  %2060 = vmatprep.subr.mxu0 %v7058_v60  ;;  %v7105_v53 = vld [vmem:[#allocation8 + $0x248] sm:$0xff]  ;;  %v7112_v60 = vld [vmem:[#allocation8 + $0x210] sm:$0xff] }
 0x20e   :  { %1583 = vmatprep.subr.mxu1 %v1510_v55  ;;  %2061 = vmatpush2.msra.mxu0 %v7059_v62  ;;  %v7107_v55 = vld [vmem:[#allocation8 + $0x238] sm:$0xff]  ;;  %v7114_v62 = vld [vmem:[#allocation8 + $0x200] sm:$0xff] }
 0x20f   :  { %1584 = vmatpush2.msra.mxu1 %v1509_v57  ;;  %2062 = vmatprep.subr.mxu0 %v7060_v0  ;;  %v7109_v57 = vld [vmem:[#allocation8 + $0x228] sm:$0xff]  ;;  %v7116_v0 = vld [vmem:[#allocation8 + $0x3f0] sm:$0xff] }
 0x210   :  { %1585 = vmatprep.subr.mxu1 %v1508_v59  ;;  %2063 = vmatpush2.msra.mxu0 %v7061_v4  ;;  %v7111_v59 = vld [vmem:[#allocation8 + $0x218] sm:$0xff]  ;;  %v7118_v4 = vld [vmem:[#allocation8 + $0x3e0] sm:$0xff] }
 0x211   :  { %1586 = vmatpush2.msra.mxu1 %v1507_v61  ;;  %2064 = vmatprep.subr.mxu0 %v7062_v7  ;;  %v7113_v61 = vld [vmem:[#allocation8 + $0x208] sm:$0xff]  ;;  %v7120_v7 = vld [vmem:[#allocation8 + $0x3d0] sm:$0xff] }
 0x212   :  { %1587 = vmatprep.subr.mxu1 %v1506_v63  ;;  %2065 = vmatpush2.msra.mxu0 %v7063_v9  ;;  %v7115_v63 = vld [vmem:[#allocation8 + $0x3f8] sm:$0xff]  ;;  %v7122_v9 = vld [vmem:[#allocation8 + $0x3c0] sm:$0xff] }
 0x213   :  { %1588 = vmatpush2.msra.mxu1 %v1505_v2  ;;  %2066 = vmatprep.subr.mxu0 %v7064_v11  ;;  %v7117_v2 = vld [vmem:[#allocation8 + $0x3e8] sm:$0xff]  ;;  %v7124_v11 = vld [vmem:[#allocation8 + $0x3b0] sm:$0xff] }
 0x214   :  { %1589 = vmatprep.subr.mxu1 %v1504_v6  ;;  %2067 = vmatpush2.msra.mxu0 %v7065_v13  ;;  %v7119_v6 = vld [vmem:[#allocation8 + $0x3d8] sm:$0xff]  ;;  %v7126_v13 = vld [vmem:[#allocation8 + $0x3a0] sm:$0xff] }
 0x215   :  { %1590 = vmatpush2.msra.mxu1 %v1503_v8  ;;  %2068 = vmatprep.subr.mxu0 %v7066_v15  ;;  %v7121_v8 = vld [vmem:[#allocation8 + $0x3c8] sm:$0xff]  ;;  %v7128_v15 = vld [vmem:[#allocation8 + $0x390] sm:$0xff] }
 0x216   :  { %1591 = vmatprep.subr.mxu1 %v1502_v10  ;;  %2069 = vmatpush2.msra.mxu0 %v7067_v18  ;;  %v7123_v10 = vld [vmem:[#allocation8 + $0x3b8] sm:$0xff]  ;;  %v7130_v18 = vld [vmem:[#allocation8 + $0x380] sm:$0xff] }
 0x217   :  { %1592 = vmatpush2.msra.mxu1 %v1501_v12  ;;  %2070 = vmatprep.subr.mxu0 %v7068_v19  ;;  %v7125_v12 = vld [vmem:[#allocation8 + $0x3a8] sm:$0xff]  ;;  %v7131_v19 = vld [vmem:[#allocation8 + $0x378] sm:$0xff] }
 0x218   :  { %1593 = vmatprep.subr.mxu1 %v1500_v14  ;;  %2071 = vmatpush2.msra.mxu0 %v7069_v20  ;;  %v7127_v14 = vld [vmem:[#allocation8 + $0x398] sm:$0xff]  ;;  %v7132_v20 = vld [vmem:[#allocation8 + $0x370] sm:$0xff] }
 0x219   :  { %1594 = vmatpush2.msra.mxu1 %v1499_v16  ;;  %2072 = vmatprep.subr.mxu0 %v7070_v21  ;;  %v7129_v16 = vld [vmem:[#allocation8 + $0x388] sm:$0xff] }
 0x21a   :  { %1596 = vmatmul.mubr.f32.vlgmr.msra.gmra.mxu1 %v8543_v5  ;;  %2109 = vmatprep.subr.mxu1 %v7071_v23  ;;  %v7078_v5 = vld [vmem:[#allocation8 + $0x2d0] sm:$0xff]  ;;  %v7133_v21 = vld [vmem:[#allocation8 + $0x368] sm:$0xff]  ;;  %v7134_v23 = vld [vmem:[#allocation8 + $0x360] sm:$0xff] }
 0x21b   :  { %1601 = vmatprep.mubr.f32.mxu1 %v8549_v17  ;;  %2110 = vmatpush1.msra.mxu1 %v7072_v24  ;;  %v7080_v17 = vld [vmem:[#allocation8 + $0x140] sm:$0xff]  ;;  %v7135_v24 = vld [vmem:[#allocation8 + $0x358] sm:$0xff] }
 0x21c   :  { %2111 = vmatprep.subr.mxu1 %v7073_v25  ;;  %2073 = vmatpush2.msra.mxu0 %v7074_v26  ;;  %v7136_v25 = vld [vmem:[#allocation8 + $0x350] sm:$0xff]  ;;  %v7137_v26 = vld [vmem:[#allocation8 + $0x348] sm:$0xff] }
 0x21d   :  { %2112 = vmatpush1.msra.mxu1 %v7075_v27  ;;  %2074 = vmatprep.subr.mxu0 %v7076_v28  ;;  %v7138_v27 = vld [vmem:[#allocation8 + $0x340] sm:$0xff]  ;;  %v7139_v28 = vld [vmem:[#allocation8 + $0x338] sm:$0xff] }
 0x21e   :  { %1602 = vmatmul.mubr.f32.gmra.mxu1 %v8551_v22  ;;  %2113 = vmatprep.subr.mxu1 %v7077_v30  ;;  %v7084_v22 = vld [vmem:[#allocation8 + $0x2b0] sm:$0xff] }
 0x21f   :  { %1607 = vmatprep.mubr.f32.mxu1 %v8555_v29  ;;  %2114 = vmatpush1.msra.mxu1 %v7078_v5  ;;  %v7086_v29 = vld [vmem:[#allocation8 + $0x130] sm:$0xff]  ;;  %v7141_v5 = vld [vmem:[#allocation8 + $0x328] sm:$0xff] }
 0x220   :  { %2115 = vmatprep.subr.mxu1 %v7079_v31  ;;  %2075 = vmatpush2.msra.mxu0 %v7080_v17  ;;  %v7140_v30 = vld [vmem:[#allocation8 + $0x330] sm:$0xff]  ;;  %v7142_v31 = vld [vmem:[#allocation8 + $0x320] sm:$0xff]  ;;  %v7143_v17 = vld [vmem:[#allocation8 + $0x318] sm:$0xff] }
 0x221   :  { %2116 = vmatpush1.msra.mxu1 %v7081_v32  ;;  %2076 = vmatprep.subr.mxu0 %v7082_v33  ;;  %v7144_v32 = vld [vmem:[#allocation8 + $0x310] sm:$0xff]  ;;  %v7145_v33 = vld [vmem:[#allocation8 + $0x308] sm:$0xff] }
 0x222   :  { %1608 = vmatmul.mubr.f32.gmra.mxu1 %v8559_v34  ;;  %2117 = vmatprep.subr.mxu1 %v7083_v35  ;;  %v7091_v34 = vld [vmem:[#allocation8 + $0x120] sm:$0xff] }
 0x223   :  { %1613 = vmatprep.mubr.f32.mxu1 %v8563_v43  ;;  %2118 = vmatpush1.msra.mxu1 %v7084_v22  ;;  %v7093_v43 = vld [vmem:[#allocation8 + $0x118] sm:$0xff]  ;;  %v7146_v35 = vld [vmem:[#allocation8 + $0x300] sm:$0xff] }
 0x224   :  { %2119 = vmatprep.subr.mxu1 %v7085_v36  ;;  %2077 = vmatpush2.msra.mxu0 %v7086_v29  ;;  %v7147_v22 = vld [vmem:[#allocation8 + $0x6f8] sm:$0xff]  ;;  %v8629_v36 = vpop.f32.mrf.mxu1 }
 0x225   :  { %2120 = vmatpush1.msra.mxu1 %v7087_v37  ;;  %2078 = vmatprep.subr.mxu0 %v7088_v38  ;;  %v8635_v38 = vpop.f32.mrf.mxu0 }
 0x226   :  { %1614 = vmatmul.mubr.f32.gmra.mxu1 %v8567_v46  ;;  %2121 = vmatprep.subr.mxu1 %v7089_v39  ;;  %v7099_v46 = vld [vmem:[#allocation8 + $0x100] sm:$0xff]  ;;  %v8631_v29 = vpop.f32.mrf.mxu1 }
 0x227   :  { %2122 = vmatpush1.msra.mxu1 %v7090_v40  ;;  %2079 = vmatpush2.msra.mxu0 %v7091_v34  ;;  %v8639_v40 = vpop.f32.mrf.mxu0 }
 0x228   :  { %2123 = vmatprep.subr.mxu1 %v7092_v41  ;;  %2080 = vmatprep.subr.mxu0 %v7093_v43  ;;  %v8633_v37 = vpop.f32.mrf.mxu1  ;;  %v8643_v41 = vpop.permute.xlu0 %1626 }
 0x229   :  { %2124 = vmatpush1.msra.mxu1 %v7094_v42  ;;  %2081 = vmatpush2.msra.mxu0 %v7095_v44  ;;  %v8645_v43 = vpop.f32.mrf.mxu0 }
 0x22a   :  { %2125 = vmatprep.subr.mxu1 %v7096_v45  ;;  %2082 = vmatprep.subr.mxu0 %v7097_v47  ;;  %v8637_v39 = vpop.f32.mrf.mxu1 }
 0x22b   :  { %2126 = vmatpush1.msra.mxu1 %v7098_v48  ;;  %2083 = vmatpush2.msra.mxu0 %v7099_v46  ;;  %v8649_v44 = vpop.f32.mrf.mxu0  ;;  %v8655_v48 = vpop.permute.xlu1 %1659 }
 0x22c   :  { %2127 = vmatprep.subr.mxu1 %v7100_v49  ;;  %2198 = vmatprep.subr.mxu0 %v7101_v50  ;;  %v8641_v34 = vpop.f32.mrf.mxu1  ;;  %v8653_v47 = vpop.permute.xlu0 %1700 }
 0x22d   :  { %2128 = vmatpush1.msra.mxu1 %v7102_v3  ;;  %v8657_v46 = vpop.f32.mrf.mxu0 }
 0x22e   :  { %2129 = vmatprep.subr.mxu1 %v7103_v51  ;;  %v8647_v42 = vpop.f32.mrf.mxu1 }
 0x22f   :  { %2130 = vmatpush1.msra.mxu1 %v7104_v52  ;;  %v8665_v51 = vpop.permute.xlu1 %1741  ;;  %v8667_v52 = vpop.f32.mrf.mxu0 }
 0x230   :  { %2131 = vmatprep.subr.mxu1 %v7105_v53  ;;  %v8651_v45 = vpop.f32.mrf.mxu1  ;;  %v8663_v3 = vpop.permute.xlu0 %1782 }
 0x231   :  { %2132 = vmatpush1.msra.mxu1 %v7106_v54  ;;  %v8671_v54 = vpop.f32.mrf.mxu0 }
 0x232   :  { %2133 = vmatprep.subr.mxu1 %v7107_v55  ;;  %v8659_v49 = vpop.f32.mrf.mxu1 }
 0x233   :  { %2134 = vmatpush1.msra.mxu1 %v7108_v56  ;;  %v8675_v56 = vpop.permute.xlu1 %1823 }
 0x234   :  { %2135 = vmatprep.subr.mxu1 %v7109_v57  ;;  %v8661_v50 = vpop.f32.mrf.mxu1  ;;  %v8673_v55 = vpop.permute.xlu0 %1864 }
 0x235   :  { %2136 = vmatpush1.msra.mxu1 %v7110_v58  ;;  %9983 = vst [vmem:[#allocation15_spill] sm:$0xff] %v8673_v55  ;;  %v8679_v58 = vpop.f32.mrf.mxu0 }
 0x236   :  { %2137 = vmatprep.subr.mxu1 %v7111_v59  ;;  %v8669_v53 = vpop.f32.mrf.mxu1 }
 0x237   :  { %2138 = vmatpush1.msra.mxu1 %v7112_v60  ;;  %v8681_v59 = vpop.f32.mrf.mxu0 }
 0x238   :  { %2139 = vmatprep.subr.mxu1 %v7113_v61  ;;  %v8677_v57 = vpop.f32.mrf.mxu1  ;;  %v8685_v61 = vpop.permute.xlu0 %1946 }
 0x239   :  { %2140 = vmatpush1.msra.mxu1 %v7114_v62  ;;  %9984 = vst [vmem:[#allocation16_spill] sm:$0xff] %v8685_v61  ;;  %v8687_v62 = vpop.permute.xlu1 %1905 }
 0x23a   :  { %2141 = vmatprep.subr.mxu1 %v7115_v63  ;;  %v8683_v60 = vpop.f32.mrf.mxu1  ;;  %9985 = vst [vmem:[#allocation17_spill] sm:$0xff] %v8687_v62  ;;  %v8689_v63 = vpop.f32.mrf.mxu0 }
 0x23b   :  { %2142 = vmatpush2.msra.mxu1 %v7116_v0 }
 0x23c   :  { %2143 = vmatprep.subr.mxu1 %v7117_v2  ;;  %v8691_v0 = vpop.f32.mrf.mxu1  ;;  %v1632_v2 = vpop.permute.xlu0 %1631 }
 0x23d   :  { %2144 = vmatpush2.msra.mxu1 %v7118_v4  ;;  %v8693_v4 = vpop.permute.xlu1 %1986 }
 0x23e   :  { %2145 = vmatprep.subr.mxu1 %v7119_v6  ;;  %9986 = vst [vmem:[#allocation18_spill] sm:$0xff] %v8693_v4  ;;  %v8695_v6 = vpop.f32.mrf.mxu0 }
 0x23f   :  { %2146 = vmatpush2.msra.mxu1 %v7120_v7  ;;  %v8697_v7 = vpop.f32.mrf.mxu1 }
 0x240   :  { %2147 = vmatprep.subr.mxu1 %v7121_v8  ;;  %v8699_v8 = vpop.f32.mrf.mxu0 }
 0x241   :  { %2148 = vmatpush2.msra.mxu1 %v7122_v9  ;;  %v8701_v9 = vpop.f32.mrf.mxu1 }
 0x242   :  { %2149 = vmatprep.subr.mxu1 %v7123_v10  ;;  %v1706_v10 = vpop.permute.xlu0 %1705 }
 0x243   :  { %2150 = vmatpush2.msra.mxu1 %v7124_v11  ;;  %v1665_v11 = vpop.permute.xlu1 %1664 }
 0x244   :  { %2151 = vmatprep.subr.mxu1 %v7125_v12  ;;  %v8703_v12 = vpop.f32.mrf.mxu0 }
 0x245   :  { %2152 = vmatpush2.msra.mxu1 %v7126_v13  ;;  %v8705_v13 = vpop.f32.mrf.mxu1 }
 0x246   :  { %2153 = vmatprep.subr.mxu1 %v7127_v14 }
 0x247   :  { %2154 = vmatpush2.msra.mxu1 %v7128_v15  ;;  %v1670_v15 = vpop.permute.xlu0 %1669 }
 0x248   :  { %2155 = vmatprep.subr.mxu1 %v7129_v16  ;;  %v1637_v16 = vpop.permute.xlu1 %1636 }
 0x249   :  { %2156 = vmatpush2.msra.mxu1 %v7130_v18  ;;  %v8709_v18 = vpop.f32.mrf.mxu0 }
 0x24a   :  { %2157 = vmatprep.subr.mxu1 %v7131_v19 }
 0x24b   :  { %2158 = vmatpush2.msra.mxu1 %v7132_v20  ;;  %v8713_v20 = vpop.f32.mrf.mxu0 }
 0x24c   :  { %2159 = vmatprep.subr.mxu1 %v7133_v21  ;;  %9987 = vst [vmem:[#allocation19_spill] sm:$0xff] %v8713_v20  ;;  %v8715_v21 = vpop.permute.xlu0 %1710 }
 0x24d   :  { %2160 = vmatpush2.msra.mxu1 %v7134_v23  ;;  %v8717_v23 = vpop.permute.xlu1 %1746 }
 0x24e   :  { %2161 = vmatprep.subr.mxu1 %v7135_v24 }
 0x24f   :  { %2162 = vmatpush2.msra.mxu1 %v7136_v25  ;;  %v8721_v25 = vpop.f32.mrf.mxu0 }
 0x250   :  { %2163 = vmatprep.subr.mxu1 %v7137_v26  ;;  %v8707_v14 = vpop.f32.mrf.mxu1  ;;  %9988 = vst [vmem:[#allocation20_spill] sm:$0xff] %v8721_v25 }
 0x251   :  { %2164 = vmatpush2.msra.mxu1 %v7138_v27  ;;  %v8723_v26 = vpop.f32.mrf.mxu0 }
 0x252   :  { %2165 = vmatprep.subr.mxu1 %v7139_v28  ;;  %v8711_v19 = vpop.f32.mrf.mxu1  ;;  %v1642_v28 = vpop.permute.xlu0 %1641 }
 0x253   :  { %2166 = vmatpush2.msra.mxu1 %v7140_v30  ;;  %v8727_v30 = vpop.permute.xlu1 %1787 }
 0x254   :  { %2167 = vmatprep.subr.mxu1 %v7141_v5  ;;  %v8729_v5 = vpop.f32.mrf.mxu0 }
 0x255   :  { %2168 = vmatpush2.msra.mxu1 %v7142_v31  ;;  %9989 = vst [vmem:[#allocation21_spill] sm:$0xff] %v8729_v5 }
 0x256   :  { %2169 = vmatprep.subr.mxu1 %v7143_v17  ;;  %v8719_v24 = vpop.f32.mrf.mxu1  ;;  %v8733_v17 = vpop.permute.xlu0 %1751 }
 0x257   :  { %2170 = vmatpush2.msra.mxu1 %v7144_v32  ;;  %v1675_v32 = vpop.permute.xlu1 %1674 }
 0x258   :  { %2171 = vmatprep.subr.mxu1 %v7145_v33  ;;  %v8725_v27 = vpop.f32.mrf.mxu1  ;;  %v8735_v33 = vpop.f32.mrf.mxu0 }
 0x259   :  { %2172 = vmatpush2.msra.mxu1 %v7146_v35  ;;  %9991 = vst [vmem:[#allocation23_spill] sm:$0xff] %v8735_v33 }
 0x25a   :  { %2287 = vmatprep.subr.mxu1 %v7147_v22  ;;  %v8739_v22 = vpop.f32.mrf.mxu0  ;;  %v8743_v4 = vpop.permute.xlu0 %1715 }
 0x25b   :  { %9993 = vst [vmem:[#allocation25_spill] sm:$0xff] %v8739_v22  ;;  %v8745_v61 = vpop.permute.xlu1 %1828 }
 0x25c   :  { %v8731_v31 = vpop.f32.mrf.mxu1  ;;  %9995 = vst [vmem:[#allocation27_spill] sm:$0xff] %v8745_v61  ;;  %v8747_v62 = vpop.f32.mrf.mxu0 }
 0x25d   :  { %9990 = vst [vmem:[#allocation22_spill] sm:$0xff] %v8731_v31  ;;  %9996 = vst [vmem:[#allocation28_spill] sm:$0xff] %v8747_v62  ;;  %v1677_v62 = vmul.f32 %v8655_v48, %v8635_v38  ;;  %v1681_v38 = vmul.f32 %v1670_v15, %v8657_v46  ;;  %v1682_v46 = vmul.f32 %v1670_v15, %v8667_v52 }
 0x25e   :  { %v8737_v35 = vpop.f32.mrf.mxu1  ;;  %v8753_v31 = vpop.permute.xlu0 %1869 }
 0x25f   :  { %9992 = vst [vmem:[#allocation24_spill] sm:$0xff] %v8737_v35  ;;  %9998 = vst [vmem:[#allocation30_spill] sm:$0xff] %v8753_v31  ;;  %v8755_v20 = vpop.permute.xlu1 %1792  ;;  %v8757_v33 = vpop.f32.mrf.mxu0  ;;  %v1645_v31 = vmul.f32 %v8643_v41, %v8631_v29  ;;  %v1718_v29 = vmul.f32 %v8653_v47, %v8661_v50  ;;  %v1721_v50 = vmul.f32 %v1706_v10, %v8683_v60 }
 0x260   :  { %9999 = vst [vmem:[#allocation31_spill] sm:$0xff] %v8755_v20  ;;  %10000 = vst [vmem:[#allocation32_spill] sm:$0xff] %v8757_v33  ;;  %v1678_v33 = vmul.f32 %v8655_v48, %v8639_v40  ;;  %v1719_v40 = vmul.f32 %v8653_v47, %v8669_v53  ;;  %v1650_v47 = vmul.f32 %v1642_v28, %v8651_v45 }
 0x261   :  { %v1683_v53 = vmul.f32 %v1675_v32, %v8671_v54  ;;  %v1759_v45 = vmul.f32 %v8665_v51, %v8681_v59  ;;  %v1762_v59 = vmul.f32 %v8717_v23, %v8699_v8  ;;  %v1725_v8 = vmul.f32 %v8743_v4, %v8705_v13  ;;  %v10010_v13 = vld [vmem:[#allocation19_spill] sm:$0xff] }
 0x262   :  { %v8741_v1 = vpop.f32.mrf.mxu1  ;;  %v8761_v22 = vpop.f32.mrf.mxu0 }
 0x263   :  { %9994 = vst [vmem:[#allocation26_spill] sm:$0xff] %v8741_v1  ;;  %10002 = vst [vmem:[#allocation34_spill] sm:$0xff] %v8761_v22  ;;  %v8763_v1 = vpop.permute.xlu0 %1833  ;;  %v8765_v55 = vpop.permute.xlu1 %1756  ;;  %v1646_v22 = vmul.f32 %v1632_v2, %v8633_v37  ;;  %v1720_v37 = vmul.f32 %v1706_v10, %v8677_v57  ;;  %v1761_v10 = vmul.f32 %v8717_v23, %v8695_v6 }
 0x264   :  { %v8749_v25 = vpop.f32.mrf.mxu1  ;;  %10003 = vst [vmem:[#allocation35_spill] sm:$0xff] %v8763_v1  ;;  %v1679_v1 = vmul.f32 %v1665_v11, %v8645_v43  ;;  %v8780_v20 = vpop.f32.mrf.mxu0 }
 0x265   :  { %9997 = vst [vmem:[#allocation29_spill] sm:$0xff] %v8749_v25  ;;  %v1644_v25 = vmul.f32 %v8643_v41, %v8629_v36  ;;  %10005 = vst [vmem:[#allocation37_spill] sm:$0xff] %v8780_v20  ;;  %v1648_v36 = vmul.f32 %v1637_v16, %v8641_v34  ;;  %v1649_v34 = vmul.f32 %v1637_v16, %v8647_v42 }
 0x266   :  { %v1722_v42 = vmul.f32 %v8715_v21, %v8691_v0  ;;  %v1723_v0 = vmul.f32 %v8715_v21, %v8697_v7 }
 0x267   :  { %v8796_v48 = vpop.permute.xlu1 %1910  ;;  %v1689_v20 = vadd.f32 %v1681_v38, %v1648_v36  ;;  %v1841_v36 = vmul.f32 %v8675_v56, %v8723_v26 }
 0x268   :  { %10008 = vst [vmem:[#allocation40_spill] sm:$0xff] %v8796_v48  ;;  %v1684_v48 = vmul.f32 %v1675_v32, %v8679_v58  ;;  %v1760_v58 = vmul.f32 %v8665_v51, %v8689_v63  ;;  %v1801_v51 = vmul.f32 %v8663_v3, %v8711_v19  ;;  %v1803_v19 = vmul.f32 %v8727_v30, %v8725_v27 }
 0x269   :  { %v1730_v32 = vadd.f32 %v1722_v42, %v1689_v20  ;;  %v10017_v42 = vld [vmem:[#allocation23_spill] sm:$0xff] }
 0x26b   :  { %v8823_v16 = vpop.permute.xlu1 %1874 }
 0x26f   :  { %v1839_v26 = vpop.permute.xlu1 %1838 }
 0x298   :  { %v8751_v5 = vpop.f32.mrf.mxu1  ;;  %v8790_v41 = vpop.f32.mrf.mxu0 }
 0x29a   :  { %v8759_v35 = vpop.f32.mrf.mxu1  ;;  %v8807_v52 = vpop.f32.mrf.mxu0 }
 0x29b   :  { %10001 = vst [vmem:[#allocation33_spill] sm:$0xff] %v8759_v35  ;;  %v1647_v35 = vmul.f32 %v1632_v2, %v8637_v39  ;;  %v8794_v39 = vpop.permute.xlu0 %1797  ;;  %v1686_v2 = vadd.f32 %v1678_v33, %v1645_v31 }
 0x29c   :  { %10007 = vst [vmem:[#allocation39_spill] sm:$0xff] %v8794_v39  ;;  %v8831_v33 = vpop.f32.mrf.mxu0 }
 0x29d   :  { %v8767_v61 = vpop.f32.mrf.mxu1 }
 0x29e   :  { %10004 = vst [vmem:[#allocation36_spill] sm:$0xff] %v8767_v61  ;;  %v1680_v61 = vmul.f32 %v1665_v11, %v8649_v44  ;;  %v1685_v44 = vadd.f32 %v1677_v62, %v1644_v25  ;;  %v1687_v11 = vadd.f32 %v1679_v1, %v1646_v22  ;;  %v1727_v62 = vadd.f32 %v1719_v40, %v1686_v2 }
 0x29f   :  { %v8792_v43 = vpop.f32.mrf.mxu1  ;;  %v1690_v1 = vadd.f32 %v1682_v46, %v1649_v34  ;;  %v8821_v15 = vpop.permute.xlu0 %1951  ;;  %v1765_v40 = vmul.f32 %v8765_v55, %v10010_v13  ;;  %v10014_v34 = vld [vmem:[#allocation21_spill] sm:$0xff]  ;;  %v10029_v13 = vld [vmem:[#allocation16_spill] sm:$0xff] }
 0x2a0   :  { %10006 = vst [vmem:[#allocation38_spill] sm:$0xff] %v8792_v43  ;;  %v1688_v57 = vadd.f32 %v1680_v61, %v1647_v35  ;;  %v1651_v43 = vmul.f32 %v1642_v28, %v8659_v49  ;;  %v1726_v39 = vadd.f32 %v1718_v29, %v1685_v44  ;;  %v1728_v25 = vadd.f32 %v1720_v37, %v1687_v11  ;;  %v10011_v37 = vld [vmem:[#allocation22_spill] sm:$0xff]  ;;  %v10016_v11 = vld [vmem:[#allocation20_spill] sm:$0xff] }
 0x2a1   :  { %v1800_v49 = vmul.f32 %v8663_v3, %v8707_v14  ;;  %v1691_v61 = vadd.f32 %v1683_v53, %v1650_v47  ;;  %v1724_v14 = vmul.f32 %v8743_v4, %v8701_v9  ;;  %v1768_v31 = vadd.f32 %v1760_v58, %v1727_v62 }
 0x2a2   :  { %v8809_v60 = vpop.f32.mrf.mxu1  ;;  %v1729_v54 = vadd.f32 %v1721_v50, %v1688_v57  ;;  %v1767_v28 = vadd.f32 %v1759_v45, %v1726_v39  ;;  %v1692_v63 = vadd.f32 %v1684_v48, %v1651_v43  ;;  %v1769_v6 = vadd.f32 %v1761_v10, %v1728_v25  ;;  %v10013_v43 = vld [vmem:[#allocation24_spill] sm:$0xff]  ;;  %v1451_v39 = vpop.f32.mrf.mxu0  ;;  %v10015_v46 = vld [vmem:[#allocation33_spill] sm:$0xff] }
 0x2a3   :  { %v1763_v35 = vmul.f32 %v8733_v17, %v8703_v12  ;;  %v1731_v22 = vadd.f32 %v1723_v0, %v1690_v1  ;;  %v1764_v9 = vmul.f32 %v8733_v17, %v8709_v18  ;;  %v1802_v3 = vmul.f32 %v8727_v30, %v8719_v24  ;;  %v10009_v12 = vld [vmem:[#allocation15_spill] sm:$0xff]  ;;  %v8855_v30 = vpop.permute.xlu0 %1915  ;;  %v10021_v0 = vld [vmem:[#allocation30_spill] sm:$0xff] }
 0x2a4   :  { %v1303_v7 = vpop.f32.mrf.mxu1  ;;  %v1770_v21 = vadd.f32 %v1762_v59, %v1729_v54  ;;  %v1808_v23 = vadd.f32 %v1800_v49, %v1767_v28  ;;  %v1732_v20 = vadd.f32 %v1724_v14, %v1691_v61  ;;  %v1809_v38 = vadd.f32 %v1801_v51, %v1768_v31  ;;  %v10012_v18 = vld [vmem:[#allocation31_spill] sm:$0xff]  ;;  %v10019_v49 = vld [vmem:[#allocation25_spill] sm:$0xff]  ;;  %v1455_v59 = vpop.f32.mrf.mxu0 }
 0x2a5   :  { %v1882_v29 = vmul.f32 %v10009_v12, %v8751_v5  ;;  %v1771_v4 = vadd.f32 %v1763_v35, %v1730_v32  ;;  %v1804_v17 = vmul.f32 %v10012_v18, %v10011_v37  ;;  %v1805_v24 = vmul.f32 %v10012_v18, %v10013_v43  ;;  %v10018_v1 = vld [vmem:[#allocation27_spill] sm:$0xff]  ;;  %v10020_v10 = vld [vmem:[#allocation36_spill] sm:$0xff] }
 0x2a6   :  { %v8853_v27 = vpop.f32.mrf.mxu1  ;;  %v1733_v48 = vadd.f32 %v1725_v8, %v1692_v63  ;;  %v1849_v44 = vadd.f32 %v1841_v36, %v1808_v23  ;;  %v1842_v5 = vmul.f32 %v8675_v56, %v10014_v34  ;;  %v1883_v50 = vmul.f32 %v10009_v12, %v10015_v46  ;;  %v10024_v8 = vld [vmem:[#allocation28_spill] sm:$0xff]  ;;  %v10025_v23 = vld [vmem:[#allocation35_spill] sm:$0xff]  ;;  %v1880_v36 = vpop.permute.xlu1 %1879 }
 0x2a7   :  { %v1772_v2 = vadd.f32 %v1764_v9, %v1731_v22  ;;  %v1766_v47 = vmul.f32 %v8765_v55, %v10016_v11  ;;  %v1810_v53 = vadd.f32 %v1802_v3, %v1769_v6  ;;  %v1811_v57 = vadd.f32 %v1803_v19, %v1770_v21  ;;  %v10022_v55 = vld [vmem:[#allocation17_spill] sm:$0xff]  ;;  %v10023_v6 = vld [vmem:[#allocation38_spill] sm:$0xff]  ;;  %v10026_v9 = vld [vmem:[#allocation32_spill] sm:$0xff] }
 0x2a8   :  { %v1773_v62 = vadd.f32 %v1765_v40, %v1732_v20  ;;  %v1850_v25 = vadd.f32 %v1842_v5, %v1809_v38  ;;  %v1843_v45 = vmul.f32 %v10018_v1, %v10017_v42  ;;  %v1890_v54 = vadd.f32 %v1882_v29, %v1849_v44  ;;  %v1309_v14 = vpop.f32.mrf.mxu1  ;;  %v1957_v20 = vpop.permute.xlu0 %1956  ;;  %v10027_v38 = vld [vmem:[#allocation29_spill] sm:$0xff]  ;;  %v10028_v12 = vld [vmem:[#allocation39_spill] sm:$0xff]  ;;  %v10031_v11 = vld [vmem:[#allocation34_spill] sm:$0xff] }
 0x2a9   :  { %v1844_v61 = vmul.f32 %v10018_v1, %v10019_v49  ;;  %v1812_v58 = vadd.f32 %v1804_v17, %v1771_v4  ;;  %v1813_v56 = vadd.f32 %v1805_v24, %v1772_v2  ;;  %v1884_v28 = vmul.f32 %v10021_v0, %v10020_v10  ;;  %v1457_v24 = vpop.f32.mrf.mxu0  ;;  %v10034_v10 = vld [vmem:[#allocation18_spill] sm:$0xff] }
 0x2aa   :  { %v1774_v51 = vadd.f32 %v1766_v47, %v1733_v48  ;;  %v1923_v63 = vmul.f32 %v10022_v55, %v8790_v41  ;;  %v1891_v31 = vadd.f32 %v1883_v50, %v1850_v25  ;;  %v1885_v32 = vmul.f32 %v10021_v0, %v10023_v6  ;;  %v10030_v50 = vld [vmem:[#allocation26_spill] sm:$0xff] }
 0x2ab   :  { %v1851_v21 = vadd.f32 %v1843_v45, %v1810_v53  ;;  %v1852_v35 = vadd.f32 %v1844_v61, %v1811_v57  ;;  %v1845_v22 = vmul.f32 %v10025_v23, %v10024_v8  ;;  %v1846_v3 = vmul.f32 %v10025_v23, %v10026_v9 }
 0x2ac   :  { %v1807_v29 = vmul.f32 %v10028_v12, %v10027_v38  ;;  %v1931_v4 = vadd.f32 %v1923_v63, %v1890_v54  ;;  %v1924_v41 = vmul.f32 %v10022_v55, %v8807_v52  ;;  %v1887_v43 = vmul.f32 %v8823_v16, %v1303_v7  ;;  %v10032_v52 = vld [vmem:[#allocation40_spill] sm:$0xff]  ;;  %v10033_v54 = vld [vmem:[#allocation37_spill] sm:$0xff]  ;;  %v1992_v55 = vpop.permute.xlu1 %1991 }
 0x2ad   :  { %v1853_v37 = vadd.f32 %v1845_v22, %v1812_v58  ;;  %v1854_v18 = vadd.f32 %v1846_v3, %v1813_v56  ;;  %v1892_v17 = vadd.f32 %v1884_v28, %v1851_v21  ;;  %v1893_v34 = vadd.f32 %v1885_v32, %v1852_v35  ;;  %v1461_v56 = vpop.f32.mrf.mxu0 }
 0x2ae   :  { %v1932_v44 = vadd.f32 %v1924_v41, %v1891_v31  ;;  %v1806_v2 = vmul.f32 %v10028_v12, %v10030_v50  ;;  %v1847_v47 = vmul.f32 %v1839_v26, %v10031_v11  ;;  %v1925_v53 = vmul.f32 %v10032_v52, %v8831_v33  ;;  %v7153_v50 = vld [vmem:[#allocation8 + $0x6e0] sm:$0xff] }
 0x2af   :  { %v1886_v57 = vmul.f32 %v8823_v16, %v8809_v60  ;;  %v1815_v7 = vadd.f32 %v1807_v29, %v1774_v51  ;;  %v1926_v42 = vmul.f32 %v10032_v52, %v1451_v39  ;;  %v1848_v49 = vmul.f32 %v1839_v26, %v10033_v54  ;;  %v1921_v51 = vpop.permute.xlu0 %1920  ;;  %v1463_v9 = vpop.f32.mrf.mxu0  ;;  %v7157_v54 = vld [vmem:[#allocation8 + $0x6d0] sm:$0xff] }
 0x2b0   :  { %v1933_v61 = vadd.f32 %v1925_v53, %v1892_v17  ;;  %v1895_v58 = vadd.f32 %v1887_v43, %v1854_v18  ;;  %v1889_v63 = vmul.f32 %v1880_v36, %v1309_v14  ;;  %v1814_v39 = vadd.f32 %v1806_v2, %v1773_v62  ;;  %v7150_v43 = vld [vmem:[#allocation8 + $0x4e8] sm:$0xff]  ;;  %v7154_v53 = vld [vmem:[#allocation8 + $0x4d8] sm:$0xff] }
 0x2b1   :  { %v1934_v33 = vadd.f32 %v1926_v42, %v1893_v34  ;;  %v1894_v31 = vadd.f32 %v1886_v57, %v1853_v37  ;;  %v1928_v6 = vmul.f32 %v8855_v30, %v1457_v24  ;;  %v1856_v21 = vadd.f32 %v1848_v49, %v1815_v7  ;;  %v7151_v24 = vld [vmem:[#allocation8 + $0x6e8] sm:$0xff]  ;;  %v7155_v57 = vld [vmem:[#allocation8 + $0x6d8] sm:$0xff] }
 0x2b2   :  { %v1927_v35 = vmul.f32 %v8855_v30, %v1455_v59  ;;  %v1888_v14 = vmul.f32 %v1880_v36, %v8853_v27  ;;  %v1855_v29 = vadd.f32 %v1847_v47, %v1814_v39  ;;  %v1962_v27 = vpop.permute.xlu1 %1961  ;;  %v1930_v36 = vmul.f32 %v1921_v51, %v1463_v9  ;;  %v7166_v39 = vld [vmem:[#allocation8 + $0x4a8] sm:$0xff] }
 0x2b3   :  { %v1936_v22 = vadd.f32 %v1928_v6, %v1895_v58  ;;  %v1897_v62 = vadd.f32 %v1889_v63, %v1856_v21  ;;  %v1997_v37 = vpop.permute.xlu0 %1996  ;;  %v1929_v2 = vmul.f32 %v1921_v51, %v1461_v56  ;;  %v7158_v58 = vld [vmem:[#allocation8 + $0x4c8] sm:$0xff]  ;;  %v7165_v51 = vld [vmem:[#allocation8 + $0x6b0] sm:$0xff]  ;;  %v7168_v6 = vld [vmem:[#allocation8 + $0x4a0] sm:$0xff] }
 0x2b4   :  { %v1935_v30 = vadd.f32 %v1927_v35, %v1894_v31  ;;  %v1896_v18 = vadd.f32 %v1888_v14, %v1855_v29  ;;  %v7159_v56 = vld [vmem:[#allocation8 + $0x6c8] sm:$0xff]  ;;  %v7170_v21 = vld [vmem:[#allocation8 + $0x498] sm:$0xff]  ;;  %v7181_v29 = vld [vmem:[#allocation8 + $0x670] sm:$0xff] }
 0x2b5   :  { %v7167_v31 = vld [vmem:[#allocation8 + $0x6a8] sm:$0xff]  ;;  %v7171_v35 = vld [vmem:[#allocation8 + $0x698] sm:$0xff] }
 0x2b6   :  { %v7174_v14 = vld [vmem:[#allocation8 + $0x488] sm:$0xff] }
 0x2b7   :  { %v7175_v9 = vld [vmem:[#allocation8 + $0x688] sm:$0xff] }
 0x2da   :  { %v1597_v19 = vpop.f32.mrf.mxu1 }
 0x2db   :  { %v1964_v40 = vmul.f32 %v10029_v13, %v1597_v19 }
 0x2dc   :  { %v1599_v48 = vpop.f32.mrf.mxu1 }
 0x2dd   :  { %v1972_v5 = vadd.f32 %v1964_v40, %v1931_v4  ;;  %v1965_v46 = vmul.f32 %v10029_v13, %v1599_v48  ;;  %v7148_v40 = vld [vmem:[#allocation8 + $0x4f0] sm:$0xff] }
 0x2de   :  { %v1603_v25 = vpop.f32.mrf.mxu1 }
 0x2df   :  { %v1973_v1 = vadd.f32 %v1965_v46, %v1932_v44  ;;  %v1966_v45 = vmul.f32 %v8821_v15, %v1603_v25  ;;  %v2004_v0 = vadd.f32 %v10034_v10, %v1972_v5  ;;  %v1938_v44 = vadd.f32 %v1930_v36, %v1897_v62  ;;  %v7152_v46 = vld [vmem:[#allocation8 + $0x4e0] sm:$0xff]  ;;  %v7178_v62 = vld [vmem:[#allocation8 + $0x478] sm:$0xff] }
 0x2e0   :  { %v1605_v28 = vpop.f32.mrf.mxu1  ;;  %v1937_v25 = vadd.f32 %v1929_v2, %v1896_v18  ;;  %v7186_v36 = vld [vmem:[#allocation8 + $0x458] sm:$0xff]  ;;  %v7191_v18 = vld [vmem:[#allocation8 + $0x648] sm:$0xff]  ;;  %v7201_v2 = vld [vmem:[#allocation8 + $0x620] sm:$0xff] }
 0x2e1   :  { %v2005_v60 = vadd.f32 %v10034_v10, %v1973_v1  ;;  %v1967_v16 = vmul.f32 %v8821_v15, %v1605_v28  ;;  %v1974_v32 = vadd.f32 %v1966_v45, %v1933_v61  ;;  %v8902_v3 = vmax.f32 %v2004_v0, 0.0  ;;  %v2002_v1 = vpop.permute.xlu1 %2001  ;;  %v7156_v45 = vld [vmem:[#allocation8 + $0x4d0] sm:$0xff]  ;;  %v7160_v10 = vld [vmem:[#allocation8 + $0x4c0] sm:$0xff] }
 0x2e2   :  { %v1609_v26 = vpop.f32.mrf.mxu1  ;;  %v7161_v0 = vld [vmem:[#allocation8 + $0x6c0] sm:$0xff] }
 0x2e3   :  { %v8899_v8 = vmax.f32 %v2005_v60, 0.0  ;;  %v1975_v23 = vadd.f32 %v1967_v16, %v1934_v33  ;;  %v1968_v15 = vmul.f32 %v1957_v20, %v1609_v26  ;;  %v2006_v59 = vadd.f32 %v1992_v55, %v1974_v32  ;;  %v7163_v33 = vld [vmem:[#allocation8 + $0x6b8] sm:$0xff]  ;;  %v7164_v16 = vld [vmem:[#allocation8 + $0x4b0] sm:$0xff]  ;;  %v7169_v32 = vld [vmem:[#allocation8 + $0x6a0] sm:$0xff] }
 0x2e4   :  { %v1611_v19 = vpop.f32.mrf.mxu1 }
 0x2e5   :  { %v2007_v38 = vadd.f32 %v1992_v55, %v1975_v23  ;;  %v1969_v12 = vmul.f32 %v1957_v20, %v1611_v19  ;;  %2084 = vmatprep.mubr.f32.mxu0 %v8899_v8  ;;  %2173 = vmatprep.mubr.f32.mxu1 %v8899_v8  ;;  %v7149_v20 = vld [vmem:[#allocation8 + $0x6f0] sm:$0xff]  ;;  %v1976_v17 = vadd.f32 %v1968_v15, %v1935_v30  ;;  %v8910_v11 = vmax.f32 %v2006_v59, 0.0  ;;  %v7162_v55 = vld [vmem:[#allocation8 + $0x4b8] sm:$0xff]  ;;  %v7176_v15 = vld [vmem:[#allocation8 + $0x480] sm:$0xff] }
 0x2e6   :  { %v1615_v4 = vpop.f32.mrf.mxu1  ;;  %2085 = vmatmul.mubr.f32.vlgmr.msra.gmra.mxu0 %v8902_v3  ;;  %2174 = vmatmul.mubr.f32.vlgmr.msra.gmra.mxu1 %v8902_v3  ;;  %v7172_v23 = vld [vmem:[#allocation8 + $0x490] sm:$0xff]  ;;  %v7177_v19 = vld [vmem:[#allocation8 + $0x680] sm:$0xff]  ;;  %v7182_v30 = vld [vmem:[#allocation8 + $0x468] sm:$0xff] }
 0x2e7   :  { %v8908_v41 = vmax.f32 %v2007_v38, 0.0  ;;  %v1977_v13 = vadd.f32 %v1969_v12, %v1936_v22  ;;  %2199 = vmatpush1.msra.mxu0 %v7148_v40  ;;  %2288 = vmatpush1.msra.mxu1 %v7149_v20  ;;  %v1970_v47 = vmul.f32 %v1962_v27, %v1615_v4  ;;  %v2008_v7 = vadd.f32 %v1997_v37, %v1976_v17  ;;  %v7173_v22 = vld [vmem:[#allocation8 + $0x690] sm:$0xff]  ;;  %v7179_v38 = vld [vmem:[#allocation8 + $0x678] sm:$0xff]  ;;  %v7183_v59 = vld [vmem:[#allocation8 + $0x668] sm:$0xff] }
 0x2e8   :  { %2200 = vmatprep.subr.mxu0 %v7150_v43  ;;  %2289 = vmatprep.subr.mxu1 %v7151_v24  ;;  %v1617_v48 = vpop.f32.mrf.mxu1  ;;  %v7180_v12 = vld [vmem:[#allocation8 + $0x470] sm:$0xff]  ;;  %v7184_v4 = vld [vmem:[#allocation8 + $0x460] sm:$0xff]  ;;  %v7194_v24 = vld [vmem:[#allocation8 + $0x438] sm:$0xff] }
 0x2e9   :  { %v2009_v34 = vadd.f32 %v1997_v37, %v1977_v13  ;;  %v1971_v5 = vmul.f32 %v1962_v27, %v1617_v48  ;;  %2201 = vmatpush1.msra.mxu0 %v7152_v46  ;;  %2290 = vmatpush1.msra.mxu1 %v7153_v50  ;;  %v1978_v49 = vadd.f32 %v1970_v47, %v1937_v25  ;;  %v8918_v28 = vmax.f32 %v2008_v7, 0.0  ;;  %v7185_v27 = vld [vmem:[#allocation8 + $0x660] sm:$0xff]  ;;  %v7187_v13 = vld [vmem:[#allocation8 + $0x658] sm:$0xff]  ;;  %v7188_v40 = vld [vmem:[#allocation8 + $0x450] sm:$0xff] }
 0x2ea   :  { %2090 = vmatprep.mubr.f32.mxu0 %v8908_v41  ;;  %2179 = vmatprep.mubr.f32.mxu1 %v8908_v41  ;;  %v7189_v20 = vld [vmem:[#allocation8 + $0x650] sm:$0xff]  ;;  %v7190_v37 = vld [vmem:[#allocation8 + $0x448] sm:$0xff]  ;;  %v7192_v17 = vld [vmem:[#allocation8 + $0x440] sm:$0xff] }
 0x2eb   :  { %v1979_v52 = vadd.f32 %v1971_v5, %v1938_v44  ;;  %2202 = vmatprep.subr.mxu0 %v7154_v53  ;;  %2291 = vmatprep.subr.mxu1 %v7155_v57  ;;  %v8914_v42 = vmax.f32 %v2009_v34, 0.0  ;;  %v2010_v63 = vadd.f32 %v2002_v1, %v1978_v49  ;;  %v7193_v43 = vld [vmem:[#allocation8 + $0x640] sm:$0xff]  ;;  %v7195_v48 = vld [vmem:[#allocation8 + $0x638] sm:$0xff]  ;;  %v7196_v44 = vld [vmem:[#allocation8 + $0x430] sm:$0xff] }
 0x2ec   :  { %2091 = vmatmul.mubr.f32.gmra.mxu0 %v8910_v11  ;;  %2180 = vmatmul.mubr.f32.gmra.mxu1 %v8910_v11  ;;  %v7197_v34 = vld [vmem:[#allocation8 + $0x630] sm:$0xff]  ;;  %v7198_v5 = vld [vmem:[#allocation8 + $0x428] sm:$0xff]  ;;  %v7200_v50 = vld [vmem:[#allocation8 + $0x420] sm:$0xff] }
 0x2ed   :  { %2203 = vmatpush1.msra.mxu0 %v7156_v45  ;;  %2292 = vmatpush1.msra.mxu1 %v7157_v54  ;;  %v2011_v61 = vadd.f32 %v2002_v1, %v1979_v52  ;;  %v8926_v26 = vmax.f32 %v2010_v63, 0.0  ;;  %v7199_v46 = vld [vmem:[#allocation8 + $0x628] sm:$0xff]  ;;  %v7202_v47 = vld [vmem:[#allocation8 + $0x418] sm:$0xff]  ;;  %v7204_v53 = vld [vmem:[#allocation8 + $0x410] sm:$0xff] }
 0x2ee   :  { %2204 = vmatprep.subr.mxu0 %v7158_v58  ;;  %2293 = vmatprep.subr.mxu1 %v7159_v56  ;;  %v7203_v52 = vld [vmem:[#allocation8 + $0x618] sm:$0xff]  ;;  %v7205_v57 = vld [vmem:[#allocation8 + $0x610] sm:$0xff]  ;;  %v7206_v25 = vld [vmem:[#allocation8 + $0x408] sm:$0xff] }
 0x2ef   :  { %2205 = vmatpush1.msra.mxu0 %v7160_v10  ;;  %2294 = vmatpush1.msra.mxu1 %v7161_v0  ;;  %v8922_v60 = vmax.f32 %v2011_v61, 0.0  ;;  %v7207_v7 = vld [vmem:[#allocation8 + $0x608] sm:$0xff]  ;;  %v7208_v1 = vld [vmem:[#allocation8 + $0x400] sm:$0xff]  ;;  %v7210_v54 = vld [vmem:[#allocation8 + $0x5f8] sm:$0xff] }
 0x2f0   :  { %2096 = vmatprep.mubr.f32.mxu0 %v8914_v42  ;;  %2185 = vmatprep.mubr.f32.mxu1 %v8914_v42  ;;  %v7209_v45 = vld [vmem:[#allocation8 + $0x600] sm:$0xff]  ;;  %v7211_v49 = vld [vmem:[#allocation8 + $0x7f8] sm:$0xff]  ;;  %v7212_v61 = vld [vmem:[#allocation8 + $0x5f0] sm:$0xff] }
 0x2f1   :  { %2206 = vmatprep.subr.mxu0 %v7162_v55  ;;  %2295 = vmatprep.subr.mxu1 %v7163_v33  ;;  %v7213_v58 = vld [vmem:[#allocation8 + $0x7f0] sm:$0xff]  ;;  %v7214_v56 = vld [vmem:[#allocation8 + $0x5e8] sm:$0xff]  ;;  %v7216_v0 = vld [vmem:[#allocation8 + $0x5e0] sm:$0xff] }
 0x2f2   :  { %2097 = vmatmul.mubr.f32.gmra.mxu0 %v8918_v28  ;;  %2186 = vmatmul.mubr.f32.gmra.mxu1 %v8918_v28  ;;  %v7215_v10 = vld [vmem:[#allocation8 + $0x7e8] sm:$0xff]  ;;  %v7217_v55 = vld [vmem:[#allocation8 + $0x7e0] sm:$0xff]  ;;  %v7218_v33 = vld [vmem:[#allocation8 + $0x5d8] sm:$0xff] }
 0x2f3   :  { %2207 = vmatpush1.msra.mxu0 %v7164_v16  ;;  %2296 = vmatpush1.msra.mxu1 %v7165_v51  ;;  %v7219_v63 = vld [vmem:[#allocation8 + $0x7d8] sm:$0xff]  ;;  %v7220_v16 = vld [vmem:[#allocation8 + $0x5d0] sm:$0xff] }
 0x2f4   :  { %2208 = vmatprep.subr.mxu0 %v7166_v39  ;;  %2297 = vmatprep.subr.mxu1 %v7167_v31  ;;  %v7221_v51 = vld [vmem:[#allocation8 + $0x7d0] sm:$0xff]  ;;  %v7222_v39 = vld [vmem:[#allocation8 + $0x5c8] sm:$0xff] }
 0x2f5   :  { %2209 = vmatpush1.msra.mxu0 %v7168_v6  ;;  %2298 = vmatpush1.msra.mxu1 %v7169_v32  ;;  %v7223_v31 = vld [vmem:[#allocation8 + $0x7c8] sm:$0xff]  ;;  %v7224_v6 = vld [vmem:[#allocation8 + $0x5c0] sm:$0xff] }
 0x2f6   :  { %2102 = vmatprep.mubr.f32.mxu0 %v8922_v60  ;;  %2191 = vmatprep.mubr.f32.mxu1 %v8922_v60  ;;  %v7225_v32 = vld [vmem:[#allocation8 + $0x7c0] sm:$0xff] }
 0x2f7   :  { %2210 = vmatprep.subr.mxu0 %v7170_v21  ;;  %2299 = vmatprep.subr.mxu1 %v7171_v35  ;;  %v7226_v21 = vld [vmem:[#allocation8 + $0x5b8] sm:$0xff] }
 0x2f8   :  { %2103 = vmatmul.mubr.f32.gmra.mxu0 %v8926_v26  ;;  %2192 = vmatmul.mubr.f32.gmra.mxu1 %v8926_v26  ;;  %v7227_v35 = vld [vmem:[#allocation8 + $0x7b8] sm:$0xff] }
 0x2f9   :  { %2211 = vmatpush1.msra.mxu0 %v7172_v23  ;;  %2300 = vmatpush1.msra.mxu1 %v7173_v22  ;;  %v7228_v23 = vld [vmem:[#allocation8 + $0x5b0] sm:$0xff] }
 0x2fa   :  { %2212 = vmatprep.subr.mxu0 %v7174_v14  ;;  %2262 = vmatprep.mubr.f32.mxu0 %v8899_v8  ;;  %v7229_v22 = vld [vmem:[#allocation8 + $0x7b0] sm:$0xff]  ;;  %v7230_v14 = vld [vmem:[#allocation8 + $0x5a8] sm:$0xff] }
 0x2fb   :  { %2301 = vmatprep.subr.mxu1 %v7175_v9  ;;  %2351 = vmatprep.mubr.f32.mxu1 %v8899_v8  ;;  %v7231_v9 = vld [vmem:[#allocation8 + $0x7a8] sm:$0xff] }
 0x2fc   :  { %2213 = vmatpush1.msra.mxu0 %v7176_v15  ;;  %2302 = vmatpush1.msra.mxu1 %v7177_v19  ;;  %v7232_v15 = vld [vmem:[#allocation8 + $0x5a0] sm:$0xff] }
 0x2fd   :  { %2214 = vmatprep.subr.mxu0 %v7178_v62  ;;  %2303 = vmatprep.subr.mxu1 %v7179_v38  ;;  %v7233_v19 = vld [vmem:[#allocation8 + $0x7a0] sm:$0xff]  ;;  %v7234_v62 = vld [vmem:[#allocation8 + $0x598] sm:$0xff] }
 0x2fe   :  { %2215 = vmatpush1.msra.mxu0 %v7180_v12  ;;  %2304 = vmatpush1.msra.mxu1 %v7181_v29  ;;  %v7235_v38 = vld [vmem:[#allocation8 + $0x798] sm:$0xff]  ;;  %v7236_v12 = vld [vmem:[#allocation8 + $0x590] sm:$0xff] }
 0x2ff   :  { %2216 = vmatprep.subr.mxu0 %v7182_v30  ;;  %2305 = vmatprep.subr.mxu1 %v7183_v59  ;;  %v7237_v29 = vld [vmem:[#allocation8 + $0x790] sm:$0xff]  ;;  %v7238_v30 = vld [vmem:[#allocation8 + $0x588] sm:$0xff] }
 0x300   :  { %2217 = vmatpush1.msra.mxu0 %v7184_v4  ;;  %2306 = vmatpush1.msra.mxu1 %v7185_v27  ;;  %v7239_v59 = vld [vmem:[#allocation8 + $0x788] sm:$0xff]  ;;  %v7240_v4 = vld [vmem:[#allocation8 + $0x580] sm:$0xff] }
 0x301   :  { %2218 = vmatprep.subr.mxu0 %v7186_v36  ;;  %2307 = vmatprep.subr.mxu1 %v7187_v13  ;;  %v7241_v27 = vld [vmem:[#allocation8 + $0x780] sm:$0xff]  ;;  %v7242_v36 = vld [vmem:[#allocation8 + $0x578] sm:$0xff] }
 0x302   :  { %2219 = vmatpush1.msra.mxu0 %v7188_v40  ;;  %2308 = vmatpush1.msra.mxu1 %v7189_v20  ;;  %v7243_v13 = vld [vmem:[#allocation8 + $0x778] sm:$0xff]  ;;  %v7244_v40 = vld [vmem:[#allocation8 + $0x570] sm:$0xff] }
 0x303   :  { %2220 = vmatprep.subr.mxu0 %v7190_v37  ;;  %2309 = vmatprep.subr.mxu1 %v7191_v18  ;;  %v7245_v20 = vld [vmem:[#allocation8 + $0x770] sm:$0xff]  ;;  %v7246_v37 = vld [vmem:[#allocation8 + $0x568] sm:$0xff] }
 0x304   :  { %2221 = vmatpush1.msra.mxu0 %v7192_v17  ;;  %2310 = vmatpush1.msra.mxu1 %v7193_v43  ;;  %v7247_v18 = vld [vmem:[#allocation8 + $0x768] sm:$0xff]  ;;  %v7248_v17 = vld [vmem:[#allocation8 + $0x560] sm:$0xff] }
 0x305   :  { %2222 = vmatprep.subr.mxu0 %v7194_v24  ;;  %2311 = vmatprep.subr.mxu1 %v7195_v48  ;;  %v7249_v43 = vld [vmem:[#allocation8 + $0x760] sm:$0xff]  ;;  %v7250_v24 = vld [vmem:[#allocation8 + $0x558] sm:$0xff] }
 0x306   :  { %2223 = vmatpush1.msra.mxu0 %v7196_v44  ;;  %2312 = vmatpush1.msra.mxu1 %v7197_v34  ;;  %v7251_v48 = vld [vmem:[#allocation8 + $0x758] sm:$0xff]  ;;  %v7252_v44 = vld [vmem:[#allocation8 + $0x550] sm:$0xff] }
 0x307   :  { %2224 = vmatprep.subr.mxu0 %v7198_v5  ;;  %2313 = vmatprep.subr.mxu1 %v7199_v46  ;;  %v7253_v34 = vld [vmem:[#allocation8 + $0x750] sm:$0xff]  ;;  %v7254_v5 = vld [vmem:[#allocation8 + $0x548] sm:$0xff] }
 0x308   :  { %2225 = vmatpush1.msra.mxu0 %v7200_v50  ;;  %2314 = vmatpush1.msra.mxu1 %v7201_v2  ;;  %v7255_v46 = vld [vmem:[#allocation8 + $0x748] sm:$0xff]  ;;  %v7256_v50 = vld [vmem:[#allocation8 + $0x540] sm:$0xff] }
 0x309   :  { %2226 = vmatprep.subr.mxu0 %v7202_v47  ;;  %2315 = vmatprep.subr.mxu1 %v7203_v52  ;;  %v7257_v2 = vld [vmem:[#allocation8 + $0x740] sm:$0xff]  ;;  %v7258_v47 = vld [vmem:[#allocation8 + $0x538] sm:$0xff] }
 0x30a   :  { %2227 = vmatpush1.msra.mxu0 %v7204_v53  ;;  %2316 = vmatpush1.msra.mxu1 %v7205_v57  ;;  %v7259_v52 = vld [vmem:[#allocation8 + $0x738] sm:$0xff]  ;;  %v7260_v53 = vld [vmem:[#allocation8 + $0x530] sm:$0xff] }
 0x30b   :  { %2228 = vmatprep.subr.mxu0 %v7206_v25  ;;  %2317 = vmatprep.subr.mxu1 %v7207_v7  ;;  %v7261_v57 = vld [vmem:[#allocation8 + $0x730] sm:$0xff]  ;;  %v7262_v25 = vld [vmem:[#allocation8 + $0x528] sm:$0xff] }
 0x30c   :  { %2229 = vmatpush1.msra.mxu0 %v7208_v1  ;;  %2318 = vmatpush1.msra.mxu1 %v7209_v45  ;;  %v7263_v7 = vld [vmem:[#allocation8 + $0x728] sm:$0xff]  ;;  %v7264_v1 = vld [vmem:[#allocation8 + $0x520] sm:$0xff] }
 0x30d   :  { %2230 = vmatprep.subr.mxu0 %v7210_v54  ;;  %2319 = vmatprep.subr.mxu1 %v7211_v49  ;;  %v7265_v45 = vld [vmem:[#allocation8 + $0x720] sm:$0xff]  ;;  %v7266_v54 = vld [vmem:[#allocation8 + $0x518] sm:$0xff] }
 0x30e   :  { %2231 = vmatpush2.msra.mxu0 %v7212_v61  ;;  %2320 = vmatpush2.msra.mxu1 %v7213_v58  ;;  %v7267_v49 = vld [vmem:[#allocation8 + $0x718] sm:$0xff]  ;;  %v7268_v61 = vld [vmem:[#allocation8 + $0x510] sm:$0xff] }
 0x30f   :  { %2232 = vmatprep.subr.mxu0 %v7214_v56  ;;  %2321 = vmatprep.subr.mxu1 %v7215_v10  ;;  %v7269_v58 = vld [vmem:[#allocation8 + $0x710] sm:$0xff]  ;;  %v7270_v56 = vld [vmem:[#allocation8 + $0x508] sm:$0xff] }
 0x310   :  { %2233 = vmatpush2.msra.mxu0 %v7216_v0  ;;  %2322 = vmatpush2.msra.mxu1 %v7217_v55  ;;  %v7271_v10 = vld [vmem:[#allocation8 + $0x708] sm:$0xff]  ;;  %v7272_v0 = vld [vmem:[#allocation8 + $0x500] sm:$0xff] }
 0x311   :  { %2234 = vmatprep.subr.mxu0 %v7218_v33  ;;  %2323 = vmatprep.subr.mxu1 %v7219_v63  ;;  %v7273_v55 = vld [vmem:[#allocation8 + $0x700] sm:$0xff]  ;;  %v7274_v33 = vld [vmem:[#allocation8 + $0x8f8] sm:$0xff] }
 0x312   :  { %2235 = vmatpush2.msra.mxu0 %v7220_v16  ;;  %2324 = vmatpush2.msra.mxu1 %v7221_v51  ;;  %v7275_v63 = vld [vmem:[#allocation8 + $0xaf8] sm:$0xff]  ;;  %v7276_v16 = vld [vmem:[#allocation8 + $0x8f0] sm:$0xff] }
 0x313   :  { %2236 = vmatprep.subr.mxu0 %v7222_v39  ;;  %2325 = vmatprep.subr.mxu1 %v7223_v31  ;;  %v7277_v51 = vld [vmem:[#allocation8 + $0xaf0] sm:$0xff]  ;;  %v7278_v39 = vld [vmem:[#allocation8 + $0x8e8] sm:$0xff] }
 0x314   :  { %2237 = vmatpush2.msra.mxu0 %v7224_v6  ;;  %2326 = vmatpush2.msra.mxu1 %v7225_v32  ;;  %v7279_v31 = vld [vmem:[#allocation8 + $0xae8] sm:$0xff]  ;;  %v7280_v6 = vld [vmem:[#allocation8 + $0x8e0] sm:$0xff] }
 0x315   :  { %2238 = vmatprep.subr.mxu0 %v7226_v21  ;;  %2327 = vmatprep.subr.mxu1 %v7227_v35  ;;  %v7281_v32 = vld [vmem:[#allocation8 + $0xae0] sm:$0xff]  ;;  %v7282_v21 = vld [vmem:[#allocation8 + $0x8d8] sm:$0xff] }
 0x316   :  { %2239 = vmatpush2.msra.mxu0 %v7228_v23  ;;  %2328 = vmatpush2.msra.mxu1 %v7229_v22  ;;  %v7283_v35 = vld [vmem:[#allocation8 + $0xad8] sm:$0xff]  ;;  %v7284_v23 = vld [vmem:[#allocation8 + $0x8d0] sm:$0xff] }
 0x317   :  { %2240 = vmatprep.subr.mxu0 %v7230_v14  ;;  %2329 = vmatprep.subr.mxu1 %v7231_v9  ;;  %v7285_v22 = vld [vmem:[#allocation8 + $0xad0] sm:$0xff]  ;;  %v7286_v14 = vld [vmem:[#allocation8 + $0x8c8] sm:$0xff] }
 0x318   :  { %2241 = vmatpush2.msra.mxu0 %v7232_v15  ;;  %2330 = vmatpush2.msra.mxu1 %v7233_v19  ;;  %v7287_v9 = vld [vmem:[#allocation8 + $0xac8] sm:$0xff]  ;;  %v7288_v15 = vld [vmem:[#allocation8 + $0x8c0] sm:$0xff] }
 0x319   :  { %2242 = vmatprep.subr.mxu0 %v7234_v62  ;;  %2331 = vmatprep.subr.mxu1 %v7235_v38  ;;  %v7289_v19 = vld [vmem:[#allocation8 + $0xac0] sm:$0xff]  ;;  %v7290_v62 = vld [vmem:[#allocation8 + $0x8b8] sm:$0xff] }
 0x31a   :  { %2243 = vmatpush2.msra.mxu0 %v7236_v12  ;;  %2332 = vmatpush2.msra.mxu1 %v7237_v29  ;;  %v7291_v38 = vld [vmem:[#allocation8 + $0xab8] sm:$0xff]  ;;  %v7292_v12 = vld [vmem:[#allocation8 + $0x8b0] sm:$0xff] }
 0x31b   :  { %2244 = vmatprep.subr.mxu0 %v7238_v30  ;;  %2333 = vmatprep.subr.mxu1 %v7239_v59  ;;  %v7293_v29 = vld [vmem:[#allocation8 + $0xab0] sm:$0xff]  ;;  %v7294_v30 = vld [vmem:[#allocation8 + $0x8a8] sm:$0xff] }
 0x31c   :  { %2245 = vmatpush2.msra.mxu0 %v7240_v4  ;;  %2334 = vmatpush2.msra.mxu1 %v7241_v27  ;;  %v7295_v59 = vld [vmem:[#allocation8 + $0xaa8] sm:$0xff]  ;;  %v7296_v4 = vld [vmem:[#allocation8 + $0x8a0] sm:$0xff] }
 0x31d   :  { %2246 = vmatprep.subr.mxu0 %v7242_v36  ;;  %2335 = vmatprep.subr.mxu1 %v7243_v13  ;;  %v7297_v27 = vld [vmem:[#allocation8 + $0xaa0] sm:$0xff]  ;;  %v7298_v36 = vld [vmem:[#allocation8 + $0x898] sm:$0xff] }
 0x31e   :  { %2247 = vmatpush2.msra.mxu0 %v7244_v40  ;;  %2336 = vmatpush2.msra.mxu1 %v7245_v20  ;;  %v7299_v13 = vld [vmem:[#allocation8 + $0xa98] sm:$0xff]  ;;  %v7300_v40 = vld [vmem:[#allocation8 + $0x890] sm:$0xff] }
 0x31f   :  { %2248 = vmatprep.subr.mxu0 %v7246_v37  ;;  %2337 = vmatprep.subr.mxu1 %v7247_v18  ;;  %v7301_v20 = vld [vmem:[#allocation8 + $0xa90] sm:$0xff]  ;;  %v7302_v37 = vld [vmem:[#allocation8 + $0x888] sm:$0xff] }
 0x320   :  { %2249 = vmatpush2.msra.mxu0 %v7248_v17  ;;  %2338 = vmatpush2.msra.mxu1 %v7249_v43  ;;  %v7303_v18 = vld [vmem:[#allocation8 + $0xa88] sm:$0xff]  ;;  %v7304_v17 = vld [vmem:[#allocation8 + $0x880] sm:$0xff] }
 0x321   :  { %2250 = vmatprep.subr.mxu0 %v7250_v24  ;;  %2339 = vmatprep.subr.mxu1 %v7251_v48  ;;  %v7305_v43 = vld [vmem:[#allocation8 + $0xa80] sm:$0xff]  ;;  %v7306_v24 = vld [vmem:[#allocation8 + $0x878] sm:$0xff] }
 0x322   :  { %2251 = vmatpush2.msra.mxu0 %v7252_v44  ;;  %2340 = vmatpush2.msra.mxu1 %v7253_v34  ;;  %v7307_v48 = vld [vmem:[#allocation8 + $0xa78] sm:$0xff]  ;;  %v7308_v44 = vld [vmem:[#allocation8 + $0x870] sm:$0xff] }
 0x323   :  { %2252 = vmatprep.subr.mxu0 %v7254_v5  ;;  %2341 = vmatprep.subr.mxu1 %v7255_v46  ;;  %v7309_v34 = vld [vmem:[#allocation8 + $0xa70] sm:$0xff]  ;;  %v7310_v5 = vld [vmem:[#allocation8 + $0x868] sm:$0xff] }
 0x324   :  { %2253 = vmatpush2.msra.mxu0 %v7256_v50  ;;  %2342 = vmatpush2.msra.mxu1 %v7257_v2  ;;  %v7311_v46 = vld [vmem:[#allocation8 + $0xa68] sm:$0xff]  ;;  %v7312_v50 = vld [vmem:[#allocation8 + $0x860] sm:$0xff] }
 0x325   :  { %2254 = vmatprep.subr.mxu0 %v7258_v47  ;;  %2343 = vmatprep.subr.mxu1 %v7259_v52  ;;  %v7313_v2 = vld [vmem:[#allocation8 + $0xa60] sm:$0xff]  ;;  %v7314_v47 = vld [vmem:[#allocation8 + $0x858] sm:$0xff] }
 0x326   :  { %2255 = vmatpush2.msra.mxu0 %v7260_v53  ;;  %2344 = vmatpush2.msra.mxu1 %v7261_v57  ;;  %v7315_v52 = vld [vmem:[#allocation8 + $0xa58] sm:$0xff]  ;;  %v7316_v53 = vld [vmem:[#allocation8 + $0x850] sm:$0xff] }
 0x327   :  { %2256 = vmatprep.subr.mxu0 %v7262_v25  ;;  %2345 = vmatprep.subr.mxu1 %v7263_v7  ;;  %v7317_v57 = vld [vmem:[#allocation8 + $0xa50] sm:$0xff]  ;;  %v7318_v25 = vld [vmem:[#allocation8 + $0x848] sm:$0xff] }
 0x328   :  { %2257 = vmatpush2.msra.mxu0 %v7264_v1  ;;  %2346 = vmatpush2.msra.mxu1 %v7265_v45  ;;  %v7319_v7 = vld [vmem:[#allocation8 + $0xa48] sm:$0xff]  ;;  %v7320_v1 = vld [vmem:[#allocation8 + $0x840] sm:$0xff] }
 0x329   :  { %2258 = vmatprep.subr.mxu0 %v7266_v54  ;;  %2347 = vmatprep.subr.mxu1 %v7267_v49  ;;  %v7321_v45 = vld [vmem:[#allocation8 + $0xa40] sm:$0xff]  ;;  %v7322_v54 = vld [vmem:[#allocation8 + $0x838] sm:$0xff] }
 0x32a   :  { %2259 = vmatpush2.msra.mxu0 %v7268_v61  ;;  %2348 = vmatpush2.msra.mxu1 %v7269_v58  ;;  %v7323_v49 = vld [vmem:[#allocation8 + $0xa38] sm:$0xff]  ;;  %v7324_v61 = vld [vmem:[#allocation8 + $0x830] sm:$0xff] }
 0x32b   :  { %2260 = vmatprep.subr.mxu0 %v7270_v56  ;;  %2349 = vmatprep.subr.mxu1 %v7271_v10  ;;  %v7325_v58 = vld [vmem:[#allocation8 + $0xa30] sm:$0xff]  ;;  %v7326_v56 = vld [vmem:[#allocation8 + $0x828] sm:$0xff] }
 0x32c   :  { %2261 = vmatpush2.msra.mxu0 %v7272_v0  ;;  %2350 = vmatpush2.msra.mxu1 %v7273_v55  ;;  %v7327_v10 = vld [vmem:[#allocation8 + $0xa28] sm:$0xff]  ;;  %v7328_v0 = vld [vmem:[#allocation8 + $0x820] sm:$0xff] }
 0x32d   :  { %2263 = vmatmul.mubr.f32.vlgmr.msra.gmra.mxu0 %v8902_v3  ;;  %2352 = vmatmul.mubr.f32.vlgmr.msra.gmra.mxu1 %v8902_v3  ;;  %v7329_v55 = vld [vmem:[#allocation8 + $0xa20] sm:$0xff] }
 0x32e   :  { %2376 = vmatprep.subr.mxu0 %v7274_v33  ;;  %2465 = vmatprep.subr.mxu1 %v7275_v63  ;;  %v7330_v33 = vld [vmem:[#allocation8 + $0x818] sm:$0xff] }
 0x32f   :  { %2268 = vmatprep.mubr.f32.mxu0 %v8908_v41  ;;  %2357 = vmatprep.mubr.f32.mxu1 %v8908_v41  ;;  %v7331_v63 = vld [vmem:[#allocation8 + $0xa18] sm:$0xff] }
 0x330   :  { %2377 = vmatpush1.msra.mxu0 %v7276_v16  ;;  %2466 = vmatpush1.msra.mxu1 %v7277_v51  ;;  %v7332_v16 = vld [vmem:[#allocation8 + $0x810] sm:$0xff] }
 0x331   :  { %2378 = vmatprep.subr.mxu0 %v7278_v39  ;;  %2467 = vmatprep.subr.mxu1 %v7279_v31  ;;  %v7333_v51 = vld [vmem:[#allocation8 + $0xa10] sm:$0xff]  ;;  %v7334_v39 = vld [vmem:[#allocation8 + $0x808] sm:$0xff] }
 0x332   :  { %2379 = vmatpush1.msra.mxu0 %v7280_v6  ;;  %2468 = vmatpush1.msra.mxu1 %v7281_v32  ;;  %v7335_v31 = vld [vmem:[#allocation8 + $0xa08] sm:$0xff]  ;;  %v7336_v6 = vld [vmem:[#allocation8 + $0x800] sm:$0xff] }
 0x333   :  { %2269 = vmatmul.mubr.f32.gmra.mxu0 %v8910_v11  ;;  %2358 = vmatmul.mubr.f32.gmra.mxu1 %v8910_v11  ;;  %v7337_v32 = vld [vmem:[#allocation8 + $0xa00] sm:$0xff] }
 0x334   :  { %2380 = vmatprep.subr.mxu0 %v7282_v21  ;;  %2469 = vmatprep.subr.mxu1 %v7283_v35  ;;  %v7338_v21 = vld [vmem:[#allocation8 + $0x9f8] sm:$0xff] }
 0x335   :  { %2274 = vmatprep.mubr.f32.mxu0 %v8914_v42  ;;  %2363 = vmatprep.mubr.f32.mxu1 %v8914_v42  ;;  %v7339_v35 = vld [vmem:[#allocation8 + $0xbf8] sm:$0xff] }
 0x336   :  { %2381 = vmatpush1.msra.mxu0 %v7284_v23  ;;  %2470 = vmatpush1.msra.mxu1 %v7285_v22  ;;  %v7340_v23 = vld [vmem:[#allocation8 + $0x9f0] sm:$0xff] }
 0x337   :  { %2382 = vmatprep.subr.mxu0 %v7286_v14  ;;  %2471 = vmatprep.subr.mxu1 %v7287_v9  ;;  %v7341_v22 = vld [vmem:[#allocation8 + $0xbf0] sm:$0xff]  ;;  %v7342_v14 = vld [vmem:[#allocation8 + $0x9e8] sm:$0xff] }
 0x338   :  { %2383 = vmatpush1.msra.mxu0 %v7288_v15  ;;  %2472 = vmatpush1.msra.mxu1 %v7289_v19  ;;  %v7343_v9 = vld [vmem:[#allocation8 + $0xbe8] sm:$0xff]  ;;  %v7344_v15 = vld [vmem:[#allocation8 + $0x9e0] sm:$0xff] }
 0x339   :  { %2275 = vmatmul.mubr.f32.gmra.mxu0 %v8918_v28  ;;  %2364 = vmatmul.mubr.f32.gmra.mxu1 %v8918_v28  ;;  %v7345_v19 = vld [vmem:[#allocation8 + $0xbe0] sm:$0xff] }
 0x33a   :  { %2384 = vmatprep.subr.mxu0 %v7290_v62  ;;  %2473 = vmatprep.subr.mxu1 %v7291_v38  ;;  %v7346_v62 = vld [vmem:[#allocation8 + $0x9d8] sm:$0xff] }
 0x33b   :  { %2280 = vmatprep.mubr.f32.mxu0 %v8922_v60  ;;  %2369 = vmatprep.mubr.f32.mxu1 %v8922_v60  ;;  %v7347_v38 = vld [vmem:[#allocation8 + $0xbd8] sm:$0xff] }
 0x33c   :  { %2385 = vmatpush1.msra.mxu0 %v7292_v12  ;;  %2474 = vmatpush1.msra.mxu1 %v7293_v29  ;;  %v7348_v12 = vld [vmem:[#allocation8 + $0x9d0] sm:$0xff] }
 0x33d   :  { %2386 = vmatprep.subr.mxu0 %v7294_v30  ;;  %2475 = vmatprep.subr.mxu1 %v7295_v59  ;;  %v7349_v29 = vld [vmem:[#allocation8 + $0xbd0] sm:$0xff]  ;;  %v7350_v30 = vld [vmem:[#allocation8 + $0x9c8] sm:$0xff] }
 0x33e   :  { %2387 = vmatpush1.msra.mxu0 %v7296_v4  ;;  %2476 = vmatpush1.msra.mxu1 %v7297_v27  ;;  %v7351_v59 = vld [vmem:[#allocation8 + $0xbc8] sm:$0xff]  ;;  %v7352_v4 = vld [vmem:[#allocation8 + $0x9c0] sm:$0xff] }
 0x33f   :  { %2281 = vmatmul.mubr.f32.gmra.mxu0 %v8926_v26  ;;  %2370 = vmatmul.mubr.f32.gmra.mxu1 %v8926_v26  ;;  %v7353_v27 = vld [vmem:[#allocation8 + $0xbc0] sm:$0xff] }
 0x340   :  { %2388 = vmatprep.subr.mxu0 %v7298_v36  ;;  %2477 = vmatprep.subr.mxu1 %v7299_v13  ;;  %v7354_v36 = vld [vmem:[#allocation8 + $0x9b8] sm:$0xff] }
 0x341   :  { %2389 = vmatpush1.msra.mxu0 %v7300_v40  ;;  %2440 = vmatprep.mubr.f32.mxu0 %v8899_v8  ;;  %v7355_v13 = vld [vmem:[#allocation8 + $0xbb8] sm:$0xff]  ;;  %v7356_v40 = vld [vmem:[#allocation8 + $0x9b0] sm:$0xff] }
 0x342   :  { %2478 = vmatpush1.msra.mxu1 %v7301_v20  ;;  %2529 = vmatprep.mubr.f32.mxu1 %v8899_v8  ;;  %v7357_v20 = vld [vmem:[#allocation8 + $0xbb0] sm:$0xff] }
 0x343   :  { %2390 = vmatprep.subr.mxu0 %v7302_v37  ;;  %2479 = vmatprep.subr.mxu1 %v7303_v18  ;;  %v7358_v37 = vld [vmem:[#allocation8 + $0x9a8] sm:$0xff] }
 0x344   :  { %2391 = vmatpush1.msra.mxu0 %v7304_v17  ;;  %2480 = vmatpush1.msra.mxu1 %v7305_v43  ;;  %v7359_v18 = vld [vmem:[#allocation8 + $0xba8] sm:$0xff]  ;;  %v7360_v17 = vld [vmem:[#allocation8 + $0x9a0] sm:$0xff] }
 0x345   :  { %2392 = vmatprep.subr.mxu0 %v7306_v24  ;;  %2481 = vmatprep.subr.mxu1 %v7307_v48  ;;  %v7361_v43 = vld [vmem:[#allocation8 + $0xba0] sm:$0xff]  ;;  %v7362_v24 = vld [vmem:[#allocation8 + $0x998] sm:$0xff] }
 0x346   :  { %2393 = vmatpush1.msra.mxu0 %v7308_v44  ;;  %2482 = vmatpush1.msra.mxu1 %v7309_v34  ;;  %v7363_v48 = vld [vmem:[#allocation8 + $0xb98] sm:$0xff]  ;;  %v7364_v44 = vld [vmem:[#allocation8 + $0x990] sm:$0xff] }
 0x347   :  { %2394 = vmatprep.subr.mxu0 %v7310_v5  ;;  %2483 = vmatprep.subr.mxu1 %v7311_v46  ;;  %v7365_v34 = vld [vmem:[#allocation8 + $0xb90] sm:$0xff]  ;;  %v7366_v5 = vld [vmem:[#allocation8 + $0x988] sm:$0xff] }
 0x348   :  { %2395 = vmatpush1.msra.mxu0 %v7312_v50  ;;  %2484 = vmatpush1.msra.mxu1 %v7313_v2  ;;  %v7367_v46 = vld [vmem:[#allocation8 + $0xb88] sm:$0xff]  ;;  %v7368_v50 = vld [vmem:[#allocation8 + $0x980] sm:$0xff] }
 0x349   :  { %2396 = vmatprep.subr.mxu0 %v7314_v47  ;;  %2485 = vmatprep.subr.mxu1 %v7315_v52  ;;  %v7369_v2 = vld [vmem:[#allocation8 + $0xb80] sm:$0xff]  ;;  %v7370_v47 = vld [vmem:[#allocation8 + $0x978] sm:$0xff] }
 0x34a   :  { %2397 = vmatpush1.msra.mxu0 %v7316_v53  ;;  %2486 = vmatpush1.msra.mxu1 %v7317_v57  ;;  %v7371_v52 = vld [vmem:[#allocation8 + $0xb78] sm:$0xff]  ;;  %v7372_v53 = vld [vmem:[#allocation8 + $0x970] sm:$0xff] }
 0x34b   :  { %2398 = vmatprep.subr.mxu0 %v7318_v25  ;;  %2487 = vmatprep.subr.mxu1 %v7319_v7  ;;  %v7373_v57 = vld [vmem:[#allocation8 + $0xb70] sm:$0xff]  ;;  %v7374_v25 = vld [vmem:[#allocation8 + $0x968] sm:$0xff] }
 0x34c   :  { %2399 = vmatpush1.msra.mxu0 %v7320_v1  ;;  %2488 = vmatpush1.msra.mxu1 %v7321_v45  ;;  %v7375_v7 = vld [vmem:[#allocation8 + $0xb68] sm:$0xff]  ;;  %v7376_v1 = vld [vmem:[#allocation8 + $0x960] sm:$0xff] }
 0x34d   :  { %2400 = vmatprep.subr.mxu0 %v7322_v54  ;;  %2489 = vmatprep.subr.mxu1 %v7323_v49  ;;  %v7377_v45 = vld [vmem:[#allocation8 + $0xb60] sm:$0xff]  ;;  %v7378_v54 = vld [vmem:[#allocation8 + $0x958] sm:$0xff] }
 0x34e   :  { %2401 = vmatpush1.msra.mxu0 %v7324_v61  ;;  %2490 = vmatpush1.msra.mxu1 %v7325_v58  ;;  %v7379_v49 = vld [vmem:[#allocation8 + $0xb58] sm:$0xff]  ;;  %v7380_v61 = vld [vmem:[#allocation8 + $0x950] sm:$0xff] }
 0x34f   :  { %2402 = vmatprep.subr.mxu0 %v7326_v56  ;;  %2491 = vmatprep.subr.mxu1 %v7327_v10  ;;  %v7381_v58 = vld [vmem:[#allocation8 + $0xb50] sm:$0xff]  ;;  %v7382_v56 = vld [vmem:[#allocation8 + $0x948] sm:$0xff] }
 0x350   :  { %2403 = vmatpush1.msra.mxu0 %v7328_v0  ;;  %2492 = vmatpush1.msra.mxu1 %v7329_v55  ;;  %v7383_v10 = vld [vmem:[#allocation8 + $0xb48] sm:$0xff]  ;;  %v7384_v0 = vld [vmem:[#allocation8 + $0x940] sm:$0xff] }
 0x351   :  { %2404 = vmatprep.subr.mxu0 %v7330_v33  ;;  %2493 = vmatprep.subr.mxu1 %v7331_v63  ;;  %v7385_v55 = vld [vmem:[#allocation8 + $0xb40] sm:$0xff]  ;;  %v7386_v33 = vld [vmem:[#allocation8 + $0x938] sm:$0xff] }
 0x352   :  { %2405 = vmatpush1.msra.mxu0 %v7332_v16  ;;  %2494 = vmatpush1.msra.mxu1 %v7333_v51  ;;  %v7387_v63 = vld [vmem:[#allocation8 + $0xb38] sm:$0xff]  ;;  %v7388_v16 = vld [vmem:[#allocation8 + $0x930] sm:$0xff] }
 0x353   :  { %2406 = vmatprep.subr.mxu0 %v7334_v39  ;;  %2495 = vmatprep.subr.mxu1 %v7335_v31  ;;  %v7389_v51 = vld [vmem:[#allocation8 + $0xb30] sm:$0xff]  ;;  %v7390_v39 = vld [vmem:[#allocation8 + $0x928] sm:$0xff] }
 0x354   :  { %2407 = vmatpush1.msra.mxu0 %v7336_v6  ;;  %2496 = vmatpush1.msra.mxu1 %v7337_v32  ;;  %v7391_v31 = vld [vmem:[#allocation8 + $0xb28] sm:$0xff]  ;;  %v7392_v6 = vld [vmem:[#allocation8 + $0x920] sm:$0xff] }
 0x355   :  { %2408 = vmatprep.subr.mxu0 %v7338_v21  ;;  %2497 = vmatprep.subr.mxu1 %v7339_v35  ;;  %v7393_v32 = vld [vmem:[#allocation8 + $0xb20] sm:$0xff]  ;;  %v7394_v21 = vld [vmem:[#allocation8 + $0x918] sm:$0xff] }
 0x356   :  { %2409 = vmatpush2.msra.mxu0 %v7340_v23  ;;  %2498 = vmatpush2.msra.mxu1 %v7341_v22  ;;  %v7395_v35 = vld [vmem:[#allocation8 + $0xb18] sm:$0xff]  ;;  %v7396_v23 = vld [vmem:[#allocation8 + $0x910] sm:$0xff] }
 0x357   :  { %2410 = vmatprep.subr.mxu0 %v7342_v14  ;;  %2499 = vmatprep.subr.mxu1 %v7343_v9  ;;  %v7397_v22 = vld [vmem:[#allocation8 + $0xb10] sm:$0xff]  ;;  %v7398_v14 = vld [vmem:[#allocation8 + $0x908] sm:$0xff] }
 0x358   :  { %2411 = vmatpush2.msra.mxu0 %v7344_v15  ;;  %2500 = vmatpush2.msra.mxu1 %v7345_v19  ;;  %v7399_v9 = vld [vmem:[#allocation8 + $0xb08] sm:$0xff]  ;;  %v7400_v15 = vld [vmem:[#allocation8 + $0x900] sm:$0xff] }
 0x359   :  { %2412 = vmatprep.subr.mxu0 %v7346_v62  ;;  %2501 = vmatprep.subr.mxu1 %v7347_v38  ;;  %v7401_v19 = vld [vmem:[#allocation8 + $0xb00] sm:$0xff]  ;;  %v7402_v62 = vld [vmem:[#allocation8 + $0xcf8] sm:$0xff] }
 0x35a   :  { %2413 = vmatpush2.msra.mxu0 %v7348_v12  ;;  %2502 = vmatpush2.msra.mxu1 %v7349_v29  ;;  %v7403_v38 = vld [vmem:[#allocation8 + $0xef8] sm:$0xff]  ;;  %v7404_v12 = vld [vmem:[#allocation8 + $0xcf0] sm:$0xff] }
 0x35b   :  { %2414 = vmatprep.subr.mxu0 %v7350_v30  ;;  %2503 = vmatprep.subr.mxu1 %v7351_v59  ;;  %v7405_v29 = vld [vmem:[#allocation8 + $0xef0] sm:$0xff]  ;;  %v7406_v30 = vld [vmem:[#allocation8 + $0xce8] sm:$0xff] }
 0x35c   :  { %2415 = vmatpush2.msra.mxu0 %v7352_v4  ;;  %2504 = vmatpush2.msra.mxu1 %v7353_v27  ;;  %v7407_v59 = vld [vmem:[#allocation8 + $0xee8] sm:$0xff]  ;;  %v7408_v4 = vld [vmem:[#allocation8 + $0xce0] sm:$0xff] }
 0x35d   :  { %2416 = vmatprep.subr.mxu0 %v7354_v36  ;;  %2505 = vmatprep.subr.mxu1 %v7355_v13  ;;  %v7409_v27 = vld [vmem:[#allocation8 + $0xee0] sm:$0xff]  ;;  %v7410_v36 = vld [vmem:[#allocation8 + $0xcd8] sm:$0xff] }
 0x35e   :  { %2417 = vmatpush2.msra.mxu0 %v7356_v40  ;;  %2506 = vmatpush2.msra.mxu1 %v7357_v20  ;;  %v7411_v13 = vld [vmem:[#allocation8 + $0xed8] sm:$0xff]  ;;  %v7412_v40 = vld [vmem:[#allocation8 + $0xcd0] sm:$0xff] }
 0x35f   :  { %2418 = vmatprep.subr.mxu0 %v7358_v37  ;;  %2507 = vmatprep.subr.mxu1 %v7359_v18  ;;  %v7413_v20 = vld [vmem:[#allocation8 + $0xed0] sm:$0xff]  ;;  %v7414_v37 = vld [vmem:[#allocation8 + $0xcc8] sm:$0xff] }
 0x360   :  { %2419 = vmatpush2.msra.mxu0 %v7360_v17  ;;  %2508 = vmatpush2.msra.mxu1 %v7361_v43  ;;  %v7415_v18 = vld [vmem:[#allocation8 + $0xec8] sm:$0xff]  ;;  %v7416_v17 = vld [vmem:[#allocation8 + $0xcc0] sm:$0xff] }
 0x361   :  { %2420 = vmatprep.subr.mxu0 %v7362_v24  ;;  %2509 = vmatprep.subr.mxu1 %v7363_v48  ;;  %v7417_v43 = vld [vmem:[#allocation8 + $0xec0] sm:$0xff]  ;;  %v7418_v24 = vld [vmem:[#allocation8 + $0xcb8] sm:$0xff] }
 0x362   :  { %2421 = vmatpush2.msra.mxu0 %v7364_v44  ;;  %2510 = vmatpush2.msra.mxu1 %v7365_v34  ;;  %v7419_v48 = vld [vmem:[#allocation8 + $0xeb8] sm:$0xff]  ;;  %v7420_v44 = vld [vmem:[#allocation8 + $0xcb0] sm:$0xff] }
 0x363   :  { %2422 = vmatprep.subr.mxu0 %v7366_v5  ;;  %2511 = vmatprep.subr.mxu1 %v7367_v46  ;;  %v7421_v34 = vld [vmem:[#allocation8 + $0xeb0] sm:$0xff]  ;;  %v7422_v5 = vld [vmem:[#allocation8 + $0xca8] sm:$0xff] }
 0x364   :  { %2423 = vmatpush2.msra.mxu0 %v7368_v50  ;;  %2512 = vmatpush2.msra.mxu1 %v7369_v2  ;;  %v7423_v46 = vld [vmem:[#allocation8 + $0xea8] sm:$0xff]  ;;  %v7424_v50 = vld [vmem:[#allocation8 + $0xca0] sm:$0xff] }
 0x365   :  { %2424 = vmatprep.subr.mxu0 %v7370_v47  ;;  %2513 = vmatprep.subr.mxu1 %v7371_v52  ;;  %v7425_v2 = vld [vmem:[#allocation8 + $0xea0] sm:$0xff]  ;;  %v7426_v47 = vld [vmem:[#allocation8 + $0xc98] sm:$0xff] }
 0x366   :  { %2425 = vmatpush2.msra.mxu0 %v7372_v53  ;;  %2514 = vmatpush2.msra.mxu1 %v7373_v57  ;;  %v7427_v52 = vld [vmem:[#allocation8 + $0xe98] sm:$0xff]  ;;  %v7428_v53 = vld [vmem:[#allocation8 + $0xc90] sm:$0xff] }
 0x367   :  { %2426 = vmatprep.subr.mxu0 %v7374_v25  ;;  %2515 = vmatprep.subr.mxu1 %v7375_v7  ;;  %v7429_v57 = vld [vmem:[#allocation8 + $0xe90] sm:$0xff]  ;;  %v7430_v25 = vld [vmem:[#allocation8 + $0xc88] sm:$0xff] }
 0x368   :  { %2427 = vmatpush2.msra.mxu0 %v7376_v1  ;;  %2516 = vmatpush2.msra.mxu1 %v7377_v45  ;;  %v7431_v7 = vld [vmem:[#allocation8 + $0xe88] sm:$0xff]  ;;  %v7432_v1 = vld [vmem:[#allocation8 + $0xc80] sm:$0xff] }
 0x369   :  { %2428 = vmatprep.subr.mxu0 %v7378_v54  ;;  %2517 = vmatprep.subr.mxu1 %v7379_v49  ;;  %v7433_v45 = vld [vmem:[#allocation8 + $0xe80] sm:$0xff]  ;;  %v7434_v54 = vld [vmem:[#allocation8 + $0xc78] sm:$0xff] }
 0x36a   :  { %2429 = vmatpush2.msra.mxu0 %v7380_v61  ;;  %2518 = vmatpush2.msra.mxu1 %v7381_v58  ;;  %v7435_v49 = vld [vmem:[#allocation8 + $0xe78] sm:$0xff]  ;;  %v7436_v61 = vld [vmem:[#allocation8 + $0xc70] sm:$0xff] }
 0x36b   :  { %2430 = vmatprep.subr.mxu0 %v7382_v56  ;;  %2519 = vmatprep.subr.mxu1 %v7383_v10  ;;  %v7437_v58 = vld [vmem:[#allocation8 + $0xe70] sm:$0xff]  ;;  %v7438_v56 = vld [vmem:[#allocation8 + $0xc68] sm:$0xff] }
 0x36c   :  { %2431 = vmatpush2.msra.mxu0 %v7384_v0  ;;  %2520 = vmatpush2.msra.mxu1 %v7385_v55  ;;  %v7439_v10 = vld [vmem:[#allocation8 + $0xe68] sm:$0xff]  ;;  %v7440_v0 = vld [vmem:[#allocation8 + $0xc60] sm:$0xff] }
 0x36d   :  { %2432 = vmatprep.subr.mxu0 %v7386_v33  ;;  %2521 = vmatprep.subr.mxu1 %v7387_v63  ;;  %v7441_v55 = vld [vmem:[#allocation8 + $0xe60] sm:$0xff]  ;;  %v7442_v33 = vld [vmem:[#allocation8 + $0xc58] sm:$0xff] }
 0x36e   :  { %2433 = vmatpush2.msra.mxu0 %v7388_v16  ;;  %2522 = vmatpush2.msra.mxu1 %v7389_v51  ;;  %v7443_v63 = vld [vmem:[#allocation8 + $0xe58] sm:$0xff]  ;;  %v7444_v16 = vld [vmem:[#allocation8 + $0xc50] sm:$0xff] }
 0x36f   :  { %2434 = vmatprep.subr.mxu0 %v7390_v39  ;;  %2523 = vmatprep.subr.mxu1 %v7391_v31  ;;  %v7445_v51 = vld [vmem:[#allocation8 + $0xe50] sm:$0xff]  ;;  %v7446_v39 = vld [vmem:[#allocation8 + $0xc48] sm:$0xff] }
 0x370   :  { %2435 = vmatpush2.msra.mxu0 %v7392_v6  ;;  %2524 = vmatpush2.msra.mxu1 %v7393_v32  ;;  %v7447_v31 = vld [vmem:[#allocation8 + $0xe48] sm:$0xff]  ;;  %v7448_v6 = vld [vmem:[#allocation8 + $0xc40] sm:$0xff] }
 0x371   :  { %2436 = vmatprep.subr.mxu0 %v7394_v21  ;;  %2525 = vmatprep.subr.mxu1 %v7395_v35  ;;  %v7449_v32 = vld [vmem:[#allocation8 + $0xe40] sm:$0xff]  ;;  %v7450_v21 = vld [vmem:[#allocation8 + $0xc38] sm:$0xff] }
 0x372   :  { %2437 = vmatpush2.msra.mxu0 %v7396_v23  ;;  %2526 = vmatpush2.msra.mxu1 %v7397_v22  ;;  %v7451_v35 = vld [vmem:[#allocation8 + $0xe38] sm:$0xff]  ;;  %v7452_v23 = vld [vmem:[#allocation8 + $0xc30] sm:$0xff] }
 0x373   :  { %2438 = vmatprep.subr.mxu0 %v7398_v14  ;;  %2527 = vmatprep.subr.mxu1 %v7399_v9  ;;  %v7453_v22 = vld [vmem:[#allocation8 + $0xe30] sm:$0xff]  ;;  %v7454_v14 = vld [vmem:[#allocation8 + $0xc28] sm:$0xff] }
 0x374   :  { %2439 = vmatpush2.msra.mxu0 %v7400_v15  ;;  %2528 = vmatpush2.msra.mxu1 %v7401_v19  ;;  %v7455_v9 = vld [vmem:[#allocation8 + $0xe28] sm:$0xff]  ;;  %v7456_v15 = vld [vmem:[#allocation8 + $0xc20] sm:$0xff] }
 0x375   :  { %2441 = vmatmul.mubr.f32.vlgmr.msra.gmra.mxu0 %v8902_v3  ;;  %2530 = vmatmul.mubr.f32.vlgmr.msra.gmra.mxu1 %v8902_v3  ;;  %v7457_v19 = vld [vmem:[#allocation8 + $0xe20] sm:$0xff] }
 0x376   :  { %2554 = vmatprep.subr.mxu0 %v7402_v62  ;;  %2643 = vmatprep.subr.mxu1 %v7403_v38  ;;  %v7458_v62 = vld [vmem:[#allocation8 + $0xc18] sm:$0xff] }
 0x377   :  { %2446 = vmatprep.mubr.f32.mxu0 %v8908_v41  ;;  %2535 = vmatprep.mubr.f32.mxu1 %v8908_v41  ;;  %v7459_v38 = vld [vmem:[#allocation8 + $0xe18] sm:$0xff] }
 0x378   :  { %2555 = vmatpush1.msra.mxu0 %v7404_v12  ;;  %2644 = vmatpush1.msra.mxu1 %v7405_v29  ;;  %v7460_v12 = vld [vmem:[#allocation8 + $0xc10] sm:$0xff] }
 0x379   :  { %2556 = vmatprep.subr.mxu0 %v7406_v30  ;;  %2645 = vmatprep.subr.mxu1 %v7407_v59  ;;  %v7461_v29 = vld [vmem:[#allocation8 + $0xe10] sm:$0xff]  ;;  %v7462_v30 = vld [vmem:[#allocation8 + $0xc08] sm:$0xff] }
 0x37a   :  { %2557 = vmatpush1.msra.mxu0 %v7408_v4  ;;  %2646 = vmatpush1.msra.mxu1 %v7409_v27  ;;  %v7463_v59 = vld [vmem:[#allocation8 + $0xe08] sm:$0xff]  ;;  %v7464_v4 = vld [vmem:[#allocation8 + $0xc00] sm:$0xff] }
 0x37b   :  { %2447 = vmatmul.mubr.f32.gmra.mxu0 %v8910_v11  ;;  %2536 = vmatmul.mubr.f32.gmra.mxu1 %v8910_v11  ;;  %v7465_v27 = vld [vmem:[#allocation8 + $0xe00] sm:$0xff] }
 0x37c   :  { %2558 = vmatprep.subr.mxu0 %v7410_v36  ;;  %2647 = vmatprep.subr.mxu1 %v7411_v13  ;;  %v7466_v36 = vld [vmem:[#allocation8 + $0xdf8] sm:$0xff] }
 0x37d   :  { %2452 = vmatprep.mubr.f32.mxu0 %v8914_v42  ;;  %2541 = vmatprep.mubr.f32.mxu1 %v8914_v42  ;;  %v7467_v13 = vld [vmem:[#allocation8 + $0xff8] sm:$0xff] }
 0x37e   :  { %2559 = vmatpush1.msra.mxu0 %v7412_v40  ;;  %2648 = vmatpush1.msra.mxu1 %v7413_v20  ;;  %v7468_v40 = vld [vmem:[#allocation8 + $0xdf0] sm:$0xff] }
 0x37f   :  { %2560 = vmatprep.subr.mxu0 %v7414_v37  ;;  %2649 = vmatprep.subr.mxu1 %v7415_v18  ;;  %v7469_v20 = vld [vmem:[#allocation8 + $0xff0] sm:$0xff]  ;;  %v7470_v37 = vld [vmem:[#allocation8 + $0xde8] sm:$0xff] }
 0x380   :  { %2561 = vmatpush1.msra.mxu0 %v7416_v17  ;;  %2650 = vmatpush1.msra.mxu1 %v7417_v43  ;;  %v7471_v18 = vld [vmem:[#allocation8 + $0xfe8] sm:$0xff]  ;;  %v7472_v17 = vld [vmem:[#allocation8 + $0xde0] sm:$0xff] }
 0x381   :  { %2453 = vmatmul.mubr.f32.gmra.mxu0 %v8918_v28  ;;  %2542 = vmatmul.mubr.f32.gmra.mxu1 %v8918_v28  ;;  %v7473_v43 = vld [vmem:[#allocation8 + $0xfe0] sm:$0xff] }
 0x382   :  { %2562 = vmatprep.subr.mxu0 %v7418_v24  ;;  %2651 = vmatprep.subr.mxu1 %v7419_v48  ;;  %v7474_v24 = vld [vmem:[#allocation8 + $0xdd8] sm:$0xff] }
 0x383   :  { %2458 = vmatprep.mubr.f32.mxu0 %v8922_v60  ;;  %2547 = vmatprep.mubr.f32.mxu1 %v8922_v60  ;;  %v7475_v48 = vld [vmem:[#allocation8 + $0xfd8] sm:$0xff] }
 0x384   :  { %2563 = vmatpush1.msra.mxu0 %v7420_v44  ;;  %2652 = vmatpush1.msra.mxu1 %v7421_v34  ;;  %v7476_v44 = vld [vmem:[#allocation8 + $0xdd0] sm:$0xff] }
 0x385   :  { %2564 = vmatprep.subr.mxu0 %v7422_v5  ;;  %2653 = vmatprep.subr.mxu1 %v7423_v46  ;;  %v7477_v34 = vld [vmem:[#allocation8 + $0xfd0] sm:$0xff]  ;;  %v7478_v5 = vld [vmem:[#allocation8 + $0xdc8] sm:$0xff] }
 0x386   :  { %2565 = vmatpush1.msra.mxu0 %v7424_v50  ;;  %2654 = vmatpush1.msra.mxu1 %v7425_v2  ;;  %v7479_v46 = vld [vmem:[#allocation8 + $0xfc8] sm:$0xff]  ;;  %v7480_v50 = vld [vmem:[#allocation8 + $0xdc0] sm:$0xff] }
 0x387   :  { %2459 = vmatmul.mubr.f32.gmra.mxu0 %v8926_v26  ;;  %2548 = vmatmul.mubr.f32.gmra.mxu1 %v8926_v26  ;;  %v7481_v2 = vld [vmem:[#allocation8 + $0xfc0] sm:$0xff] }
 0x388   :  { %2566 = vmatprep.subr.mxu0 %v7426_v47  ;;  %2655 = vmatprep.subr.mxu1 %v7427_v52  ;;  %v7482_v47 = vld [vmem:[#allocation8 + $0xdb8] sm:$0xff] }
 0x389   :  { %2567 = vmatpush1.msra.mxu0 %v7428_v53  ;;  %2618 = vmatprep.mubr.f32.mxu0 %v8899_v8  ;;  %v7483_v52 = vld [vmem:[#allocation8 + $0xfb8] sm:$0xff]  ;;  %v7484_v53 = vld [vmem:[#allocation8 + $0xdb0] sm:$0xff] }
 0x38a   :  { %2656 = vmatpush1.msra.mxu1 %v7429_v57  ;;  %2707 = vmatprep.mubr.f32.mxu1 %v8899_v8  ;;  %v7485_v57 = vld [vmem:[#allocation8 + $0xfb0] sm:$0xff] }
 0x38b   :  { %2568 = vmatprep.subr.mxu0 %v7430_v25  ;;  %2657 = vmatprep.subr.mxu1 %v7431_v7  ;;  %v7486_v25 = vld [vmem:[#allocation8 + $0xda8] sm:$0xff] }
 0x38c   :  { %2569 = vmatpush1.msra.mxu0 %v7432_v1  ;;  %2658 = vmatpush1.msra.mxu1 %v7433_v45  ;;  %v7487_v7 = vld [vmem:[#allocation8 + $0xfa8] sm:$0xff]  ;;  %v7488_v1 = vld [vmem:[#allocation8 + $0xda0] sm:$0xff] }
 0x38d   :  { %2570 = vmatprep.subr.mxu0 %v7434_v54  ;;  %2659 = vmatprep.subr.mxu1 %v7435_v49  ;;  %v7489_v45 = vld [vmem:[#allocation8 + $0xfa0] sm:$0xff]  ;;  %v7490_v54 = vld [vmem:[#allocation8 + $0xd98] sm:$0xff] }
 0x38e   :  { %2571 = vmatpush1.msra.mxu0 %v7436_v61  ;;  %2660 = vmatpush1.msra.mxu1 %v7437_v58  ;;  %v7491_v49 = vld [vmem:[#allocation8 + $0xf98] sm:$0xff]  ;;  %v7492_v61 = vld [vmem:[#allocation8 + $0xd90] sm:$0xff] }
 0x38f   :  { %2572 = vmatprep.subr.mxu0 %v7438_v56  ;;  %2661 = vmatprep.subr.mxu1 %v7439_v10  ;;  %v7493_v58 = vld [vmem:[#allocation8 + $0xf90] sm:$0xff]  ;;  %v7494_v56 = vld [vmem:[#allocation8 + $0xd88] sm:$0xff] }
 0x390   :  { %2573 = vmatpush1.msra.mxu0 %v7440_v0  ;;  %2662 = vmatpush1.msra.mxu1 %v7441_v55  ;;  %v7495_v10 = vld [vmem:[#allocation8 + $0xf88] sm:$0xff]  ;;  %v7496_v0 = vld [vmem:[#allocation8 + $0xd80] sm:$0xff] }
 0x391   :  { %2574 = vmatprep.subr.mxu0 %v7442_v33  ;;  %2663 = vmatprep.subr.mxu1 %v7443_v63  ;;  %v7497_v55 = vld [vmem:[#allocation8 + $0xf80] sm:$0xff]  ;;  %v7498_v33 = vld [vmem:[#allocation8 + $0xd78] sm:$0xff] }
 0x392   :  { %2575 = vmatpush1.msra.mxu0 %v7444_v16  ;;  %2664 = vmatpush1.msra.mxu1 %v7445_v51  ;;  %v7499_v63 = vld [vmem:[#allocation8 + $0xf78] sm:$0xff]  ;;  %v7500_v16 = vld [vmem:[#allocation8 + $0xd70] sm:$0xff] }
 0x393   :  { %2576 = vmatprep.subr.mxu0 %v7446_v39  ;;  %2665 = vmatprep.subr.mxu1 %v7447_v31  ;;  %v7501_v51 = vld [vmem:[#allocation8 + $0xf70] sm:$0xff]  ;;  %v7502_v39 = vld [vmem:[#allocation8 + $0xd68] sm:$0xff] }
 0x394   :  { %2577 = vmatpush1.msra.mxu0 %v7448_v6  ;;  %2666 = vmatpush1.msra.mxu1 %v7449_v32  ;;  %v7503_v31 = vld [vmem:[#allocation8 + $0xf68] sm:$0xff]  ;;  %v7504_v6 = vld [vmem:[#allocation8 + $0xd60] sm:$0xff] }
 0x395   :  { %2578 = vmatprep.subr.mxu0 %v7450_v21  ;;  %2667 = vmatprep.subr.mxu1 %v7451_v35  ;;  %v7505_v32 = vld [vmem:[#allocation8 + $0xf60] sm:$0xff]  ;;  %v7506_v21 = vld [vmem:[#allocation8 + $0xd58] sm:$0xff] }
 0x396   :  { %2579 = vmatpush1.msra.mxu0 %v7452_v23  ;;  %2668 = vmatpush1.msra.mxu1 %v7453_v22  ;;  %v7507_v35 = vld [vmem:[#allocation8 + $0xf58] sm:$0xff]  ;;  %v7508_v23 = vld [vmem:[#allocation8 + $0xd50] sm:$0xff] }
 0x397   :  { %2580 = vmatprep.subr.mxu0 %v7454_v14  ;;  %2669 = vmatprep.subr.mxu1 %v7455_v9  ;;  %v7509_v22 = vld [vmem:[#allocation8 + $0xf50] sm:$0xff]  ;;  %v7510_v14 = vld [vmem:[#allocation8 + $0xd48] sm:$0xff] }
 0x398   :  { %2581 = vmatpush1.msra.mxu0 %v7456_v15  ;;  %2670 = vmatpush1.msra.mxu1 %v7457_v19  ;;  %v7511_v9 = vld [vmem:[#allocation8 + $0xf48] sm:$0xff]  ;;  %v7512_v15 = vld [vmem:[#allocation8 + $0xd40] sm:$0xff] }
 0x399   :  { %2582 = vmatprep.subr.mxu0 %v7458_v62  ;;  %2671 = vmatprep.subr.mxu1 %v7459_v38  ;;  %v7513_v19 = vld [vmem:[#allocation8 + $0xf40] sm:$0xff]  ;;  %v7514_v62 = vld [vmem:[#allocation8 + $0xd38] sm:$0xff] }
 0x39a   :  { %2583 = vmatpush1.msra.mxu0 %v7460_v12  ;;  %2672 = vmatpush1.msra.mxu1 %v7461_v29  ;;  %v7515_v38 = vld [vmem:[#allocation8 + $0xf38] sm:$0xff]  ;;  %v7516_v12 = vld [vmem:[#allocation8 + $0xd30] sm:$0xff] }
 0x39b   :  { %2584 = vmatprep.subr.mxu0 %v7462_v30  ;;  %2673 = vmatprep.subr.mxu1 %v7463_v59  ;;  %v7517_v29 = vld [vmem:[#allocation8 + $0xf30] sm:$0xff]  ;;  %v7518_v30 = vld [vmem:[#allocation8 + $0xd28] sm:$0xff] }
 0x39c   :  { %2585 = vmatpush1.msra.mxu0 %v7464_v4  ;;  %2674 = vmatpush1.msra.mxu1 %v7465_v27  ;;  %v7519_v59 = vld [vmem:[#allocation8 + $0xf28] sm:$0xff]  ;;  %v7520_v4 = vld [vmem:[#allocation8 + $0xd20] sm:$0xff] }
 0x39d   :  { %2586 = vmatprep.subr.mxu0 %v7466_v36  ;;  %2675 = vmatprep.subr.mxu1 %v7467_v13  ;;  %v7521_v27 = vld [vmem:[#allocation8 + $0xf20] sm:$0xff]  ;;  %v7522_v36 = vld [vmem:[#allocation8 + $0xd18] sm:$0xff] }
 0x39e   :  { %2587 = vmatpush2.msra.mxu0 %v7468_v40  ;;  %2676 = vmatpush2.msra.mxu1 %v7469_v20  ;;  %v7523_v13 = vld [vmem:[#allocation8 + $0xf18] sm:$0xff]  ;;  %v7524_v40 = vld [vmem:[#allocation8 + $0xd10] sm:$0xff] }
 0x39f   :  { %2588 = vmatprep.subr.mxu0 %v7470_v37  ;;  %2677 = vmatprep.subr.mxu1 %v7471_v18  ;;  %v7525_v20 = vld [vmem:[#allocation8 + $0xf10] sm:$0xff]  ;;  %v7526_v37 = vld [vmem:[#allocation8 + $0xd08] sm:$0xff] }
 0x3a0   :  { %2589 = vmatpush2.msra.mxu0 %v7472_v17  ;;  %2678 = vmatpush2.msra.mxu1 %v7473_v43  ;;  %v7527_v18 = vld [vmem:[#allocation8 + $0xf08] sm:$0xff]  ;;  %v7528_v17 = vld [vmem:[#allocation8 + $0xd00] sm:$0xff] }
 0x3a1   :  { %2590 = vmatprep.subr.mxu0 %v7474_v24  ;;  %2679 = vmatprep.subr.mxu1 %v7475_v48  ;;  %v7529_v43 = vld [vmem:[#allocation8 + $0xf00] sm:$0xff]  ;;  %v7530_v24 = vld [vmem:[#allocation8 + $0x10f8] sm:$0xff]  ;;  %v7531_v48 = vld [vmem:[#allocation8 + $0x10f0] sm:$0xff] }
 0x3a2   :  { %2591 = vmatpush2.msra.mxu0 %v7476_v44  ;;  %2680 = vmatpush2.msra.mxu1 %v7477_v34  ;;  %v7532_v44 = vld [vmem:[#allocation8 + $0x10e8] sm:$0xff]  ;;  %v7533_v34 = vld [vmem:[#allocation8 + $0x10e0] sm:$0xff] }
 0x3a3   :  { %2592 = vmatprep.subr.mxu0 %v7478_v5  ;;  %2681 = vmatprep.subr.mxu1 %v7479_v46  ;;  %v7534_v5 = vld [vmem:[#allocation8 + $0x10d8] sm:$0xff]  ;;  %v7535_v46 = vld [vmem:[#allocation8 + $0x10d0] sm:$0xff] }
 0x3a4   :  { %2593 = vmatpush2.msra.mxu0 %v7480_v50  ;;  %2682 = vmatpush2.msra.mxu1 %v7481_v2  ;;  %v7536_v50 = vld [vmem:[#allocation8 + $0x10c8] sm:$0xff]  ;;  %v7537_v2 = vld [vmem:[#allocation8 + $0x10c0] sm:$0xff] }
 0x3a5   :  { %2594 = vmatprep.subr.mxu0 %v7482_v47  ;;  %2683 = vmatprep.subr.mxu1 %v7483_v52  ;;  %v7538_v47 = vld [vmem:[#allocation8 + $0x10b8] sm:$0xff]  ;;  %v7539_v52 = vld [vmem:[#allocation8 + $0x10b0] sm:$0xff] }
 0x3a6   :  { %2595 = vmatpush2.msra.mxu0 %v7484_v53  ;;  %2684 = vmatpush2.msra.mxu1 %v7485_v57  ;;  %v7540_v53 = vld [vmem:[#allocation8 + $0x10a8] sm:$0xff]  ;;  %v7541_v57 = vld [vmem:[#allocation8 + $0x10a0] sm:$0xff] }
 0x3a7   :  { %2596 = vmatprep.subr.mxu0 %v7486_v25  ;;  %2685 = vmatprep.subr.mxu1 %v7487_v7  ;;  %v7542_v25 = vld [vmem:[#allocation8 + $0x1098] sm:$0xff]  ;;  %v7543_v7 = vld [vmem:[#allocation8 + $0x1090] sm:$0xff] }
 0x3a8   :  { %2597 = vmatpush2.msra.mxu0 %v7488_v1  ;;  %2686 = vmatpush2.msra.mxu1 %v7489_v45  ;;  %v7544_v1 = vld [vmem:[#allocation8 + $0x1088] sm:$0xff]  ;;  %v7545_v45 = vld [vmem:[#allocation8 + $0x1080] sm:$0xff] }
 0x3a9   :  { %2598 = vmatprep.subr.mxu0 %v7490_v54  ;;  %2687 = vmatprep.subr.mxu1 %v7491_v49  ;;  %v8981_v54 = vpop.f32.mrf.mxu0  ;;  %v8983_v49 = vpop.f32.mrf.mxu1 }
 0x3aa   :  { %2599 = vmatpush2.msra.mxu0 %v7492_v61  ;;  %2688 = vmatpush2.msra.mxu1 %v7493_v58  ;;  %v7546_v61 = vld [vmem:[#allocation8 + $0x1078] sm:$0xff]  ;;  %v7547_v58 = vld [vmem:[#allocation8 + $0x1070] sm:$0xff] }
 0x3ab   :  { %2600 = vmatprep.subr.mxu0 %v7494_v56  ;;  %2689 = vmatprep.subr.mxu1 %v7495_v10  ;;  %v7548_v56 = vld [vmem:[#allocation8 + $0x1068] sm:$0xff]  ;;  %v7549_v10 = vld [vmem:[#allocation8 + $0x1060] sm:$0xff] }
 0x3ac   :  { %2601 = vmatpush2.msra.mxu0 %v7496_v0  ;;  %2690 = vmatpush2.msra.mxu1 %v7497_v55  ;;  %v8985_v0 = vpop.f32.mrf.mxu0  ;;  %v8987_v55 = vpop.f32.mrf.mxu1 }
 0x3ad   :  { %2602 = vmatprep.subr.mxu0 %v7498_v33  ;;  %2691 = vmatprep.subr.mxu1 %v7499_v63  ;;  %v7551_v33 = vld [vmem:[#allocation8 + $0x1050] sm:$0xff]  ;;  %v7552_v63 = vld [vmem:[#allocation8 + $0x1048] sm:$0xff] }
 0x3ae   :  { %2603 = vmatpush2.msra.mxu0 %v7500_v16  ;;  %2692 = vmatpush2.msra.mxu1 %v7501_v51  ;;  %v7553_v16 = vld [vmem:[#allocation8 + $0x1040] sm:$0xff]  ;;  %v8989_v51 = vpop.f32.mrf.mxu0 }
 0x3af   :  { %2604 = vmatprep.subr.mxu0 %v7502_v39  ;;  %2693 = vmatprep.subr.mxu1 %v7503_v31  ;;  %v8991_v39 = vpop.f32.mrf.mxu1  ;;  %v7554_v31 = vld [vmem:[#allocation8 + $0x1038] sm:$0xff] }
 0x3b0   :  { %2605 = vmatpush2.msra.mxu0 %v7504_v6  ;;  %2694 = vmatpush2.msra.mxu1 %v7505_v32  ;;  %v7555_v6 = vld [vmem:[#allocation8 + $0x1030] sm:$0xff]  ;;  %v7556_v32 = vld [vmem:[#allocation8 + $0x1028] sm:$0xff] }
 0x3b1   :  { %2606 = vmatprep.subr.mxu0 %v7506_v21  ;;  %2695 = vmatprep.subr.mxu1 %v7507_v35  ;;  %v7557_v21 = vld [vmem:[#allocation8 + $0x1020] sm:$0xff]  ;;  %v8993_v35 = vpop.f32.mrf.mxu0 }
 0x3b2   :  { %2607 = vmatpush2.msra.mxu0 %v7508_v23  ;;  %2696 = vmatpush2.msra.mxu1 %v7509_v22  ;;  %v8995_v23 = vpop.f32.mrf.mxu1  ;;  %v7558_v22 = vld [vmem:[#allocation8 + $0x1018] sm:$0xff] }
 0x3b3   :  { %2608 = vmatprep.subr.mxu0 %v7510_v14  ;;  %2697 = vmatprep.subr.mxu1 %v7511_v9  ;;  %v7559_v14 = vld [vmem:[#allocation8 + $0x1010] sm:$0xff]  ;;  %v7560_v9 = vld [vmem:[#allocation8 + $0x1008] sm:$0xff] }
 0x3b4   :  { %2609 = vmatpush2.msra.mxu0 %v7512_v15  ;;  %2698 = vmatpush2.msra.mxu1 %v7513_v19  ;;  %v7561_v15 = vld [vmem:[#allocation8 + $0x1000] sm:$0xff]  ;;  %v8997_v19 = vpop.f32.mrf.mxu0 }
 0x3b5   :  { %2610 = vmatprep.subr.mxu0 %v7514_v62  ;;  %2699 = vmatprep.subr.mxu1 %v7515_v38  ;;  %v8999_v62 = vpop.f32.mrf.mxu1  ;;  %v7562_v38 = vld [vmem:[#allocation8 + $0x11f8] sm:$0xff] }
 0x3b6   :  { %2611 = vmatpush2.msra.mxu0 %v7516_v12  ;;  %2700 = vmatpush2.msra.mxu1 %v7517_v29  ;;  %v7563_v12 = vld [vmem:[#allocation8 + $0x11f0] sm:$0xff]  ;;  %v7564_v29 = vld [vmem:[#allocation8 + $0x11e8] sm:$0xff] }
 0x3b7   :  { %2612 = vmatprep.subr.mxu0 %v7518_v30  ;;  %2701 = vmatprep.subr.mxu1 %v7519_v59  ;;  %v7565_v30 = vld [vmem:[#allocation8 + $0x11e0] sm:$0xff]  ;;  %v9001_v59 = vpop.f32.mrf.mxu0 }
 0x3b8   :  { %2613 = vmatpush2.msra.mxu0 %v7520_v4  ;;  %2702 = vmatpush2.msra.mxu1 %v7521_v27  ;;  %v9003_v4 = vpop.f32.mrf.mxu1  ;;  %v7566_v27 = vld [vmem:[#allocation8 + $0x11d8] sm:$0xff] }
 0x3b9   :  { %2614 = vmatprep.subr.mxu0 %v7522_v36  ;;  %2703 = vmatprep.subr.mxu1 %v7523_v13  ;;  %v7567_v36 = vld [vmem:[#allocation8 + $0x11d0] sm:$0xff]  ;;  %v7568_v13 = vld [vmem:[#allocation8 + $0x11c8] sm:$0xff] }
 0x3ba   :  { %2615 = vmatpush2.msra.mxu0 %v7524_v40  ;;  %2704 = vmatpush2.msra.mxu1 %v7525_v20  ;;  %v7569_v40 = vld [vmem:[#allocation8 + $0x11c0] sm:$0xff]  ;;  %v9005_v20 = vpop.f32.mrf.mxu0 }
 0x3bb   :  { %2616 = vmatprep.subr.mxu0 %v7526_v37  ;;  %2705 = vmatprep.subr.mxu1 %v7527_v18  ;;  %v9007_v37 = vpop.f32.mrf.mxu1  ;;  %v7570_v18 = vld [vmem:[#allocation8 + $0x11b8] sm:$0xff] }
 0x3bc   :  { %2617 = vmatpush2.msra.mxu0 %v7528_v17  ;;  %2706 = vmatpush2.msra.mxu1 %v7529_v43  ;;  %v7571_v17 = vld [vmem:[#allocation8 + $0x11b0] sm:$0xff]  ;;  %v7572_v43 = vld [vmem:[#allocation8 + $0x11a8] sm:$0xff] }
 0x3bd   :  { %2619 = vmatmul.mubr.f32.vlgmr.msra.gmra.mxu0 %v8902_v3  ;;  %2708 = vmatmul.mubr.f32.vlgmr.msra.gmra.mxu1 %v8902_v3 }
 0x3be   :  { %2732 = vmatprep.subr.mxu0 %v7530_v24  ;;  %2624 = vmatprep.mubr.f32.mxu0 %v8908_v41  ;;  %v7573_v24 = vld [vmem:[#allocation8 + $0x11a0] sm:$0xff] }
 0x3bf   :  { %2713 = vmatprep.mubr.f32.mxu1 %v8908_v41  ;;  %2733 = vmatpush1.msra.mxu0 %v7531_v48  ;;  %v9009_v48 = vpop.f32.mrf.mxu0 }
 0x3c0   :  { %2734 = vmatprep.subr.mxu0 %v7532_v44  ;;  %v9011_v44 = vpop.f32.mrf.mxu1 }
 0x3c1   :  { %2735 = vmatpush1.msra.mxu0 %v7533_v34  ;;  %2714 = vmatmul.mubr.f32.gmra.mxu1 %v8910_v11  ;;  %v7574_v34 = vld [vmem:[#allocation8 + $0x1198] sm:$0xff] }
 0x3c2   :  { %2625 = vmatmul.mubr.f32.gmra.mxu0 %v8910_v11  ;;  %2736 = vmatprep.subr.mxu0 %v7534_v5  ;;  %v7575_v5 = vld [vmem:[#allocation8 + $0x1190] sm:$0xff] }
 0x3c3   :  { %2630 = vmatprep.mubr.f32.mxu0 %v8914_v42  ;;  %2719 = vmatprep.mubr.f32.mxu1 %v8914_v42 }
 0x3c4   :  { %2737 = vmatpush1.msra.mxu0 %v7535_v46  ;;  %v7576_v46 = vld [vmem:[#allocation8 + $0x1188] sm:$0xff] }
 0x3c5   :  { %2738 = vmatprep.subr.mxu0 %v7536_v50  ;;  %2720 = vmatmul.mubr.f32.gmra.mxu1 %v8918_v28 }
 0x3c6   :  { %2739 = vmatpush1.msra.mxu0 %v7537_v2  ;;  %2725 = vmatprep.mubr.f32.mxu1 %v8922_v60 }
 0x3c7   :  { %2631 = vmatmul.mubr.f32.gmra.mxu0 %v8918_v28  ;;  %2740 = vmatprep.subr.mxu0 %v7538_v47  ;;  %v7577_v47 = vld [vmem:[#allocation8 + $0x1180] sm:$0xff] }
 0x3c8   :  { %2636 = vmatprep.mubr.f32.mxu0 %v8922_v60  ;;  %2741 = vmatpush1.msra.mxu0 %v7539_v52  ;;  %v7578_v52 = vld [vmem:[#allocation8 + $0x1178] sm:$0xff] }
 0x3c9   :  { %2742 = vmatprep.subr.mxu0 %v7540_v53  ;;  %2726 = vmatmul.mubr.f32.gmra.mxu1 %v8926_v26 }
 0x3ca   :  { %2743 = vmatpush1.msra.mxu0 %v7541_v57  ;;  %v7579_v57 = vld [vmem:[#allocation8 + $0x1170] sm:$0xff] }
 0x3cb   :  { %2637 = vmatmul.mubr.f32.gmra.mxu0 %v8926_v26  ;;  %2744 = vmatprep.subr.mxu0 %v7542_v25  ;;  %v7580_v25 = vld [vmem:[#allocation8 + $0x1168] sm:$0xff] }
 0x3cc   :  { %2745 = vmatpush1.msra.mxu0 %v7543_v7  ;;  %2796 = vmatprep.mubr.f32.mxu0 %v8899_v8  ;;  %v7550_v8 = vld [vmem:[#allocation8 + $0x1058] sm:$0xff] }
 0x3cd   :  { %2746 = vmatprep.subr.mxu0 %v7544_v1  ;;  %v7581_v1 = vld [vmem:[#allocation8 + $0x1160] sm:$0xff] }
 0x3ce   :  { %2747 = vmatpush1.msra.mxu0 %v7545_v45  ;;  %v7582_v45 = vld [vmem:[#allocation8 + $0x1158] sm:$0xff] }
 0x3cf   :  { %2748 = vmatprep.subr.mxu0 %v7546_v61 }
 0x3d0   :  { %2749 = vmatpush1.msra.mxu0 %v7547_v58  ;;  %v7583_v58 = vld [vmem:[#allocation8 + $0x1150] sm:$0xff] }
 0x3d1   :  { %2750 = vmatprep.subr.mxu0 %v7548_v56  ;;  %v7584_v56 = vld [vmem:[#allocation8 + $0x1148] sm:$0xff] }
 0x3d2   :  { %2751 = vmatpush1.msra.mxu0 %v7549_v10 }
 0x3d3   :  { %2752 = vmatprep.subr.mxu0 %v7550_v8 }
 0x3d4   :  { %2753 = vmatpush1.msra.mxu0 %v7551_v33  ;;  %v7585_v33 = vld [vmem:[#allocation8 + $0x1140] sm:$0xff] }
 0x3d5   :  { %2754 = vmatprep.subr.mxu0 %v7552_v63  ;;  %v7586_v63 = vld [vmem:[#allocation8 + $0x1138] sm:$0xff] }
 0x3d6   :  { %2755 = vmatpush1.msra.mxu0 %v7553_v16  ;;  %v7587_v16 = vld [vmem:[#allocation8 + $0x1130] sm:$0xff] }
 0x3d7   :  { %2756 = vmatprep.subr.mxu0 %v7554_v31  ;;  %v7588_v31 = vld [vmem:[#allocation8 + $0x1128] sm:$0xff] }
 0x3d8   :  { %2757 = vmatpush1.msra.mxu0 %v7555_v6 }
 0x3d9   :  { %2758 = vmatprep.subr.mxu0 %v7556_v32 }
 0x3da   :  { %2759 = vmatpush1.msra.mxu0 %v7557_v21  ;;  %v7589_v21 = vld [vmem:[#allocation8 + $0x1120] sm:$0xff] }
 0x3db   :  { %2760 = vmatprep.subr.mxu0 %v7558_v22  ;;  %v7590_v22 = vld [vmem:[#allocation8 + $0x1118] sm:$0xff] }
 0x3dc   :  { %2761 = vmatpush1.msra.mxu0 %v7559_v14 }
 0x3dd   :  { %2762 = vmatprep.subr.mxu0 %v7560_v9  ;;  %v7591_v9 = vld [vmem:[#allocation8 + $0x1110] sm:$0xff] }
 0x3de   :  { %2763 = vmatpush1.msra.mxu0 %v7561_v15  ;;  %v7592_v15 = vld [vmem:[#allocation8 + $0x1108] sm:$0xff] }
 0x3df   :  { %2764 = vmatprep.subr.mxu0 %v7562_v38 }
 0x3e0   :  { %2765 = vmatpush2.msra.mxu0 %v7563_v12  ;;  %v7593_v12 = vld [vmem:[#allocation8 + $0x1100] sm:$0xff] }
 0x3e1   :  { %2766 = vmatprep.subr.mxu0 %v7564_v29 }
 0x3e2   :  { %2767 = vmatpush2.msra.mxu0 %v7565_v30 }
 0x3e3   :  { %2768 = vmatprep.subr.mxu0 %v7566_v27 }
 0x3e4   :  { %2769 = vmatpush2.msra.mxu0 %v7567_v36 }
 0x3e5   :  { %2770 = vmatprep.subr.mxu0 %v7568_v13 }
 0x3e6   :  { %2771 = vmatpush2.msra.mxu0 %v7569_v40 }
 0x3e7   :  { %2772 = vmatprep.subr.mxu0 %v7570_v18 }
 0x3e8   :  { %2773 = vmatpush2.msra.mxu0 %v7571_v17 }
 0x3e9   :  { %2774 = vmatprep.subr.mxu0 %v7572_v43 }
 0x3ea   :  { %2775 = vmatpush2.msra.mxu0 %v7573_v24 }
 0x3eb   :  { %2776 = vmatprep.subr.mxu0 %v7574_v34 }
 0x3ec   :  { %2777 = vmatpush2.msra.mxu0 %v7575_v5 }
 0x3ed   :  { %2778 = vmatprep.subr.mxu0 %v7576_v46  ;;  %v9013_v50 = vpop.f32.mrf.mxu0  ;;  %v2353_v2 = vpop.f32.mrf.mxu1 }
 0x3ee   :  { %2779 = vmatpush2.msra.mxu0 %v7577_v47 }
 0x3ef   :  { %2780 = vmatprep.subr.mxu0 %v7578_v52  ;;  %v2355_v53 = vpop.f32.mrf.mxu1  ;;  %v2266_v7 = vpop.f32.mrf.mxu0  ;;  %v2821_v52 = vld [vmem:[#allocation5] sm:$0xff] }
 0x3f0   :  { %2781 = vmatpush2.msra.mxu0 %v7579_v57  ;;  %v2824_v57 = vld [vmem:[#allocation5 + $0x18] sm:$0xff] }
 0x3f1   :  { %2782 = vmatprep.subr.mxu0 %v7580_v25  ;;  %v2828_v25 = vld [vmem:[#allocation5 + $0x38] sm:$0xff] }
 0x3f2   :  { %2783 = vmatpush2.msra.mxu0 %v7581_v1  ;;  %v2831_v1 = vld [vmem:[#allocation5 + $0x50] sm:$0xff] }
 0x3f3   :  { %2784 = vmatprep.subr.mxu0 %v7582_v45  ;;  %v2359_v61 = vpop.f32.mrf.mxu1  ;;  %v2270_v10 = vpop.f32.mrf.mxu0  ;;  %v2830_v45 = vld [vmem:[#allocation5 + $0x48] sm:$0xff] }
 0x3f4   :  { %2785 = vmatpush2.msra.mxu0 %v7583_v58 }
 0x3f5   :  { %2786 = vmatprep.subr.mxu0 %v7584_v56  ;;  %v2361_v8 = vpop.f32.mrf.mxu1  ;;  %v2272_v6 = vpop.f32.mrf.mxu0 }
 0x3f6   :  { %2787 = vmatpush2.msra.mxu0 %v7585_v33 }
 0x3f7   :  { %2788 = vmatprep.subr.mxu0 %v7586_v63 }
 0x3f8   :  { %2789 = vmatpush2.msra.mxu0 %v7587_v16 }
 0x3f9   :  { %2790 = vmatprep.subr.mxu0 %v7588_v31  ;;  %v2365_v32 = vpop.f32.mrf.mxu1  ;;  %v2276_v38 = vpop.f32.mrf.mxu0  ;;  %v2823_v31 = vld [vmem:[#allocation5 + $0x10] sm:$0xff] }
 0x3fa   :  { %2791 = vmatpush2.msra.mxu0 %v7589_v21  ;;  %v2832_v21 = vld [vmem:[#allocation5 + $0x58] sm:$0xff] }
 0x3fb   :  { %2792 = vmatprep.subr.mxu0 %v7590_v22  ;;  %v2367_v14 = vpop.f32.mrf.mxu1  ;;  %v2278_v30 = vpop.f32.mrf.mxu0 }
 0x3fc   :  { %2793 = vmatpush2.msra.mxu0 %v7591_v9 }
 0x3fd   :  { %2794 = vmatprep.subr.mxu0 %v7592_v15 }
 0x3fe   :  { %2795 = vmatpush2.msra.mxu0 %v7593_v12 }
 0x3ff   :  { %2797 = vmatmul.mubr.f32.vlgmr.msra.gmra.mxu0 %v8902_v3  ;;  %v2371_v29 = vpop.f32.mrf.mxu1  ;;  %v2282_v36 = vpop.f32.mrf.mxu0 }
 0x400   :  { %2802 = vmatprep.mubr.f32.mxu0 %v8908_v41  ;;  %v10035_v41 = vmov 0.0  }
 0x401   :  { %v2373_v27 = vpop.f32.mrf.mxu1  ;;  %v2284_v3 = vpop.f32.mrf.mxu0 }
 0x402   :  { %2870 = vmatprep.subr.mxu1 %v2373_v27 }
 0x403   :  { %2803 = vmatmul.mubr.f32.gmra.mxu0 %v8910_v11  ;;  %2871 = vmatpush1.msra.mxu1 %v2371_v29  ;;  %v2822_v11 = vld [vmem:[#allocation5 + $0x8] sm:$0xff] }
 0x404   :  { %2808 = vmatprep.mubr.f32.mxu0 %v8914_v42  ;;  %2872 = vmatprep.subr.mxu1 %v2367_v14 }
 0x405   :  { %2873 = vmatpush1.msra.mxu1 %v2365_v32  ;;  %2934 = vmatprep.mubr.f32.mxu1 %v2822_v11  ;;  %v2829_v32 = vld [vmem:[#allocation5 + $0x40] sm:$0xff]  ;;  %v2855_v11 = vpop.permute.xlu0 %2854 }
 0x406   :  { %2874 = vmatprep.subr.mxu1 %v2361_v8 }
 0x407   :  { %2809 = vmatmul.mubr.f32.gmra.mxu0 %v8918_v28  ;;  %2875 = vmatpush1.msra.mxu1 %v2359_v61 }
 0x408   :  { %2814 = vmatprep.mubr.f32.mxu0 %v8922_v60  ;;  %2876 = vmatprep.subr.mxu1 %v2355_v53  ;;  %v2825_v53 = vld [vmem:[#allocation5 + $0x20] sm:$0xff] }
 0x409   :  { %2877 = vmatpush1.msra.mxu1 %v2353_v2 }
 0x40a   :  { %2878 = vmatprep.subr.mxu1 %v2284_v3 }
 0x40b   :  { %2815 = vmatmul.mubr.f32.gmra.mxu0 %v8926_v26  ;;  %2879 = vmatpush1.msra.mxu1 %v2282_v36 }
 0x40c   :  { %2880 = vmatprep.subr.mxu1 %v2278_v30  ;;  %3023 = vmatprep.mubr.f32.mxu0 %v10035_v41 }
 0x40d   :  { %2881 = vmatpush1.msra.mxu1 %v2276_v38 }
 0x40e   :  { %2882 = vmatprep.subr.mxu1 %v2272_v6  ;;  %v2826_v6 = vld [vmem:[#allocation5 + $0x28] sm:$0xff] }
 0x40f   :  { %2883 = vmatpush1.msra.mxu1 %v2270_v10 }
 0x410   :  { %2884 = vmatprep.subr.mxu1 %v2266_v7  ;;  %v2827_v7 = vld [vmem:[#allocation5 + $0x30] sm:$0xff] }
 0x411   :  { %2885 = vmatpush1.msra.mxu1 %v9013_v50 }
 0x412   :  { %2886 = vmatprep.subr.mxu1 %v9011_v44 }
 0x413   :  { %2887 = vmatpush1.msra.mxu1 %v9007_v37 }
 0x414   :  { %2888 = vmatprep.subr.mxu1 %v9003_v4 }
 0x415   :  { %2889 = vmatpush1.msra.mxu1 %v8999_v62 }
 0x416   :  { %2890 = vmatprep.subr.mxu1 %v8995_v23 }
 0x417   :  { %2891 = vmatpush1.msra.mxu1 %v8991_v39 }
 0x418   :  { %2892 = vmatprep.subr.mxu1 %v8987_v55 }
 0x419   :  { %2893 = vmatpush1.msra.mxu1 %v8983_v49 }
 0x41a   :  { %2894 = vmatprep.subr.mxu1 %v9009_v48 }
 0x41b   :  { %2895 = vmatpush1.msra.mxu1 %v9005_v20 }
 0x41c   :  { %2896 = vmatprep.subr.mxu1 %v9001_v59 }
 0x41d   :  { %2897 = vmatpush1.msra.mxu1 %v8997_v19 }
 0x41e   :  { %2898 = vmatprep.subr.mxu1 %v8993_v35 }
 0x41f   :  { %2899 = vmatpush1.msra.mxu1 %v8989_v51 }
 0x420   :  { %2900 = vmatprep.subr.mxu1 %v8985_v0 }
 0x421   :  { %2901 = vmatpush1.msra.mxu1 %v8981_v54 }
 0x435   :  { %v9040_v42 = vpop.f32.mrf.mxu0  ;;  %v2531_v28 = vpop.f32.mrf.mxu1 }
 0x437   :  { %v2444_v60 = vpop.f32.mrf.mxu0  ;;  %v2533_v26 = vpop.f32.mrf.mxu1 }
 0x43b   :  { %v2448_v49 = vpop.f32.mrf.mxu0  ;;  %v2537_v55 = vpop.f32.mrf.mxu1 }
 0x43d   :  { %v2450_v39 = vpop.f32.mrf.mxu0  ;;  %v2539_v23 = vpop.f32.mrf.mxu1 }
 0x441   :  { %v2454_v19 = vpop.f32.mrf.mxu0  ;;  %v2543_v62 = vpop.f32.mrf.mxu1 }
 0x443   :  { %v2456_v35 = vpop.f32.mrf.mxu0  ;;  %v2545_v59 = vpop.f32.mrf.mxu1 }
 0x447   :  { %v2460_v51 = vpop.f32.mrf.mxu0  ;;  %v2549_v4 = vpop.f32.mrf.mxu1 }
 0x449   :  { %v2462_v0 = vpop.f32.mrf.mxu0  ;;  %v2551_v13 = vpop.f32.mrf.mxu1 }
 0x47d   :  { %v2620_v54 = vpop.f32.mrf.mxu0  ;;  %v2709_v40 = vpop.f32.mrf.mxu1 }
 0x47f   :  { %v2622_v20 = vpop.f32.mrf.mxu0  ;;  %v2711_v37 = vpop.f32.mrf.mxu1 }
 0x481   :  { %v2715_v18 = vpop.f32.mrf.mxu1 }
 0x482   :  { %v2626_v17 = vpop.f32.mrf.mxu0 }
 0x483   :  { %v2717_v43 = vpop.f32.mrf.mxu1 }
 0x484   :  { %v2628_v24 = vpop.f32.mrf.mxu0 }
 0x485   :  { %v2721_v48 = vpop.f32.mrf.mxu1 }
 0x487   :  { %v2632_v44 = vpop.f32.mrf.mxu0  ;;  %v2723_v34 = vpop.f32.mrf.mxu1 }
 0x489   :  { %v2727_v5 = vpop.f32.mrf.mxu1  ;;  %v2634_v46 = vpop.f32.mrf.mxu0 }
 0x48b   :  { %v2729_v50 = vpop.f32.mrf.mxu1  ;;  %v2638_v2 = vpop.f32.mrf.mxu0 }
 0x48c   :  { %2902 = vmatprep.subr.mxu1 %v2729_v50  ;;  %v3459_v50 = vld [vmem:[%s9941_s2 + $0x10] sm:$0xff] }
 0x48d   :  { %2903 = vmatpush2.msra.mxu1 %v2727_v5  ;;  %v2640_v47 = vpop.f32.mrf.mxu0 }
 0x48e   :  { %2904 = vmatprep.subr.mxu1 %v2723_v34 }
 0x48f   :  { %2905 = vmatpush2.msra.mxu1 %v2721_v48 }
 0x490   :  { %2906 = vmatprep.subr.mxu1 %v2717_v43 }
 0x491   :  { %2907 = vmatpush2.msra.mxu1 %v2715_v18 }
 0x492   :  { %2908 = vmatprep.subr.mxu1 %v2711_v37 }
 0x493   :  { %2909 = vmatpush2.msra.mxu1 %v2709_v40 }
 0x494   :  { %2910 = vmatprep.subr.mxu1 %v2640_v47  ;;  %v6864_v47 = vld [vmem:[%s9942_s3 + $0x20] sm:$0xff] }
 0x495   :  { %2911 = vmatpush2.msra.mxu1 %v2638_v2  ;;  %v3460_v2 = vld [vmem:[%s9941_s2 + $0x18] sm:$0xff] }
 0x496   :  { %2912 = vmatprep.subr.mxu1 %v2634_v46  ;;  %v3457_v46 = vld [vmem:[%s9941_s2] sm:$0xff] }
 0x497   :  { %2913 = vmatpush2.msra.mxu1 %v2632_v44 }
 0x498   :  { %2914 = vmatprep.subr.mxu1 %v2628_v24 }
 0x499   :  { %2915 = vmatpush2.msra.mxu1 %v2626_v17 }
 0x49a   :  { %2916 = vmatprep.subr.mxu1 %v2622_v20 }
 0x49b   :  { %2917 = vmatpush2.msra.mxu1 %v2620_v54 }
 0x49c   :  { %2918 = vmatprep.subr.mxu1 %v2551_v13 }
 0x49d   :  { %2919 = vmatpush2.msra.mxu1 %v2549_v4 }
 0x49e   :  { %2920 = vmatprep.subr.mxu1 %v2545_v59 }
 0x49f   :  { %2921 = vmatpush2.msra.mxu1 %v2543_v62 }
 0x4a0   :  { %2922 = vmatprep.subr.mxu1 %v2539_v23 }
 0x4a1   :  { %2923 = vmatpush2.msra.mxu1 %v2537_v55 }
 0x4a2   :  { %2924 = vmatprep.subr.mxu1 %v2533_v26 }
 0x4a3   :  { %2925 = vmatpush2.msra.mxu1 %v2531_v28 }
 0x4a4   :  { %2926 = vmatprep.subr.mxu1 %v2462_v0 }
 0x4a5   :  { %2927 = vmatpush2.msra.mxu1 %v2460_v51  ;;  %v2845_v51 = vpop.permute.xlu0 %2844 }
 0x4a6   :  { %2928 = vmatprep.subr.mxu1 %v2456_v35 }
 0x4a7   :  { %2929 = vmatpush2.msra.mxu1 %v2454_v19 }
 0x4a8   :  { %2930 = vmatprep.subr.mxu1 %v2450_v39 }
 0x4a9   :  { %2931 = vmatpush2.msra.mxu1 %v2448_v49 }
 0x4aa   :  { %2932 = vmatprep.subr.mxu1 %v2444_v60 }
 0x4ab   :  { %2933 = vmatpush2.msra.mxu1 %v9040_v42  ;;  %v2850_v42 = vpop.permute.xlu1 %2849 }
 0x4ac   :  { %2935 = vmatmul.mubr.f32.vlgmr.msra.gmra.mxu1 %v2821_v52  ;;  %v6872_v52 = vld [vmem:[%s9942_s3 + $0x60] sm:$0xff] }
 0x4ad   :  { %2940 = vmatprep.mubr.f32.mxu1 %v2825_v53  ;;  %v3458_v53 = vld [vmem:[%s9941_s2 + $0x8] sm:$0xff] }
 0x4af   :  { %v2840_v18 = vpop.permute.xlu1 %2839 }
 0x4b0   :  { %2941 = vmatmul.mubr.f32.gmra.mxu1 %v2824_v57  ;;  %v6880_v57 = vld [vmem:[%s9942_s3 + $0xa0] sm:$0xff] }
 0x4b1   :  { %2946 = vmatprep.mubr.f32.mxu1 %v2828_v25  ;;  %v4967_v25 = vld [vmem:[%s9942_s3] sm:$0xff] }
 0x4b4   :  { %2947 = vmatmul.mubr.f32.gmra.mxu1 %v2827_v7  ;;  %v6888_v7 = vld [vmem:[%s9942_s3 + $0xe0] sm:$0xff] }
 0x4b5   :  { %2952 = vmatprep.mubr.f32.mxu1 %v2831_v1  ;;  %v6868_v1 = vld [vmem:[%s9942_s3 + $0x40] sm:$0xff] }
 0x4b8   :  { %2953 = vmatmul.mubr.f32.gmra.mxu1 %v2830_v45  ;;  %v5319_v45 = vld [vmem:[%s9943_s4] sm:$0xff] }
 0x4bf   :  { %v2798_v61 = vpop.f32.mrf.mxu0 }
 0x4c1   :  { %v2800_v58 = vpop.f32.mrf.mxu0 }
 0x4c3   :  { %v2804_v56 = vpop.f32.mrf.mxu0 }
 0x4c5   :  { %v2806_v10 = vpop.f32.mrf.mxu0 }
 0x4c7   :  { %v2810_v8 = vpop.f32.mrf.mxu0 }
 0x4c9   :  { %v2812_v33 = vpop.f32.mrf.mxu0 }
 0x4cb   :  { %v2816_v63 = vpop.f32.mrf.mxu0 }
 0x4cd   :  { %v2818_v16 = vpop.f32.mrf.mxu0 }
 0x4ce   :  { %2983 = vmatprep.subr.mxu0 %v2818_v16  ;;  %v6877_v16 = vld [vmem:[%s9942_s3 + $0x88] sm:$0xff] }
 0x4cf   :  { %2984 = vmatpush1.msra.mxu0 %v2816_v63  ;;  %v4968_v63 = vld [vmem:[%s9942_s3 + $0x8] sm:$0xff] }
 0x4d0   :  { %2985 = vmatprep.subr.mxu0 %v2812_v33  ;;  %v6873_v33 = vld [vmem:[%s9942_s3 + $0x68] sm:$0xff] }
 0x4d1   :  { %2986 = vmatpush1.msra.mxu0 %v2810_v8  ;;  %v6892_v8 = vld [vmem:[%s9942_s3 + $0x100] sm:$0xff] }
 0x4d2   :  { %2987 = vmatprep.subr.mxu0 %v2806_v10  ;;  %v4969_v10 = vld [vmem:[%s9942_s3 + $0x10] sm:$0xff] }
 0x4d3   :  { %2988 = vmatpush1.msra.mxu0 %v2804_v56  ;;  %v6884_v56 = vld [vmem:[%s9942_s3 + $0xc0] sm:$0xff] }
 0x4d4   :  { %2989 = vmatprep.subr.mxu0 %v2800_v58  ;;  %v6865_v58 = vld [vmem:[%s9942_s3 + $0x28] sm:$0xff] }
 0x4d5   :  { %2990 = vmatpush1.msra.mxu0 %v2798_v61  ;;  %v6876_v61 = vld [vmem:[%s9942_s3 + $0x80] sm:$0xff] }
 0x4d6   :  { %6842 = vmatmul.mubr.msk.f32.vlgmr.msra.gmra.mxu0 %vm2857_vm1, %v2823_v31  ;;  %6934 = vmatprep.subr.mxu0 %v10035_v41  ;;  %v6869_v31 = vld [vmem:[%s9942_s3 + $0x48] sm:$0xff] }
 0x4d7   :  { %3029 = vmatprep.mubr.f32.mxu0 %v10035_v41 }
 0x4da   :  { %6843 = vmatmul.mubr.msk.f32.gmra.mxu0 %vm2857_vm1, %v2826_v6  ;;  %v6867_v6 = vld [vmem:[%s9942_s3 + $0x38] sm:$0xff] }
 0x4db   :  { %3035 = vmatprep.mubr.f32.mxu0 %v10035_v41 }
 0x4de   :  { %6844 = vmatmul.mubr.msk.f32.gmra.mxu0 %vm2857_vm1, %v2829_v32  ;;  %v6866_v32 = vld [vmem:[%s9942_s3 + $0x30] sm:$0xff] }
 0x4df   :  { %3041 = vmatprep.mubr.f32.mxu0 %v10035_v41 }
 0x4e2   :  { %6845 = vmatmul.mubr.msk.f32.gmra.mxu0 %vm2857_vm1, %v2832_v21  ;;  %v6881_v21 = vld [vmem:[%s9942_s3 + $0xa8] sm:$0xff] }
 0x4e3   :  { %6942 = vmatprep.mubr.msk.f32.mxu0 %vm8292_vm2, %v10035_v41 }
 0x56c   :  { %v2936_v22 = vpop.f32.mrf.mxu1 }
 0x56d   :  { %v2937_v24 = vadd.f32 %v2936_v22, %v2840_v18  ;;  %v6870_v22 = vld [vmem:[%s9942_s3 + $0x50] sm:$0xff] }
 0x56e   :  { %v2938_v14 = vpop.f32.mrf.mxu1 }
 0x56f   :  { %v2939_v17 = vadd.f32 %v2938_v14, %v2840_v18  ;;  %v6878_v14 = vld [vmem:[%s9942_s3 + $0x90] sm:$0xff] }
 0x570   :  { %v2942_v9 = vpop.f32.mrf.mxu1 }
 0x571   :  { %v2943_v40 = vadd.f32 %v2942_v9, %v2845_v51  ;;  %v4970_v9 = vld [vmem:[%s9942_s3 + $0x18] sm:$0xff] }
 0x572   :  { %v2944_v15 = vpop.f32.mrf.mxu1 }
 0x573   :  { %v2945_v0 = vadd.f32 %v2944_v15, %v2845_v51  ;;  %v6875_v15 = vld [vmem:[%s9942_s3 + $0x78] sm:$0xff]  ;;  %v5321_v51 = vld [vmem:[%s9943_s4 + $0x10] sm:$0xff] }
 0x574   :  { %v2948_v38 = vpop.f32.mrf.mxu1 }
 0x575   :  { %v2949_v60 = vadd.f32 %v2948_v38, %v2850_v42  ;;  %v6874_v38 = vld [vmem:[%s9942_s3 + $0x70] sm:$0xff] }
 0x576   :  { %v2950_v29 = vpop.f32.mrf.mxu1 }
 0x577   :  { %v2951_v26 = vadd.f32 %v2950_v29, %v2850_v42  ;;  %v6871_v29 = vld [vmem:[%s9942_s3 + $0x58] sm:$0xff] }
 0x578   :  { %v2954_v36 = vpop.f32.mrf.mxu1  ;;  %v6879_v42 = vld [vmem:[%s9942_s3 + $0x98] sm:$0xff] }
 0x579   :  { %v2955_v62 = vadd.f32 %v2954_v36, %v2855_v11  ;;  %v6883_v36 = vld [vmem:[%s9942_s3 + $0xb8] sm:$0xff] }
 0x57a   :  { %v2956_v49 = vpop.f32.mrf.mxu1 }
 0x57b   :  { %v2957_v35 = vadd.f32 %v2956_v49, %v2855_v11  ;;  %v6887_v11 = vld [vmem:[%s9942_s3 + $0xd8] sm:$0xff]  ;;  %v6890_v49 = vld [vmem:[%s9942_s3 + $0xf0] sm:$0xff] }
 0x596   :  { %v3025_v12 = vpop.f32.mrf.mxu0 }
 0x597   :  { %v9071_v34 = vadd.f32 %v3025_v12, %v2937_v24  ;;  %v6889_v12 = vld [vmem:[%s9942_s3 + $0xe8] sm:$0xff] }
 0x598   :  { %v3027_v30 = vpop.f32.mrf.mxu0 }
 0x599   :  { %v9067_v48 = vadd.f32 %v3027_v30, %v2939_v17  ;;  %10043 = vst [vmem:[#allocation20_spill] sm:$0xff] %v9071_v34  ;;  %v6886_v30 = vld [vmem:[%s9942_s3 + $0xd0] sm:$0xff] }
 0x59a   :  { %v3031_v27 = vpop.f32.mrf.mxu0 }
 0x59b   :  { %v9065_v43 = vadd.f32 %v3031_v27, %v2943_v40  ;;  %10042 = vst [vmem:[#allocation33_spill] sm:$0xff] %v9067_v48  ;;  %v3048_v5 = vadd.f32 %v9067_v48, %v9071_v34  ;;  %v6885_v27 = vld [vmem:[%s9942_s3 + $0xc8] sm:$0xff] }
 0x59c   :  { %v3033_v3 = vpop.f32.mrf.mxu0 }
 0x59d   :  { %v9061_v20 = vadd.f32 %v3033_v3, %v2945_v0  ;;  %10041 = vst [vmem:[#allocation21_spill] sm:$0xff] %v9065_v43  ;;  %v6882_v3 = vld [vmem:[%s9942_s3 + $0xb0] sm:$0xff]  ;;  %v6173_v0 = vld [vmem:[%s9945_s6 + $0x8] sm:$0xff] }
 0x59e   :  { %v3037_v28 = vpop.f32.mrf.mxu0 }
 0x59f   :  { %v9051_v39 = vadd.f32 %v3037_v28, %v2949_v60  ;;  %10040 = vst [vmem:[#allocation24_spill] sm:$0xff] %v9061_v20  ;;  %v3051_v44 = vadd.f32 %v9061_v20, %v9065_v43  ;;  %v5320_v28 = vld [vmem:[%s9943_s4 + $0x8] sm:$0xff] }
 0x5a0   :  { %v3039_v55 = vpop.f32.mrf.mxu0  ;;  %v6893_v60 = vld [vmem:[%s9942_s3 + $0x108] sm:$0xff] }
 0x5a1   :  { %10036 = vst [vmem:[#allocation15_spill] sm:$0xff] %v9051_v39  ;;  %v9053_v23 = vadd.f32 %v3039_v55, %v2951_v26  ;;  %v6895_v26 = vld [vmem:[%s9942_s3 + $0x118] sm:$0xff] }
 0x5a2   :  { %v3043_v19 = vpop.f32.mrf.mxu0  ;;  %v5322_v55 = vld [vmem:[%s9943_s4 + $0x18] sm:$0xff] }
 0x5a3   :  { %10037 = vst [vmem:[#allocation19_spill] sm:$0xff] %v9053_v23  ;;  %v3054_v59 = vadd.f32 %v9053_v23, %v9051_v39  ;;  %v9057_v13 = vadd.f32 %v3043_v19, %v2955_v62  ;;  %v6894_v19 = vld [vmem:[%s9942_s3 + $0x110] sm:$0xff] }
 0x5a4   :  { %v3045_v4 = vpop.f32.mrf.mxu0  ;;  %v6174_v62 = vld [vmem:[%s9945_s6 + $0x10] sm:$0xff] }
 0x5a5   :  { %10038 = vst [vmem:[#allocation22_spill] sm:$0xff] %v9057_v13  ;;  %v9059_v54 = vadd.f32 %v3045_v4, %v2957_v35  ;;  %3055 = vadd.xlane.f32.xlu1 %v3054_v59  ;;  %v6891_v35 = vld [vmem:[%s9942_s3 + $0xf8] sm:$0xff]  ;;  %v6172_v59 = vld [vmem:[%s9945_s6] sm:$0xff] }
 0x5a6   :  { %v6175_v4 = vld [vmem:[%s9945_s6 + $0x18] sm:$0xff] }
 0x5a7   :  { %10039 = vst [vmem:[#allocation31_spill] sm:$0xff] %v9059_v54  ;;  %v3057_v37 = vadd.f32 %v9059_v54, %v9057_v13 }
 0x5a9   :  { %3058 = vadd.xlane.f32.xlu0 %v3057_v37 }
 0x5ad   :  { %3052 = vadd.xlane.f32.xlu0 %v3051_v44 }
 0x5b1   :  { %3049 = vadd.xlane.f32.xlu0 %v3048_v5 }
 0x5b6   :  { %3463 = vperm.xlu1 %6985, %v3457_v46  }
 0x5ba   :  { %3473 = vperm.xlu1 %6985, %v3459_v50   ;;  %v3064_v50 = vld [vmem:[#allocation7] sm:$0x3] }
 0x5be   :  { %3478 = vperm.xlu1 %6985, %v3460_v2   ;;  %v3139_v2 = vld [vmem:[%s9947_s8] sm:$0xff] }
 0x5c2   :  { %5005 = vperm.xlu1 %6985, %v6864_v47   ;;  %v3774_v47 = vld [vmem:[#allocation8 + $0x2f8] sm:$0xff] }
 0x5c3   :  { %3807 = vmatprep.subr.mxu1 %v3774_v47  ;;  %v3615_v47 = vld [vmem:[#allocation8 + $0xc8] sm:$0xff] }
 0x5c6   :  { %5085 = vperm.xlu1 %6985, %v6872_v52   ;;  %v3773_v52 = vld [vmem:[#allocation8 + $0x2f0] sm:$0xff] }
 0x5c7   :  { %3468 = vperm.xlu0 %6984, %v3458_v53   ;;  %v3772_v53 = vld [vmem:[#allocation8 + $0x2e8] sm:$0xff]  ;;  %3808 = vmatpush1.msra.mxu1 %v3773_v52  ;;  %v3614_v52 = vld [vmem:[#allocation8 + $0xc0] sm:$0xff] }
 0x5c8   :  { %3809 = vmatprep.subr.mxu1 %v3772_v53  ;;  %v3455_v53 = vld [vmem:[%s9940_s1 + $0x10] sm:$0xff] }
 0x5ca   :  { %5165 = vperm.xlu1 %6985, %v6880_v57   ;;  %v3771_v57 = vld [vmem:[#allocation8 + $0x2e0] sm:$0xff] }
 0x5cb   :  { %4973 = vperm.xlu0 %6984, %v4967_v25   ;;  %v3770_v25 = vld [vmem:[#allocation8 + $0x2d8] sm:$0xff]  ;;  %3810 = vmatpush1.msra.mxu1 %v3771_v57 }
 0x5cc   :  { %3811 = vmatprep.subr.mxu1 %v3770_v25  ;;  %v3613_v57 = vld [vmem:[#allocation8 + $0xb8] sm:$0xff]  ;;  %v3612_v25 = vld [vmem:[#allocation8 + $0xb0] sm:$0xff] }
 0x5ce   :  { %5245 = vperm.xlu1 %6985, %v6888_v7   ;;  %v3769_v7 = vld [vmem:[#allocation8 + $0x2d0] sm:$0xff] }
 0x5cf   :  { %5045 = vperm.xlu0 %6984, %v6868_v1   ;;  %v3768_v1 = vld [vmem:[#allocation8 + $0x2c8] sm:$0xff]  ;;  %3812 = vmatpush1.msra.mxu1 %v3769_v7 }
 0x5d0   :  { %3813 = vmatprep.subr.mxu1 %v3768_v1  ;;  %v3611_v7 = vld [vmem:[#allocation8 + $0xa8] sm:$0xff]  ;;  %v3610_v1 = vld [vmem:[#allocation8 + $0xa0] sm:$0xff] }
 0x5d2   :  { %5325 = vperm.xlu1 %6985, %v5319_v45   ;;  %v3767_v45 = vld [vmem:[#allocation8 + $0x2c0] sm:$0xff] }
 0x5d3   :  { %5125 = vperm.xlu0 %6984, %v6876_v61   ;;  %v3766_v61 = vld [vmem:[#allocation8 + $0x2b8] sm:$0xff]  ;;  %3814 = vmatpush1.msra.mxu1 %v3767_v45 }
 0x5d4   :  { %3815 = vmatprep.subr.mxu1 %v3766_v61  ;;  %v3456_v45 = vld [vmem:[%s9940_s1 + $0x18] sm:$0xff] }
 0x5d5   :  { %v3609_v61 = vld [vmem:[#allocation8 + $0x98] sm:$0xff] }
 0x5d6   :  { %5010 = vperm.xlu1 %6985, %v6865_v58   ;;  %v3765_v58 = vld [vmem:[#allocation8 + $0x2b0] sm:$0xff] }
 0x5d7   :  { %5205 = vperm.xlu0 %6984, %v6884_v56   ;;  %v3764_v56 = vld [vmem:[#allocation8 + $0x2a8] sm:$0xff]  ;;  %3816 = vmatpush1.msra.mxu1 %v3765_v58  ;;  %v3608_v58 = vld [vmem:[#allocation8 + $0x90] sm:$0xff] }
 0x5d8   :  { %3817 = vmatprep.subr.mxu1 %v3764_v56  ;;  %v3607_v56 = vld [vmem:[#allocation8 + $0x88] sm:$0xff] }
 0x5da   :  { %4983 = vperm.xlu1 %6985, %v4969_v10   ;;  %v3763_v10 = vld [vmem:[#allocation8 + $0x2a0] sm:$0xff] }
 0x5db   :  { %5285 = vperm.xlu0 %6984, %v6892_v8   ;;  %v3762_v8 = vld [vmem:[#allocation8 + $0x298] sm:$0xff]  ;;  %3818 = vmatpush1.msra.mxu1 %v3763_v10  ;;  %v3606_v10 = vld [vmem:[#allocation8 + $0x80] sm:$0xff] }
 0x5dc   :  { %3819 = vmatprep.subr.mxu1 %v3762_v8  ;;  %v3605_v8 = vld [vmem:[#allocation8 + $0x78] sm:$0xff] }
 0x5de   :  { %5090 = vperm.xlu1 %6985, %v6873_v33   ;;  %v3761_v33 = vld [vmem:[#allocation8 + $0x290] sm:$0xff] }
 0x5df   :  { %4978 = vperm.xlu0 %6984, %v4968_v63   ;;  %v3760_v63 = vld [vmem:[#allocation8 + $0x288] sm:$0xff]  ;;  %3820 = vmatpush1.msra.mxu1 %v3761_v33  ;;  %v3604_v33 = vld [vmem:[#allocation8 + $0x70] sm:$0xff] }
 0x5e0   :  { %3821 = vmatprep.subr.mxu1 %v3760_v63  ;;  %v3603_v63 = vld [vmem:[#allocation8 + $0x68] sm:$0xff] }
 0x5e2   :  { %5130 = vperm.xlu1 %6985, %v6877_v16   ;;  %v3759_v16 = vld [vmem:[#allocation8 + $0x280] sm:$0xff] }
 0x5e3   :  { %5050 = vperm.xlu0 %6984, %v6869_v31   ;;  %v3758_v31 = vld [vmem:[#allocation8 + $0x278] sm:$0xff]  ;;  %3822 = vmatpush1.msra.mxu1 %v3759_v16  ;;  %v3602_v16 = vld [vmem:[#allocation8 + $0x60] sm:$0xff] }
 0x5e4   :  { %3823 = vmatprep.subr.mxu1 %v3758_v31  ;;  %v3601_v31 = vld [vmem:[#allocation8 + $0x58] sm:$0xff] }
 0x5e6   :  { %5020 = vperm.xlu1 %6985, %v6867_v6   ;;  %v3757_v6 = vld [vmem:[#allocation8 + $0x270] sm:$0xff] }
 0x5e7   :  { %5015 = vperm.xlu0 %6984, %v6866_v32   ;;  %v3756_v32 = vld [vmem:[#allocation8 + $0x268] sm:$0xff]  ;;  %3824 = vmatpush1.msra.mxu1 %v3757_v6  ;;  %v3600_v6 = vld [vmem:[#allocation8 + $0x50] sm:$0xff] }
 0x5e8   :  { %3825 = vmatprep.subr.mxu1 %v3756_v32  ;;  %v3599_v32 = vld [vmem:[#allocation8 + $0x48] sm:$0xff] }
 0x5ea   :  { %5170 = vperm.xlu1 %6985, %v6881_v21   ;;  %v3755_v21 = vld [vmem:[#allocation8 + $0x260] sm:$0xff] }
 0x5eb   :  { %5055 = vperm.xlu0 %6984, %v6870_v22   ;;  %v3754_v22 = vld [vmem:[#allocation8 + $0x258] sm:$0xff]  ;;  %3826 = vmatpush1.msra.mxu1 %v3755_v21  ;;  %v3598_v21 = vld [vmem:[#allocation8 + $0x40] sm:$0xff] }
 0x5ec   :  { %3827 = vmatprep.subr.mxu1 %v3754_v22  ;;  %v3597_v22 = vld [vmem:[#allocation8 + $0x38] sm:$0xff] }
 0x5ee   :  { %5135 = vperm.xlu1 %6985, %v6878_v14   ;;  %v3753_v14 = vld [vmem:[#allocation8 + $0x250] sm:$0xff] }
 0x5ef   :  { %4988 = vperm.xlu0 %6984, %v4970_v9   ;;  %v3752_v9 = vld [vmem:[#allocation8 + $0x248] sm:$0xff]  ;;  %3828 = vmatpush1.msra.mxu1 %v3753_v14  ;;  %v3596_v14 = vld [vmem:[#allocation8 + $0x30] sm:$0xff] }
 0x5f0   :  { %3829 = vmatprep.subr.mxu1 %v3752_v9  ;;  %v3595_v9 = vld [vmem:[#allocation8 + $0x28] sm:$0xff] }
 0x5f2   :  { %5100 = vperm.xlu1 %6985, %v6875_v15   ;;  %v3751_v15 = vld [vmem:[#allocation8 + $0x240] sm:$0xff] }
 0x5f3   :  { %5095 = vperm.xlu0 %6984, %v6874_v38   ;;  %v3750_v38 = vld [vmem:[#allocation8 + $0x238] sm:$0xff]  ;;  %3830 = vmatpush1.msra.mxu1 %v3751_v15  ;;  %v3594_v15 = vld [vmem:[#allocation8 + $0x20] sm:$0xff] }
 0x5f4   :  { %3831 = vmatprep.subr.mxu1 %v3750_v38  ;;  %v3593_v38 = vld [vmem:[#allocation8 + $0x18] sm:$0xff] }
 0x5f6   :  { %5250 = vperm.xlu1 %6985, %v6889_v12   ;;  %v3749_v12 = vld [vmem:[#allocation8 + $0x230] sm:$0xff] }
 0x5f7   :  { %5060 = vperm.xlu0 %6984, %v6871_v29   ;;  %v3748_v29 = vld [vmem:[#allocation8 + $0x228] sm:$0xff]  ;;  %3832 = vmatpush1.msra.mxu1 %v3749_v12  ;;  %v3592_v12 = vld [vmem:[#allocation8 + $0x10] sm:$0xff] }
 0x5f8   :  { %3833 = vmatprep.subr.mxu1 %v3748_v29  ;;  %v3591_v29 = vld [vmem:[#allocation8 + $0x8] sm:$0xff] }
 0x5fa   :  { %5215 = vperm.xlu1 %6985, %v6886_v30   ;;  %v3747_v30 = vld [vmem:[#allocation8 + $0x220] sm:$0xff] }
 0x5fb   :  { %5210 = vperm.xlu0 %6984, %v6885_v27   ;;  %v3746_v27 = vld [vmem:[#allocation8 + $0x218] sm:$0xff]  ;;  %3834 = vmatpush1.msra.mxu1 %v3747_v30  ;;  %v3590_v30 = vld [vmem:[#allocation8] sm:$0xff] }
 0x5fc   :  { %3835 = vmatprep.subr.mxu1 %v3746_v27  ;;  %v3653_v27 = vld [vmem:[#allocation8 + $0x1f8] sm:$0xff] }
 0x5fe   :  { %5180 = vperm.xlu1 %6985, %v6883_v36   ;;  %v3745_v36 = vld [vmem:[#allocation8 + $0x210] sm:$0xff] }
 0x5ff   :  { %5175 = vperm.xlu0 %6984, %v6882_v3   ;;  %v3744_v3 = vld [vmem:[#allocation8 + $0x208] sm:$0xff]  ;;  %3836 = vmatpush1.msra.mxu1 %v3745_v36  ;;  %v3652_v36 = vld [vmem:[#allocation8 + $0x1f0] sm:$0xff] }
 0x600   :  { %3837 = vmatprep.subr.mxu1 %v3744_v3  ;;  %v3805_v3 = vld [vmem:[#allocation8 + $0x3f0] sm:$0xff] }
 0x602   :  { %5220 = vperm.xlu1 %6985, %v6887_v11   ;;  %v3743_v11 = vld [vmem:[#allocation8 + $0x200] sm:$0xff] }
 0x603   :  { %5140 = vperm.xlu0 %6984, %v6879_v42   ;;  %v3806_v42 = vld [vmem:[#allocation8 + $0x3f8] sm:$0xff]  ;;  %3838 = vmatpush1.msra.mxu1 %v3743_v11  ;;  %v3651_v11 = vld [vmem:[#allocation8 + $0x1e8] sm:$0xff] }
 0x604   :  { %3839 = vmatprep.subr.mxu1 %v3806_v42  ;;  %v3804_v42 = vld [vmem:[#allocation8 + $0x3e8] sm:$0xff] }
 0x605   :  { %3840 = vmatpush2.msra.mxu1 %v3805_v3  ;;  %v3624_v3 = vld [vmem:[#allocation8 + $0x110] sm:$0xff] }
 0x606   :  { %5330 = vperm.xlu1 %6985, %v5320_v28   ;;  %3841 = vmatprep.subr.mxu1 %v3804_v42  ;;  %v3623_v42 = vld [vmem:[#allocation8 + $0x108] sm:$0xff] }
 0x607   :  { %5290 = vperm.xlu0 %6984, %v6893_v60  }
 0x60a   :  { %5300 = vperm.xlu1 %6985, %v6895_v26  }
 0x60b   :  { %5255 = vperm.xlu0 %6984, %v6890_v49   ;;  %v3140_v49 = vld [vmem:[%s9947_s8 + $0x8] sm:$0xff] }
 0x60e   :  { %5340 = vperm.xlu1 %6985, %v5322_v55   ;;  %v3141_v55 = vld [vmem:[%s9947_s8 + $0x10] sm:$0xff] }
 0x60f   :  { %5295 = vperm.xlu0 %6984, %v6894_v19   ;;  %v3452_v19 = vld [vmem:[#allocation2 + $0x18] sm:$0xff] }
 0x612   :  { %6188 = vperm.xlu1 %6985, %v6174_v62   ;;  %v7594_v62 = vld [vmem:[#allocation2 + $0x8] sm:$0xff] }
 0x613   :  { %5260 = vperm.xlu0 %6984, %v6891_v35   ;;  %v3142_v35 = vld [vmem:[%s9947_s8 + $0x18] sm:$0xff] }
 0x616   :  { %6178 = vperm.xlu1 %6985, %v6172_v59   ;;  %v7595_v59 = vld [vmem:[#allocation2] sm:$0xff] }
 0x617   :  { %5335 = vperm.xlu0 %6984, %v5321_v51   ;;  %v3297_v51 = vld [vmem:[%s9948_s9] sm:$0xff] }
 0x61b   :  { %6193 = vperm.xlu0 %6984, %v6175_v4   ;;  %v3451_v4 = vld [vmem:[#allocation2 + $0x10] sm:$0xff] }
 0x61f   :  { %6183 = vperm.xlu0 %6984, %v6173_v0   ;;  %v3621_v0 = vld [vmem:[#allocation8 + $0xf8] sm:$0xff] }
 0x62e   :  { %v3056_v40 = vpop.xlane.xlu1 %3055 }
 0x62f   :  { %v3062_v17 = vmul.f32 0.00390625, %v3056_v40  ;;  %v3298_v40 = vld [vmem:[%s9948_s9 + $0x8] sm:$0xff] }
 0x632   :  { %v3059_v37 = vpop.xlane.xlu0 %3058 }
 0x633   :  { %v3063_v18 = vmul.f32 0.00390625, %v3059_v37  ;;  %v3299_v37 = vld [vmem:[%s9948_s9 + $0x10] sm:$0xff] }
 0x635   :  { %6935 = vmatpush3.msra.mxu0 %v3063_v18  ;;  %v3300_v18 = vld [vmem:[%s9948_s9 + $0x18] sm:$0xff] }
 0x636   :  { %6936 = vmatprep.subr.mxu0 %v10035_v41  ;;  %v3053_v24 = vpop.xlane.xlu0 %3052 }
 0x637   :  { %v3061_v44 = vmul.f32 0.00390625, %v3053_v24  ;;  %6937 = vmatpush3.msra.mxu0 %v3062_v17  ;;  %v3453_v17 = vld [vmem:[%s9940_s1] sm:$0xff]  ;;  %v3620_v24 = vld [vmem:[#allocation8 + $0xf0] sm:$0xff] }
 0x638   :  { %6938 = vmatprep.subr.mxu0 %v10035_v41 }
 0x639   :  { %6939 = vmatpush3.msra.mxu0 %v3061_v44  ;;  %v3619_v44 = vld [vmem:[#allocation8 + $0xe8] sm:$0xff] }
 0x63a   :  { %v3050_v5 = vpop.xlane.xlu0 %3049  ;;  %6940 = vmatprep.subr.mxu0 %v10035_v41 }
 0x63b   :  { %v3060_v46 = vmul.f32 0.00390625, %v3050_v5  ;;  %v3618_v5 = vld [vmem:[#allocation8 + $0xe0] sm:$0xff] }
 0x63d   :  { %6941 = vmatpush3.msra.mxu0 %v3060_v46  ;;  %v3454_v46 = vld [vmem:[%s9940_s1 + $0x8] sm:$0xff] }
 0x63e   :  { %6943 = vmatmul.mubr.msk.f32.vlgmr.msra.gmra.mxu0 %vm2857_vm1, %v3064_v50  ;;  %v3617_v50 = vld [vmem:[#allocation8 + $0xd8] sm:$0xff] }
 0x63f   :  { %6947 = vmatprep.mubr.msk.f32.mxu0 %vm3143_vm3, %v3139_v2  ;;  %v3616_v2 = vld [vmem:[#allocation8 + $0xd0] sm:$0xff] }
 0x6fe   :  { %v3134_v28 = vpop.f32.mrf.mxu0 }
 0x6ff   :  { %v3138_v60 = vmax.f32 %v3134_v28, 0.0  ;;  %v3650_v28 = vld [vmem:[#allocation8 + $0x1e0] sm:$0xff] }
 0x700   :  { %v6944_v26 = vpop.f32.mrf.mxu0 }
 0x701   :  { %6945 = vmatprep.subr.msk.mxu0 %vm3156_vm4, %v3138_v60  ;;  %v3649_v26 = vld [vmem:[#allocation8 + $0x1d8] sm:$0xff] }
 0x702   :  { %6946 = vmatpush3.msk.msra.mxu0 %vm3156_vm4, %v3138_v60  ;;  %v3803_v60 = vld [vmem:[#allocation8 + $0x3e0] sm:$0xff] }
 0x703   :  { %6948 = vmatmul.mubr.msk.f32.vlgmr.msra.gmra.mxu0 %vm3143_vm3, %v3140_v49  ;;  %3367 = vmatprep.subr.mxu0 %v7594_v62  ;;  %v3802_v49 = vld [vmem:[#allocation8 + $0x3d8] sm:$0xff]  ;;  %v3647_v62 = vld [vmem:[#allocation8 + $0x1c8] sm:$0xff] }
 0x704   :  { %6950 = vmatprep.mubr.msk.f32.mxu0 %vm3143_vm3, %v3141_v55  ;;  %3368 = vmatpush1.msra.mxu0 %v7595_v59  ;;  %v3648_v55 = vld [vmem:[#allocation8 + $0x1d0] sm:$0xff]  ;;  %v3646_v59 = vld [vmem:[#allocation8 + $0x1c0] sm:$0xff] }
 0x705   :  { %3523 = vmatprep.subr.mxu0 %v3452_v19  ;;  %3842 = vmatpush2.msra.mxu1 %v3803_v60  ;;  %v3801_v19 = vld [vmem:[#allocation8 + $0x3d0] sm:$0xff]  ;;  %v3622_v60 = vld [vmem:[#allocation8 + $0x100] sm:$0xff] }
 0x706   :  { %3843 = vmatprep.subr.mxu1 %v3802_v49  ;;  %v3927_v49 = vld [vmem:[#allocation8 + $0x4f8] sm:$0xff] }
 0x707   :  { %6951 = vmatmul.mubr.msk.f32.gmra.mxu0 %vm3143_vm3, %v3142_v35  ;;  %3844 = vmatpush2.msra.mxu1 %v3801_v19  ;;  %v3800_v35 = vld [vmem:[#allocation8 + $0x3c8] sm:$0xff] }
 0x708   :  { %3401 = vmatprep.mubr.f32.mxu0 %v10035_v41  ;;  %3845 = vmatprep.subr.mxu1 %v3800_v35 }
 0x70b   :  { %6856 = vmatmul.mubr.msk.f32.vlgmr.msra.gmra.mxu0 %vm125_vm0, %v3297_v51  ;;  %v3799_v51 = vld [vmem:[#allocation8 + $0x3c0] sm:$0xff] }
 0x70c   :  { %3407 = vmatprep.mubr.f32.mxu0 %v10035_v41  ;;  %3524 = vmatpush1.msra.mxu0 %v3451_v4  ;;  %v3645_v4 = vld [vmem:[#allocation8 + $0x1b8] sm:$0xff] }
 0x70d   :  { %3654 = vmatprep.subr.mxu0 %v3621_v0  ;;  %3846 = vmatpush2.msra.mxu1 %v3799_v51  ;;  %v3798_v0 = vld [vmem:[#allocation8 + $0x3b8] sm:$0xff] }
 0x70e   :  { %3847 = vmatprep.subr.mxu1 %v3798_v0 }
 0x70f   :  { %6857 = vmatmul.mubr.msk.f32.gmra.mxu0 %vm125_vm0, %v3298_v40  ;;  %v3644_v40 = vld [vmem:[#allocation8 + $0x1b0] sm:$0xff] }
 0x710   :  { %3413 = vmatprep.mubr.f32.mxu0 %v10035_v41 }
 0x713   :  { %6858 = vmatmul.mubr.msk.f32.gmra.mxu0 %vm125_vm0, %v3299_v37  ;;  %v3797_v37 = vld [vmem:[#allocation8 + $0x3b0] sm:$0xff] }
 0x714   :  { %3419 = vmatprep.mubr.f32.mxu0 %v10035_v41  ;;  %3848 = vmatpush2.msra.mxu1 %v3797_v37 }
 0x717   :  { %6859 = vmatmul.mubr.msk.f32.gmra.mxu0 %vm125_vm0, %v3300_v18  ;;  %v3643_v18 = vld [vmem:[#allocation8 + $0x1a8] sm:$0xff] }
 0x718   :  { %3557 = vmatprep.mubr.f32.mxu0 %v10035_v41 }
 0x71b   :  { %6860 = vmatmul.mubr.msk.f32.vlgmr.msra.gmra.mxu0 %vm125_vm0, %v3453_v17  ;;  %v3796_v17 = vld [vmem:[#allocation8 + $0x3a8] sm:$0xff] }
 0x71c   :  { %3563 = vmatprep.mubr.f32.mxu0 %v10035_v41  ;;  %3655 = vmatpush1.msra.mxu0 %v3620_v24  ;;  %v3642_v24 = vld [vmem:[#allocation8 + $0x1a0] sm:$0xff] }
 0x71d   :  { %3656 = vmatprep.subr.mxu0 %v3619_v44  ;;  %3849 = vmatprep.subr.mxu1 %v3796_v17  ;;  %v3795_v44 = vld [vmem:[#allocation8 + $0x3a0] sm:$0xff] }
 0x71e   :  { %3657 = vmatpush1.msra.mxu0 %v3618_v5  ;;  %3850 = vmatpush2.msra.mxu1 %v3795_v44  ;;  %v3641_v5 = vld [vmem:[#allocation8 + $0x198] sm:$0xff] }
 0x71f   :  { %6861 = vmatmul.mubr.msk.f32.gmra.mxu0 %vm125_vm0, %v3454_v46  ;;  %3658 = vmatprep.subr.mxu0 %v3617_v50  ;;  %v3794_v46 = vld [vmem:[#allocation8 + $0x398] sm:$0xff]  ;;  %v3640_v50 = vld [vmem:[#allocation8 + $0x190] sm:$0xff] }
 0x720   :  { %3569 = vmatprep.mubr.f32.mxu0 %v10035_v41  ;;  %3659 = vmatpush1.msra.mxu0 %v3616_v2  ;;  %v3793_v2 = vld [vmem:[#allocation8 + $0x390] sm:$0xff] }
 0x721   :  { %3660 = vmatprep.subr.mxu0 %v3615_v47  ;;  %3851 = vmatprep.subr.mxu1 %v3794_v46  ;;  %v3639_v47 = vld [vmem:[#allocation8 + $0x188] sm:$0xff] }
 0x722   :  { %3661 = vmatpush1.msra.mxu0 %v3614_v52  ;;  %3852 = vmatpush2.msra.mxu1 %v3793_v2  ;;  %v3792_v52 = vld [vmem:[#allocation8 + $0x388] sm:$0xff] }
 0x723   :  { %6862 = vmatmul.mubr.msk.f32.gmra.mxu0 %vm125_vm0, %v3455_v53  ;;  %3662 = vmatprep.subr.mxu0 %v3613_v57  ;;  %v3638_v53 = vld [vmem:[#allocation8 + $0x180] sm:$0xff] }
 0x724   :  { %3575 = vmatprep.mubr.f32.mxu0 %v10035_v41  ;;  %3663 = vmatpush1.msra.mxu0 %v3612_v25  ;;  %v3791_v57 = vld [vmem:[#allocation8 + $0x380] sm:$0xff]  ;;  %v3637_v25 = vld [vmem:[#allocation8 + $0x178] sm:$0xff] }
 0x725   :  { %3664 = vmatprep.subr.mxu0 %v3611_v7  ;;  %3853 = vmatprep.subr.mxu1 %v3792_v52  ;;  %v3790_v7 = vld [vmem:[#allocation8 + $0x378] sm:$0xff] }
 0x726   :  { %3665 = vmatpush1.msra.mxu0 %v3610_v1  ;;  %3854 = vmatpush2.msra.mxu1 %v3791_v57  ;;  %v3636_v1 = vld [vmem:[#allocation8 + $0x170] sm:$0xff] }
 0x727   :  { %6863 = vmatmul.mubr.msk.f32.gmra.mxu0 %vm125_vm0, %v3456_v45  ;;  %3666 = vmatprep.subr.mxu0 %v3609_v61  ;;  %v3789_v45 = vld [vmem:[#allocation8 + $0x370] sm:$0xff]  ;;  %v3635_v61 = vld [vmem:[#allocation8 + $0x168] sm:$0xff] }
 0x728   :  { %3667 = vmatpush1.msra.mxu0 %v3608_v58  ;;  %3855 = vmatprep.subr.mxu1 %v3790_v7  ;;  %v3788_v58 = vld [vmem:[#allocation8 + $0x368] sm:$0xff]  ;;  %v3926_v7 = vld [vmem:[#allocation8 + $0x4f0] sm:$0xff] }
 0x729   :  { %3668 = vmatprep.subr.mxu0 %v3607_v56  ;;  %3856 = vmatpush2.msra.mxu1 %v3789_v45  ;;  %v3634_v56 = vld [vmem:[#allocation8 + $0x160] sm:$0xff] }
 0x72a   :  { %3669 = vmatpush1.msra.mxu0 %v3606_v10  ;;  %3857 = vmatprep.subr.mxu1 %v3788_v58  ;;  %v3787_v10 = vld [vmem:[#allocation8 + $0x360] sm:$0xff]  ;;  %v4078_v58 = vld [vmem:[#allocation8 + $0x6e8] sm:$0xff] }
 0x72b   :  { %3670 = vmatprep.subr.mxu0 %v3605_v8  ;;  %3858 = vmatpush2.msra.mxu1 %v3787_v10  ;;  %v3633_v8 = vld [vmem:[#allocation8 + $0x158] sm:$0xff] }
 0x72c   :  { %3671 = vmatpush1.msra.mxu0 %v3604_v33  ;;  %v3786_v33 = vld [vmem:[#allocation8 + $0x358] sm:$0xff] }
 0x72d   :  { %3672 = vmatprep.subr.mxu0 %v3603_v63  ;;  %3859 = vmatprep.subr.mxu1 %v3786_v33  ;;  %v3632_v63 = vld [vmem:[#allocation8 + $0x150] sm:$0xff]  ;;  %v4077_v33 = vld [vmem:[#allocation8 + $0x6e0] sm:$0xff] }
 0x72e   :  { %3673 = vmatpush1.msra.mxu0 %v3602_v16  ;;  %v3785_v16 = vld [vmem:[#allocation8 + $0x350] sm:$0xff] }
 0x72f   :  { %3674 = vmatprep.subr.mxu0 %v3601_v31  ;;  %3860 = vmatpush2.msra.mxu1 %v3785_v16  ;;  %v3631_v31 = vld [vmem:[#allocation8 + $0x148] sm:$0xff] }
 0x730   :  { %3675 = vmatpush1.msra.mxu0 %v3600_v6  ;;  %v3784_v6 = vld [vmem:[#allocation8 + $0x348] sm:$0xff] }
 0x731   :  { %3676 = vmatprep.subr.mxu0 %v3599_v32  ;;  %3861 = vmatprep.subr.mxu1 %v3784_v6  ;;  %v3630_v32 = vld [vmem:[#allocation8 + $0x140] sm:$0xff]  ;;  %v3923_v6 = vld [vmem:[#allocation8 + $0x4d8] sm:$0xff] }
 0x732   :  { %3677 = vmatpush1.msra.mxu0 %v3598_v21  ;;  %v3783_v21 = vld [vmem:[#allocation8 + $0x340] sm:$0xff] }
 0x733   :  { %3678 = vmatprep.subr.mxu0 %v3597_v22  ;;  %3862 = vmatpush2.msra.mxu1 %v3783_v21  ;;  %v3629_v22 = vld [vmem:[#allocation8 + $0x138] sm:$0xff] }
 0x734   :  { %3679 = vmatpush1.msra.mxu0 %v3596_v14  ;;  %v3782_v14 = vld [vmem:[#allocation8 + $0x338] sm:$0xff] }
 0x735   :  { %3680 = vmatprep.subr.mxu0 %v3595_v9  ;;  %3863 = vmatprep.subr.mxu1 %v3782_v14  ;;  %v3628_v9 = vld [vmem:[#allocation8 + $0x130] sm:$0xff] }
 0x736   :  { %3681 = vmatpush1.msra.mxu0 %v3594_v15  ;;  %v3781_v15 = vld [vmem:[#allocation8 + $0x330] sm:$0xff] }
 0x737   :  { %3682 = vmatprep.subr.mxu0 %v3593_v38  ;;  %3864 = vmatpush2.msra.mxu1 %v3781_v15  ;;  %v3627_v38 = vld [vmem:[#allocation8 + $0x128] sm:$0xff]  ;;  %v4075_v15 = vld [vmem:[#allocation8 + $0x6d0] sm:$0xff] }
 0x738   :  { %3683 = vmatpush1.msra.mxu0 %v3592_v12  ;;  %v3780_v12 = vld [vmem:[#allocation8 + $0x328] sm:$0xff] }
 0x739   :  { %3684 = vmatprep.subr.mxu0 %v3591_v29  ;;  %3865 = vmatprep.subr.mxu1 %v3780_v12  ;;  %v3626_v29 = vld [vmem:[#allocation8 + $0x120] sm:$0xff]  ;;  %v4074_v12 = vld [vmem:[#allocation8 + $0x6c8] sm:$0xff] }
 0x73a   :  { %3685 = vmatpush1.msra.mxu0 %v3590_v30  ;;  %v3779_v30 = vld [vmem:[#allocation8 + $0x320] sm:$0xff] }
 0x73b   :  { %3686 = vmatprep.subr.mxu0 %v3653_v27  ;;  %3866 = vmatpush2.msra.mxu1 %v3779_v30  ;;  %v3625_v27 = vld [vmem:[#allocation8 + $0x118] sm:$0xff] }
 0x73c   :  { %3687 = vmatpush2.msra.mxu0 %v3652_v36  ;;  %v3778_v36 = vld [vmem:[#allocation8 + $0x318] sm:$0xff] }
 0x73d   :  { %3688 = vmatprep.subr.mxu0 %v3651_v11  ;;  %3867 = vmatprep.subr.mxu1 %v3778_v36  ;;  %v3777_v11 = vld [vmem:[#allocation8 + $0x310] sm:$0xff]  ;;  %v3920_v36 = vld [vmem:[#allocation8 + $0x4c0] sm:$0xff] }
 0x73e   :  { %3689 = vmatpush2.msra.mxu0 %v3650_v28  ;;  %3868 = vmatpush2.msra.mxu1 %v3777_v11  ;;  %v3776_v28 = vld [vmem:[#allocation8 + $0x308] sm:$0xff] }
 0x73f   :  { %3690 = vmatprep.subr.mxu0 %v3649_v26  ;;  %3869 = vmatprep.subr.mxu1 %v3776_v28  ;;  %v3775_v26 = vld [vmem:[#allocation8 + $0x300] sm:$0xff]  ;;  %v3919_v28 = vld [vmem:[#allocation8 + $0x4b8] sm:$0xff] }
 0x740   :  { %3691 = vmatpush2.msra.mxu0 %v3648_v55  ;;  %3870 = vmatpush2.msra.mxu1 %v3775_v26  ;;  %v4080_v55 = vld [vmem:[#allocation8 + $0x6f8] sm:$0xff] }
 0x741   :  { %3692 = vmatprep.subr.mxu0 %v3647_v62  ;;  %4113 = vmatprep.subr.mxu1 %v4080_v55  ;;  %v4071_v55 = vld [vmem:[#allocation8 + $0x6b0] sm:$0xff] }
 0x742   :  { %3693 = vmatpush2.msra.mxu0 %v3646_v59 }
 0x743   :  { %3694 = vmatprep.subr.mxu0 %v3645_v4 }
 0x744   :  { %3695 = vmatpush2.msra.mxu0 %v3644_v40 }
 0x745   :  { %3696 = vmatprep.subr.mxu0 %v3643_v18 }
 0x746   :  { %3697 = vmatpush2.msra.mxu0 %v3642_v24 }
 0x747   :  { %3698 = vmatprep.subr.mxu0 %v3641_v5  ;;  %v3464_v5 = vpop.permute.xlu1 %3463 }
 0x748   :  { %3699 = vmatpush2.msra.mxu0 %v3640_v50 }
 0x749   :  { %3700 = vmatprep.subr.mxu0 %v3639_v47 }
 0x74a   :  { %3701 = vmatpush2.msra.mxu0 %v3638_v53  ;;  %v3469_v53 = vpop.permute.xlu0 %3468 }
 0x74b   :  { %3702 = vmatprep.subr.mxu0 %v3637_v25 }
 0x74c   :  { %3703 = vmatpush2.msra.mxu0 %v3636_v1  ;;  %v4079_v1 = vld [vmem:[#allocation8 + $0x6f0] sm:$0xff] }
 0x74d   :  { %3704 = vmatprep.subr.mxu0 %v3635_v61  ;;  %v3925_v61 = vld [vmem:[#allocation8 + $0x4e8] sm:$0xff] }
 0x74e   :  { %3705 = vmatpush2.msra.mxu0 %v3634_v56 }
 0x74f   :  { %3706 = vmatprep.subr.mxu0 %v3633_v8  ;;  %v3924_v8 = vld [vmem:[#allocation8 + $0x4e0] sm:$0xff] }
 0x750   :  { %3707 = vmatpush2.msra.mxu0 %v3632_v63  ;;  %v3474_v63 = vpop.permute.xlu1 %3473 }
 0x751   :  { %3708 = vmatprep.subr.mxu0 %v3631_v31 }
 0x752   :  { %3709 = vmatpush2.msra.mxu0 %v3630_v32  ;;  %v4076_v32 = vld [vmem:[#allocation8 + $0x6d8] sm:$0xff] }
 0x753   :  { %3710 = vmatprep.subr.mxu0 %v3629_v22 }
 0x754   :  { %3711 = vmatpush2.msra.mxu0 %v3628_v9  ;;  %v3922_v9 = vld [vmem:[#allocation8 + $0x4d0] sm:$0xff]  ;;  %v3479_v11 = vpop.permute.xlu1 %3478 }
 0x755   :  { %3712 = vmatprep.subr.mxu0 %v3627_v38  ;;  %v3921_v38 = vld [vmem:[#allocation8 + $0x4c8] sm:$0xff] }
 0x756   :  { %3713 = vmatpush2.msra.mxu0 %v3626_v29 }
 0x757   :  { %3714 = vmatprep.subr.mxu0 %v3625_v27 }
 0x758   :  { %3715 = vmatpush2.msra.mxu0 %v3624_v3  ;;  %v4073_v3 = vld [vmem:[#allocation8 + $0x6c0] sm:$0xff] }
 0x759   :  { %3716 = vmatprep.subr.mxu0 %v3623_v42 }
 0x75a   :  { %3717 = vmatpush2.msra.mxu0 %v3622_v60  ;;  %v4072_v60 = vld [vmem:[#allocation8 + $0x6b8] sm:$0xff] }
 0x75b   :  { %3960 = vmatprep.subr.mxu0 %v3927_v49  ;;  %v3918_v49 = vld [vmem:[#allocation8 + $0x4b0] sm:$0xff] }
 0x7c3   :  { %v9283_v19 = vpop.f32.mrf.mxu0 }
 0x7c4   :  { %10044 = vst [vmem:[#allocation23_spill] sm:$0xff] %v9283_v19 }
 0x7c5   :  { %v9285_v62 = vpop.f32.mrf.mxu0 }
 0x7c6   :  { %10045 = vst [vmem:[#allocation27_spill] sm:$0xff] %v9285_v62 }
 0x7c7   :  { %v9287_v35 = vpop.f32.mrf.mxu0 }
 0x7c8   :  { %10046 = vst [vmem:[#allocation25_spill] sm:$0xff] %v9287_v35 }
 0x7c9   :  { %v9289_v59 = vpop.f32.mrf.mxu0 }
 0x7ca   :  { %10047 = vst [vmem:[#allocation36_spill] sm:$0xff] %v9289_v59 }
 0x7cb   :  { %v9291_v51 = vpop.f32.mrf.mxu0 }
 0x7cc   :  { %10048 = vst [vmem:[#allocation30_spill] sm:$0xff] %v9291_v51 }
 0x7cd   :  { %v9293_v4 = vpop.f32.mrf.mxu0 }
 0x7ce   :  { %10049 = vst [vmem:[#allocation17_spill] sm:$0xff] %v9293_v4 }
 0x7cf   :  { %v9295_v0 = vpop.f32.mrf.mxu0 }
 0x7d0   :  { %10050 = vst [vmem:[#allocation38_spill] sm:$0xff] %v9295_v0 }
 0x7d1   :  { %v9297_v40 = vpop.f32.mrf.mxu0 }
 0x7d2   :  { %10051 = vst [vmem:[#allocation28_spill] sm:$0xff] %v9297_v40 }
 0x7d3   :  { %v9299_v37 = vpop.f32.mrf.mxu0 }
 0x7d4   :  { %10052 = vst [vmem:[#allocation35_spill] sm:$0xff] %v9299_v37 }
 0x7d5   :  { %v9301_v18 = vpop.f32.mrf.mxu0 }
 0x7d6   :  { %10053 = vst [vmem:[#allocation32_spill] sm:$0xff] %v9301_v18 }
 0x7d7   :  { %v9303_v17 = vpop.f32.mrf.mxu0 }
 0x7d8   :  { %10054 = vst [vmem:[#allocation29_spill] sm:$0xff] %v9303_v17 }
 0x7d9   :  { %v9305_v24 = vpop.f32.mrf.mxu0 }
 0x7da   :  { %10055 = vst [vmem:[#allocation39_spill] sm:$0xff] %v9305_v24 }
 0x7db   :  { %v3559_v44 = vpop.f32.mrf.mxu0 }
 0x7dc   :  { %v3560_v46 = vadd.f32 %v3559_v44, %v3464_v5  ;;  %v3917_v44 = vld [vmem:[#allocation8 + $0x4a8] sm:$0xff] }
 0x7dd   :  { %v3561_v50 = vpop.f32.mrf.mxu0 }
 0x7de   :  { %v3562_v2 = vadd.f32 %v3561_v50, %v3464_v5  ;;  %v9309_v57 = vmax.f32 %v3560_v46, 0.0  ;;  %v4070_v5 = vld [vmem:[#allocation8 + $0x6a8] sm:$0xff] }
 0x7df   :  { %v3565_v47 = vpop.f32.mrf.mxu0 }
 0x7e0   :  { %v9307_v52 = vmax.f32 %v3562_v2, 0.0  ;;  %v3566_v56 = vadd.f32 %v3565_v47, %v3469_v53  ;;  %v3916_v2 = vld [vmem:[#allocation8 + $0x4a0] sm:$0xff] }
 0x7e1   :  { %v3567_v25 = vpop.f32.mrf.mxu0  ;;  %v4069_v47 = vld [vmem:[#allocation8 + $0x6a0] sm:$0xff] }
 0x7e2   :  { %v3568_v45 = vadd.f32 %v3567_v25, %v3469_v53  ;;  %3718 = vmatprep.mubr.f32.mxu0 %v9307_v52  ;;  %3871 = vmatprep.mubr.f32.mxu1 %v9307_v52  ;;  %v9317_v22 = vmax.f32 %v3566_v56, 0.0  ;;  %v3915_v53 = vld [vmem:[#allocation8 + $0x498] sm:$0xff]  ;;  %v3912_v56 = vld [vmem:[#allocation8 + $0x480] sm:$0xff] }
 0x7e3   :  { %v3571_v10 = vpop.f32.mrf.mxu0  ;;  %3719 = vmatmul.mubr.f32.vlgmr.msra.gmra.mxu0 %v9309_v57  ;;  %3872 = vmatmul.mubr.f32.vlgmr.msra.gmra.mxu1 %v9309_v57  ;;  %v4068_v25 = vld [vmem:[#allocation8 + $0x698] sm:$0xff] }
 0x7e4   :  { %v9315_v16 = vmax.f32 %v3568_v45, 0.0  ;;  %3961 = vmatpush1.msra.mxu0 %v3926_v7  ;;  %4114 = vmatpush1.msra.mxu1 %v4079_v1  ;;  %v3572_v29 = vadd.f32 %v3571_v10, %v3474_v63  ;;  %v3914_v1 = vld [vmem:[#allocation8 + $0x490] sm:$0xff]  ;;  %v4065_v10 = vld [vmem:[#allocation8 + $0x680] sm:$0xff] }
 0x7e5   :  { %3962 = vmatprep.subr.mxu0 %v3925_v61  ;;  %4115 = vmatprep.subr.mxu1 %v4078_v58  ;;  %v3573_v31 = vpop.f32.mrf.mxu0  ;;  %v4067_v45 = vld [vmem:[#allocation8 + $0x690] sm:$0xff]  ;;  %v3913_v61 = vld [vmem:[#allocation8 + $0x488] sm:$0xff] }
 0x7e6   :  { %v3574_v21 = vadd.f32 %v3573_v31, %v3474_v63  ;;  %3963 = vmatpush1.msra.mxu0 %v3924_v8  ;;  %4116 = vmatpush1.msra.mxu1 %v4077_v33  ;;  %v9325_v26 = vmax.f32 %v3572_v29, 0.0  ;;  %v4066_v58 = vld [vmem:[#allocation8 + $0x688] sm:$0xff]  ;;  %v3911_v8 = vld [vmem:[#allocation8 + $0x478] sm:$0xff]  ;;  %v3910_v63 = vld [vmem:[#allocation8 + $0x470] sm:$0xff] }
 0x7e7   :  { %3724 = vmatprep.mubr.f32.mxu0 %v9315_v16  ;;  %3877 = vmatprep.mubr.f32.mxu1 %v9315_v16  ;;  %v3577_v14 = vpop.f32.mrf.mxu0  ;;  %v4064_v33 = vld [vmem:[#allocation8 + $0x678] sm:$0xff]  ;;  %v4063_v31 = vld [vmem:[#allocation8 + $0x670] sm:$0xff]  ;;  %v3905_v29 = vld [vmem:[#allocation8 + $0x448] sm:$0xff] }
 0x7e8   :  { %3964 = vmatprep.subr.mxu0 %v3923_v6  ;;  %4117 = vmatprep.subr.mxu1 %v4076_v32  ;;  %v9321_v30 = vmax.f32 %v3574_v21, 0.0  ;;  %v3578_v46 = vadd.f32 %v3577_v14, %v3479_v11  ;;  %v3909_v6 = vld [vmem:[#allocation8 + $0x468] sm:$0xff]  ;;  %v3908_v21 = vld [vmem:[#allocation8 + $0x460] sm:$0xff] }
 0x7e9   :  { %3725 = vmatmul.mubr.f32.gmra.mxu0 %v9317_v22  ;;  %3878 = vmatmul.mubr.f32.gmra.mxu1 %v9317_v22  ;;  %v3579_v27 = vpop.f32.mrf.mxu0  ;;  %v4062_v32 = vld [vmem:[#allocation8 + $0x668] sm:$0xff]  ;;  %v4061_v14 = vld [vmem:[#allocation8 + $0x660] sm:$0xff] }
 0x7ea   :  { %3965 = vmatpush1.msra.mxu0 %v3922_v9  ;;  %4118 = vmatpush1.msra.mxu1 %v4075_v15  ;;  %v3580_v42 = vadd.f32 %v3579_v27, %v3479_v11  ;;  %v9333_v7 = vmax.f32 %v3578_v46, 0.0  ;;  %v3907_v9 = vld [vmem:[#allocation8 + $0x458] sm:$0xff]  ;;  %v4058_v27 = vld [vmem:[#allocation8 + $0x648] sm:$0xff] }
 0x7eb   :  { %3966 = vmatprep.subr.mxu0 %v3921_v38  ;;  %4119 = vmatprep.subr.mxu1 %v4074_v12  ;;  %v4060_v15 = vld [vmem:[#allocation8 + $0x658] sm:$0xff]  ;;  %v3906_v38 = vld [vmem:[#allocation8 + $0x450] sm:$0xff] }
 0x7ec   :  { %3967 = vmatpush1.msra.mxu0 %v3920_v36  ;;  %4120 = vmatpush1.msra.mxu1 %v4073_v3  ;;  %v9329_v50 = vmax.f32 %v3580_v42, 0.0  ;;  %v4059_v12 = vld [vmem:[#allocation8 + $0x650] sm:$0xff]  ;;  %v3904_v36 = vld [vmem:[#allocation8 + $0x440] sm:$0xff]  ;;  %v3903_v11 = vld [vmem:[#allocation8 + $0x438] sm:$0xff] }
 0x7ed   :  { %3730 = vmatprep.mubr.f32.mxu0 %v9321_v30  ;;  %3883 = vmatprep.mubr.f32.mxu1 %v9321_v30  ;;  %v4057_v3 = vld [vmem:[#allocation8 + $0x640] sm:$0xff]  ;;  %v4056_v42 = vld [vmem:[#allocation8 + $0x638] sm:$0xff] }
 0x7ee   :  { %3968 = vmatprep.subr.mxu0 %v3919_v28  ;;  %4121 = vmatprep.subr.mxu1 %v4072_v60  ;;  %v3902_v28 = vld [vmem:[#allocation8 + $0x430] sm:$0xff]  ;;  %v3899_v46 = vld [vmem:[#allocation8 + $0x418] sm:$0xff] }
 0x7ef   :  { %3731 = vmatmul.mubr.f32.gmra.mxu0 %v9325_v26  ;;  %3884 = vmatmul.mubr.f32.gmra.mxu1 %v9325_v26  ;;  %v4055_v60 = vld [vmem:[#allocation8 + $0x630] sm:$0xff] }
 0x7f0   :  { %3969 = vmatpush1.msra.mxu0 %v3918_v49  ;;  %4122 = vmatpush1.msra.mxu1 %v4071_v55  ;;  %v3901_v49 = vld [vmem:[#allocation8 + $0x428] sm:$0xff] }
 0x7f1   :  { %3970 = vmatprep.subr.mxu0 %v3917_v44  ;;  %4123 = vmatprep.subr.mxu1 %v4070_v5  ;;  %v4054_v55 = vld [vmem:[#allocation8 + $0x628] sm:$0xff]  ;;  %v3900_v44 = vld [vmem:[#allocation8 + $0x420] sm:$0xff] }
 0x7f2   :  { %3971 = vmatpush1.msra.mxu0 %v3916_v2  ;;  %4124 = vmatpush1.msra.mxu1 %v4069_v47  ;;  %v4053_v5 = vld [vmem:[#allocation8 + $0x620] sm:$0xff]  ;;  %v4052_v2 = vld [vmem:[#allocation8 + $0x618] sm:$0xff]  ;;  %v3898_v47 = vld [vmem:[#allocation8 + $0x410] sm:$0xff] }
 0x7f3   :  { %3736 = vmatprep.mubr.f32.mxu0 %v9329_v50  ;;  %3889 = vmatprep.mubr.f32.mxu1 %v9329_v50 }
 0x7f4   :  { %3972 = vmatprep.subr.mxu0 %v3915_v53  ;;  %4125 = vmatprep.subr.mxu1 %v4068_v25  ;;  %v4051_v53 = vld [vmem:[#allocation8 + $0x610] sm:$0xff]  ;;  %v3897_v25 = vld [vmem:[#allocation8 + $0x408] sm:$0xff] }
 0x7f5   :  { %3737 = vmatmul.mubr.f32.gmra.mxu0 %v9333_v7  ;;  %3890 = vmatmul.mubr.f32.gmra.mxu1 %v9333_v7 }
 0x7f6   :  { %3973 = vmatpush1.msra.mxu0 %v3914_v1  ;;  %4126 = vmatpush1.msra.mxu1 %v4067_v45  ;;  %v4050_v1 = vld [vmem:[#allocation8 + $0x608] sm:$0xff]  ;;  %v3896_v45 = vld [vmem:[#allocation8 + $0x400] sm:$0xff] }
 0x7f7   :  { %3974 = vmatprep.subr.mxu0 %v3913_v61  ;;  %4024 = vmatprep.mubr.f32.mxu0 %v9307_v52  ;;  %v4049_v61 = vld [vmem:[#allocation8 + $0x600] sm:$0xff] }
 0x7f8   :  { %4127 = vmatprep.subr.mxu1 %v4066_v58  ;;  %4177 = vmatprep.mubr.f32.mxu1 %v9307_v52  ;;  %v3959_v58 = vld [vmem:[#allocation8 + $0x5f8] sm:$0xff] }
 0x7f9   :  { %3975 = vmatpush1.msra.mxu0 %v3912_v56  ;;  %4128 = vmatpush1.msra.mxu1 %v4065_v10  ;;  %v4112_v56 = vld [vmem:[#allocation8 + $0x7f8] sm:$0xff]  ;;  %v3958_v10 = vld [vmem:[#allocation8 + $0x5f0] sm:$0xff] }
 0x7fa   :  { %3976 = vmatprep.subr.mxu0 %v3911_v8  ;;  %4129 = vmatprep.subr.mxu1 %v4064_v33  ;;  %v4111_v8 = vld [vmem:[#allocation8 + $0x7f0] sm:$0xff]  ;;  %v3957_v33 = vld [vmem:[#allocation8 + $0x5e8] sm:$0xff] }
 0x7fb   :  { %3977 = vmatpush1.msra.mxu0 %v3910_v63  ;;  %4130 = vmatpush1.msra.mxu1 %v4063_v31  ;;  %v4110_v63 = vld [vmem:[#allocation8 + $0x7e8] sm:$0xff]  ;;  %v3956_v31 = vld [vmem:[#allocation8 + $0x5e0] sm:$0xff] }
 0x7fc   :  { %3978 = vmatprep.subr.mxu0 %v3909_v6  ;;  %4131 = vmatprep.subr.mxu1 %v4062_v32  ;;  %v4109_v6 = vld [vmem:[#allocation8 + $0x7e0] sm:$0xff]  ;;  %v3955_v32 = vld [vmem:[#allocation8 + $0x5d8] sm:$0xff] }
 0x7fd   :  { %3979 = vmatpush1.msra.mxu0 %v3908_v21  ;;  %4132 = vmatpush1.msra.mxu1 %v4061_v14  ;;  %v4108_v21 = vld [vmem:[#allocation8 + $0x7d8] sm:$0xff]  ;;  %v3954_v14 = vld [vmem:[#allocation8 + $0x5d0] sm:$0xff] }
 0x7fe   :  { %3980 = vmatprep.subr.mxu0 %v3907_v9  ;;  %4133 = vmatprep.subr.mxu1 %v4060_v15  ;;  %v4107_v9 = vld [vmem:[#allocation8 + $0x7d0] sm:$0xff]  ;;  %v3953_v15 = vld [vmem:[#allocation8 + $0x5c8] sm:$0xff] }
 0x7ff   :  { %3981 = vmatpush1.msra.mxu0 %v3906_v38  ;;  %4134 = vmatpush1.msra.mxu1 %v4059_v12  ;;  %v4106_v38 = vld [vmem:[#allocation8 + $0x7c8] sm:$0xff]  ;;  %v3952_v12 = vld [vmem:[#allocation8 + $0x5c0] sm:$0xff] }
 0x800   :  { %3982 = vmatprep.subr.mxu0 %v3905_v29  ;;  %4135 = vmatprep.subr.mxu1 %v4058_v27  ;;  %v4105_v29 = vld [vmem:[#allocation8 + $0x7c0] sm:$0xff]  ;;  %v3951_v27 = vld [vmem:[#allocation8 + $0x5b8] sm:$0xff] }
 0x801   :  { %3983 = vmatpush1.msra.mxu0 %v3904_v36  ;;  %4136 = vmatpush1.msra.mxu1 %v4057_v3  ;;  %v4104_v36 = vld [vmem:[#allocation8 + $0x7b8] sm:$0xff]  ;;  %v3950_v3 = vld [vmem:[#allocation8 + $0x5b0] sm:$0xff] }
 0x802   :  { %3984 = vmatprep.subr.mxu0 %v3903_v11  ;;  %4137 = vmatprep.subr.mxu1 %v4056_v42  ;;  %v4103_v11 = vld [vmem:[#allocation8 + $0x7b0] sm:$0xff]  ;;  %v3949_v42 = vld [vmem:[#allocation8 + $0x5a8] sm:$0xff] }
 0x803   :  { %3985 = vmatpush1.msra.mxu0 %v3902_v28  ;;  %4138 = vmatpush1.msra.mxu1 %v4055_v60  ;;  %v4102_v28 = vld [vmem:[#allocation8 + $0x7a8] sm:$0xff]  ;;  %v3948_v60 = vld [vmem:[#allocation8 + $0x5a0] sm:$0xff] }
 0x804   :  { %3986 = vmatprep.subr.mxu0 %v3901_v49  ;;  %4139 = vmatprep.subr.mxu1 %v4054_v55  ;;  %v4101_v49 = vld [vmem:[#allocation8 + $0x7a0] sm:$0xff]  ;;  %v3947_v55 = vld [vmem:[#allocation8 + $0x598] sm:$0xff] }
 0x805   :  { %3987 = vmatpush1.msra.mxu0 %v3900_v44  ;;  %4140 = vmatpush1.msra.mxu1 %v4053_v5  ;;  %v4100_v44 = vld [vmem:[#allocation8 + $0x798] sm:$0xff]  ;;  %v3946_v5 = vld [vmem:[#allocation8 + $0x590] sm:$0xff] }
 0x806   :  { %3988 = vmatprep.subr.mxu0 %v3899_v46  ;;  %4141 = vmatprep.subr.mxu1 %v4052_v2  ;;  %v4099_v46 = vld [vmem:[#allocation8 + $0x790] sm:$0xff]  ;;  %v3945_v2 = vld [vmem:[#allocation8 + $0x588] sm:$0xff] }
 0x807   :  { %3989 = vmatpush1.msra.mxu0 %v3898_v47  ;;  %4142 = vmatpush1.msra.mxu1 %v4051_v53  ;;  %v4098_v47 = vld [vmem:[#allocation8 + $0x788] sm:$0xff]  ;;  %v3944_v53 = vld [vmem:[#allocation8 + $0x580] sm:$0xff] }
 0x808   :  { %3990 = vmatprep.subr.mxu0 %v3897_v25  ;;  %4143 = vmatprep.subr.mxu1 %v4050_v1  ;;  %v4097_v25 = vld [vmem:[#allocation8 + $0x780] sm:$0xff]  ;;  %v3943_v1 = vld [vmem:[#allocation8 + $0x578] sm:$0xff] }
 0x809   :  { %3991 = vmatpush1.msra.mxu0 %v3896_v45  ;;  %4144 = vmatpush1.msra.mxu1 %v4049_v61  ;;  %v4096_v45 = vld [vmem:[#allocation8 + $0x778] sm:$0xff]  ;;  %v3942_v61 = vld [vmem:[#allocation8 + $0x570] sm:$0xff] }
 0x80a   :  { %3992 = vmatprep.subr.mxu0 %v3959_v58  ;;  %4145 = vmatprep.subr.mxu1 %v4112_v56  ;;  %v4095_v58 = vld [vmem:[#allocation8 + $0x770] sm:$0xff]  ;;  %v3941_v56 = vld [vmem:[#allocation8 + $0x568] sm:$0xff] }
 0x80b   :  { %3993 = vmatpush2.msra.mxu0 %v3958_v10  ;;  %4146 = vmatpush2.msra.mxu1 %v4111_v8  ;;  %v4094_v10 = vld [vmem:[#allocation8 + $0x768] sm:$0xff]  ;;  %v3940_v8 = vld [vmem:[#allocation8 + $0x560] sm:$0xff] }
 0x80c   :  { %3994 = vmatprep.subr.mxu0 %v3957_v33  ;;  %4147 = vmatprep.subr.mxu1 %v4110_v63  ;;  %v4093_v33 = vld [vmem:[#allocation8 + $0x760] sm:$0xff]  ;;  %v3939_v63 = vld [vmem:[#allocation8 + $0x558] sm:$0xff] }
 0x80d   :  { %3995 = vmatpush2.msra.mxu0 %v3956_v31  ;;  %4148 = vmatpush2.msra.mxu1 %v4109_v6  ;;  %v4092_v31 = vld [vmem:[#allocation8 + $0x758] sm:$0xff]  ;;  %v3938_v6 = vld [vmem:[#allocation8 + $0x550] sm:$0xff] }
 0x80e   :  { %3996 = vmatprep.subr.mxu0 %v3955_v32  ;;  %4149 = vmatprep.subr.mxu1 %v4108_v21  ;;  %v4091_v32 = vld [vmem:[#allocation8 + $0x750] sm:$0xff]  ;;  %v3937_v21 = vld [vmem:[#allocation8 + $0x548] sm:$0xff] }
 0x80f   :  { %3997 = vmatpush2.msra.mxu0 %v3954_v14  ;;  %4150 = vmatpush2.msra.mxu1 %v4107_v9  ;;  %v4090_v14 = vld [vmem:[#allocation8 + $0x748] sm:$0xff]  ;;  %v3936_v9 = vld [vmem:[#allocation8 + $0x540] sm:$0xff] }
 0x810   :  { %3998 = vmatprep.subr.mxu0 %v3953_v15  ;;  %4151 = vmatprep.subr.mxu1 %v4106_v38  ;;  %v4089_v15 = vld [vmem:[#allocation8 + $0x740] sm:$0xff]  ;;  %v3935_v38 = vld [vmem:[#allocation8 + $0x538] sm:$0xff] }
 0x811   :  { %3999 = vmatpush2.msra.mxu0 %v3952_v12  ;;  %4152 = vmatpush2.msra.mxu1 %v4105_v29  ;;  %v4088_v12 = vld [vmem:[#allocation8 + $0x738] sm:$0xff]  ;;  %v3934_v29 = vld [vmem:[#allocation8 + $0x530] sm:$0xff] }
 0x812   :  { %4000 = vmatprep.subr.mxu0 %v3951_v27  ;;  %4153 = vmatprep.subr.mxu1 %v4104_v36  ;;  %v4087_v27 = vld [vmem:[#allocation8 + $0x730] sm:$0xff]  ;;  %v3933_v36 = vld [vmem:[#allocation8 + $0x528] sm:$0xff] }
 0x813   :  { %4001 = vmatpush2.msra.mxu0 %v3950_v3  ;;  %4154 = vmatpush2.msra.mxu1 %v4103_v11  ;;  %v4086_v3 = vld [vmem:[#allocation8 + $0x728] sm:$0xff]  ;;  %v3932_v11 = vld [vmem:[#allocation8 + $0x520] sm:$0xff] }
 0x814   :  { %4002 = vmatprep.subr.mxu0 %v3949_v42  ;;  %4155 = vmatprep.subr.mxu1 %v4102_v28  ;;  %v4085_v42 = vld [vmem:[#allocation8 + $0x720] sm:$0xff]  ;;  %v3931_v28 = vld [vmem:[#allocation8 + $0x518] sm:$0xff] }
 0x815   :  { %4003 = vmatpush2.msra.mxu0 %v3948_v60  ;;  %4156 = vmatpush2.msra.mxu1 %v4101_v49  ;;  %v4084_v60 = vld [vmem:[#allocation8 + $0x718] sm:$0xff]  ;;  %v3930_v49 = vld [vmem:[#allocation8 + $0x510] sm:$0xff] }
 0x816   :  { %4004 = vmatprep.subr.mxu0 %v3947_v55  ;;  %4157 = vmatprep.subr.mxu1 %v4100_v44  ;;  %v4083_v55 = vld [vmem:[#allocation8 + $0x710] sm:$0xff]  ;;  %v3929_v44 = vld [vmem:[#allocation8 + $0x508] sm:$0xff] }
 0x817   :  { %4005 = vmatpush2.msra.mxu0 %v3946_v5  ;;  %4158 = vmatpush2.msra.mxu1 %v4099_v46  ;;  %v4082_v5 = vld [vmem:[#allocation8 + $0x708] sm:$0xff]  ;;  %v3928_v46 = vld [vmem:[#allocation8 + $0x500] sm:$0xff] }
 0x818   :  { %4006 = vmatprep.subr.mxu0 %v3945_v2  ;;  %4159 = vmatprep.subr.mxu1 %v4098_v47  ;;  %v4081_v2 = vld [vmem:[#allocation8 + $0x700] sm:$0xff]  ;;  %v4233_v47 = vld [vmem:[#allocation8 + $0x8f8] sm:$0xff] }
 0x819   :  { %4007 = vmatpush2.msra.mxu0 %v3944_v53  ;;  %4160 = vmatpush2.msra.mxu1 %v4097_v25  ;;  %v4386_v53 = vld [vmem:[#allocation8 + $0xaf8] sm:$0xff]  ;;  %v4232_v25 = vld [vmem:[#allocation8 + $0x8f0] sm:$0xff] }
 0x81a   :  { %4008 = vmatprep.subr.mxu0 %v3943_v1  ;;  %4161 = vmatprep.subr.mxu1 %v4096_v45  ;;  %v4385_v1 = vld [vmem:[#allocation8 + $0xaf0] sm:$0xff]  ;;  %v4231_v45 = vld [vmem:[#allocation8 + $0x8e8] sm:$0xff] }
 0x81b   :  { %4009 = vmatpush2.msra.mxu0 %v3942_v61  ;;  %4162 = vmatpush2.msra.mxu1 %v4095_v58  ;;  %v4384_v61 = vld [vmem:[#allocation8 + $0xae8] sm:$0xff]  ;;  %v4230_v58 = vld [vmem:[#allocation8 + $0x8e0] sm:$0xff] }
 0x81c   :  { %4010 = vmatprep.subr.mxu0 %v3941_v56  ;;  %4163 = vmatprep.subr.mxu1 %v4094_v10  ;;  %v4383_v56 = vld [vmem:[#allocation8 + $0xae0] sm:$0xff]  ;;  %v4229_v10 = vld [vmem:[#allocation8 + $0x8d8] sm:$0xff] }
 0x81d   :  { %4011 = vmatpush2.msra.mxu0 %v3940_v8  ;;  %4164 = vmatpush2.msra.mxu1 %v4093_v33  ;;  %v4382_v8 = vld [vmem:[#allocation8 + $0xad8] sm:$0xff]  ;;  %v4228_v33 = vld [vmem:[#allocation8 + $0x8d0] sm:$0xff] }
 0x81e   :  { %4012 = vmatprep.subr.mxu0 %v3939_v63  ;;  %4165 = vmatprep.subr.mxu1 %v4092_v31  ;;  %v4381_v63 = vld [vmem:[#allocation8 + $0xad0] sm:$0xff]  ;;  %v4227_v31 = vld [vmem:[#allocation8 + $0x8c8] sm:$0xff] }
 0x81f   :  { %4013 = vmatpush2.msra.mxu0 %v3938_v6  ;;  %4166 = vmatpush2.msra.mxu1 %v4091_v32  ;;  %v4380_v6 = vld [vmem:[#allocation8 + $0xac8] sm:$0xff]  ;;  %v4226_v32 = vld [vmem:[#allocation8 + $0x8c0] sm:$0xff] }
 0x820   :  { %4014 = vmatprep.subr.mxu0 %v3937_v21  ;;  %4167 = vmatprep.subr.mxu1 %v4090_v14  ;;  %v4379_v21 = vld [vmem:[#allocation8 + $0xac0] sm:$0xff]  ;;  %v4225_v14 = vld [vmem:[#allocation8 + $0x8b8] sm:$0xff] }
 0x821   :  { %4015 = vmatpush2.msra.mxu0 %v3936_v9  ;;  %4168 = vmatpush2.msra.mxu1 %v4089_v15  ;;  %v4378_v9 = vld [vmem:[#allocation8 + $0xab8] sm:$0xff]  ;;  %v4224_v15 = vld [vmem:[#allocation8 + $0x8b0] sm:$0xff] }
 0x822   :  { %4016 = vmatprep.subr.mxu0 %v3935_v38  ;;  %4169 = vmatprep.subr.mxu1 %v4088_v12  ;;  %v4377_v38 = vld [vmem:[#allocation8 + $0xab0] sm:$0xff]  ;;  %v4223_v12 = vld [vmem:[#allocation8 + $0x8a8] sm:$0xff] }
 0x823   :  { %4017 = vmatpush2.msra.mxu0 %v3934_v29  ;;  %4170 = vmatpush2.msra.mxu1 %v4087_v27  ;;  %v4376_v29 = vld [vmem:[#allocation8 + $0xaa8] sm:$0xff]  ;;  %v4222_v27 = vld [vmem:[#allocation8 + $0x8a0] sm:$0xff] }
 0x824   :  { %4018 = vmatprep.subr.mxu0 %v3933_v36  ;;  %4171 = vmatprep.subr.mxu1 %v4086_v3  ;;  %v4375_v36 = vld [vmem:[#allocation8 + $0xaa0] sm:$0xff]  ;;  %v4221_v3 = vld [vmem:[#allocation8 + $0x898] sm:$0xff] }
 0x825   :  { %4019 = vmatpush2.msra.mxu0 %v3932_v11  ;;  %4172 = vmatpush2.msra.mxu1 %v4085_v42  ;;  %v4374_v11 = vld [vmem:[#allocation8 + $0xa98] sm:$0xff]  ;;  %v4220_v42 = vld [vmem:[#allocation8 + $0x890] sm:$0xff] }
 0x826   :  { %4020 = vmatprep.subr.mxu0 %v3931_v28  ;;  %4173 = vmatprep.subr.mxu1 %v4084_v60  ;;  %v4373_v28 = vld [vmem:[#allocation8 + $0xa90] sm:$0xff]  ;;  %v4219_v60 = vld [vmem:[#allocation8 + $0x888] sm:$0xff] }
 0x827   :  { %4021 = vmatpush2.msra.mxu0 %v3930_v49  ;;  %4174 = vmatpush2.msra.mxu1 %v4083_v55  ;;  %v4372_v49 = vld [vmem:[#allocation8 + $0xa88] sm:$0xff]  ;;  %v4218_v55 = vld [vmem:[#allocation8 + $0x880] sm:$0xff] }
 0x828   :  { %4022 = vmatprep.subr.mxu0 %v3929_v44  ;;  %4175 = vmatprep.subr.mxu1 %v4082_v5  ;;  %v4371_v44 = vld [vmem:[#allocation8 + $0xa80] sm:$0xff]  ;;  %v4217_v5 = vld [vmem:[#allocation8 + $0x878] sm:$0xff] }
 0x829   :  { %4023 = vmatpush2.msra.mxu0 %v3928_v46  ;;  %4176 = vmatpush2.msra.mxu1 %v4081_v2  ;;  %v4370_v46 = vld [vmem:[#allocation8 + $0xa78] sm:$0xff]  ;;  %v4216_v2 = vld [vmem:[#allocation8 + $0x870] sm:$0xff] }
 0x82a   :  { %4025 = vmatmul.mubr.f32.vlgmr.msra.gmra.mxu0 %v9309_v57  ;;  %4178 = vmatmul.mubr.f32.vlgmr.msra.gmra.mxu1 %v9309_v57 }
 0x82b   :  { %4266 = vmatprep.subr.mxu0 %v4233_v47  ;;  %4419 = vmatprep.subr.mxu1 %v4386_v53  ;;  %v4369_v47 = vld [vmem:[#allocation8 + $0xa70] sm:$0xff]  ;;  %v4215_v53 = vld [vmem:[#allocation8 + $0x868] sm:$0xff] }
 0x82c   :  { %4030 = vmatprep.mubr.f32.mxu0 %v9315_v16  ;;  %4183 = vmatprep.mubr.f32.mxu1 %v9315_v16 }
 0x82d   :  { %4267 = vmatpush1.msra.mxu0 %v4232_v25  ;;  %4420 = vmatpush1.msra.mxu1 %v4385_v1  ;;  %v4368_v25 = vld [vmem:[#allocation8 + $0xa68] sm:$0xff]  ;;  %v4214_v1 = vld [vmem:[#allocation8 + $0x860] sm:$0xff] }
 0x82e   :  { %4268 = vmatprep.subr.mxu0 %v4231_v45  ;;  %4421 = vmatprep.subr.mxu1 %v4384_v61  ;;  %v4367_v45 = vld [vmem:[#allocation8 + $0xa60] sm:$0xff]  ;;  %v4213_v61 = vld [vmem:[#allocation8 + $0x858] sm:$0xff] }
 0x82f   :  { %4269 = vmatpush1.msra.mxu0 %v4230_v58  ;;  %4422 = vmatpush1.msra.mxu1 %v4383_v56  ;;  %v4366_v58 = vld [vmem:[#allocation8 + $0xa58] sm:$0xff]  ;;  %v4212_v56 = vld [vmem:[#allocation8 + $0x850] sm:$0xff] }
 0x830   :  { %4031 = vmatmul.mubr.f32.gmra.mxu0 %v9317_v22  ;;  %4184 = vmatmul.mubr.f32.gmra.mxu1 %v9317_v22 }
 0x831   :  { %4270 = vmatprep.subr.mxu0 %v4229_v10  ;;  %4423 = vmatprep.subr.mxu1 %v4382_v8  ;;  %v4365_v10 = vld [vmem:[#allocation8 + $0xa50] sm:$0xff]  ;;  %v4211_v8 = vld [vmem:[#allocation8 + $0x848] sm:$0xff] }
 0x832   :  { %4036 = vmatprep.mubr.f32.mxu0 %v9321_v30  ;;  %4189 = vmatprep.mubr.f32.mxu1 %v9321_v30 }
 0x833   :  { %4271 = vmatpush1.msra.mxu0 %v4228_v33  ;;  %4424 = vmatpush1.msra.mxu1 %v4381_v63  ;;  %v4364_v33 = vld [vmem:[#allocation8 + $0xa48] sm:$0xff]  ;;  %v4210_v63 = vld [vmem:[#allocation8 + $0x840] sm:$0xff] }
 0x834   :  { %4272 = vmatprep.subr.mxu0 %v4227_v31  ;;  %4425 = vmatprep.subr.mxu1 %v4380_v6  ;;  %v4363_v31 = vld [vmem:[#allocation8 + $0xa40] sm:$0xff]  ;;  %v4209_v6 = vld [vmem:[#allocation8 + $0x838] sm:$0xff] }
 0x835   :  { %4273 = vmatpush1.msra.mxu0 %v4226_v32  ;;  %4426 = vmatpush1.msra.mxu1 %v4379_v21  ;;  %v4362_v32 = vld [vmem:[#allocation8 + $0xa38] sm:$0xff]  ;;  %v4208_v21 = vld [vmem:[#allocation8 + $0x830] sm:$0xff] }
 0x836   :  { %4037 = vmatmul.mubr.f32.gmra.mxu0 %v9325_v26  ;;  %4190 = vmatmul.mubr.f32.gmra.mxu1 %v9325_v26 }
 0x837   :  { %4274 = vmatprep.subr.mxu0 %v4225_v14  ;;  %4427 = vmatprep.subr.mxu1 %v4378_v9  ;;  %v4361_v14 = vld [vmem:[#allocation8 + $0xa30] sm:$0xff]  ;;  %v4207_v9 = vld [vmem:[#allocation8 + $0x828] sm:$0xff] }
 0x838   :  { %4042 = vmatprep.mubr.f32.mxu0 %v9329_v50  ;;  %4195 = vmatprep.mubr.f32.mxu1 %v9329_v50 }
 0x839   :  { %4275 = vmatpush1.msra.mxu0 %v4224_v15  ;;  %4428 = vmatpush1.msra.mxu1 %v4377_v38  ;;  %v4360_v15 = vld [vmem:[#allocation8 + $0xa28] sm:$0xff]  ;;  %v4206_v38 = vld [vmem:[#allocation8 + $0x820] sm:$0xff] }
 0x83a   :  { %4276 = vmatprep.subr.mxu0 %v4223_v12  ;;  %4429 = vmatprep.subr.mxu1 %v4376_v29  ;;  %v4359_v12 = vld [vmem:[#allocation8 + $0xa20] sm:$0xff]  ;;  %v4205_v29 = vld [vmem:[#allocation8 + $0x818] sm:$0xff] }
 0x83b   :  { %4277 = vmatpush1.msra.mxu0 %v4222_v27  ;;  %4430 = vmatpush1.msra.mxu1 %v4375_v36  ;;  %v4358_v27 = vld [vmem:[#allocation8 + $0xa18] sm:$0xff]  ;;  %v4204_v36 = vld [vmem:[#allocation8 + $0x810] sm:$0xff] }
 0x83c   :  { %4043 = vmatmul.mubr.f32.gmra.mxu0 %v9333_v7  ;;  %4196 = vmatmul.mubr.f32.gmra.mxu1 %v9333_v7 }
 0x83d   :  { %4278 = vmatprep.subr.mxu0 %v4221_v3  ;;  %4431 = vmatprep.subr.mxu1 %v4374_v11  ;;  %v4357_v3 = vld [vmem:[#allocation8 + $0xa10] sm:$0xff]  ;;  %v4203_v11 = vld [vmem:[#allocation8 + $0x808] sm:$0xff] }
 0x83e   :  { %4279 = vmatpush1.msra.mxu0 %v4220_v42  ;;  %4330 = vmatprep.mubr.f32.mxu0 %v9307_v52  ;;  %v4356_v42 = vld [vmem:[#allocation8 + $0xa08] sm:$0xff] }
 0x83f   :  { %4432 = vmatpush1.msra.mxu1 %v4373_v28  ;;  %4483 = vmatprep.mubr.f32.mxu1 %v9307_v52  ;;  %v4202_v28 = vld [vmem:[#allocation8 + $0x800] sm:$0xff] }
 0x840   :  { %4280 = vmatprep.subr.mxu0 %v4219_v60  ;;  %4433 = vmatprep.subr.mxu1 %v4372_v49  ;;  %v4355_v60 = vld [vmem:[#allocation8 + $0xa00] sm:$0xff]  ;;  %v4265_v49 = vld [vmem:[#allocation8 + $0x9f8] sm:$0xff] }
 0x841   :  { %4281 = vmatpush1.msra.mxu0 %v4218_v55  ;;  %4434 = vmatpush1.msra.mxu1 %v4371_v44  ;;  %v4418_v55 = vld [vmem:[#allocation8 + $0xbf8] sm:$0xff]  ;;  %v4264_v44 = vld [vmem:[#allocation8 + $0x9f0] sm:$0xff] }
 0x842   :  { %4282 = vmatprep.subr.mxu0 %v4217_v5  ;;  %4435 = vmatprep.subr.mxu1 %v4370_v46  ;;  %v4417_v5 = vld [vmem:[#allocation8 + $0xbf0] sm:$0xff]  ;;  %v4263_v46 = vld [vmem:[#allocation8 + $0x9e8] sm:$0xff] }
 0x843   :  { %4283 = vmatpush1.msra.mxu0 %v4216_v2  ;;  %4436 = vmatpush1.msra.mxu1 %v4369_v47  ;;  %v4416_v2 = vld [vmem:[#allocation8 + $0xbe8] sm:$0xff]  ;;  %v4262_v47 = vld [vmem:[#allocation8 + $0x9e0] sm:$0xff] }
 0x844   :  { %4284 = vmatprep.subr.mxu0 %v4215_v53  ;;  %4437 = vmatprep.subr.mxu1 %v4368_v25  ;;  %v4415_v53 = vld [vmem:[#allocation8 + $0xbe0] sm:$0xff]  ;;  %v4261_v25 = vld [vmem:[#allocation8 + $0x9d8] sm:$0xff] }
 0x845   :  { %4285 = vmatpush1.msra.mxu0 %v4214_v1  ;;  %4438 = vmatpush1.msra.mxu1 %v4367_v45  ;;  %v4414_v1 = vld [vmem:[#allocation8 + $0xbd8] sm:$0xff]  ;;  %v4260_v45 = vld [vmem:[#allocation8 + $0x9d0] sm:$0xff] }
 0x846   :  { %4286 = vmatprep.subr.mxu0 %v4213_v61  ;;  %4439 = vmatprep.subr.mxu1 %v4366_v58  ;;  %v4413_v61 = vld [vmem:[#allocation8 + $0xbd0] sm:$0xff]  ;;  %v4259_v58 = vld [vmem:[#allocation8 + $0x9c8] sm:$0xff] }
 0x847   :  { %4287 = vmatpush1.msra.mxu0 %v4212_v56  ;;  %4440 = vmatpush1.msra.mxu1 %v4365_v10  ;;  %v4412_v56 = vld [vmem:[#allocation8 + $0xbc8] sm:$0xff]  ;;  %v4258_v10 = vld [vmem:[#allocation8 + $0x9c0] sm:$0xff] }
 0x848   :  { %4288 = vmatprep.subr.mxu0 %v4211_v8  ;;  %4441 = vmatprep.subr.mxu1 %v4364_v33  ;;  %v4411_v8 = vld [vmem:[#allocation8 + $0xbc0] sm:$0xff]  ;;  %v4257_v33 = vld [vmem:[#allocation8 + $0x9b8] sm:$0xff] }
 0x849   :  { %4289 = vmatpush1.msra.mxu0 %v4210_v63  ;;  %4442 = vmatpush1.msra.mxu1 %v4363_v31  ;;  %v4410_v63 = vld [vmem:[#allocation8 + $0xbb8] sm:$0xff]  ;;  %v4256_v31 = vld [vmem:[#allocation8 + $0x9b0] sm:$0xff] }
 0x84a   :  { %4290 = vmatprep.subr.mxu0 %v4209_v6  ;;  %4443 = vmatprep.subr.mxu1 %v4362_v32  ;;  %v4409_v6 = vld [vmem:[#allocation8 + $0xbb0] sm:$0xff]  ;;  %v4255_v32 = vld [vmem:[#allocation8 + $0x9a8] sm:$0xff] }
 0x84b   :  { %4291 = vmatpush1.msra.mxu0 %v4208_v21  ;;  %4444 = vmatpush1.msra.mxu1 %v4361_v14  ;;  %v4408_v21 = vld [vmem:[#allocation8 + $0xba8] sm:$0xff]  ;;  %v4254_v14 = vld [vmem:[#allocation8 + $0x9a0] sm:$0xff] }
 0x84c   :  { %4292 = vmatprep.subr.mxu0 %v4207_v9  ;;  %4445 = vmatprep.subr.mxu1 %v4360_v15  ;;  %v4407_v9 = vld [vmem:[#allocation8 + $0xba0] sm:$0xff]  ;;  %v4253_v15 = vld [vmem:[#allocation8 + $0x998] sm:$0xff] }
 0x84d   :  { %4293 = vmatpush1.msra.mxu0 %v4206_v38  ;;  %4446 = vmatpush1.msra.mxu1 %v4359_v12  ;;  %v4406_v38 = vld [vmem:[#allocation8 + $0xb98] sm:$0xff]  ;;  %v4252_v12 = vld [vmem:[#allocation8 + $0x990] sm:$0xff] }
 0x84e   :  { %4294 = vmatprep.subr.mxu0 %v4205_v29  ;;  %4447 = vmatprep.subr.mxu1 %v4358_v27  ;;  %v4405_v29 = vld [vmem:[#allocation8 + $0xb90] sm:$0xff]  ;;  %v4251_v27 = vld [vmem:[#allocation8 + $0x988] sm:$0xff] }
 0x84f   :  { %4295 = vmatpush1.msra.mxu0 %v4204_v36  ;;  %4448 = vmatpush1.msra.mxu1 %v4357_v3  ;;  %v4404_v36 = vld [vmem:[#allocation8 + $0xb88] sm:$0xff]  ;;  %v4250_v3 = vld [vmem:[#allocation8 + $0x980] sm:$0xff] }
 0x850   :  { %4296 = vmatprep.subr.mxu0 %v4203_v11  ;;  %4449 = vmatprep.subr.mxu1 %v4356_v42  ;;  %v4403_v11 = vld [vmem:[#allocation8 + $0xb80] sm:$0xff]  ;;  %v4249_v42 = vld [vmem:[#allocation8 + $0x978] sm:$0xff] }
 0x851   :  { %4297 = vmatpush1.msra.mxu0 %v4202_v28  ;;  %4450 = vmatpush1.msra.mxu1 %v4355_v60  ;;  %v4402_v28 = vld [vmem:[#allocation8 + $0xb78] sm:$0xff]  ;;  %v4248_v60 = vld [vmem:[#allocation8 + $0x970] sm:$0xff] }
 0x852   :  { %4298 = vmatprep.subr.mxu0 %v4265_v49  ;;  %4451 = vmatprep.subr.mxu1 %v4418_v55  ;;  %v4401_v49 = vld [vmem:[#allocation8 + $0xb70] sm:$0xff]  ;;  %v4247_v55 = vld [vmem:[#allocation8 + $0x968] sm:$0xff] }
 0x853   :  { %4299 = vmatpush2.msra.mxu0 %v4264_v44  ;;  %4452 = vmatpush2.msra.mxu1 %v4417_v5  ;;  %v4400_v44 = vld [vmem:[#allocation8 + $0xb68] sm:$0xff]  ;;  %v4246_v5 = vld [vmem:[#allocation8 + $0x960] sm:$0xff] }
 0x854   :  { %4300 = vmatprep.subr.mxu0 %v4263_v46  ;;  %4453 = vmatprep.subr.mxu1 %v4416_v2  ;;  %v4399_v46 = vld [vmem:[#allocation8 + $0xb60] sm:$0xff]  ;;  %v4245_v2 = vld [vmem:[#allocation8 + $0x958] sm:$0xff] }
 0x855   :  { %4301 = vmatpush2.msra.mxu0 %v4262_v47  ;;  %4454 = vmatpush2.msra.mxu1 %v4415_v53  ;;  %v4398_v47 = vld [vmem:[#allocation8 + $0xb58] sm:$0xff]  ;;  %v4244_v53 = vld [vmem:[#allocation8 + $0x950] sm:$0xff] }
 0x856   :  { %4302 = vmatprep.subr.mxu0 %v4261_v25  ;;  %4455 = vmatprep.subr.mxu1 %v4414_v1  ;;  %v4397_v25 = vld [vmem:[#allocation8 + $0xb50] sm:$0xff]  ;;  %v4243_v1 = vld [vmem:[#allocation8 + $0x948] sm:$0xff] }
 0x857   :  { %4303 = vmatpush2.msra.mxu0 %v4260_v45  ;;  %4456 = vmatpush2.msra.mxu1 %v4413_v61  ;;  %v4396_v45 = vld [vmem:[#allocation8 + $0xb48] sm:$0xff]  ;;  %v4242_v61 = vld [vmem:[#allocation8 + $0x940] sm:$0xff] }
 0x858   :  { %4304 = vmatprep.subr.mxu0 %v4259_v58  ;;  %4457 = vmatprep.subr.mxu1 %v4412_v56  ;;  %v4395_v58 = vld [vmem:[#allocation8 + $0xb40] sm:$0xff]  ;;  %v4241_v56 = vld [vmem:[#allocation8 + $0x938] sm:$0xff] }
 0x859   :  { %4305 = vmatpush2.msra.mxu0 %v4258_v10  ;;  %4458 = vmatpush2.msra.mxu1 %v4411_v8  ;;  %v4394_v10 = vld [vmem:[#allocation8 + $0xb38] sm:$0xff]  ;;  %v4240_v8 = vld [vmem:[#allocation8 + $0x930] sm:$0xff] }
 0x85a   :  { %4306 = vmatprep.subr.mxu0 %v4257_v33  ;;  %4459 = vmatprep.subr.mxu1 %v4410_v63  ;;  %v4393_v33 = vld [vmem:[#allocation8 + $0xb30] sm:$0xff]  ;;  %v4239_v63 = vld [vmem:[#allocation8 + $0x928] sm:$0xff] }
 0x85b   :  { %4307 = vmatpush2.msra.mxu0 %v4256_v31  ;;  %4460 = vmatpush2.msra.mxu1 %v4409_v6  ;;  %v4392_v31 = vld [vmem:[#allocation8 + $0xb28] sm:$0xff]  ;;  %v4238_v6 = vld [vmem:[#allocation8 + $0x920] sm:$0xff] }
 0x85c   :  { %4308 = vmatprep.subr.mxu0 %v4255_v32  ;;  %4461 = vmatprep.subr.mxu1 %v4408_v21  ;;  %v4391_v32 = vld [vmem:[#allocation8 + $0xb20] sm:$0xff]  ;;  %v4237_v21 = vld [vmem:[#allocation8 + $0x918] sm:$0xff] }
 0x85d   :  { %4309 = vmatpush2.msra.mxu0 %v4254_v14  ;;  %4462 = vmatpush2.msra.mxu1 %v4407_v9  ;;  %v4390_v14 = vld [vmem:[#allocation8 + $0xb18] sm:$0xff]  ;;  %v4236_v9 = vld [vmem:[#allocation8 + $0x910] sm:$0xff] }
 0x85e   :  { %4310 = vmatprep.subr.mxu0 %v4253_v15  ;;  %4463 = vmatprep.subr.mxu1 %v4406_v38  ;;  %v4389_v15 = vld [vmem:[#allocation8 + $0xb10] sm:$0xff]  ;;  %v4235_v38 = vld [vmem:[#allocation8 + $0x908] sm:$0xff] }
 0x85f   :  { %4311 = vmatpush2.msra.mxu0 %v4252_v12  ;;  %4464 = vmatpush2.msra.mxu1 %v4405_v29  ;;  %v4388_v12 = vld [vmem:[#allocation8 + $0xb08] sm:$0xff]  ;;  %v4234_v29 = vld [vmem:[#allocation8 + $0x900] sm:$0xff] }
 0x860   :  { %4312 = vmatprep.subr.mxu0 %v4251_v27  ;;  %4465 = vmatprep.subr.mxu1 %v4404_v36  ;;  %v4387_v27 = vld [vmem:[#allocation8 + $0xb00] sm:$0xff]  ;;  %v4539_v36 = vld [vmem:[#allocation8 + $0xcf8] sm:$0xff] }
 0x861   :  { %4313 = vmatpush2.msra.mxu0 %v4250_v3  ;;  %4466 = vmatpush2.msra.mxu1 %v4403_v11  ;;  %v4692_v3 = vld [vmem:[#allocation8 + $0xef8] sm:$0xff]  ;;  %v4538_v11 = vld [vmem:[#allocation8 + $0xcf0] sm:$0xff] }
 0x862   :  { %4314 = vmatprep.subr.mxu0 %v4249_v42  ;;  %4467 = vmatprep.subr.mxu1 %v4402_v28  ;;  %v4691_v42 = vld [vmem:[#allocation8 + $0xef0] sm:$0xff]  ;;  %v4537_v28 = vld [vmem:[#allocation8 + $0xce8] sm:$0xff] }
 0x863   :  { %4315 = vmatpush2.msra.mxu0 %v4248_v60  ;;  %4468 = vmatpush2.msra.mxu1 %v4401_v49  ;;  %v4690_v60 = vld [vmem:[#allocation8 + $0xee8] sm:$0xff]  ;;  %v4536_v49 = vld [vmem:[#allocation8 + $0xce0] sm:$0xff] }
 0x864   :  { %4316 = vmatprep.subr.mxu0 %v4247_v55  ;;  %4469 = vmatprep.subr.mxu1 %v4400_v44  ;;  %v4689_v55 = vld [vmem:[#allocation8 + $0xee0] sm:$0xff]  ;;  %v4535_v44 = vld [vmem:[#allocation8 + $0xcd8] sm:$0xff] }
 0x865   :  { %4317 = vmatpush2.msra.mxu0 %v4246_v5  ;;  %4470 = vmatpush2.msra.mxu1 %v4399_v46  ;;  %v4688_v5 = vld [vmem:[#allocation8 + $0xed8] sm:$0xff]  ;;  %v4534_v46 = vld [vmem:[#allocation8 + $0xcd0] sm:$0xff] }
 0x866   :  { %4318 = vmatprep.subr.mxu0 %v4245_v2  ;;  %4471 = vmatprep.subr.mxu1 %v4398_v47  ;;  %v4687_v2 = vld [vmem:[#allocation8 + $0xed0] sm:$0xff]  ;;  %v4533_v47 = vld [vmem:[#allocation8 + $0xcc8] sm:$0xff] }
 0x867   :  { %4319 = vmatpush2.msra.mxu0 %v4244_v53  ;;  %4472 = vmatpush2.msra.mxu1 %v4397_v25  ;;  %v4686_v53 = vld [vmem:[#allocation8 + $0xec8] sm:$0xff]  ;;  %v4532_v25 = vld [vmem:[#allocation8 + $0xcc0] sm:$0xff] }
 0x868   :  { %4320 = vmatprep.subr.mxu0 %v4243_v1  ;;  %4473 = vmatprep.subr.mxu1 %v4396_v45  ;;  %v4685_v1 = vld [vmem:[#allocation8 + $0xec0] sm:$0xff]  ;;  %v4531_v45 = vld [vmem:[#allocation8 + $0xcb8] sm:$0xff] }
 0x869   :  { %4321 = vmatpush2.msra.mxu0 %v4242_v61  ;;  %4474 = vmatpush2.msra.mxu1 %v4395_v58  ;;  %v4684_v61 = vld [vmem:[#allocation8 + $0xeb8] sm:$0xff]  ;;  %v4530_v58 = vld [vmem:[#allocation8 + $0xcb0] sm:$0xff] }
 0x86a   :  { %4322 = vmatprep.subr.mxu0 %v4241_v56  ;;  %4475 = vmatprep.subr.mxu1 %v4394_v10  ;;  %v4683_v56 = vld [vmem:[#allocation8 + $0xeb0] sm:$0xff]  ;;  %v4529_v10 = vld [vmem:[#allocation8 + $0xca8] sm:$0xff] }
 0x86b   :  { %4323 = vmatpush2.msra.mxu0 %v4240_v8  ;;  %4476 = vmatpush2.msra.mxu1 %v4393_v33  ;;  %v4682_v8 = vld [vmem:[#allocation8 + $0xea8] sm:$0xff]  ;;  %v4528_v33 = vld [vmem:[#allocation8 + $0xca0] sm:$0xff] }
 0x86c   :  { %4324 = vmatprep.subr.mxu0 %v4239_v63  ;;  %4477 = vmatprep.subr.mxu1 %v4392_v31  ;;  %v4681_v63 = vld [vmem:[#allocation8 + $0xea0] sm:$0xff]  ;;  %v4527_v31 = vld [vmem:[#allocation8 + $0xc98] sm:$0xff] }
 0x86d   :  { %4325 = vmatpush2.msra.mxu0 %v4238_v6  ;;  %4478 = vmatpush2.msra.mxu1 %v4391_v32  ;;  %v4680_v6 = vld [vmem:[#allocation8 + $0xe98] sm:$0xff]  ;;  %v4526_v32 = vld [vmem:[#allocation8 + $0xc90] sm:$0xff] }
 0x86e   :  { %4326 = vmatprep.subr.mxu0 %v4237_v21  ;;  %4479 = vmatprep.subr.mxu1 %v4390_v14  ;;  %v4679_v21 = vld [vmem:[#allocation8 + $0xe90] sm:$0xff]  ;;  %v4525_v14 = vld [vmem:[#allocation8 + $0xc88] sm:$0xff] }
 0x86f   :  { %4327 = vmatpush2.msra.mxu0 %v4236_v9  ;;  %4480 = vmatpush2.msra.mxu1 %v4389_v15  ;;  %v4678_v9 = vld [vmem:[#allocation8 + $0xe88] sm:$0xff]  ;;  %v4524_v15 = vld [vmem:[#allocation8 + $0xc80] sm:$0xff] }
 0x870   :  { %4328 = vmatprep.subr.mxu0 %v4235_v38  ;;  %4481 = vmatprep.subr.mxu1 %v4388_v12  ;;  %v4677_v38 = vld [vmem:[#allocation8 + $0xe80] sm:$0xff]  ;;  %v4523_v12 = vld [vmem:[#allocation8 + $0xc78] sm:$0xff] }
 0x871   :  { %4329 = vmatpush2.msra.mxu0 %v4234_v29  ;;  %4482 = vmatpush2.msra.mxu1 %v4387_v27  ;;  %v4676_v29 = vld [vmem:[#allocation8 + $0xe78] sm:$0xff]  ;;  %v4522_v27 = vld [vmem:[#allocation8 + $0xc70] sm:$0xff] }
 0x872   :  { %4331 = vmatmul.mubr.f32.vlgmr.msra.gmra.mxu0 %v9309_v57  ;;  %4484 = vmatmul.mubr.f32.vlgmr.msra.gmra.mxu1 %v9309_v57 }
 0x873   :  { %4572 = vmatprep.subr.mxu0 %v4539_v36  ;;  %4725 = vmatprep.subr.mxu1 %v4692_v3  ;;  %v4675_v36 = vld [vmem:[#allocation8 + $0xe70] sm:$0xff]  ;;  %v4521_v3 = vld [vmem:[#allocation8 + $0xc68] sm:$0xff] }
 0x874   :  { %4336 = vmatprep.mubr.f32.mxu0 %v9315_v16  ;;  %4489 = vmatprep.mubr.f32.mxu1 %v9315_v16 }
 0x875   :  { %4573 = vmatpush1.msra.mxu0 %v4538_v11  ;;  %4726 = vmatpush1.msra.mxu1 %v4691_v42  ;;  %v4674_v11 = vld [vmem:[#allocation8 + $0xe68] sm:$0xff]  ;;  %v4520_v42 = vld [vmem:[#allocation8 + $0xc60] sm:$0xff] }
 0x876   :  { %4574 = vmatprep.subr.mxu0 %v4537_v28  ;;  %4727 = vmatprep.subr.mxu1 %v4690_v60  ;;  %v4673_v28 = vld [vmem:[#allocation8 + $0xe60] sm:$0xff]  ;;  %v4519_v60 = vld [vmem:[#allocation8 + $0xc58] sm:$0xff] }
 0x877   :  { %4575 = vmatpush1.msra.mxu0 %v4536_v49  ;;  %4728 = vmatpush1.msra.mxu1 %v4689_v55  ;;  %v4672_v49 = vld [vmem:[#allocation8 + $0xe58] sm:$0xff]  ;;  %v4518_v55 = vld [vmem:[#allocation8 + $0xc50] sm:$0xff] }
 0x878   :  { %4337 = vmatmul.mubr.f32.gmra.mxu0 %v9317_v22  ;;  %4490 = vmatmul.mubr.f32.gmra.mxu1 %v9317_v22 }
 0x879   :  { %4576 = vmatprep.subr.mxu0 %v4535_v44  ;;  %4729 = vmatprep.subr.mxu1 %v4688_v5  ;;  %v4671_v44 = vld [vmem:[#allocation8 + $0xe50] sm:$0xff]  ;;  %v4517_v5 = vld [vmem:[#allocation8 + $0xc48] sm:$0xff] }
 0x87a   :  { %4342 = vmatprep.mubr.f32.mxu0 %v9321_v30  ;;  %4495 = vmatprep.mubr.f32.mxu1 %v9321_v30 }
 0x87b   :  { %4577 = vmatpush1.msra.mxu0 %v4534_v46  ;;  %4730 = vmatpush1.msra.mxu1 %v4687_v2  ;;  %v4670_v46 = vld [vmem:[#allocation8 + $0xe48] sm:$0xff]  ;;  %v4516_v2 = vld [vmem:[#allocation8 + $0xc40] sm:$0xff] }
 0x87c   :  { %4578 = vmatprep.subr.mxu0 %v4533_v47  ;;  %4731 = vmatprep.subr.mxu1 %v4686_v53  ;;  %v4669_v47 = vld [vmem:[#allocation8 + $0xe40] sm:$0xff]  ;;  %v4515_v53 = vld [vmem:[#allocation8 + $0xc38] sm:$0xff] }
 0x87d   :  { %4579 = vmatpush1.msra.mxu0 %v4532_v25  ;;  %4732 = vmatpush1.msra.mxu1 %v4685_v1  ;;  %v4668_v25 = vld [vmem:[#allocation8 + $0xe38] sm:$0xff]  ;;  %v4514_v1 = vld [vmem:[#allocation8 + $0xc30] sm:$0xff] }
 0x87e   :  { %4343 = vmatmul.mubr.f32.gmra.mxu0 %v9325_v26  ;;  %4496 = vmatmul.mubr.f32.gmra.mxu1 %v9325_v26 }
 0x87f   :  { %4580 = vmatprep.subr.mxu0 %v4531_v45  ;;  %4733 = vmatprep.subr.mxu1 %v4684_v61  ;;  %v4667_v45 = vld [vmem:[#allocation8 + $0xe30] sm:$0xff]  ;;  %v4513_v61 = vld [vmem:[#allocation8 + $0xc28] sm:$0xff] }
 0x880   :  { %4348 = vmatprep.mubr.f32.mxu0 %v9329_v50  ;;  %4501 = vmatprep.mubr.f32.mxu1 %v9329_v50 }
 0x881   :  { %4581 = vmatpush1.msra.mxu0 %v4530_v58  ;;  %4734 = vmatpush1.msra.mxu1 %v4683_v56  ;;  %v4666_v58 = vld [vmem:[#allocation8 + $0xe28] sm:$0xff]  ;;  %v4512_v56 = vld [vmem:[#allocation8 + $0xc20] sm:$0xff] }
 0x882   :  { %4582 = vmatprep.subr.mxu0 %v4529_v10  ;;  %4735 = vmatprep.subr.mxu1 %v4682_v8  ;;  %v4665_v10 = vld [vmem:[#allocation8 + $0xe20] sm:$0xff]  ;;  %v4511_v8 = vld [vmem:[#allocation8 + $0xc18] sm:$0xff] }
 0x883   :  { %4583 = vmatpush1.msra.mxu0 %v4528_v33  ;;  %4736 = vmatpush1.msra.mxu1 %v4681_v63  ;;  %v4664_v33 = vld [vmem:[#allocation8 + $0xe18] sm:$0xff]  ;;  %v4510_v63 = vld [vmem:[#allocation8 + $0xc10] sm:$0xff] }
 0x884   :  { %4349 = vmatmul.mubr.f32.gmra.mxu0 %v9333_v7  ;;  %4502 = vmatmul.mubr.f32.gmra.mxu1 %v9333_v7 }
 0x885   :  { %4584 = vmatprep.subr.mxu0 %v4527_v31  ;;  %4737 = vmatprep.subr.mxu1 %v4680_v6  ;;  %v4663_v31 = vld [vmem:[#allocation8 + $0xe10] sm:$0xff]  ;;  %v4509_v6 = vld [vmem:[#allocation8 + $0xc08] sm:$0xff] }
 0x886   :  { %4585 = vmatpush1.msra.mxu0 %v4526_v32  ;;  %4636 = vmatprep.mubr.f32.mxu0 %v9307_v52  ;;  %v4662_v32 = vld [vmem:[#allocation8 + $0xe08] sm:$0xff] }
 0x887   :  { %4738 = vmatpush1.msra.mxu1 %v4679_v21  ;;  %4789 = vmatprep.mubr.f32.mxu1 %v9307_v52  ;;  %v4508_v21 = vld [vmem:[#allocation8 + $0xc00] sm:$0xff] }
 0x888   :  { %4586 = vmatprep.subr.mxu0 %v4525_v14  ;;  %4739 = vmatprep.subr.mxu1 %v4678_v9  ;;  %v4661_v14 = vld [vmem:[#allocation8 + $0xe00] sm:$0xff]  ;;  %v4571_v9 = vld [vmem:[#allocation8 + $0xdf8] sm:$0xff] }
 0x889   :  { %4587 = vmatpush1.msra.mxu0 %v4524_v15  ;;  %4740 = vmatpush1.msra.mxu1 %v4677_v38  ;;  %v4724_v15 = vld [vmem:[#allocation8 + $0xff8] sm:$0xff]  ;;  %v4570_v38 = vld [vmem:[#allocation8 + $0xdf0] sm:$0xff] }
 0x88a   :  { %4588 = vmatprep.subr.mxu0 %v4523_v12  ;;  %4741 = vmatprep.subr.mxu1 %v4676_v29  ;;  %v4723_v12 = vld [vmem:[#allocation8 + $0xff0] sm:$0xff]  ;;  %v4569_v29 = vld [vmem:[#allocation8 + $0xde8] sm:$0xff] }
 0x88b   :  { %4589 = vmatpush1.msra.mxu0 %v4522_v27  ;;  %4742 = vmatpush1.msra.mxu1 %v4675_v36  ;;  %v4722_v27 = vld [vmem:[#allocation8 + $0xfe8] sm:$0xff]  ;;  %v4568_v36 = vld [vmem:[#allocation8 + $0xde0] sm:$0xff] }
 0x88c   :  { %4590 = vmatprep.subr.mxu0 %v4521_v3  ;;  %4743 = vmatprep.subr.mxu1 %v4674_v11  ;;  %v4721_v3 = vld [vmem:[#allocation8 + $0xfe0] sm:$0xff]  ;;  %v4567_v11 = vld [vmem:[#allocation8 + $0xdd8] sm:$0xff] }
 0x88d   :  { %4591 = vmatpush1.msra.mxu0 %v4520_v42  ;;  %4744 = vmatpush1.msra.mxu1 %v4673_v28  ;;  %v4720_v42 = vld [vmem:[#allocation8 + $0xfd8] sm:$0xff]  ;;  %v4566_v28 = vld [vmem:[#allocation8 + $0xdd0] sm:$0xff] }
 0x88e   :  { %4592 = vmatprep.subr.mxu0 %v4519_v60  ;;  %4745 = vmatprep.subr.mxu1 %v4672_v49  ;;  %v4719_v60 = vld [vmem:[#allocation8 + $0xfd0] sm:$0xff]  ;;  %v4565_v49 = vld [vmem:[#allocation8 + $0xdc8] sm:$0xff] }
 0x88f   :  { %4593 = vmatpush1.msra.mxu0 %v4518_v55  ;;  %4746 = vmatpush1.msra.mxu1 %v4671_v44  ;;  %v4718_v55 = vld [vmem:[#allocation8 + $0xfc8] sm:$0xff]  ;;  %v4564_v44 = vld [vmem:[#allocation8 + $0xdc0] sm:$0xff] }
 0x890   :  { %4594 = vmatprep.subr.mxu0 %v4517_v5  ;;  %4747 = vmatprep.subr.mxu1 %v4670_v46  ;;  %v4717_v5 = vld [vmem:[#allocation8 + $0xfc0] sm:$0xff]  ;;  %v4563_v46 = vld [vmem:[#allocation8 + $0xdb8] sm:$0xff] }
 0x891   :  { %4595 = vmatpush1.msra.mxu0 %v4516_v2  ;;  %4748 = vmatpush1.msra.mxu1 %v4669_v47  ;;  %v4716_v2 = vld [vmem:[#allocation8 + $0xfb8] sm:$0xff]  ;;  %v4562_v47 = vld [vmem:[#allocation8 + $0xdb0] sm:$0xff] }
 0x892   :  { %4596 = vmatprep.subr.mxu0 %v4515_v53  ;;  %4749 = vmatprep.subr.mxu1 %v4668_v25  ;;  %v4715_v53 = vld [vmem:[#allocation8 + $0xfb0] sm:$0xff]  ;;  %v4561_v25 = vld [vmem:[#allocation8 + $0xda8] sm:$0xff] }
 0x893   :  { %4597 = vmatpush1.msra.mxu0 %v4514_v1  ;;  %4750 = vmatpush1.msra.mxu1 %v4667_v45  ;;  %v4714_v1 = vld [vmem:[#allocation8 + $0xfa8] sm:$0xff]  ;;  %v4560_v45 = vld [vmem:[#allocation8 + $0xda0] sm:$0xff] }
 0x894   :  { %4598 = vmatprep.subr.mxu0 %v4513_v61  ;;  %4751 = vmatprep.subr.mxu1 %v4666_v58  ;;  %v4713_v61 = vld [vmem:[#allocation8 + $0xfa0] sm:$0xff]  ;;  %v4559_v58 = vld [vmem:[#allocation8 + $0xd98] sm:$0xff] }
 0x895   :  { %4599 = vmatpush1.msra.mxu0 %v4512_v56  ;;  %4752 = vmatpush1.msra.mxu1 %v4665_v10  ;;  %v4712_v56 = vld [vmem:[#allocation8 + $0xf98] sm:$0xff]  ;;  %v4558_v10 = vld [vmem:[#allocation8 + $0xd90] sm:$0xff] }
 0x896   :  { %4600 = vmatprep.subr.mxu0 %v4511_v8  ;;  %4753 = vmatprep.subr.mxu1 %v4664_v33  ;;  %v4711_v8 = vld [vmem:[#allocation8 + $0xf90] sm:$0xff]  ;;  %v4557_v33 = vld [vmem:[#allocation8 + $0xd88] sm:$0xff] }
 0x897   :  { %4601 = vmatpush1.msra.mxu0 %v4510_v63  ;;  %4754 = vmatpush1.msra.mxu1 %v4663_v31  ;;  %v4710_v63 = vld [vmem:[#allocation8 + $0xf88] sm:$0xff]  ;;  %v4556_v31 = vld [vmem:[#allocation8 + $0xd80] sm:$0xff] }
 0x898   :  { %4602 = vmatprep.subr.mxu0 %v4509_v6  ;;  %4755 = vmatprep.subr.mxu1 %v4662_v32  ;;  %v4709_v6 = vld [vmem:[#allocation8 + $0xf80] sm:$0xff]  ;;  %v4555_v32 = vld [vmem:[#allocation8 + $0xd78] sm:$0xff] }
 0x899   :  { %4603 = vmatpush1.msra.mxu0 %v4508_v21  ;;  %4756 = vmatpush1.msra.mxu1 %v4661_v14  ;;  %v4708_v21 = vld [vmem:[#allocation8 + $0xf78] sm:$0xff]  ;;  %v4554_v14 = vld [vmem:[#allocation8 + $0xd70] sm:$0xff] }
 0x89a   :  { %4604 = vmatprep.subr.mxu0 %v4571_v9  ;;  %4757 = vmatprep.subr.mxu1 %v4724_v15  ;;  %v4707_v9 = vld [vmem:[#allocation8 + $0xf70] sm:$0xff]  ;;  %v4553_v15 = vld [vmem:[#allocation8 + $0xd68] sm:$0xff] }
 0x89b   :  { %4605 = vmatpush2.msra.mxu0 %v4570_v38  ;;  %4758 = vmatpush2.msra.mxu1 %v4723_v12  ;;  %v4706_v38 = vld [vmem:[#allocation8 + $0xf68] sm:$0xff]  ;;  %v4552_v12 = vld [vmem:[#allocation8 + $0xd60] sm:$0xff] }
 0x89c   :  { %4606 = vmatprep.subr.mxu0 %v4569_v29  ;;  %4759 = vmatprep.subr.mxu1 %v4722_v27  ;;  %v4705_v29 = vld [vmem:[#allocation8 + $0xf60] sm:$0xff]  ;;  %v4551_v27 = vld [vmem:[#allocation8 + $0xd58] sm:$0xff] }
 0x89d   :  { %4607 = vmatpush2.msra.mxu0 %v4568_v36  ;;  %4760 = vmatpush2.msra.mxu1 %v4721_v3  ;;  %v4704_v36 = vld [vmem:[#allocation8 + $0xf58] sm:$0xff]  ;;  %v4550_v3 = vld [vmem:[#allocation8 + $0xd50] sm:$0xff] }
 0x89e   :  { %4608 = vmatprep.subr.mxu0 %v4567_v11  ;;  %4761 = vmatprep.subr.mxu1 %v4720_v42  ;;  %v4703_v11 = vld [vmem:[#allocation8 + $0xf50] sm:$0xff]  ;;  %v4549_v42 = vld [vmem:[#allocation8 + $0xd48] sm:$0xff] }
 0x89f   :  { %4609 = vmatpush2.msra.mxu0 %v4566_v28  ;;  %4762 = vmatpush2.msra.mxu1 %v4719_v60  ;;  %v4702_v28 = vld [vmem:[#allocation8 + $0xf48] sm:$0xff]  ;;  %v4548_v60 = vld [vmem:[#allocation8 + $0xd40] sm:$0xff] }
 0x8a0   :  { %4610 = vmatprep.subr.mxu0 %v4565_v49  ;;  %4763 = vmatprep.subr.mxu1 %v4718_v55  ;;  %v4701_v49 = vld [vmem:[#allocation8 + $0xf40] sm:$0xff]  ;;  %v4547_v55 = vld [vmem:[#allocation8 + $0xd38] sm:$0xff] }
 0x8a1   :  { %4611 = vmatpush2.msra.mxu0 %v4564_v44  ;;  %4764 = vmatpush2.msra.mxu1 %v4717_v5  ;;  %v4700_v44 = vld [vmem:[#allocation8 + $0xf38] sm:$0xff]  ;;  %v4546_v5 = vld [vmem:[#allocation8 + $0xd30] sm:$0xff] }
 0x8a2   :  { %4612 = vmatprep.subr.mxu0 %v4563_v46  ;;  %4765 = vmatprep.subr.mxu1 %v4716_v2  ;;  %v4699_v46 = vld [vmem:[#allocation8 + $0xf30] sm:$0xff]  ;;  %v4545_v2 = vld [vmem:[#allocation8 + $0xd28] sm:$0xff] }
 0x8a3   :  { %4613 = vmatpush2.msra.mxu0 %v4562_v47  ;;  %4766 = vmatpush2.msra.mxu1 %v4715_v53  ;;  %v4698_v47 = vld [vmem:[#allocation8 + $0xf28] sm:$0xff]  ;;  %v4544_v53 = vld [vmem:[#allocation8 + $0xd20] sm:$0xff] }
 0x8a4   :  { %4614 = vmatprep.subr.mxu0 %v4561_v25  ;;  %4767 = vmatprep.subr.mxu1 %v4714_v1  ;;  %v4697_v25 = vld [vmem:[#allocation8 + $0xf20] sm:$0xff]  ;;  %v4543_v1 = vld [vmem:[#allocation8 + $0xd18] sm:$0xff] }
 0x8a5   :  { %4615 = vmatpush2.msra.mxu0 %v4560_v45  ;;  %4768 = vmatpush2.msra.mxu1 %v4713_v61  ;;  %v4696_v45 = vld [vmem:[#allocation8 + $0xf18] sm:$0xff]  ;;  %v4542_v61 = vld [vmem:[#allocation8 + $0xd10] sm:$0xff] }
 0x8a6   :  { %4616 = vmatprep.subr.mxu0 %v4559_v58  ;;  %4769 = vmatprep.subr.mxu1 %v4712_v56  ;;  %v4695_v58 = vld [vmem:[#allocation8 + $0xf10] sm:$0xff]  ;;  %v4541_v56 = vld [vmem:[#allocation8 + $0xd08] sm:$0xff] }
 0x8a7   :  { %4617 = vmatpush2.msra.mxu0 %v4558_v10  ;;  %4770 = vmatpush2.msra.mxu1 %v4711_v8  ;;  %v4694_v10 = vld [vmem:[#allocation8 + $0xf08] sm:$0xff]  ;;  %v4540_v8 = vld [vmem:[#allocation8 + $0xd00] sm:$0xff] }
 0x8a8   :  { %4618 = vmatprep.subr.mxu0 %v4557_v33  ;;  %4771 = vmatprep.subr.mxu1 %v4710_v63  ;;  %v4693_v33 = vld [vmem:[#allocation8 + $0xf00] sm:$0xff]  ;;  %v4845_v63 = vld [vmem:[#allocation8 + $0x10f8] sm:$0xff] }
 0x8a9   :  { %4619 = vmatpush2.msra.mxu0 %v4556_v31  ;;  %4772 = vmatpush2.msra.mxu1 %v4709_v6  ;;  %v4844_v31 = vld [vmem:[#allocation8 + $0x10f0] sm:$0xff]  ;;  %v4843_v6 = vld [vmem:[#allocation8 + $0x10e8] sm:$0xff] }
 0x8aa   :  { %4620 = vmatprep.subr.mxu0 %v4555_v32  ;;  %4773 = vmatprep.subr.mxu1 %v4708_v21  ;;  %v4842_v32 = vld [vmem:[#allocation8 + $0x10e0] sm:$0xff]  ;;  %v4841_v21 = vld [vmem:[#allocation8 + $0x10d8] sm:$0xff] }
 0x8ab   :  { %4621 = vmatpush2.msra.mxu0 %v4554_v14  ;;  %4774 = vmatpush2.msra.mxu1 %v4707_v9  ;;  %v7596_v14 = vld [vmem:[#allocation8 + $0xf8] sm:$0xff]  ;;  %v4840_v9 = vld [vmem:[#allocation8 + $0x10d0] sm:$0xff] }
 0x8ac   :  { %4622 = vmatprep.subr.mxu0 %v4553_v15  ;;  %4775 = vmatprep.subr.mxu1 %v4706_v38  ;;  %v4839_v15 = vld [vmem:[#allocation8 + $0x10c8] sm:$0xff]  ;;  %v4838_v38 = vld [vmem:[#allocation8 + $0x10c0] sm:$0xff] }
 0x8ad   :  { %4623 = vmatpush2.msra.mxu0 %v4552_v12  ;;  %4776 = vmatpush2.msra.mxu1 %v4705_v29  ;;  %v4837_v12 = vld [vmem:[#allocation8 + $0x10b8] sm:$0xff]  ;;  %v7597_v29 = vld [vmem:[#allocation8 + $0xf0] sm:$0xff] }
 0x8ae   :  { %4624 = vmatprep.subr.mxu0 %v4551_v27  ;;  %4777 = vmatprep.subr.mxu1 %v4704_v36  ;;  %v4836_v27 = vld [vmem:[#allocation8 + $0x10b0] sm:$0xff]  ;;  %v4835_v36 = vld [vmem:[#allocation8 + $0x10a8] sm:$0xff] }
 0x8af   :  { %4625 = vmatpush2.msra.mxu0 %v4550_v3  ;;  %4778 = vmatpush2.msra.mxu1 %v4703_v11  ;;  %v4834_v3 = vld [vmem:[#allocation8 + $0x10a0] sm:$0xff]  ;;  %v4833_v11 = vld [vmem:[#allocation8 + $0x1098] sm:$0xff] }
 0x8b0   :  { %4626 = vmatprep.subr.mxu0 %v4549_v42  ;;  %4779 = vmatprep.subr.mxu1 %v4702_v28  ;;  %v4832_v42 = vld [vmem:[#allocation8 + $0x1090] sm:$0xff]  ;;  %v4831_v28 = vld [vmem:[#allocation8 + $0x1088] sm:$0xff] }
 0x8b1   :  { %4627 = vmatpush2.msra.mxu0 %v4548_v60  ;;  %4780 = vmatpush2.msra.mxu1 %v4701_v49  ;;  %v7598_v60 = vld [vmem:[#allocation8 + $0xe8] sm:$0xff]  ;;  %v4830_v49 = vld [vmem:[#allocation8 + $0x1080] sm:$0xff] }
 0x8b2   :  { %4628 = vmatprep.subr.mxu0 %v4547_v55  ;;  %4781 = vmatprep.subr.mxu1 %v4700_v44  ;;  %v4829_v55 = vld [vmem:[#allocation8 + $0x1078] sm:$0xff]  ;;  %v4828_v44 = vld [vmem:[#allocation8 + $0x1070] sm:$0xff] }
 0x8b3   :  { %4629 = vmatpush2.msra.mxu0 %v4546_v5  ;;  %4782 = vmatpush2.msra.mxu1 %v4699_v46  ;;  %v7599_v5 = vld [vmem:[#allocation8 + $0xe0] sm:$0xff]  ;;  %v4827_v46 = vld [vmem:[#allocation8 + $0x1068] sm:$0xff] }
 0x8b4   :  { %4630 = vmatprep.subr.mxu0 %v4545_v2  ;;  %4783 = vmatprep.subr.mxu1 %v4698_v47  ;;  %v7600_v2 = vld [vmem:[#allocation8 + $0xd8] sm:$0xff]  ;;  %v4826_v47 = vld [vmem:[#allocation8 + $0x1060] sm:$0xff] }
 0x8b5   :  { %4631 = vmatpush2.msra.mxu0 %v4544_v53  ;;  %4784 = vmatpush2.msra.mxu1 %v4697_v25  ;;  %v7601_v53 = vld [vmem:[#allocation8 + $0xd0] sm:$0xff]  ;;  %v4825_v25 = vld [vmem:[#allocation8 + $0x1058] sm:$0xff] }
 0x8b6   :  { %4632 = vmatprep.subr.mxu0 %v4543_v1  ;;  %4785 = vmatprep.subr.mxu1 %v4696_v45  ;;  %v7602_v1 = vld [vmem:[#allocation8 + $0xc8] sm:$0xff]  ;;  %v4824_v45 = vld [vmem:[#allocation8 + $0x1050] sm:$0xff] }
 0x8b7   :  { %4633 = vmatpush2.msra.mxu0 %v4542_v61  ;;  %4786 = vmatpush2.msra.mxu1 %v4695_v58  ;;  %v4823_v61 = vld [vmem:[#allocation8 + $0x1048] sm:$0xff]  ;;  %v7604_v58 = vld [vmem:[#allocation8 + $0xb8] sm:$0xff] }
 0x8b8   :  { %4634 = vmatprep.subr.mxu0 %v4541_v56  ;;  %4787 = vmatprep.subr.mxu1 %v4694_v10  ;;  %v4822_v56 = vld [vmem:[#allocation8 + $0x1040] sm:$0xff]  ;;  %v7605_v10 = vld [vmem:[#allocation8 + $0xb0] sm:$0xff] }
 0x8b9   :  { %4635 = vmatpush2.msra.mxu0 %v4540_v8  ;;  %4788 = vmatpush2.msra.mxu1 %v4693_v33  ;;  %v4821_v8 = vld [vmem:[#allocation8 + $0x1038] sm:$0xff]  ;;  %v7606_v33 = vld [vmem:[#allocation8 + $0xa8] sm:$0xff] }
 0x8ba   :  { %4637 = vmatmul.mubr.f32.vlgmr.msra.gmra.mxu0 %v9309_v57  ;;  %4790 = vmatmul.mubr.f32.vlgmr.msra.gmra.mxu1 %v9309_v57 }
 0x8bb   :  { %4878 = vmatprep.subr.mxu0 %v4845_v63  ;;  %4642 = vmatprep.mubr.f32.mxu0 %v9315_v16  ;;  %v4820_v63 = vld [vmem:[#allocation8 + $0x1030] sm:$0xff] }
 0x8bc   :  { %4795 = vmatprep.mubr.f32.mxu1 %v9315_v16  ;;  %4879 = vmatpush1.msra.mxu0 %v4844_v31  ;;  %v7607_v31 = vld [vmem:[#allocation8 + $0xa0] sm:$0xff] }
 0x8bd   :  { %4880 = vmatprep.subr.mxu0 %v4843_v6  ;;  %5359 = vmatprep.subr.mxu1 %v7596_v14  ;;  %v4819_v6 = vld [vmem:[#allocation8 + $0x1028] sm:$0xff]  ;;  %v7609_v14 = vld [vmem:[#allocation8 + $0x90] sm:$0xff] }
 0x8be   :  { %4881 = vmatpush1.msra.mxu0 %v4842_v32  ;;  %4796 = vmatmul.mubr.f32.gmra.mxu1 %v9317_v22  ;;  %v7608_v32 = vld [vmem:[#allocation8 + $0x98] sm:$0xff] }
 0x8bf   :  { %4643 = vmatmul.mubr.f32.gmra.mxu0 %v9317_v22  ;;  %4882 = vmatprep.subr.mxu0 %v4841_v21  ;;  %v4818_v21 = vld [vmem:[#allocation8 + $0x1020] sm:$0xff] }
 0x8c0   :  { %4648 = vmatprep.mubr.f32.mxu0 %v9321_v30  ;;  %4801 = vmatprep.mubr.f32.mxu1 %v9321_v30 }
 0x8c1   :  { %4883 = vmatpush1.msra.mxu0 %v4840_v9  ;;  %5360 = vmatpush1.msra.mxu1 %v7597_v29  ;;  %v4817_v9 = vld [vmem:[#allocation8 + $0x1018] sm:$0xff]  ;;  %v4815_v29 = vld [vmem:[#allocation8 + $0x1008] sm:$0xff] }
 0x8c2   :  { %4884 = vmatprep.subr.mxu0 %v4839_v15  ;;  %4802 = vmatmul.mubr.f32.gmra.mxu1 %v9325_v26  ;;  %v7610_v15 = vld [vmem:[#allocation8 + $0x88] sm:$0xff] }
 0x8c3   :  { %4885 = vmatpush1.msra.mxu0 %v4838_v38  ;;  %4807 = vmatprep.mubr.f32.mxu1 %v9329_v50  ;;  %v4816_v38 = vld [vmem:[#allocation8 + $0x1010] sm:$0xff] }
 0x8c4   :  { %4649 = vmatmul.mubr.f32.gmra.mxu0 %v9325_v26  ;;  %4886 = vmatprep.subr.mxu0 %v4837_v12  ;;  %v7611_v12 = vld [vmem:[#allocation8 + $0x80] sm:$0xff] }
 0x8c5   :  { %4654 = vmatprep.mubr.f32.mxu0 %v9329_v50  ;;  %4887 = vmatpush1.msra.mxu0 %v4836_v27  ;;  %v7612_v27 = vld [vmem:[#allocation8 + $0x78] sm:$0xff] }
 0x8c6   :  { %4888 = vmatprep.subr.mxu0 %v4835_v36  ;;  %4808 = vmatmul.mubr.f32.gmra.mxu1 %v9333_v7  ;;  %v4814_v36 = vld [vmem:[#allocation8 + $0x1000] sm:$0xff] }
 0x8c7   :  { %4889 = vmatpush1.msra.mxu0 %v4834_v3  ;;  %5361 = vmatprep.subr.mxu1 %v7598_v60  ;;  %v7613_v3 = vld [vmem:[#allocation8 + $0x70] sm:$0xff]  ;;  %v7615_v60 = vld [vmem:[#allocation8 + $0x60] sm:$0xff] }
 0x8c8   :  { %4655 = vmatmul.mubr.f32.gmra.mxu0 %v9333_v7  ;;  %4890 = vmatprep.subr.mxu0 %v4833_v11  ;;  %v4877_v11 = vld [vmem:[#allocation8 + $0x11f8] sm:$0xff] }
 0x8c9   :  { %4891 = vmatpush1.msra.mxu0 %v4832_v42  ;;  %4942 = vmatprep.mubr.f32.mxu0 %v9307_v52  ;;  %v7603_v52 = vld [vmem:[#allocation8 + $0xc0] sm:$0xff]  ;;  %v7614_v42 = vld [vmem:[#allocation8 + $0x68] sm:$0xff] }
 0x8ca   :  { %4892 = vmatprep.subr.mxu0 %v4831_v28  ;;  %5362 = vmatpush1.msra.mxu1 %v7599_v5  ;;  %v4876_v28 = vld [vmem:[#allocation8 + $0x11f0] sm:$0xff] }
 0x8cb   :  { %4893 = vmatpush1.msra.mxu0 %v4830_v49  ;;  %5363 = vmatprep.subr.mxu1 %v7600_v2  ;;  %v4875_v49 = vld [vmem:[#allocation8 + $0x11e8] sm:$0xff]  ;;  %v7617_v5 = vld [vmem:[#allocation8 + $0x50] sm:$0xff] }
 0x8cc   :  { %4894 = vmatprep.subr.mxu0 %v4829_v55  ;;  %5364 = vmatpush1.msra.mxu1 %v7601_v53  ;;  %v7616_v55 = vld [vmem:[#allocation8 + $0x58] sm:$0xff]  ;;  %v7618_v2 = vld [vmem:[#allocation8 + $0x48] sm:$0xff]  ;;  %v7619_v53 = vld [vmem:[#allocation8 + $0x40] sm:$0xff] }
 0x8cd   :  { %4895 = vmatpush1.msra.mxu0 %v4828_v44  ;;  %5365 = vmatprep.subr.mxu1 %v7602_v1  ;;  %v4874_v44 = vld [vmem:[#allocation8 + $0x11e0] sm:$0xff]  ;;  %v7620_v1 = vld [vmem:[#allocation8 + $0x38] sm:$0xff] }
 0x8ce   :  { %4896 = vmatprep.subr.mxu0 %v4827_v46  ;;  %5366 = vmatpush1.msra.mxu1 %v7603_v52  ;;  %v4873_v46 = vld [vmem:[#allocation8 + $0x11d8] sm:$0xff]  ;;  %v7621_v52 = vld [vmem:[#allocation8 + $0x30] sm:$0xff] }
 0x8cf   :  { %4897 = vmatpush1.msra.mxu0 %v4826_v47  ;;  %5367 = vmatprep.subr.mxu1 %v7604_v58  ;;  %v4872_v47 = vld [vmem:[#allocation8 + $0x11d0] sm:$0xff]  ;;  %v7622_v58 = vld [vmem:[#allocation8 + $0x28] sm:$0xff] }
 0x8d0   :  { %4898 = vmatprep.subr.mxu0 %v4825_v25  ;;  %5368 = vmatpush1.msra.mxu1 %v7605_v10  ;;  %v4871_v25 = vld [vmem:[#allocation8 + $0x11c8] sm:$0xff]  ;;  %v7623_v10 = vld [vmem:[#allocation8 + $0x20] sm:$0xff] }
 0x8d1   :  { %4899 = vmatpush1.msra.mxu0 %v4824_v45  ;;  %5369 = vmatprep.subr.mxu1 %v7606_v33  ;;  %v4870_v45 = vld [vmem:[#allocation8 + $0x11c0] sm:$0xff]  ;;  %v7624_v33 = vld [vmem:[#allocation8 + $0x18] sm:$0xff] }
 0x8d2   :  { %4900 = vmatprep.subr.mxu0 %v4823_v61  ;;  %5370 = vmatpush1.msra.mxu1 %v7607_v31  ;;  %v4869_v61 = vld [vmem:[#allocation8 + $0x11b8] sm:$0xff]  ;;  %v7625_v31 = vld [vmem:[#allocation8 + $0x10] sm:$0xff] }
 0x8d3   :  { %4901 = vmatpush1.msra.mxu0 %v4822_v56  ;;  %5371 = vmatprep.subr.mxu1 %v7608_v32  ;;  %v4868_v56 = vld [vmem:[#allocation8 + $0x11b0] sm:$0xff]  ;;  %v7626_v32 = vld [vmem:[#allocation8 + $0x8] sm:$0xff] }
 0x8d4   :  { %4902 = vmatprep.subr.mxu0 %v4821_v8  ;;  %5372 = vmatpush1.msra.mxu1 %v7609_v14  ;;  %v4867_v8 = vld [vmem:[#allocation8 + $0x11a8] sm:$0xff]  ;;  %v7627_v14 = vld [vmem:[#allocation8] sm:$0xff] }
 0x8d5   :  { %4903 = vmatpush1.msra.mxu0 %v4820_v63  ;;  %5373 = vmatprep.subr.mxu1 %v7610_v15  ;;  %v4866_v63 = vld [vmem:[#allocation8 + $0x11a0] sm:$0xff]  ;;  %v7628_v15 = vld [vmem:[#allocation8 + $0x1f8] sm:$0xff] }
 0x8d6   :  { %4904 = vmatprep.subr.mxu0 %v4819_v6  ;;  %5374 = vmatpush1.msra.mxu1 %v7611_v12  ;;  %v4865_v6 = vld [vmem:[#allocation8 + $0x1198] sm:$0xff]  ;;  %v7629_v12 = vld [vmem:[#allocation8 + $0x1f0] sm:$0xff] }
 0x8d7   :  { %4905 = vmatpush1.msra.mxu0 %v4818_v21  ;;  %5375 = vmatprep.subr.mxu1 %v7612_v27  ;;  %v4864_v21 = vld [vmem:[#allocation8 + $0x1190] sm:$0xff]  ;;  %v7630_v27 = vld [vmem:[#allocation8 + $0x1e8] sm:$0xff] }
 0x8d8   :  { %4906 = vmatprep.subr.mxu0 %v4817_v9  ;;  %5376 = vmatpush1.msra.mxu1 %v7613_v3  ;;  %v4863_v9 = vld [vmem:[#allocation8 + $0x1188] sm:$0xff]  ;;  %v7631_v3 = vld [vmem:[#allocation8 + $0x1e0] sm:$0xff] }
 0x8d9   :  { %4907 = vmatpush1.msra.mxu0 %v4816_v38  ;;  %5377 = vmatprep.subr.mxu1 %v7614_v42  ;;  %v4862_v38 = vld [vmem:[#allocation8 + $0x1180] sm:$0xff]  ;;  %v7632_v42 = vld [vmem:[#allocation8 + $0x1d8] sm:$0xff] }
 0x8da   :  { %4908 = vmatprep.subr.mxu0 %v4815_v29  ;;  %5378 = vmatpush1.msra.mxu1 %v7615_v60  ;;  %v4861_v29 = vld [vmem:[#allocation8 + $0x1178] sm:$0xff]  ;;  %v7633_v60 = vld [vmem:[#allocation8 + $0x1d0] sm:$0xff] }
 0x8db   :  { %4909 = vmatpush1.msra.mxu0 %v4814_v36  ;;  %5379 = vmatprep.subr.mxu1 %v7616_v55  ;;  %v4860_v36 = vld [vmem:[#allocation8 + $0x1170] sm:$0xff]  ;;  %v7634_v55 = vld [vmem:[#allocation8 + $0x1c8] sm:$0xff] }
 0x8dc   :  { %4910 = vmatprep.subr.mxu0 %v4877_v11  ;;  %5380 = vmatpush1.msra.mxu1 %v7617_v5  ;;  %v4859_v11 = vld [vmem:[#allocation8 + $0x1168] sm:$0xff]  ;;  %v7635_v5 = vld [vmem:[#allocation8 + $0x1c0] sm:$0xff] }
 0x8dd   :  { %4911 = vmatpush2.msra.mxu0 %v4876_v28  ;;  %5381 = vmatprep.subr.mxu1 %v7618_v2  ;;  %v4858_v28 = vld [vmem:[#allocation8 + $0x1160] sm:$0xff]  ;;  %v7636_v2 = vld [vmem:[#allocation8 + $0x1b8] sm:$0xff] }
 0x8de   :  { %4912 = vmatprep.subr.mxu0 %v4875_v49  ;;  %5382 = vmatpush1.msra.mxu1 %v7619_v53  ;;  %v4857_v49 = vld [vmem:[#allocation8 + $0x1158] sm:$0xff]  ;;  %v7637_v53 = vld [vmem:[#allocation8 + $0x1b0] sm:$0xff] }
 0x8df   :  { %4913 = vmatpush2.msra.mxu0 %v4874_v44  ;;  %5383 = vmatprep.subr.mxu1 %v7620_v1  ;;  %v4856_v44 = vld [vmem:[#allocation8 + $0x1150] sm:$0xff]  ;;  %v7638_v1 = vld [vmem:[#allocation8 + $0x1a8] sm:$0xff] }
 0x8e0   :  { %4914 = vmatprep.subr.mxu0 %v4873_v46  ;;  %5384 = vmatpush1.msra.mxu1 %v7621_v52  ;;  %v4855_v46 = vld [vmem:[#allocation8 + $0x1148] sm:$0xff]  ;;  %v7639_v52 = vld [vmem:[#allocation8 + $0x1a0] sm:$0xff] }
 0x8e1   :  { %4915 = vmatpush2.msra.mxu0 %v4872_v47  ;;  %5385 = vmatprep.subr.mxu1 %v7622_v58  ;;  %v4854_v47 = vld [vmem:[#allocation8 + $0x1140] sm:$0xff]  ;;  %v7640_v58 = vld [vmem:[#allocation8 + $0x198] sm:$0xff] }
 0x8e2   :  { %4916 = vmatprep.subr.mxu0 %v4871_v25  ;;  %5386 = vmatpush1.msra.mxu1 %v7623_v10  ;;  %v4853_v25 = vld [vmem:[#allocation8 + $0x1138] sm:$0xff]  ;;  %v7641_v10 = vld [vmem:[#allocation8 + $0x190] sm:$0xff] }
 0x8e3   :  { %4917 = vmatpush2.msra.mxu0 %v4870_v45  ;;  %5387 = vmatprep.subr.mxu1 %v7624_v33  ;;  %v4852_v45 = vld [vmem:[#allocation8 + $0x1130] sm:$0xff]  ;;  %v7642_v33 = vld [vmem:[#allocation8 + $0x188] sm:$0xff] }
 0x8e4   :  { %4918 = vmatprep.subr.mxu0 %v4869_v61  ;;  %5388 = vmatpush1.msra.mxu1 %v7625_v31  ;;  %v4851_v61 = vld [vmem:[#allocation8 + $0x1128] sm:$0xff]  ;;  %v7643_v31 = vld [vmem:[#allocation8 + $0x180] sm:$0xff] }
 0x8e5   :  { %4919 = vmatpush2.msra.mxu0 %v4868_v56  ;;  %5389 = vmatprep.subr.mxu1 %v7626_v32  ;;  %v4850_v56 = vld [vmem:[#allocation8 + $0x1120] sm:$0xff]  ;;  %v7644_v32 = vld [vmem:[#allocation8 + $0x178] sm:$0xff] }
 0x8e6   :  { %4920 = vmatprep.subr.mxu0 %v4867_v8  ;;  %5390 = vmatpush1.msra.mxu1 %v7627_v14  ;;  %v4849_v8 = vld [vmem:[#allocation8 + $0x1118] sm:$0xff]  ;;  %v7645_v14 = vld [vmem:[#allocation8 + $0x170] sm:$0xff] }
 0x8e7   :  { %4921 = vmatpush2.msra.mxu0 %v4866_v63  ;;  %5391 = vmatprep.subr.mxu1 %v7628_v15  ;;  %v4848_v63 = vld [vmem:[#allocation8 + $0x1110] sm:$0xff]  ;;  %v7647_v15 = vld [vmem:[#allocation8 + $0x160] sm:$0xff] }
 0x8e8   :  { %4922 = vmatprep.subr.mxu0 %v4865_v6  ;;  %5392 = vmatpush2.msra.mxu1 %v7629_v12  ;;  %v4847_v6 = vld [vmem:[#allocation8 + $0x1108] sm:$0xff]  ;;  %v7649_v12 = vld [vmem:[#allocation8 + $0x2f8] sm:$0xff] }
 0x8e9   :  { %4923 = vmatpush2.msra.mxu0 %v4864_v21  ;;  %5393 = vmatprep.subr.mxu1 %v7630_v27  ;;  %v4846_v21 = vld [vmem:[#allocation8 + $0x1100] sm:$0xff]  ;;  %v7651_v27 = vld [vmem:[#allocation8 + $0x2e8] sm:$0xff] }
 0x8ea   :  { %4924 = vmatprep.subr.mxu0 %v4863_v9  ;;  %5394 = vmatpush2.msra.mxu1 %v7631_v3  ;;  %v7646_v9 = vld [vmem:[#allocation8 + $0x168] sm:$0xff]  ;;  %v7653_v3 = vld [vmem:[#allocation8 + $0x2e0] sm:$0xff] }
 0x8eb   :  { %4925 = vmatpush2.msra.mxu0 %v4862_v38  ;;  %5395 = vmatprep.subr.mxu1 %v7632_v42  ;;  %v7648_v38 = vld [vmem:[#allocation8 + $0x158] sm:$0xff] }
 0x8ec   :  { %4926 = vmatprep.subr.mxu0 %v4861_v29  ;;  %5396 = vmatpush2.msra.mxu1 %v7633_v60  ;;  %v7650_v29 = vld [vmem:[#allocation8 + $0x2f0] sm:$0xff]  ;;  %v7655_v42 = vld [vmem:[#allocation8 + $0x2d8] sm:$0xff]  ;;  %v7659_v60 = vld [vmem:[#allocation8 + $0x2c0] sm:$0xff] }
 0x8ed   :  { %4927 = vmatpush2.msra.mxu0 %v4860_v36  ;;  %5397 = vmatprep.subr.mxu1 %v7634_v55  ;;  %v7652_v36 = vld [vmem:[#allocation8 + $0x150] sm:$0xff]  ;;  %v7661_v55 = vld [vmem:[#allocation8 + $0x2b8] sm:$0xff] }
 0x8ee   :  { %4928 = vmatprep.subr.mxu0 %v4859_v11  ;;  %5398 = vmatpush2.msra.mxu1 %v7635_v5  ;;  %v7654_v11 = vld [vmem:[#allocation8 + $0x148] sm:$0xff]  ;;  %v7665_v5 = vld [vmem:[#allocation8 + $0x2a0] sm:$0xff] }
 0x8ef   :  { %4929 = vmatpush2.msra.mxu0 %v4858_v28  ;;  %5399 = vmatprep.subr.mxu1 %v7636_v2  ;;  %v7657_v28 = vld [vmem:[#allocation8 + $0x2c8] sm:$0xff]  ;;  %v7667_v2 = vld [vmem:[#allocation8 + $0x298] sm:$0xff] }
 0x8f0   :  { %4930 = vmatprep.subr.mxu0 %v4857_v49  ;;  %5400 = vmatpush2.msra.mxu1 %v7637_v53  ;;  %v7660_v49 = vld [vmem:[#allocation8 + $0x138] sm:$0xff]  ;;  %v7670_v53 = vld [vmem:[#allocation8 + $0x288] sm:$0xff] }
 0x8f1   :  { %4931 = vmatpush2.msra.mxu0 %v4856_v44  ;;  %5401 = vmatprep.subr.mxu1 %v7638_v1  ;;  %v7663_v44 = vld [vmem:[#allocation8 + $0x2a8] sm:$0xff]  ;;  %v7673_v1 = vld [vmem:[#allocation8 + $0x110] sm:$0xff] }
 0x8f2   :  { %4932 = vmatprep.subr.mxu0 %v4855_v46  ;;  %5402 = vmatpush2.msra.mxu1 %v7639_v52  ;;  %v7666_v46 = vld [vmem:[#allocation8 + $0x128] sm:$0xff] }
 0x8f3   :  { %4933 = vmatpush2.msra.mxu0 %v4854_v47  ;;  %5403 = vmatprep.subr.mxu1 %v7640_v58  ;;  %v7668_v47 = vld [vmem:[#allocation8 + $0x290] sm:$0xff]  ;;  %v7675_v52 = vld [vmem:[#allocation8 + $0x108] sm:$0xff] }
 0x8f4   :  { %4934 = vmatprep.subr.mxu0 %v4853_v25  ;;  %5404 = vmatpush2.msra.mxu1 %v7641_v10  ;;  %v7672_v25 = vld [vmem:[#allocation8 + $0x280] sm:$0xff]  ;;  %v7678_v58 = vld [vmem:[#allocation8 + $0x268] sm:$0xff] }
 0x8f5   :  { %4935 = vmatpush2.msra.mxu0 %v4852_v45  ;;  %5405 = vmatprep.subr.mxu1 %v7642_v33  ;;  %v7674_v45 = vld [vmem:[#allocation8 + $0x278] sm:$0xff]  ;;  %v7680_v10 = vld [vmem:[#allocation8 + $0x260] sm:$0xff]  ;;  %v7682_v33 = vld [vmem:[#allocation8 + $0x250] sm:$0xff] }
 0x8f6   :  { %4936 = vmatprep.subr.mxu0 %v4851_v61  ;;  %5406 = vmatpush2.msra.mxu1 %v7643_v31  ;;  %v7676_v61 = vld [vmem:[#allocation8 + $0x270] sm:$0xff]  ;;  %v7684_v31 = vld [vmem:[#allocation8 + $0x240] sm:$0xff] }
 0x8f7   :  { %4937 = vmatpush2.msra.mxu0 %v4850_v56  ;;  %5407 = vmatprep.subr.mxu1 %v7644_v32  ;;  %v7679_v56 = vld [vmem:[#allocation8 + $0x4f8] sm:$0xff]  ;;  %v7686_v32 = vld [vmem:[#allocation8 + $0x230] sm:$0xff] }
 0x8f8   :  { %4938 = vmatprep.subr.mxu0 %v4849_v8  ;;  %5408 = vmatpush2.msra.mxu1 %v7645_v14  ;;  %v7681_v8 = vld [vmem:[#allocation8 + $0x258] sm:$0xff]  ;;  %v7688_v14 = vld [vmem:[#allocation8 + $0x220] sm:$0xff] }
 0x8f9   :  { %4939 = vmatpush2.msra.mxu0 %v4848_v63  ;;  %5409 = vmatprep.subr.mxu1 %v7646_v9  ;;  %v7683_v63 = vld [vmem:[#allocation8 + $0x248] sm:$0xff]  ;;  %v7689_v9 = vld [vmem:[#allocation8 + $0x218] sm:$0xff] }
 0x8fa   :  { %4940 = vmatprep.subr.mxu0 %v4847_v6  ;;  %5410 = vmatpush2.msra.mxu1 %v7647_v15  ;;  %v7685_v6 = vld [vmem:[#allocation8 + $0x238] sm:$0xff]  ;;  %v7690_v15 = vld [vmem:[#allocation8 + $0x210] sm:$0xff] }
 0x8fb   :  { %4941 = vmatpush2.msra.mxu0 %v4846_v21  ;;  %5411 = vmatprep.subr.mxu1 %v7648_v38  ;;  %v7687_v21 = vld [vmem:[#allocation8 + $0x228] sm:$0xff] }
 0x8fc   :  { %4943 = vmatmul.mubr.f32.vlgmr.msra.gmra.mxu0 %v9309_v57  ;;  %5448 = vmatprep.subr.mxu0 %v7649_v12  ;;  %v7656_v57 = vld [vmem:[#allocation8 + $0x2d0] sm:$0xff]  ;;  %v7691_v38 = vld [vmem:[#allocation8 + $0x208] sm:$0xff]  ;;  %v7692_v12 = vld [vmem:[#allocation8 + $0x200] sm:$0xff] }
 0x8fd   :  { %4948 = vmatprep.mubr.f32.mxu0 %v9315_v16  ;;  %5449 = vmatpush1.msra.mxu0 %v7650_v29  ;;  %v7658_v16 = vld [vmem:[#allocation8 + $0x140] sm:$0xff]  ;;  %v7693_v29 = vld [vmem:[#allocation8 + $0x3f8] sm:$0xff] }
 0x8fe   :  { %5450 = vmatprep.subr.mxu0 %v7651_v27  ;;  %5412 = vmatpush2.msra.mxu1 %v7652_v36  ;;  %v7694_v27 = vld [vmem:[#allocation8 + $0x3f0] sm:$0xff]  ;;  %v7695_v36 = vld [vmem:[#allocation8 + $0x3e8] sm:$0xff] }
 0x8ff   :  { %5451 = vmatpush1.msra.mxu0 %v7653_v3  ;;  %5413 = vmatprep.subr.mxu1 %v7654_v11  ;;  %v7696_v3 = vld [vmem:[#allocation8 + $0x3e0] sm:$0xff]  ;;  %v7697_v11 = vld [vmem:[#allocation8 + $0x3d8] sm:$0xff] }
 0x900   :  { %4949 = vmatmul.mubr.f32.gmra.mxu0 %v9317_v22  ;;  %5452 = vmatprep.subr.mxu0 %v7655_v42  ;;  %v7662_v22 = vld [vmem:[#allocation8 + $0x2b0] sm:$0xff] }
 0x901   :  { %4954 = vmatprep.mubr.f32.mxu0 %v9321_v30  ;;  %5453 = vmatpush1.msra.mxu0 %v7656_v57  ;;  %v7664_v30 = vld [vmem:[#allocation8 + $0x130] sm:$0xff]  ;;  %v7699_v57 = vld [vmem:[#allocation8 + $0x3c8] sm:$0xff] }
 0x902   :  { %5454 = vmatprep.subr.mxu0 %v7657_v28  ;;  %5414 = vmatpush2.msra.mxu1 %v7658_v16  ;;  %v7698_v42 = vld [vmem:[#allocation8 + $0x3d0] sm:$0xff]  ;;  %v7700_v28 = vld [vmem:[#allocation8 + $0x3c0] sm:$0xff]  ;;  %v7701_v16 = vld [vmem:[#allocation8 + $0x3b8] sm:$0xff] }
 0x903   :  { %5455 = vmatpush1.msra.mxu0 %v7659_v60  ;;  %5415 = vmatprep.subr.mxu1 %v7660_v49  ;;  %v7702_v60 = vld [vmem:[#allocation8 + $0x3b0] sm:$0xff]  ;;  %v7703_v49 = vld [vmem:[#allocation8 + $0x3a8] sm:$0xff] }
 0x904   :  { %4955 = vmatmul.mubr.f32.gmra.mxu0 %v9325_v26  ;;  %5456 = vmatprep.subr.mxu0 %v7661_v55  ;;  %v7669_v26 = vld [vmem:[#allocation8 + $0x120] sm:$0xff] }
 0x905   :  { %4960 = vmatprep.mubr.f32.mxu0 %v9329_v50  ;;  %5457 = vmatpush1.msra.mxu0 %v7662_v22  ;;  %v7671_v50 = vld [vmem:[#allocation8 + $0x118] sm:$0xff]  ;;  %v7704_v55 = vld [vmem:[#allocation8 + $0x3a0] sm:$0xff] }
 0x906   :  { %5458 = vmatprep.subr.mxu0 %v7663_v44  ;;  %5416 = vmatpush2.msra.mxu1 %v7664_v30  ;;  %v7705_v22 = vld [vmem:[#allocation8 + $0x398] sm:$0xff]  ;;  %v7706_v44 = vld [vmem:[#allocation8 + $0x390] sm:$0xff]  ;;  %v7707_v30 = vld [vmem:[#allocation8 + $0x388] sm:$0xff] }
 0x907   :  { %5459 = vmatpush1.msra.mxu0 %v7665_v5  ;;  %5417 = vmatprep.subr.mxu1 %v7666_v46  ;;  %v7708_v5 = vld [vmem:[#allocation8 + $0x380] sm:$0xff]  ;;  %v7709_v46 = vld [vmem:[#allocation8 + $0x378] sm:$0xff] }
 0x908   :  { %4961 = vmatmul.mubr.f32.gmra.mxu0 %v9333_v7  ;;  %5460 = vmatprep.subr.mxu0 %v7667_v2  ;;  %v7677_v7 = vld [vmem:[#allocation8 + $0x100] sm:$0xff]  ;;  %v7710_v2 = vld [vmem:[#allocation8 + $0x370] sm:$0xff] }
 0x909   :  { %5461 = vmatpush1.msra.mxu0 %v7668_v47  ;;  %5418 = vmatpush2.msra.mxu1 %v7669_v26  ;;  %v7711_v47 = vld [vmem:[#allocation8 + $0x368] sm:$0xff]  ;;  %v7712_v26 = vld [vmem:[#allocation8 + $0x360] sm:$0xff] }
 0x90a   :  { %5462 = vmatprep.subr.mxu0 %v7670_v53  ;;  %5419 = vmatprep.subr.mxu1 %v7671_v50  ;;  %v7713_v53 = vld [vmem:[#allocation8 + $0x358] sm:$0xff]  ;;  %v7714_v50 = vld [vmem:[#allocation8 + $0x350] sm:$0xff] }
 0x90b   :  { %5463 = vmatpush1.msra.mxu0 %v7672_v25  ;;  %5420 = vmatpush2.msra.mxu1 %v7673_v1  ;;  %v7715_v25 = vld [vmem:[#allocation8 + $0x348] sm:$0xff]  ;;  %v7716_v1 = vld [vmem:[#allocation8 + $0x340] sm:$0xff] }
 0x90c   :  { %5464 = vmatprep.subr.mxu0 %v7674_v45  ;;  %5421 = vmatprep.subr.mxu1 %v7675_v52  ;;  %v7717_v45 = vld [vmem:[#allocation8 + $0x338] sm:$0xff]  ;;  %v7718_v52 = vld [vmem:[#allocation8 + $0x330] sm:$0xff] }
 0x90d   :  { %5465 = vmatpush1.msra.mxu0 %v7676_v61  ;;  %5422 = vmatpush2.msra.mxu1 %v7677_v7  ;;  %v7719_v61 = vld [vmem:[#allocation8 + $0x328] sm:$0xff]  ;;  %v7720_v7 = vld [vmem:[#allocation8 + $0x320] sm:$0xff] }
 0x90e   :  { %5466 = vmatprep.subr.mxu0 %v7678_v58  ;;  %5537 = vmatprep.subr.mxu1 %v7679_v56  ;;  %v7721_v58 = vld [vmem:[#allocation8 + $0x318] sm:$0xff]  ;;  %v7722_v56 = vld [vmem:[#allocation8 + $0x310] sm:$0xff] }
 0x90f   :  { %5467 = vmatpush1.msra.mxu0 %v7680_v10  ;;  %v7723_v10 = vld [vmem:[#allocation8 + $0x308] sm:$0xff] }
 0x910   :  { %5468 = vmatprep.subr.mxu0 %v7681_v8  ;;  %v7724_v8 = vld [vmem:[#allocation8 + $0x300] sm:$0xff] }
 0x911   :  { %5469 = vmatpush1.msra.mxu0 %v7682_v33  ;;  %v7725_v33 = vld [vmem:[#allocation8 + $0x6f8] sm:$0xff] }
 0x912   :  { %5470 = vmatprep.subr.mxu0 %v7683_v63  ;;  %v9395_v63 = vpop.f32.mrf.mxu0 }
 0x913   :  { %5471 = vmatpush1.msra.mxu0 %v7684_v31 }
 0x914   :  { %5472 = vmatprep.subr.mxu0 %v7685_v6  ;;  %v9397_v31 = vpop.f32.mrf.mxu0 }
 0x915   :  { %5473 = vmatpush1.msra.mxu0 %v7686_v32  ;;  %v9401_v32 = vpop.f32.mrf.mxu1 }
 0x916   :  { %5474 = vmatprep.subr.mxu0 %v7687_v21  ;;  %v9399_v6 = vpop.f32.mrf.mxu0 }
 0x917   :  { %5475 = vmatpush1.msra.mxu0 %v7688_v14  ;;  %v9405_v14 = vpop.f32.mrf.mxu1 }
 0x918   :  { %5476 = vmatprep.subr.mxu0 %v7689_v9  ;;  %v9403_v21 = vpop.f32.mrf.mxu0 }
 0x919   :  { %5477 = vmatpush1.msra.mxu0 %v7690_v15  ;;  %v9409_v15 = vpop.permute.xlu0 %4973 }
 0x91a   :  { %5478 = vmatprep.subr.mxu0 %v7691_v38  ;;  %v9407_v9 = vpop.f32.mrf.mxu0  ;;  %v9411_v38 = vpop.f32.mrf.mxu1 }
 0x91b   :  { %5479 = vmatpush1.msra.mxu0 %v7692_v12 }
 0x91c   :  { %5480 = vmatprep.subr.mxu0 %v7693_v29  ;;  %v9413_v12 = vpop.f32.mrf.mxu0  ;;  %v9415_v29 = vpop.f32.mrf.mxu1 }
 0x91d   :  { %5481 = vmatpush2.msra.mxu0 %v7694_v27 }
 0x91e   :  { %5482 = vmatprep.subr.mxu0 %v7695_v36  ;;  %v9417_v27 = vpop.f32.mrf.mxu0  ;;  %v9419_v36 = vpop.permute.xlu1 %5005 }
 0x91f   :  { %5483 = vmatpush2.msra.mxu0 %v7696_v3  ;;  %v9421_v3 = vpop.permute.xlu0 %5045 }
 0x920   :  { %5484 = vmatprep.subr.mxu0 %v7697_v11  ;;  %v9423_v11 = vpop.f32.mrf.mxu1 }
 0x921   :  { %5485 = vmatpush2.msra.mxu0 %v7698_v42  ;;  %v9425_v42 = vpop.f32.mrf.mxu0 }
 0x922   :  { %5486 = vmatprep.subr.mxu0 %v7699_v57 }
 0x923   :  { %5487 = vmatpush2.msra.mxu0 %v7700_v28  ;;  %v9427_v57 = vpop.f32.mrf.mxu0  ;;  %v9429_v28 = vpop.permute.xlu1 %5085 }
 0x924   :  { %5488 = vmatprep.subr.mxu0 %v7701_v16  ;;  %v9431_v16 = vpop.permute.xlu0 %5125 }
 0x925   :  { %5489 = vmatpush2.msra.mxu0 %v7702_v60  ;;  %v9433_v60 = vpop.f32.mrf.mxu1 }
 0x926   :  { %5490 = vmatprep.subr.mxu0 %v7703_v49  ;;  %v9435_v49 = vpop.f32.mrf.mxu0 }
 0x927   :  { %5491 = vmatpush2.msra.mxu0 %v7704_v55  ;;  %v9437_v55 = vpop.f32.mrf.mxu1 }
 0x928   :  { %5492 = vmatprep.subr.mxu0 %v7705_v22  ;;  %v9439_v22 = vpop.permute.xlu1 %5165 }
 0x929   :  { %5493 = vmatpush2.msra.mxu0 %v7706_v44  ;;  %v9441_v44 = vpop.permute.xlu0 %5205 }
 0x92a   :  { %5494 = vmatprep.subr.mxu0 %v7707_v30  ;;  %10056 = vst [vmem:[#allocation16_spill] sm:$0xff] %v9441_v44  ;;  %v9443_v30 = vpop.f32.mrf.mxu0 }
 0x92b   :  { %5495 = vmatpush2.msra.mxu0 %v7708_v5  ;;  %v9445_v5 = vpop.f32.mrf.mxu1 }
 0x92c   :  { %5496 = vmatprep.subr.mxu0 %v7709_v46 }
 0x92d   :  { %5497 = vmatpush2.msra.mxu0 %v7710_v2  ;;  %v9447_v46 = vpop.f32.mrf.mxu1  ;;  %v9449_v2 = vpop.f32.mrf.mxu0 }
 0x92e   :  { %5498 = vmatprep.subr.mxu0 %v7711_v47  ;;  %v9451_v47 = vpop.permute.xlu1 %5245 }
 0x92f   :  { %5499 = vmatpush2.msra.mxu0 %v7712_v26  ;;  %10057 = vst [vmem:[#allocation26_spill] sm:$0xff] %v9451_v47  ;;  %v9453_v26 = vpop.permute.xlu0 %5285 }
 0x930   :  { %5500 = vmatprep.subr.mxu0 %v7713_v53  ;;  %10058 = vst [vmem:[#allocation34_spill] sm:$0xff] %v9453_v26  ;;  %v9455_v53 = vpop.f32.mrf.mxu1 }
 0x931   :  { %5501 = vmatpush2.msra.mxu0 %v7714_v50  ;;  %v9457_v50 = vpop.f32.mrf.mxu0 }
 0x932   :  { %5502 = vmatprep.subr.mxu0 %v7715_v25  ;;  %v9459_v25 = vpop.permute.xlu1 %5325 }
 0x933   :  { %5503 = vmatpush2.msra.mxu0 %v7716_v1  ;;  %10059 = vst [vmem:[#allocation40_spill] sm:$0xff] %v9459_v25  ;;  %v4979_v1 = vpop.permute.xlu0 %4978 }
 0x934   :  { %5504 = vmatprep.subr.mxu0 %v7717_v45  ;;  %v9461_v45 = vpop.f32.mrf.mxu1 }
 0x935   :  { %5505 = vmatpush2.msra.mxu0 %v7718_v52  ;;  %v9463_v52 = vpop.f32.mrf.mxu0 }
 0x936   :  { %5506 = vmatprep.subr.mxu0 %v7719_v61  ;;  %v9465_v61 = vpop.f32.mrf.mxu1 }
 0x937   :  { %5507 = vmatpush2.msra.mxu0 %v7720_v7  ;;  %v9467_v7 = vpop.f32.mrf.mxu0 }
 0x938   :  { %5508 = vmatprep.subr.mxu0 %v7721_v58  ;;  %v5011_v58 = vpop.permute.xlu1 %5010 }
 0x939   :  { %5509 = vmatpush2.msra.mxu0 %v7722_v56  ;;  %v5051_v56 = vpop.permute.xlu0 %5050 }
 0x93a   :  { %5510 = vmatprep.subr.mxu0 %v7723_v10  ;;  %v9469_v10 = vpop.f32.mrf.mxu1 }
 0x93b   :  { %5511 = vmatpush2.msra.mxu0 %v7724_v8  ;;  %v9471_v8 = vpop.f32.mrf.mxu0 }
 0x93c   :  { %5626 = vmatprep.subr.mxu0 %v7725_v33  ;;  %v4984_v18 = vpop.permute.xlu1 %4983  ;;  %v9475_v23 = vpop.f32.mrf.mxu1 }
 0x93d   :  { %v9473_v33 = vpop.f32.mrf.mxu0  ;;  %v5016_v37 = vpop.permute.xlu0 %5015 }
 0x93e   :  { %v9479_v4 = vpop.f32.mrf.mxu1 }
 0x93f   :  { %v9477_v39 = vpop.f32.mrf.mxu0  ;;  %10060 = vst [vmem:[#allocation37_spill] sm:$0xff] %v9479_v4 }
 0x940   :  { %v9481_v51 = vpop.permute.xlu1 %5090  ;;  %v9487_v20 = vpop.f32.mrf.mxu1 }
 0x941   :  { %v9483_v48 = vpop.permute.xlu0 %5055  ;;  %v9485_v34 = vpop.f32.mrf.mxu0  ;;  %10061 = vst [vmem:[#allocation18_spill] sm:$0xff] %v9487_v20 }
 0x942   :  { %v9489_v43 = vpop.f32.mrf.mxu1 }
 0x943   :  { %v9491_v24 = vpop.f32.mrf.mxu0 }
 0x944   :  { %v9493_v17 = vpop.permute.xlu1 %5130  ;;  %v9495_v0 = vpop.f32.mrf.mxu1 }
 0x945   :  { %v4989_v40 = vpop.permute.xlu0 %4988  ;;  %10062 = vst [vmem:[#allocation41_spill] sm:$0xff] %v9495_v0  ;;  %v9497_v54 = vpop.f32.mrf.mxu0 }
 0x946   :  { %10063 = vst [vmem:[#allocation42_spill] sm:$0xff] %v9497_v54  ;;  %v9501_v35 = vpop.f32.mrf.mxu1 }
 0x947   :  { %10064 = vst [vmem:[#allocation43_spill] sm:$0xff] %v9501_v35  ;;  %v9503_v59 = vpop.f32.mrf.mxu0 }
 0x948   :  { %v5021_v13 = vpop.permute.xlu1 %5020  ;;  %10065 = vst [vmem:[#allocation44_spill] sm:$0xff] %v9503_v59  ;;  %v9505_v62 = vpop.f32.mrf.mxu1 }
 0x949   :  { %v9499_v19 = vpop.permute.xlu0 %5095  ;;  %10066 = vst [vmem:[#allocation45_spill] sm:$0xff] %v9505_v62  ;;  %v9507_v41 = vpop.f32.mrf.mxu0 }
 0x94a   :  { %10067 = vst [vmem:[#allocation46_spill] sm:$0xff] %v9507_v41  ;;  %v9513_v47 = vpop.f32.mrf.mxu1 }
 0x94b   :  { %10069 = vst [vmem:[#allocation48_spill] sm:$0xff] %v9513_v47  ;;  %v9515_v20 = vpop.f32.mrf.mxu0  ;;  %v5023_v47 = vmul.f32 %v9419_v36, %v9401_v32  ;;  %v5027_v32 = vmul.f32 %v5016_v37, %v9423_v11  ;;  %v5028_v11 = vmul.f32 %v5016_v37, %v9433_v60  ;;  %v5067_v37 = vmul.f32 %v9483_v48, %v9457_v50 }
 0x94c   :  { %v9509_v25 = vpop.permute.xlu1 %5170  ;;  %10070 = vst [vmem:[#allocation49_spill] sm:$0xff] %v9515_v20  ;;  %v9523_v35 = vpop.f32.mrf.mxu1  ;;  %v4991_v20 = vmul.f32 %v9409_v15, %v9395_v63  ;;  %v4995_v63 = vmul.f32 %v4984_v18, %v9407_v9  ;;  %v4996_v9 = vmul.f32 %v4984_v18, %v9413_v12 }
 0x94d   :  { %10068 = vst [vmem:[#allocation47_spill] sm:$0xff] %v9509_v25  ;;  %v9511_v26 = vpop.permute.xlu0 %5060  ;;  %10073 = vst [vmem:[#allocation52_spill] sm:$0xff] %v9523_v35  ;;  %v5024_v35 = vmul.f32 %v9419_v36, %v9405_v14  ;;  %v5064_v14 = vmul.f32 %v9421_v3, %v9435_v49  ;;  %v5029_v49 = vmul.f32 %v5021_v13, %v9437_v55 }
 0x94e   :  { %v9527_v62 = vpop.f32.mrf.mxu1 }
 0x94f   :  { %10075 = vst [vmem:[#allocation54_spill] sm:$0xff] %v9527_v62  ;;  %v4993_v62 = vmul.f32 %v4979_v1, %v9399_v6  ;;  %v5065_v6 = vmul.f32 %v5051_v56, %v9443_v30 }
 0x950   :  { %v9519_v54 = vpop.permute.xlu1 %5135 }
 0x951   :  { %10071 = vst [vmem:[#allocation50_spill] sm:$0xff] %v9519_v54  ;;  %v9521_v4 = vpop.permute.xlu0 %5210  ;;  %v9546_v54 = vpop.f32.mrf.mxu1 }
 0x952   :  { %10072 = vst [vmem:[#allocation51_spill] sm:$0xff] %v9521_v4  ;;  %v4992_v4 = vmul.f32 %v9409_v15, %v9397_v31  ;;  %10078 = vst [vmem:[#allocation57_spill] sm:$0xff] %v9546_v54  ;;  %v5063_v31 = vmul.f32 %v9421_v3, %v9427_v57  ;;  %v5066_v57 = vmul.f32 %v5051_v56, %v9449_v2 }
 0x953   :  { %v4997_v3 = vmul.f32 %v4989_v40, %v9417_v27  ;;  %v5035_v54 = vadd.f32 %v5027_v32, %v4995_v63  ;;  %v5105_v27 = vmul.f32 %v9481_v51, %v9461_v45  ;;  %v5107_v56 = vmul.f32 %v9499_v19, %v9469_v10  ;;  %v10082_v10 = vld [vmem:[#allocation16_spill] sm:$0xff] }
 0x954   :  { %v9529_v41 = vpop.permute.xlu1 %5100  ;;  %v5183_v63 = vmul.f32 %v9439_v22, %v9489_v43 }
 0x955   :  { %v9531_v25 = vpop.permute.xlu0 %5175  ;;  %v5037_v12 = vadd.f32 %v5029_v49, %v4997_v3 }
 0x956   :  { %10076 = vst [vmem:[#allocation55_spill] sm:$0xff] %v9531_v25  ;;  %v4994_v25 = vmul.f32 %v4979_v1, %v9403_v21  ;;  %v5032_v1 = vadd.f32 %v5024_v35, %v4992_v4 }
 0x958   :  { %v9560_v21 = vpop.permute.xlu1 %5250 }
 0x959   :  { %10080 = vst [vmem:[#allocation59_spill] sm:$0xff] %v9560_v21  ;;  %v9562_v36 = vpop.permute.xlu0 %5140 }
 0x95a   :  { %10081 = vst [vmem:[#allocation60_spill] sm:$0xff] %v9562_v36  ;;  %v5030_v36 = vmul.f32 %v5021_v13, %v9445_v5  ;;  %v5104_v13 = vmul.f32 %v9429_v28, %v9455_v53  ;;  %v5106_v5 = vmul.f32 %v9481_v51, %v9465_v61  ;;  %v5070_v51 = vmul.f32 %v9511_v26, %v9471_v8  ;;  %v10083_v8 = vld [vmem:[#allocation37_spill] sm:$0xff] }
 0x95c   :  { %v9587_v60 = vpop.permute.xlu1 %5215 }
 0x95d   :  { %v9589_v55 = vpop.permute.xlu0 %5290 }
 0x97a   :  { %v9517_v0 = vpop.f32.mrf.mxu0  ;;  %v9556_v15 = vpop.f32.mrf.mxu1 }
 0x97c   :  { %v9525_v59 = vpop.f32.mrf.mxu0  ;;  %v9573_v18 = vpop.f32.mrf.mxu1 }
 0x97d   :  { %10074 = vst [vmem:[#allocation53_spill] sm:$0xff] %v9525_v59  ;;  %v5025_v59 = vmul.f32 %v5011_v58, %v9411_v38 }
 0x97e   :  { %v9597_v45 = vpop.f32.mrf.mxu1 }
 0x97f   :  { %v9533_v44 = vpop.f32.mrf.mxu0 }
 0x980   :  { %10077 = vst [vmem:[#allocation56_spill] sm:$0xff] %v9533_v44  ;;  %v5026_v44 = vmul.f32 %v5011_v58, %v9415_v29  ;;  %v5031_v29 = vadd.f32 %v5023_v47, %v4991_v20  ;;  %v5033_v58 = vadd.f32 %v5025_v59, %v4993_v62  ;;  %v5072_v20 = vadd.f32 %v5064_v14, %v5032_v1 }
 0x981   :  { %v9558_v38 = vpop.f32.mrf.mxu0  ;;  %v5036_v62 = vadd.f32 %v5028_v11, %v4996_v9  ;;  %v5103_v59 = vmul.f32 %v9429_v28, %v9447_v46  ;;  %v5069_v46 = vmul.f32 %v9511_v26, %v9467_v7  ;;  %v5144_v28 = vmul.f32 %v9431_v16, %v9477_v39  ;;  %v10087_v9 = vld [vmem:[#allocation41_spill] sm:$0xff] }
 0x982   :  { %10079 = vst [vmem:[#allocation58_spill] sm:$0xff] %v9558_v38  ;;  %v5034_v30 = vadd.f32 %v5026_v44, %v4994_v25  ;;  %v4998_v38 = vmul.f32 %v4989_v40, %v9425_v42  ;;  %v5071_v21 = vadd.f32 %v5063_v31, %v5031_v29  ;;  %v5073_v47 = vadd.f32 %v5065_v6, %v5033_v58  ;;  %v10084_v6 = vld [vmem:[#allocation42_spill] sm:$0xff] }
 0x983   :  { %v5143_v40 = vmul.f32 %v9431_v16, %v9473_v33  ;;  %v5068_v42 = vmul.f32 %v9483_v48, %v9463_v52  ;;  %v5112_v53 = vadd.f32 %v5104_v13, %v5072_v20  ;;  %v5075_v25 = vadd.f32 %v5067_v37, %v5035_v54  ;;  %v10089_v58 = vld [vmem:[#allocation18_spill] sm:$0xff]  ;;  %v10090_v37 = vld [vmem:[#allocation43_spill] sm:$0xff] }
 0x984   :  { %v9575_v35 = vpop.f32.mrf.mxu0  ;;  %v5074_v4 = vadd.f32 %v5066_v57, %v5034_v30  ;;  %v5111_v44 = vadd.f32 %v5103_v59, %v5071_v21  ;;  %v5038_v2 = vadd.f32 %v5030_v36, %v4998_v38  ;;  %v5113_v50 = vadd.f32 %v5105_v27, %v5073_v47  ;;  %v10086_v38 = vld [vmem:[#allocation44_spill] sm:$0xff]  ;;  %v4799_v21 = vpop.f32.mrf.mxu1  ;;  %v10088_v11 = vld [vmem:[#allocation53_spill] sm:$0xff] }
 0x985   :  { %v5076_v33 = vadd.f32 %v5068_v42, %v5036_v62  ;;  %v5108_v7 = vmul.f32 %v9499_v19, %v9475_v23  ;;  %v5145_v39 = vmul.f32 %v9493_v17, %v9485_v34  ;;  %v5146_v54 = vmul.f32 %v9493_v17, %v9491_v24  ;;  %v10085_v23 = vld [vmem:[#allocation50_spill] sm:$0xff]  ;;  %v5181_v24 = vpop.permute.xlu1 %5180  ;;  %v9621_v36 = vpop.permute.xlu0 %5255  ;;  %v10091_v62 = vld [vmem:[#allocation47_spill] sm:$0xff] }
 0x986   :  { %v4652_v48 = vpop.f32.mrf.mxu0  ;;  %v5114_v52 = vadd.f32 %v5106_v5, %v5074_v4  ;;  %v5151_v61 = vadd.f32 %v5143_v40, %v5111_v44  ;;  %v5077_v16 = vadd.f32 %v5069_v46, %v5037_v12  ;;  %v5152_v32 = vadd.f32 %v5144_v28, %v5112_v53  ;;  %v10092_v40 = vld [vmem:[#allocation45_spill] sm:$0xff]  ;;  %v10094_v42 = vld [vmem:[#allocation51_spill] sm:$0xff]  ;;  %v4803_v5 = vpop.f32.mrf.mxu1 }
 0x987   :  { %v5223_v31 = vmul.f32 %v10082_v10, %v9517_v0  ;;  %v5115_v26 = vadd.f32 %v5107_v56, %v5075_v25  ;;  %v5109_v14 = vmul.f32 %v9529_v41, %v10083_v8  ;;  %v5147_v19 = vmul.f32 %v10085_v23, %v10084_v6  ;;  %v10093_v27 = vld [vmem:[#allocation56_spill] sm:$0xff]  ;;  %v10102_v8 = vld [vmem:[#allocation34_spill] sm:$0xff] }
 0x988   :  { %v5148_v34 = vmul.f32 %v10085_v23, %v10086_v38  ;;  %v9619_v17 = vpop.f32.mrf.mxu0  ;;  %v5078_v43 = vadd.f32 %v5070_v51, %v5038_v2  ;;  %v5191_v29 = vadd.f32 %v5183_v63, %v5151_v61  ;;  %v5184_v0 = vmul.f32 %v9439_v22, %v10087_v9  ;;  %v10097_v51 = vld [vmem:[#allocation48_spill] sm:$0xff]  ;;  %v10098_v61 = vld [vmem:[#allocation55_spill] sm:$0xff] }
 0x989   :  { %v5224_v57 = vmul.f32 %v10082_v10, %v10088_v11  ;;  %v5116_v1 = vadd.f32 %v5108_v7, %v5076_v33  ;;  %v5110_v3 = vmul.f32 %v9529_v41, %v10089_v58  ;;  %v5153_v49 = vadd.f32 %v5145_v39, %v5113_v50  ;;  %v10095_v41 = vld [vmem:[#allocation26_spill] sm:$0xff]  ;;  %v10099_v7 = vld [vmem:[#allocation52_spill] sm:$0xff]  ;;  %v5296_v63 = vpop.permute.xlu0 %5295 }
 0x98a   :  { %v5154_v30 = vadd.f32 %v5146_v54, %v5114_v52  ;;  %v5117_v20 = vadd.f32 %v5109_v14, %v5077_v16  ;;  %v5192_v47 = vadd.f32 %v5184_v0, %v5152_v32  ;;  %v5185_v59 = vmul.f32 %v10091_v62, %v10090_v37  ;;  %v4658_v46 = vpop.f32.mrf.mxu0  ;;  %v10096_v50 = vld [vmem:[#allocation58_spill] sm:$0xff]  ;;  %v5221_v16 = vpop.permute.xlu1 %5220  ;;  %v10100_v32 = vld [vmem:[#allocation49_spill] sm:$0xff]  ;;  %v10101_v10 = vld [vmem:[#allocation60_spill] sm:$0xff] }
 0x98b   :  { %v5231_v4 = vadd.f32 %v5223_v31, %v5191_v29  ;;  %v5186_v12 = vmul.f32 %v10091_v62, %v10092_v40  ;;  %v5155_v13 = vadd.f32 %v5147_v19, %v5115_v26  ;;  %v5156_v22 = vadd.f32 %v5148_v34, %v5116_v1  ;;  %v4805_v34 = vpop.f32.mrf.mxu1  ;;  %v10104_v58 = vld [vmem:[#allocation54_spill] sm:$0xff] }
 0x98c   :  { %v5225_v44 = vmul.f32 %v10094_v42, %v10093_v27  ;;  %v5118_v28 = vadd.f32 %v5110_v3, %v5078_v43  ;;  %v5263_v2 = vmul.f32 %v10095_v41, %v9556_v15  ;;  %v5232_v53 = vadd.f32 %v5224_v57, %v5192_v47  ;;  %v10103_v57 = vld [vmem:[#allocation46_spill] sm:$0xff]  ;;  %v10107_v27 = vld [vmem:[#allocation40_spill] sm:$0xff] }
 0x98d   :  { %v5226_v25 = vmul.f32 %v10094_v42, %v10096_v50  ;;  %v5193_v52 = vadd.f32 %v5185_v59, %v5153_v49  ;;  %v5194_v56 = vadd.f32 %v5186_v12, %v5154_v30  ;;  %v5187_v33 = vmul.f32 %v10098_v61, %v10097_v51 }
 0x98e   :  { %v5188_v39 = vmul.f32 %v10098_v61, %v10099_v7  ;;  %v5150_v31 = vmul.f32 %v10101_v10, %v10100_v32  ;;  %v5271_v26 = vadd.f32 %v5263_v2, %v5231_v4  ;;  %v5264_v15 = vmul.f32 %v10095_v41, %v9573_v18  ;;  %v10105_v18 = vld [vmem:[#allocation59_spill] sm:$0xff]  ;;  %v10106_v4 = vld [vmem:[#allocation57_spill] sm:$0xff]  ;;  %v5331_v41 = vpop.permute.xlu1 %5330 }
 0x98f   :  { %v5195_v6 = vadd.f32 %v5187_v33, %v5155_v13  ;;  %v5233_v19 = vadd.f32 %v5225_v44, %v5193_v52  ;;  %v5228_v38 = vmul.f32 %v9587_v60, %v4652_v48  ;;  %v5234_v9 = vadd.f32 %v5226_v25, %v5194_v56 }
 0x990   :  { %v5196_v23 = vadd.f32 %v5188_v39, %v5156_v22  ;;  %v5272_v29 = vadd.f32 %v5264_v15, %v5232_v53  ;;  %v5149_v1 = vmul.f32 %v10101_v10, %v10103_v57  ;;  %v5189_v3 = vmul.f32 %v5181_v24, %v10104_v58  ;;  %v4809_v22 = vpop.f32.mrf.mxu1  ;;  %v7731_v57 = vld [vmem:[#allocation8 + $0x6e0] sm:$0xff] }
 0x991   :  { %v5265_v49 = vmul.f32 %v10105_v18, %v9597_v45  ;;  %v5227_v30 = vmul.f32 %v9587_v60, %v9575_v35  ;;  %v5158_v48 = vadd.f32 %v5150_v31, %v5118_v28  ;;  %v5266_v37 = vmul.f32 %v10105_v18, %v4799_v21  ;;  %v5261_v28 = vpop.permute.xlu0 %5260 }
 0x992   :  { %v5190_v40 = vmul.f32 %v5181_v24, %v10106_v4  ;;  %v5236_v13 = vadd.f32 %v5228_v38, %v5196_v23  ;;  %v5230_v2 = vmul.f32 %v5221_v16, %v4658_v46  ;;  %v5157_v21 = vadd.f32 %v5149_v1, %v5117_v20  ;;  %v4811_v7 = vpop.f32.mrf.mxu1  ;;  %v7728_v38 = vld [vmem:[#allocation8 + $0x4e8] sm:$0xff]  ;;  %v7735_v4 = vld [vmem:[#allocation8 + $0x6d0] sm:$0xff] }
 0x993   :  { %v5273_v12 = vadd.f32 %v5265_v49, %v5233_v19  ;;  %v5274_v45 = vadd.f32 %v5266_v37, %v5234_v9  ;;  %v5235_v53 = vadd.f32 %v5227_v30, %v5195_v6  ;;  %v5268_v50 = vmul.f32 %v9621_v36, %v4805_v34  ;;  %v7729_v34 = vld [vmem:[#allocation8 + $0x6e8] sm:$0xff]  ;;  %v7732_v49 = vld [vmem:[#allocation8 + $0x4d8] sm:$0xff] }
 0x994   :  { %v5198_v52 = vadd.f32 %v5190_v40, %v5158_v48  ;;  %v5267_v56 = vmul.f32 %v9621_v36, %v4803_v5  ;;  %v5229_v46 = vmul.f32 %v5221_v16, %v9619_v17  ;;  %v5197_v31 = vadd.f32 %v5189_v3, %v5157_v21  ;;  %v5301_v17 = vpop.permute.xlu1 %5300  ;;  %v7733_v30 = vld [vmem:[#allocation8 + $0x6d8] sm:$0xff]  ;;  %v7744_v21 = vld [vmem:[#allocation8 + $0x4a8] sm:$0xff] }
 0x995   :  { %v5276_v33 = vadd.f32 %v5268_v50, %v5236_v13  ;;  %v5270_v16 = vmul.f32 %v5261_v28, %v4811_v7  ;;  %v5336_v6 = vpop.permute.xlu0 %5335  ;;  %v5269_v1 = vmul.f32 %v5261_v28, %v4809_v22  ;;  %v7736_v13 = vld [vmem:[#allocation8 + $0x4c8] sm:$0xff]  ;;  %v7743_v28 = vld [vmem:[#allocation8 + $0x6b0] sm:$0xff]  ;;  %v7746_v50 = vld [vmem:[#allocation8 + $0x4a0] sm:$0xff] }
 0x996   :  { %v5238_v20 = vadd.f32 %v5230_v2, %v5198_v52  ;;  %v5275_v36 = vadd.f32 %v5267_v56, %v5235_v53  ;;  %v5237_v23 = vadd.f32 %v5229_v46, %v5197_v31  ;;  %v7737_v22 = vld [vmem:[#allocation8 + $0x6c8] sm:$0xff]  ;;  %v7748_v52 = vld [vmem:[#allocation8 + $0x498] sm:$0xff]  ;;  %v7759_v31 = vld [vmem:[#allocation8 + $0x670] sm:$0xff] }
 0x997   :  { %v7745_v53 = vld [vmem:[#allocation8 + $0x6a8] sm:$0xff]  ;;  %v7749_v56 = vld [vmem:[#allocation8 + $0x698] sm:$0xff] }
 0x998   :  { %v7752_v46 = vld [vmem:[#allocation8 + $0x488] sm:$0xff] }
 0x999   :  { %v7753_v7 = vld [vmem:[#allocation8 + $0x688] sm:$0xff] }
 0x9bc   :  { %v4944_v54 = vpop.f32.mrf.mxu0 }
 0x9bd   :  { %v5303_v14 = vmul.f32 %v10102_v8, %v4944_v54 }
 0x9be   :  { %v4946_v43 = vpop.f32.mrf.mxu0 }
 0x9bf   :  { %v5311_v0 = vadd.f32 %v5303_v14, %v5271_v26  ;;  %v5304_v11 = vmul.f32 %v10102_v8, %v4946_v43  ;;  %v7726_v14 = vld [vmem:[#allocation8 + $0x4f0] sm:$0xff] }
 0x9c0   :  { %v4950_v47 = vpop.f32.mrf.mxu0 }
 0x9c1   :  { %v5312_v62 = vadd.f32 %v5304_v11, %v5272_v29  ;;  %v5305_v59 = vmul.f32 %v9589_v55, %v4950_v47  ;;  %v5343_v42 = vadd.f32 %v10107_v27, %v5311_v0  ;;  %v5278_v29 = vadd.f32 %v5270_v16, %v5238_v20  ;;  %v7730_v11 = vld [vmem:[#allocation8 + $0x4e0] sm:$0xff]  ;;  %v7756_v20 = vld [vmem:[#allocation8 + $0x478] sm:$0xff] }
 0x9c2   :  { %v4952_v44 = vpop.f32.mrf.mxu0  ;;  %v5277_v47 = vadd.f32 %v5269_v1, %v5237_v23  ;;  %v7764_v16 = vld [vmem:[#allocation8 + $0x458] sm:$0xff]  ;;  %v7769_v23 = vld [vmem:[#allocation8 + $0x648] sm:$0xff]  ;;  %v7779_v1 = vld [vmem:[#allocation8 + $0x620] sm:$0xff] }
 0x9c3   :  { %v5344_v35 = vadd.f32 %v10107_v27, %v5312_v62  ;;  %v5306_v60 = vmul.f32 %v9589_v55, %v4952_v44  ;;  %v5313_v25 = vadd.f32 %v5305_v59, %v5273_v12  ;;  %v9668_v39 = vmax.f32 %v5343_v42, 0.0  ;;  %v5341_v62 = vpop.permute.xlu1 %5340  ;;  %v7734_v59 = vld [vmem:[#allocation8 + $0x4d0] sm:$0xff]  ;;  %v7738_v27 = vld [vmem:[#allocation8 + $0x4c0] sm:$0xff] }
 0x9c4   :  { %v4956_v24 = vpop.f32.mrf.mxu0  ;;  %v7739_v42 = vld [vmem:[#allocation8 + $0x6c0] sm:$0xff] }
 0x9c5   :  { %v9665_v51 = vmax.f32 %v5344_v35, 0.0  ;;  %v5314_v61 = vadd.f32 %v5306_v60, %v5274_v45  ;;  %v5307_v55 = vmul.f32 %v5296_v63, %v4956_v24  ;;  %v5345_v5 = vadd.f32 %v5331_v41, %v5313_v25  ;;  %v7741_v45 = vld [vmem:[#allocation8 + $0x6b8] sm:$0xff]  ;;  %v7742_v60 = vld [vmem:[#allocation8 + $0x4b0] sm:$0xff]  ;;  %v7747_v25 = vld [vmem:[#allocation8 + $0x6a0] sm:$0xff] }
 0x9c6   :  { %v4958_v54 = vpop.f32.mrf.mxu0 }
 0x9c7   :  { %v5346_v32 = vadd.f32 %v5331_v41, %v5314_v61  ;;  %v5308_v10 = vmul.f32 %v5296_v63, %v4958_v54  ;;  %5423 = vmatprep.mubr.f32.mxu1 %v9665_v51  ;;  %5512 = vmatprep.mubr.f32.mxu0 %v9665_v51  ;;  %v7727_v63 = vld [vmem:[#allocation8 + $0x6f0] sm:$0xff]  ;;  %v5315_v19 = vadd.f32 %v5307_v55, %v5275_v36  ;;  %v9676_v58 = vmax.f32 %v5345_v5, 0.0  ;;  %v7740_v41 = vld [vmem:[#allocation8 + $0x4b8] sm:$0xff]  ;;  %v7754_v55 = vld [vmem:[#allocation8 + $0x480] sm:$0xff] }
 0x9c8   :  { %v4962_v26 = vpop.f32.mrf.mxu0  ;;  %5424 = vmatmul.mubr.f32.vlgmr.msra.gmra.mxu1 %v9668_v39  ;;  %5513 = vmatmul.mubr.f32.vlgmr.msra.gmra.mxu0 %v9668_v39  ;;  %v7750_v61 = vld [vmem:[#allocation8 + $0x490] sm:$0xff]  ;;  %v7755_v54 = vld [vmem:[#allocation8 + $0x680] sm:$0xff]  ;;  %v7760_v36 = vld [vmem:[#allocation8 + $0x468] sm:$0xff] }
 0x9c9   :  { %v9674_v15 = vmax.f32 %v5346_v32, 0.0  ;;  %v5316_v8 = vadd.f32 %v5308_v10, %v5276_v33  ;;  %5538 = vmatpush1.msra.mxu1 %v7726_v14  ;;  %5627 = vmatpush1.msra.mxu0 %v7727_v63  ;;  %v5309_v3 = vmul.f32 %v5301_v17, %v4962_v26  ;;  %v5347_v48 = vadd.f32 %v5336_v6, %v5315_v19  ;;  %v7751_v33 = vld [vmem:[#allocation8 + $0x690] sm:$0xff]  ;;  %v7757_v32 = vld [vmem:[#allocation8 + $0x678] sm:$0xff]  ;;  %v7761_v5 = vld [vmem:[#allocation8 + $0x668] sm:$0xff] }
 0x9ca   :  { %5539 = vmatprep.subr.mxu1 %v7728_v38  ;;  %5628 = vmatprep.subr.mxu0 %v7729_v34  ;;  %v4964_v43 = vpop.f32.mrf.mxu0  ;;  %v7758_v10 = vld [vmem:[#allocation8 + $0x470] sm:$0xff]  ;;  %v7762_v26 = vld [vmem:[#allocation8 + $0x460] sm:$0xff]  ;;  %v7772_v34 = vld [vmem:[#allocation8 + $0x438] sm:$0xff] }
 0x9cb   :  { %v5348_v9 = vadd.f32 %v5336_v6, %v5316_v8  ;;  %v5310_v0 = vmul.f32 %v5301_v17, %v4964_v43  ;;  %5540 = vmatpush1.msra.mxu1 %v7730_v11  ;;  %5629 = vmatpush1.msra.mxu0 %v7731_v57  ;;  %v5317_v40 = vadd.f32 %v5309_v3, %v5277_v47  ;;  %v9684_v44 = vmax.f32 %v5347_v48, 0.0  ;;  %v7763_v17 = vld [vmem:[#allocation8 + $0x660] sm:$0xff]  ;;  %v7765_v8 = vld [vmem:[#allocation8 + $0x658] sm:$0xff]  ;;  %v7766_v14 = vld [vmem:[#allocation8 + $0x450] sm:$0xff] }
 0x9cc   :  { %5429 = vmatprep.mubr.f32.mxu1 %v9674_v15  ;;  %5518 = vmatprep.mubr.f32.mxu0 %v9674_v15  ;;  %v7767_v63 = vld [vmem:[#allocation8 + $0x650] sm:$0xff]  ;;  %v7768_v6 = vld [vmem:[#allocation8 + $0x448] sm:$0xff]  ;;  %v7770_v19 = vld [vmem:[#allocation8 + $0x440] sm:$0xff] }
 0x9cd   :  { %v5318_v18 = vadd.f32 %v5310_v0, %v5278_v29  ;;  %5541 = vmatprep.subr.mxu1 %v7732_v49  ;;  %5630 = vmatprep.subr.mxu0 %v7733_v30  ;;  %v9680_v37 = vmax.f32 %v5348_v9, 0.0  ;;  %v5349_v2 = vadd.f32 %v5341_v62, %v5317_v40  ;;  %v7771_v38 = vld [vmem:[#allocation8 + $0x640] sm:$0xff]  ;;  %v7773_v43 = vld [vmem:[#allocation8 + $0x638] sm:$0xff]  ;;  %v7774_v29 = vld [vmem:[#allocation8 + $0x430] sm:$0xff] }
 0x9ce   :  { %5430 = vmatmul.mubr.f32.gmra.mxu1 %v9676_v58  ;;  %5519 = vmatmul.mubr.f32.gmra.mxu0 %v9676_v58  ;;  %v7775_v9 = vld [vmem:[#allocation8 + $0x630] sm:$0xff]  ;;  %v7776_v0 = vld [vmem:[#allocation8 + $0x428] sm:$0xff]  ;;  %v7778_v57 = vld [vmem:[#allocation8 + $0x420] sm:$0xff] }
 0x9cf   :  { %5542 = vmatpush1.msra.mxu1 %v7734_v59  ;;  %5631 = vmatpush1.msra.mxu0 %v7735_v4  ;;  %v5350_v12 = vadd.f32 %v5341_v62, %v5318_v18  ;;  %v9692_v24 = vmax.f32 %v5349_v2, 0.0  ;;  %v7777_v11 = vld [vmem:[#allocation8 + $0x628] sm:$0xff]  ;;  %v7780_v3 = vld [vmem:[#allocation8 + $0x418] sm:$0xff]  ;;  %v7782_v49 = vld [vmem:[#allocation8 + $0x410] sm:$0xff] }
 0x9d0   :  { %5543 = vmatprep.subr.mxu1 %v7736_v13  ;;  %5632 = vmatprep.subr.mxu0 %v7737_v22  ;;  %v7781_v18 = vld [vmem:[#allocation8 + $0x618] sm:$0xff]  ;;  %v7783_v30 = vld [vmem:[#allocation8 + $0x610] sm:$0xff]  ;;  %v7784_v47 = vld [vmem:[#allocation8 + $0x408] sm:$0xff] }
 0x9d1   :  { %5544 = vmatpush1.msra.mxu1 %v7738_v27  ;;  %5633 = vmatpush1.msra.mxu0 %v7739_v42  ;;  %v9688_v35 = vmax.f32 %v5350_v12, 0.0  ;;  %v7785_v48 = vld [vmem:[#allocation8 + $0x608] sm:$0xff]  ;;  %v7786_v62 = vld [vmem:[#allocation8 + $0x400] sm:$0xff]  ;;  %v7788_v4 = vld [vmem:[#allocation8 + $0x5f8] sm:$0xff] }
 0x9d2   :  { %5435 = vmatprep.mubr.f32.mxu1 %v9680_v37  ;;  %5524 = vmatprep.mubr.f32.mxu0 %v9680_v37  ;;  %v7787_v59 = vld [vmem:[#allocation8 + $0x600] sm:$0xff]  ;;  %v7789_v40 = vld [vmem:[#allocation8 + $0x7f8] sm:$0xff]  ;;  %v7790_v12 = vld [vmem:[#allocation8 + $0x5f0] sm:$0xff] }
 0x9d3   :  { %5545 = vmatprep.subr.mxu1 %v7740_v41  ;;  %5634 = vmatprep.subr.mxu0 %v7741_v45  ;;  %v7791_v13 = vld [vmem:[#allocation8 + $0x7f0] sm:$0xff]  ;;  %v7792_v22 = vld [vmem:[#allocation8 + $0x5e8] sm:$0xff]  ;;  %v7794_v42 = vld [vmem:[#allocation8 + $0x5e0] sm:$0xff] }
 0x9d4   :  { %5436 = vmatmul.mubr.f32.gmra.mxu1 %v9684_v44  ;;  %5525 = vmatmul.mubr.f32.gmra.mxu0 %v9684_v44  ;;  %v7793_v27 = vld [vmem:[#allocation8 + $0x7e8] sm:$0xff]  ;;  %v7795_v41 = vld [vmem:[#allocation8 + $0x7e0] sm:$0xff]  ;;  %v7796_v45 = vld [vmem:[#allocation8 + $0x5d8] sm:$0xff] }
 0x9d5   :  { %5546 = vmatpush1.msra.mxu1 %v7742_v60  ;;  %5635 = vmatpush1.msra.mxu0 %v7743_v28  ;;  %v7797_v2 = vld [vmem:[#allocation8 + $0x7d8] sm:$0xff]  ;;  %v7798_v60 = vld [vmem:[#allocation8 + $0x5d0] sm:$0xff] }
 0x9d6   :  { %5547 = vmatprep.subr.mxu1 %v7744_v21  ;;  %5636 = vmatprep.subr.mxu0 %v7745_v53  ;;  %v7799_v28 = vld [vmem:[#allocation8 + $0x7d0] sm:$0xff]  ;;  %v7800_v21 = vld [vmem:[#allocation8 + $0x5c8] sm:$0xff] }
 0x9d7   :  { %5548 = vmatpush1.msra.mxu1 %v7746_v50  ;;  %5637 = vmatpush1.msra.mxu0 %v7747_v25  ;;  %v7801_v53 = vld [vmem:[#allocation8 + $0x7c8] sm:$0xff]  ;;  %v7802_v50 = vld [vmem:[#allocation8 + $0x5c0] sm:$0xff] }
 0x9d8   :  { %5441 = vmatprep.mubr.f32.mxu1 %v9688_v35  ;;  %5530 = vmatprep.mubr.f32.mxu0 %v9688_v35  ;;  %v7803_v25 = vld [vmem:[#allocation8 + $0x7c0] sm:$0xff] }
 0x9d9   :  { %5549 = vmatprep.subr.mxu1 %v7748_v52  ;;  %5638 = vmatprep.subr.mxu0 %v7749_v56  ;;  %v7804_v52 = vld [vmem:[#allocation8 + $0x5b8] sm:$0xff] }
 0x9da   :  { %5442 = vmatmul.mubr.f32.gmra.mxu1 %v9692_v24  ;;  %5531 = vmatmul.mubr.f32.gmra.mxu0 %v9692_v24  ;;  %v7805_v56 = vld [vmem:[#allocation8 + $0x7b8] sm:$0xff] }
 0x9db   :  { %5550 = vmatpush1.msra.mxu1 %v7750_v61  ;;  %5639 = vmatpush1.msra.mxu0 %v7751_v33  ;;  %v7806_v61 = vld [vmem:[#allocation8 + $0x5b0] sm:$0xff] }
 0x9dc   :  { %5551 = vmatprep.subr.mxu1 %v7752_v46  ;;  %5601 = vmatprep.mubr.f32.mxu1 %v9665_v51  ;;  %v7807_v33 = vld [vmem:[#allocation8 + $0x7b0] sm:$0xff]  ;;  %v7808_v46 = vld [vmem:[#allocation8 + $0x5a8] sm:$0xff] }
 0x9dd   :  { %5640 = vmatprep.subr.mxu0 %v7753_v7  ;;  %5690 = vmatprep.mubr.f32.mxu0 %v9665_v51  ;;  %v7809_v7 = vld [vmem:[#allocation8 + $0x7a8] sm:$0xff] }
 0x9de   :  { %5552 = vmatpush1.msra.mxu1 %v7754_v55  ;;  %5641 = vmatpush1.msra.mxu0 %v7755_v54  ;;  %v7810_v55 = vld [vmem:[#allocation8 + $0x5a0] sm:$0xff] }
 0x9df   :  { %5553 = vmatprep.subr.mxu1 %v7756_v20  ;;  %5642 = vmatprep.subr.mxu0 %v7757_v32  ;;  %v7811_v54 = vld [vmem:[#allocation8 + $0x7a0] sm:$0xff]  ;;  %v7812_v20 = vld [vmem:[#allocation8 + $0x598] sm:$0xff] }
 0x9e0   :  { %5554 = vmatpush1.msra.mxu1 %v7758_v10  ;;  %5643 = vmatpush1.msra.mxu0 %v7759_v31  ;;  %v7813_v32 = vld [vmem:[#allocation8 + $0x798] sm:$0xff]  ;;  %v7814_v10 = vld [vmem:[#allocation8 + $0x590] sm:$0xff] }
 0x9e1   :  { %5555 = vmatprep.subr.mxu1 %v7760_v36  ;;  %5644 = vmatprep.subr.mxu0 %v7761_v5  ;;  %v7815_v31 = vld [vmem:[#allocation8 + $0x790] sm:$0xff]  ;;  %v7816_v36 = vld [vmem:[#allocation8 + $0x588] sm:$0xff] }
 0x9e2   :  { %5556 = vmatpush1.msra.mxu1 %v7762_v26  ;;  %5645 = vmatpush1.msra.mxu0 %v7763_v17  ;;  %v7817_v5 = vld [vmem:[#allocation8 + $0x788] sm:$0xff]  ;;  %v7818_v26 = vld [vmem:[#allocation8 + $0x580] sm:$0xff] }
 0x9e3   :  { %5557 = vmatprep.subr.mxu1 %v7764_v16  ;;  %5646 = vmatprep.subr.mxu0 %v7765_v8  ;;  %v7819_v17 = vld [vmem:[#allocation8 + $0x780] sm:$0xff]  ;;  %v7820_v16 = vld [vmem:[#allocation8 + $0x578] sm:$0xff] }
 0x9e4   :  { %5558 = vmatpush1.msra.mxu1 %v7766_v14  ;;  %5647 = vmatpush1.msra.mxu0 %v7767_v63  ;;  %v7821_v8 = vld [vmem:[#allocation8 + $0x778] sm:$0xff]  ;;  %v7822_v14 = vld [vmem:[#allocation8 + $0x570] sm:$0xff] }
 0x9e5   :  { %5559 = vmatprep.subr.mxu1 %v7768_v6  ;;  %5648 = vmatprep.subr.mxu0 %v7769_v23  ;;  %v7823_v63 = vld [vmem:[#allocation8 + $0x770] sm:$0xff]  ;;  %v7824_v6 = vld [vmem:[#allocation8 + $0x568] sm:$0xff] }
 0x9e6   :  { %5560 = vmatpush1.msra.mxu1 %v7770_v19  ;;  %5649 = vmatpush1.msra.mxu0 %v7771_v38  ;;  %v7825_v23 = vld [vmem:[#allocation8 + $0x768] sm:$0xff]  ;;  %v7826_v19 = vld [vmem:[#allocation8 + $0x560] sm:$0xff] }
 0x9e7   :  { %5561 = vmatprep.subr.mxu1 %v7772_v34  ;;  %5650 = vmatprep.subr.mxu0 %v7773_v43  ;;  %v7827_v38 = vld [vmem:[#allocation8 + $0x760] sm:$0xff]  ;;  %v7828_v34 = vld [vmem:[#allocation8 + $0x558] sm:$0xff] }
 0x9e8   :  { %5562 = vmatpush1.msra.mxu1 %v7774_v29  ;;  %5651 = vmatpush1.msra.mxu0 %v7775_v9  ;;  %v7829_v43 = vld [vmem:[#allocation8 + $0x758] sm:$0xff]  ;;  %v7830_v29 = vld [vmem:[#allocation8 + $0x550] sm:$0xff] }
 0x9e9   :  { %5563 = vmatprep.subr.mxu1 %v7776_v0  ;;  %5652 = vmatprep.subr.mxu0 %v7777_v11  ;;  %v7831_v9 = vld [vmem:[#allocation8 + $0x750] sm:$0xff]  ;;  %v7832_v0 = vld [vmem:[#allocation8 + $0x548] sm:$0xff] }
 0x9ea   :  { %5564 = vmatpush1.msra.mxu1 %v7778_v57  ;;  %5653 = vmatpush1.msra.mxu0 %v7779_v1  ;;  %v7833_v11 = vld [vmem:[#allocation8 + $0x748] sm:$0xff]  ;;  %v7834_v57 = vld [vmem:[#allocation8 + $0x540] sm:$0xff] }
 0x9eb   :  { %5565 = vmatprep.subr.mxu1 %v7780_v3  ;;  %5654 = vmatprep.subr.mxu0 %v7781_v18  ;;  %v7835_v1 = vld [vmem:[#allocation8 + $0x740] sm:$0xff]  ;;  %v7836_v3 = vld [vmem:[#allocation8 + $0x538] sm:$0xff] }
 0x9ec   :  { %5566 = vmatpush1.msra.mxu1 %v7782_v49  ;;  %5655 = vmatpush1.msra.mxu0 %v7783_v30  ;;  %v7837_v18 = vld [vmem:[#allocation8 + $0x738] sm:$0xff]  ;;  %v7838_v49 = vld [vmem:[#allocation8 + $0x530] sm:$0xff] }
 0x9ed   :  { %5567 = vmatprep.subr.mxu1 %v7784_v47  ;;  %5656 = vmatprep.subr.mxu0 %v7785_v48  ;;  %v7839_v30 = vld [vmem:[#allocation8 + $0x730] sm:$0xff]  ;;  %v7840_v47 = vld [vmem:[#allocation8 + $0x528] sm:$0xff] }
 0x9ee   :  { %5568 = vmatpush1.msra.mxu1 %v7786_v62  ;;  %5657 = vmatpush1.msra.mxu0 %v7787_v59  ;;  %v7841_v48 = vld [vmem:[#allocation8 + $0x728] sm:$0xff]  ;;  %v7842_v62 = vld [vmem:[#allocation8 + $0x520] sm:$0xff] }
 0x9ef   :  { %5569 = vmatprep.subr.mxu1 %v7788_v4  ;;  %5658 = vmatprep.subr.mxu0 %v7789_v40  ;;  %v7843_v59 = vld [vmem:[#allocation8 + $0x720] sm:$0xff]  ;;  %v7844_v4 = vld [vmem:[#allocation8 + $0x518] sm:$0xff] }
 0x9f0   :  { %5570 = vmatpush2.msra.mxu1 %v7790_v12  ;;  %5659 = vmatpush2.msra.mxu0 %v7791_v13  ;;  %v7845_v40 = vld [vmem:[#allocation8 + $0x718] sm:$0xff]  ;;  %v7846_v12 = vld [vmem:[#allocation8 + $0x510] sm:$0xff] }
 0x9f1   :  { %5571 = vmatprep.subr.mxu1 %v7792_v22  ;;  %5660 = vmatprep.subr.mxu0 %v7793_v27  ;;  %v7847_v13 = vld [vmem:[#allocation8 + $0x710] sm:$0xff]  ;;  %v7848_v22 = vld [vmem:[#allocation8 + $0x508] sm:$0xff] }
 0x9f2   :  { %5572 = vmatpush2.msra.mxu1 %v7794_v42  ;;  %5661 = vmatpush2.msra.mxu0 %v7795_v41  ;;  %v7849_v27 = vld [vmem:[#allocation8 + $0x708] sm:$0xff]  ;;  %v7850_v42 = vld [vmem:[#allocation8 + $0x500] sm:$0xff] }
 0x9f3   :  { %5573 = vmatprep.subr.mxu1 %v7796_v45  ;;  %5662 = vmatprep.subr.mxu0 %v7797_v2  ;;  %v7851_v41 = vld [vmem:[#allocation8 + $0x700] sm:$0xff]  ;;  %v7852_v45 = vld [vmem:[#allocation8 + $0x8f8] sm:$0xff] }
 0x9f4   :  { %5574 = vmatpush2.msra.mxu1 %v7798_v60  ;;  %5663 = vmatpush2.msra.mxu0 %v7799_v28  ;;  %v7853_v2 = vld [vmem:[#allocation8 + $0xaf8] sm:$0xff]  ;;  %v7854_v60 = vld [vmem:[#allocation8 + $0x8f0] sm:$0xff] }
 0x9f5   :  { %5575 = vmatprep.subr.mxu1 %v7800_v21  ;;  %5664 = vmatprep.subr.mxu0 %v7801_v53  ;;  %v7855_v28 = vld [vmem:[#allocation8 + $0xaf0] sm:$0xff]  ;;  %v7856_v21 = vld [vmem:[#allocation8 + $0x8e8] sm:$0xff] }
 0x9f6   :  { %5576 = vmatpush2.msra.mxu1 %v7802_v50  ;;  %5665 = vmatpush2.msra.mxu0 %v7803_v25  ;;  %v7857_v53 = vld [vmem:[#allocation8 + $0xae8] sm:$0xff]  ;;  %v7858_v50 = vld [vmem:[#allocation8 + $0x8e0] sm:$0xff] }
 0x9f7   :  { %5577 = vmatprep.subr.mxu1 %v7804_v52  ;;  %5666 = vmatprep.subr.mxu0 %v7805_v56  ;;  %v7859_v25 = vld [vmem:[#allocation8 + $0xae0] sm:$0xff]  ;;  %v7860_v52 = vld [vmem:[#allocation8 + $0x8d8] sm:$0xff] }
 0x9f8   :  { %5578 = vmatpush2.msra.mxu1 %v7806_v61  ;;  %5667 = vmatpush2.msra.mxu0 %v7807_v33  ;;  %v7861_v56 = vld [vmem:[#allocation8 + $0xad8] sm:$0xff]  ;;  %v7862_v61 = vld [vmem:[#allocation8 + $0x8d0] sm:$0xff] }
 0x9f9   :  { %5579 = vmatprep.subr.mxu1 %v7808_v46  ;;  %5668 = vmatprep.subr.mxu0 %v7809_v7  ;;  %v7863_v33 = vld [vmem:[#allocation8 + $0xad0] sm:$0xff]  ;;  %v7864_v46 = vld [vmem:[#allocation8 + $0x8c8] sm:$0xff] }
 0x9fa   :  { %5580 = vmatpush2.msra.mxu1 %v7810_v55  ;;  %5669 = vmatpush2.msra.mxu0 %v7811_v54  ;;  %v7865_v7 = vld [vmem:[#allocation8 + $0xac8] sm:$0xff]  ;;  %v7866_v55 = vld [vmem:[#allocation8 + $0x8c0] sm:$0xff] }
 0x9fb   :  { %5581 = vmatprep.subr.mxu1 %v7812_v20  ;;  %5670 = vmatprep.subr.mxu0 %v7813_v32  ;;  %v7867_v54 = vld [vmem:[#allocation8 + $0xac0] sm:$0xff]  ;;  %v7868_v20 = vld [vmem:[#allocation8 + $0x8b8] sm:$0xff] }
 0x9fc   :  { %5582 = vmatpush2.msra.mxu1 %v7814_v10  ;;  %5671 = vmatpush2.msra.mxu0 %v7815_v31  ;;  %v7869_v32 = vld [vmem:[#allocation8 + $0xab8] sm:$0xff]  ;;  %v7870_v10 = vld [vmem:[#allocation8 + $0x8b0] sm:$0xff] }
 0x9fd   :  { %5583 = vmatprep.subr.mxu1 %v7816_v36  ;;  %5672 = vmatprep.subr.mxu0 %v7817_v5  ;;  %v7871_v31 = vld [vmem:[#allocation8 + $0xab0] sm:$0xff]  ;;  %v7872_v36 = vld [vmem:[#allocation8 + $0x8a8] sm:$0xff] }
 0x9fe   :  { %5584 = vmatpush2.msra.mxu1 %v7818_v26  ;;  %5673 = vmatpush2.msra.mxu0 %v7819_v17  ;;  %v7873_v5 = vld [vmem:[#allocation8 + $0xaa8] sm:$0xff]  ;;  %v7874_v26 = vld [vmem:[#allocation8 + $0x8a0] sm:$0xff] }
 0x9ff   :  { %5585 = vmatprep.subr.mxu1 %v7820_v16  ;;  %5674 = vmatprep.subr.mxu0 %v7821_v8  ;;  %v7875_v17 = vld [vmem:[#allocation8 + $0xaa0] sm:$0xff]  ;;  %v7876_v16 = vld [vmem:[#allocation8 + $0x898] sm:$0xff] }
 0xa00   :  { %5586 = vmatpush2.msra.mxu1 %v7822_v14  ;;  %5675 = vmatpush2.msra.mxu0 %v7823_v63  ;;  %v7877_v8 = vld [vmem:[#allocation8 + $0xa98] sm:$0xff]  ;;  %v7878_v14 = vld [vmem:[#allocation8 + $0x890] sm:$0xff] }
 0xa01   :  { %5587 = vmatprep.subr.mxu1 %v7824_v6  ;;  %5676 = vmatprep.subr.mxu0 %v7825_v23  ;;  %v7879_v63 = vld [vmem:[#allocation8 + $0xa90] sm:$0xff]  ;;  %v7880_v6 = vld [vmem:[#allocation8 + $0x888] sm:$0xff] }
 0xa02   :  { %5588 = vmatpush2.msra.mxu1 %v7826_v19  ;;  %5677 = vmatpush2.msra.mxu0 %v7827_v38  ;;  %v7881_v23 = vld [vmem:[#allocation8 + $0xa88] sm:$0xff]  ;;  %v7882_v19 = vld [vmem:[#allocation8 + $0x880] sm:$0xff] }
 0xa03   :  { %5589 = vmatprep.subr.mxu1 %v7828_v34  ;;  %5678 = vmatprep.subr.mxu0 %v7829_v43  ;;  %v7883_v38 = vld [vmem:[#allocation8 + $0xa80] sm:$0xff]  ;;  %v7884_v34 = vld [vmem:[#allocation8 + $0x878] sm:$0xff] }
 0xa04   :  { %5590 = vmatpush2.msra.mxu1 %v7830_v29  ;;  %5679 = vmatpush2.msra.mxu0 %v7831_v9  ;;  %v7885_v43 = vld [vmem:[#allocation8 + $0xa78] sm:$0xff]  ;;  %v7886_v29 = vld [vmem:[#allocation8 + $0x870] sm:$0xff] }
 0xa05   :  { %5591 = vmatprep.subr.mxu1 %v7832_v0  ;;  %5680 = vmatprep.subr.mxu0 %v7833_v11  ;;  %v7887_v9 = vld [vmem:[#allocation8 + $0xa70] sm:$0xff]  ;;  %v7888_v0 = vld [vmem:[#allocation8 + $0x868] sm:$0xff] }
 0xa06   :  { %5592 = vmatpush2.msra.mxu1 %v7834_v57  ;;  %5681 = vmatpush2.msra.mxu0 %v7835_v1  ;;  %v7889_v11 = vld [vmem:[#allocation8 + $0xa68] sm:$0xff]  ;;  %v7890_v57 = vld [vmem:[#allocation8 + $0x860] sm:$0xff] }
 0xa07   :  { %5593 = vmatprep.subr.mxu1 %v7836_v3  ;;  %5682 = vmatprep.subr.mxu0 %v7837_v18  ;;  %v7891_v1 = vld [vmem:[#allocation8 + $0xa60] sm:$0xff]  ;;  %v7892_v3 = vld [vmem:[#allocation8 + $0x858] sm:$0xff] }
 0xa08   :  { %5594 = vmatpush2.msra.mxu1 %v7838_v49  ;;  %5683 = vmatpush2.msra.mxu0 %v7839_v30  ;;  %v7893_v18 = vld [vmem:[#allocation8 + $0xa58] sm:$0xff]  ;;  %v7894_v49 = vld [vmem:[#allocation8 + $0x850] sm:$0xff] }
 0xa09   :  { %5595 = vmatprep.subr.mxu1 %v7840_v47  ;;  %5684 = vmatprep.subr.mxu0 %v7841_v48  ;;  %v7895_v30 = vld [vmem:[#allocation8 + $0xa50] sm:$0xff]  ;;  %v7896_v47 = vld [vmem:[#allocation8 + $0x848] sm:$0xff] }
 0xa0a   :  { %5596 = vmatpush2.msra.mxu1 %v7842_v62  ;;  %5685 = vmatpush2.msra.mxu0 %v7843_v59  ;;  %v7897_v48 = vld [vmem:[#allocation8 + $0xa48] sm:$0xff]  ;;  %v7898_v62 = vld [vmem:[#allocation8 + $0x840] sm:$0xff] }
 0xa0b   :  { %5597 = vmatprep.subr.mxu1 %v7844_v4  ;;  %5686 = vmatprep.subr.mxu0 %v7845_v40  ;;  %v7899_v59 = vld [vmem:[#allocation8 + $0xa40] sm:$0xff]  ;;  %v7900_v4 = vld [vmem:[#allocation8 + $0x838] sm:$0xff] }
 0xa0c   :  { %5598 = vmatpush2.msra.mxu1 %v7846_v12  ;;  %5687 = vmatpush2.msra.mxu0 %v7847_v13  ;;  %v7901_v40 = vld [vmem:[#allocation8 + $0xa38] sm:$0xff]  ;;  %v7902_v12 = vld [vmem:[#allocation8 + $0x830] sm:$0xff] }
 0xa0d   :  { %5599 = vmatprep.subr.mxu1 %v7848_v22  ;;  %5688 = vmatprep.subr.mxu0 %v7849_v27  ;;  %v7903_v13 = vld [vmem:[#allocation8 + $0xa30] sm:$0xff]  ;;  %v7904_v22 = vld [vmem:[#allocation8 + $0x828] sm:$0xff] }
 0xa0e   :  { %5600 = vmatpush2.msra.mxu1 %v7850_v42  ;;  %5689 = vmatpush2.msra.mxu0 %v7851_v41  ;;  %v7905_v27 = vld [vmem:[#allocation8 + $0xa28] sm:$0xff]  ;;  %v7906_v42 = vld [vmem:[#allocation8 + $0x820] sm:$0xff] }
 0xa0f   :  { %5602 = vmatmul.mubr.f32.vlgmr.msra.gmra.mxu1 %v9668_v39  ;;  %5691 = vmatmul.mubr.f32.vlgmr.msra.gmra.mxu0 %v9668_v39  ;;  %v7907_v41 = vld [vmem:[#allocation8 + $0xa20] sm:$0xff] }
 0xa10   :  { %5715 = vmatprep.subr.mxu1 %v7852_v45  ;;  %5804 = vmatprep.subr.mxu0 %v7853_v2  ;;  %v7908_v45 = vld [vmem:[#allocation8 + $0x818] sm:$0xff] }
 0xa11   :  { %5607 = vmatprep.mubr.f32.mxu1 %v9674_v15  ;;  %5696 = vmatprep.mubr.f32.mxu0 %v9674_v15  ;;  %v7909_v2 = vld [vmem:[#allocation8 + $0xa18] sm:$0xff] }
 0xa12   :  { %5716 = vmatpush1.msra.mxu1 %v7854_v60  ;;  %5805 = vmatpush1.msra.mxu0 %v7855_v28  ;;  %v7910_v60 = vld [vmem:[#allocation8 + $0x810] sm:$0xff] }
 0xa13   :  { %5717 = vmatprep.subr.mxu1 %v7856_v21  ;;  %5806 = vmatprep.subr.mxu0 %v7857_v53  ;;  %v7911_v28 = vld [vmem:[#allocation8 + $0xa10] sm:$0xff]  ;;  %v7912_v21 = vld [vmem:[#allocation8 + $0x808] sm:$0xff] }
 0xa14   :  { %5718 = vmatpush1.msra.mxu1 %v7858_v50  ;;  %5807 = vmatpush1.msra.mxu0 %v7859_v25  ;;  %v7913_v53 = vld [vmem:[#allocation8 + $0xa08] sm:$0xff]  ;;  %v7914_v50 = vld [vmem:[#allocation8 + $0x800] sm:$0xff] }
 0xa15   :  { %5608 = vmatmul.mubr.f32.gmra.mxu1 %v9676_v58  ;;  %5697 = vmatmul.mubr.f32.gmra.mxu0 %v9676_v58  ;;  %v7915_v25 = vld [vmem:[#allocation8 + $0xa00] sm:$0xff] }
 0xa16   :  { %5719 = vmatprep.subr.mxu1 %v7860_v52  ;;  %5808 = vmatprep.subr.mxu0 %v7861_v56  ;;  %v7916_v52 = vld [vmem:[#allocation8 + $0x9f8] sm:$0xff] }
 0xa17   :  { %5613 = vmatprep.mubr.f32.mxu1 %v9680_v37  ;;  %5702 = vmatprep.mubr.f32.mxu0 %v9680_v37  ;;  %v7917_v56 = vld [vmem:[#allocation8 + $0xbf8] sm:$0xff] }
 0xa18   :  { %5720 = vmatpush1.msra.mxu1 %v7862_v61  ;;  %5809 = vmatpush1.msra.mxu0 %v7863_v33  ;;  %v7918_v61 = vld [vmem:[#allocation8 + $0x9f0] sm:$0xff] }
 0xa19   :  { %5721 = vmatprep.subr.mxu1 %v7864_v46  ;;  %5810 = vmatprep.subr.mxu0 %v7865_v7  ;;  %v7919_v33 = vld [vmem:[#allocation8 + $0xbf0] sm:$0xff]  ;;  %v7920_v46 = vld [vmem:[#allocation8 + $0x9e8] sm:$0xff] }
 0xa1a   :  { %5722 = vmatpush1.msra.mxu1 %v7866_v55  ;;  %5811 = vmatpush1.msra.mxu0 %v7867_v54  ;;  %v7921_v7 = vld [vmem:[#allocation8 + $0xbe8] sm:$0xff]  ;;  %v7922_v55 = vld [vmem:[#allocation8 + $0x9e0] sm:$0xff] }
 0xa1b   :  { %5614 = vmatmul.mubr.f32.gmra.mxu1 %v9684_v44  ;;  %5703 = vmatmul.mubr.f32.gmra.mxu0 %v9684_v44  ;;  %v7923_v54 = vld [vmem:[#allocation8 + $0xbe0] sm:$0xff] }
 0xa1c   :  { %5723 = vmatprep.subr.mxu1 %v7868_v20  ;;  %5812 = vmatprep.subr.mxu0 %v7869_v32  ;;  %v7924_v20 = vld [vmem:[#allocation8 + $0x9d8] sm:$0xff] }
 0xa1d   :  { %5619 = vmatprep.mubr.f32.mxu1 %v9688_v35  ;;  %5708 = vmatprep.mubr.f32.mxu0 %v9688_v35  ;;  %v7925_v32 = vld [vmem:[#allocation8 + $0xbd8] sm:$0xff] }
 0xa1e   :  { %5724 = vmatpush1.msra.mxu1 %v7870_v10  ;;  %5813 = vmatpush1.msra.mxu0 %v7871_v31  ;;  %v7926_v10 = vld [vmem:[#allocation8 + $0x9d0] sm:$0xff] }
 0xa1f   :  { %5725 = vmatprep.subr.mxu1 %v7872_v36  ;;  %5814 = vmatprep.subr.mxu0 %v7873_v5  ;;  %v7927_v31 = vld [vmem:[#allocation8 + $0xbd0] sm:$0xff]  ;;  %v7928_v36 = vld [vmem:[#allocation8 + $0x9c8] sm:$0xff] }
 0xa20   :  { %5726 = vmatpush1.msra.mxu1 %v7874_v26  ;;  %5815 = vmatpush1.msra.mxu0 %v7875_v17  ;;  %v7929_v5 = vld [vmem:[#allocation8 + $0xbc8] sm:$0xff]  ;;  %v7930_v26 = vld [vmem:[#allocation8 + $0x9c0] sm:$0xff] }
 0xa21   :  { %5620 = vmatmul.mubr.f32.gmra.mxu1 %v9692_v24  ;;  %5709 = vmatmul.mubr.f32.gmra.mxu0 %v9692_v24  ;;  %v7931_v17 = vld [vmem:[#allocation8 + $0xbc0] sm:$0xff] }
 0xa22   :  { %5727 = vmatprep.subr.mxu1 %v7876_v16  ;;  %5816 = vmatprep.subr.mxu0 %v7877_v8  ;;  %v7932_v16 = vld [vmem:[#allocation8 + $0x9b8] sm:$0xff] }
 0xa23   :  { %5728 = vmatpush1.msra.mxu1 %v7878_v14  ;;  %5779 = vmatprep.mubr.f32.mxu1 %v9665_v51  ;;  %v7933_v8 = vld [vmem:[#allocation8 + $0xbb8] sm:$0xff]  ;;  %v7934_v14 = vld [vmem:[#allocation8 + $0x9b0] sm:$0xff] }
 0xa24   :  { %5817 = vmatpush1.msra.mxu0 %v7879_v63  ;;  %5868 = vmatprep.mubr.f32.mxu0 %v9665_v51  ;;  %v7935_v63 = vld [vmem:[#allocation8 + $0xbb0] sm:$0xff] }
 0xa25   :  { %5729 = vmatprep.subr.mxu1 %v7880_v6  ;;  %5818 = vmatprep.subr.mxu0 %v7881_v23  ;;  %v7936_v6 = vld [vmem:[#allocation8 + $0x9a8] sm:$0xff] }
 0xa26   :  { %5730 = vmatpush1.msra.mxu1 %v7882_v19  ;;  %5819 = vmatpush1.msra.mxu0 %v7883_v38  ;;  %v7937_v23 = vld [vmem:[#allocation8 + $0xba8] sm:$0xff]  ;;  %v7938_v19 = vld [vmem:[#allocation8 + $0x9a0] sm:$0xff] }
 0xa27   :  { %5731 = vmatprep.subr.mxu1 %v7884_v34  ;;  %5820 = vmatprep.subr.mxu0 %v7885_v43  ;;  %v7939_v38 = vld [vmem:[#allocation8 + $0xba0] sm:$0xff]  ;;  %v7940_v34 = vld [vmem:[#allocation8 + $0x998] sm:$0xff] }
 0xa28   :  { %5732 = vmatpush1.msra.mxu1 %v7886_v29  ;;  %5821 = vmatpush1.msra.mxu0 %v7887_v9  ;;  %v7941_v43 = vld [vmem:[#allocation8 + $0xb98] sm:$0xff]  ;;  %v7942_v29 = vld [vmem:[#allocation8 + $0x990] sm:$0xff] }
 0xa29   :  { %5733 = vmatprep.subr.mxu1 %v7888_v0  ;;  %5822 = vmatprep.subr.mxu0 %v7889_v11  ;;  %v7943_v9 = vld [vmem:[#allocation8 + $0xb90] sm:$0xff]  ;;  %v7944_v0 = vld [vmem:[#allocation8 + $0x988] sm:$0xff] }
 0xa2a   :  { %5734 = vmatpush1.msra.mxu1 %v7890_v57  ;;  %5823 = vmatpush1.msra.mxu0 %v7891_v1  ;;  %v7945_v11 = vld [vmem:[#allocation8 + $0xb88] sm:$0xff]  ;;  %v7946_v57 = vld [vmem:[#allocation8 + $0x980] sm:$0xff] }
 0xa2b   :  { %5735 = vmatprep.subr.mxu1 %v7892_v3  ;;  %5824 = vmatprep.subr.mxu0 %v7893_v18  ;;  %v7947_v1 = vld [vmem:[#allocation8 + $0xb80] sm:$0xff]  ;;  %v7948_v3 = vld [vmem:[#allocation8 + $0x978] sm:$0xff] }
 0xa2c   :  { %5736 = vmatpush1.msra.mxu1 %v7894_v49  ;;  %5825 = vmatpush1.msra.mxu0 %v7895_v30  ;;  %v7949_v18 = vld [vmem:[#allocation8 + $0xb78] sm:$0xff]  ;;  %v7950_v49 = vld [vmem:[#allocation8 + $0x970] sm:$0xff] }
 0xa2d   :  { %5737 = vmatprep.subr.mxu1 %v7896_v47  ;;  %5826 = vmatprep.subr.mxu0 %v7897_v48  ;;  %v7951_v30 = vld [vmem:[#allocation8 + $0xb70] sm:$0xff]  ;;  %v7952_v47 = vld [vmem:[#allocation8 + $0x968] sm:$0xff] }
 0xa2e   :  { %5738 = vmatpush1.msra.mxu1 %v7898_v62  ;;  %5827 = vmatpush1.msra.mxu0 %v7899_v59  ;;  %v7953_v48 = vld [vmem:[#allocation8 + $0xb68] sm:$0xff]  ;;  %v7954_v62 = vld [vmem:[#allocation8 + $0x960] sm:$0xff] }
 0xa2f   :  { %5739 = vmatprep.subr.mxu1 %v7900_v4  ;;  %5828 = vmatprep.subr.mxu0 %v7901_v40  ;;  %v7955_v59 = vld [vmem:[#allocation8 + $0xb60] sm:$0xff]  ;;  %v7956_v4 = vld [vmem:[#allocation8 + $0x958] sm:$0xff] }
 0xa30   :  { %5740 = vmatpush1.msra.mxu1 %v7902_v12  ;;  %5829 = vmatpush1.msra.mxu0 %v7903_v13  ;;  %v7957_v40 = vld [vmem:[#allocation8 + $0xb58] sm:$0xff]  ;;  %v7958_v12 = vld [vmem:[#allocation8 + $0x950] sm:$0xff] }
 0xa31   :  { %5741 = vmatprep.subr.mxu1 %v7904_v22  ;;  %5830 = vmatprep.subr.mxu0 %v7905_v27  ;;  %v7959_v13 = vld [vmem:[#allocation8 + $0xb50] sm:$0xff]  ;;  %v7960_v22 = vld [vmem:[#allocation8 + $0x948] sm:$0xff] }
 0xa32   :  { %5742 = vmatpush1.msra.mxu1 %v7906_v42  ;;  %5831 = vmatpush1.msra.mxu0 %v7907_v41  ;;  %v7961_v27 = vld [vmem:[#allocation8 + $0xb48] sm:$0xff]  ;;  %v7962_v42 = vld [vmem:[#allocation8 + $0x940] sm:$0xff] }
 0xa33   :  { %5743 = vmatprep.subr.mxu1 %v7908_v45  ;;  %5832 = vmatprep.subr.mxu0 %v7909_v2  ;;  %v7963_v41 = vld [vmem:[#allocation8 + $0xb40] sm:$0xff]  ;;  %v7964_v45 = vld [vmem:[#allocation8 + $0x938] sm:$0xff] }
 0xa34   :  { %5744 = vmatpush1.msra.mxu1 %v7910_v60  ;;  %5833 = vmatpush1.msra.mxu0 %v7911_v28  ;;  %v7965_v2 = vld [vmem:[#allocation8 + $0xb38] sm:$0xff]  ;;  %v7966_v60 = vld [vmem:[#allocation8 + $0x930] sm:$0xff] }
 0xa35   :  { %5745 = vmatprep.subr.mxu1 %v7912_v21  ;;  %5834 = vmatprep.subr.mxu0 %v7913_v53  ;;  %v7967_v28 = vld [vmem:[#allocation8 + $0xb30] sm:$0xff]  ;;  %v7968_v21 = vld [vmem:[#allocation8 + $0x928] sm:$0xff] }
 0xa36   :  { %5746 = vmatpush1.msra.mxu1 %v7914_v50  ;;  %5835 = vmatpush1.msra.mxu0 %v7915_v25  ;;  %v7969_v53 = vld [vmem:[#allocation8 + $0xb28] sm:$0xff]  ;;  %v7970_v50 = vld [vmem:[#allocation8 + $0x920] sm:$0xff] }
 0xa37   :  { %5747 = vmatprep.subr.mxu1 %v7916_v52  ;;  %5836 = vmatprep.subr.mxu0 %v7917_v56  ;;  %v7971_v25 = vld [vmem:[#allocation8 + $0xb20] sm:$0xff]  ;;  %v7972_v52 = vld [vmem:[#allocation8 + $0x918] sm:$0xff] }
 0xa38   :  { %5748 = vmatpush2.msra.mxu1 %v7918_v61  ;;  %5837 = vmatpush2.msra.mxu0 %v7919_v33  ;;  %v7973_v56 = vld [vmem:[#allocation8 + $0xb18] sm:$0xff]  ;;  %v7974_v61 = vld [vmem:[#allocation8 + $0x910] sm:$0xff] }
 0xa39   :  { %5749 = vmatprep.subr.mxu1 %v7920_v46  ;;  %5838 = vmatprep.subr.mxu0 %v7921_v7  ;;  %v7975_v33 = vld [vmem:[#allocation8 + $0xb10] sm:$0xff]  ;;  %v7976_v46 = vld [vmem:[#allocation8 + $0x908] sm:$0xff] }
 0xa3a   :  { %5750 = vmatpush2.msra.mxu1 %v7922_v55  ;;  %5839 = vmatpush2.msra.mxu0 %v7923_v54  ;;  %v7977_v7 = vld [vmem:[#allocation8 + $0xb08] sm:$0xff]  ;;  %v7978_v55 = vld [vmem:[#allocation8 + $0x900] sm:$0xff] }
 0xa3b   :  { %5751 = vmatprep.subr.mxu1 %v7924_v20  ;;  %5840 = vmatprep.subr.mxu0 %v7925_v32  ;;  %v7979_v54 = vld [vmem:[#allocation8 + $0xb00] sm:$0xff]  ;;  %v7980_v20 = vld [vmem:[#allocation8 + $0xcf8] sm:$0xff] }
 0xa3c   :  { %5752 = vmatpush2.msra.mxu1 %v7926_v10  ;;  %5841 = vmatpush2.msra.mxu0 %v7927_v31  ;;  %v7981_v32 = vld [vmem:[#allocation8 + $0xef8] sm:$0xff]  ;;  %v7982_v10 = vld [vmem:[#allocation8 + $0xcf0] sm:$0xff] }
 0xa3d   :  { %5753 = vmatprep.subr.mxu1 %v7928_v36  ;;  %5842 = vmatprep.subr.mxu0 %v7929_v5  ;;  %v7983_v31 = vld [vmem:[#allocation8 + $0xef0] sm:$0xff]  ;;  %v7984_v36 = vld [vmem:[#allocation8 + $0xce8] sm:$0xff] }
 0xa3e   :  { %5754 = vmatpush2.msra.mxu1 %v7930_v26  ;;  %5843 = vmatpush2.msra.mxu0 %v7931_v17  ;;  %v7985_v5 = vld [vmem:[#allocation8 + $0xee8] sm:$0xff]  ;;  %v7986_v26 = vld [vmem:[#allocation8 + $0xce0] sm:$0xff] }
 0xa3f   :  { %5755 = vmatprep.subr.mxu1 %v7932_v16  ;;  %5844 = vmatprep.subr.mxu0 %v7933_v8  ;;  %v7987_v17 = vld [vmem:[#allocation8 + $0xee0] sm:$0xff]  ;;  %v7988_v16 = vld [vmem:[#allocation8 + $0xcd8] sm:$0xff] }
 0xa40   :  { %5756 = vmatpush2.msra.mxu1 %v7934_v14  ;;  %5845 = vmatpush2.msra.mxu0 %v7935_v63  ;;  %v7989_v8 = vld [vmem:[#allocation8 + $0xed8] sm:$0xff]  ;;  %v7990_v14 = vld [vmem:[#allocation8 + $0xcd0] sm:$0xff] }
 0xa41   :  { %5757 = vmatprep.subr.mxu1 %v7936_v6  ;;  %5846 = vmatprep.subr.mxu0 %v7937_v23  ;;  %v7991_v63 = vld [vmem:[#allocation8 + $0xed0] sm:$0xff]  ;;  %v7992_v6 = vld [vmem:[#allocation8 + $0xcc8] sm:$0xff] }
 0xa42   :  { %5758 = vmatpush2.msra.mxu1 %v7938_v19  ;;  %5847 = vmatpush2.msra.mxu0 %v7939_v38  ;;  %v7993_v23 = vld [vmem:[#allocation8 + $0xec8] sm:$0xff]  ;;  %v7994_v19 = vld [vmem:[#allocation8 + $0xcc0] sm:$0xff] }
 0xa43   :  { %5759 = vmatprep.subr.mxu1 %v7940_v34  ;;  %5848 = vmatprep.subr.mxu0 %v7941_v43  ;;  %v7995_v38 = vld [vmem:[#allocation8 + $0xec0] sm:$0xff]  ;;  %v7996_v34 = vld [vmem:[#allocation8 + $0xcb8] sm:$0xff] }
 0xa44   :  { %5760 = vmatpush2.msra.mxu1 %v7942_v29  ;;  %5849 = vmatpush2.msra.mxu0 %v7943_v9  ;;  %v7997_v43 = vld [vmem:[#allocation8 + $0xeb8] sm:$0xff]  ;;  %v7998_v29 = vld [vmem:[#allocation8 + $0xcb0] sm:$0xff] }
 0xa45   :  { %5761 = vmatprep.subr.mxu1 %v7944_v0  ;;  %5850 = vmatprep.subr.mxu0 %v7945_v11  ;;  %v7999_v9 = vld [vmem:[#allocation8 + $0xeb0] sm:$0xff]  ;;  %v8000_v0 = vld [vmem:[#allocation8 + $0xca8] sm:$0xff] }
 0xa46   :  { %5762 = vmatpush2.msra.mxu1 %v7946_v57  ;;  %5851 = vmatpush2.msra.mxu0 %v7947_v1  ;;  %v8001_v11 = vld [vmem:[#allocation8 + $0xea8] sm:$0xff]  ;;  %v8002_v57 = vld [vmem:[#allocation8 + $0xca0] sm:$0xff] }
 0xa47   :  { %5763 = vmatprep.subr.mxu1 %v7948_v3  ;;  %5852 = vmatprep.subr.mxu0 %v7949_v18  ;;  %v8003_v1 = vld [vmem:[#allocation8 + $0xea0] sm:$0xff]  ;;  %v8004_v3 = vld [vmem:[#allocation8 + $0xc98] sm:$0xff] }
 0xa48   :  { %5764 = vmatpush2.msra.mxu1 %v7950_v49  ;;  %5853 = vmatpush2.msra.mxu0 %v7951_v30  ;;  %v8005_v18 = vld [vmem:[#allocation8 + $0xe98] sm:$0xff]  ;;  %v8006_v49 = vld [vmem:[#allocation8 + $0xc90] sm:$0xff] }
 0xa49   :  { %5765 = vmatprep.subr.mxu1 %v7952_v47  ;;  %5854 = vmatprep.subr.mxu0 %v7953_v48  ;;  %v8007_v30 = vld [vmem:[#allocation8 + $0xe90] sm:$0xff]  ;;  %v8008_v47 = vld [vmem:[#allocation8 + $0xc88] sm:$0xff] }
 0xa4a   :  { %5766 = vmatpush2.msra.mxu1 %v7954_v62  ;;  %5855 = vmatpush2.msra.mxu0 %v7955_v59  ;;  %v8009_v48 = vld [vmem:[#allocation8 + $0xe88] sm:$0xff]  ;;  %v8010_v62 = vld [vmem:[#allocation8 + $0xc80] sm:$0xff] }
 0xa4b   :  { %5767 = vmatprep.subr.mxu1 %v7956_v4  ;;  %5856 = vmatprep.subr.mxu0 %v7957_v40  ;;  %v8011_v59 = vld [vmem:[#allocation8 + $0xe80] sm:$0xff]  ;;  %v8012_v4 = vld [vmem:[#allocation8 + $0xc78] sm:$0xff] }
 0xa4c   :  { %5768 = vmatpush2.msra.mxu1 %v7958_v12  ;;  %5857 = vmatpush2.msra.mxu0 %v7959_v13  ;;  %v8013_v40 = vld [vmem:[#allocation8 + $0xe78] sm:$0xff]  ;;  %v8014_v12 = vld [vmem:[#allocation8 + $0xc70] sm:$0xff] }
 0xa4d   :  { %5769 = vmatprep.subr.mxu1 %v7960_v22  ;;  %5858 = vmatprep.subr.mxu0 %v7961_v27  ;;  %v8015_v13 = vld [vmem:[#allocation8 + $0xe70] sm:$0xff]  ;;  %v8016_v22 = vld [vmem:[#allocation8 + $0xc68] sm:$0xff] }
 0xa4e   :  { %5770 = vmatpush2.msra.mxu1 %v7962_v42  ;;  %5859 = vmatpush2.msra.mxu0 %v7963_v41  ;;  %v8017_v27 = vld [vmem:[#allocation8 + $0xe68] sm:$0xff]  ;;  %v8018_v42 = vld [vmem:[#allocation8 + $0xc60] sm:$0xff] }
 0xa4f   :  { %5771 = vmatprep.subr.mxu1 %v7964_v45  ;;  %5860 = vmatprep.subr.mxu0 %v7965_v2  ;;  %v8019_v41 = vld [vmem:[#allocation8 + $0xe60] sm:$0xff]  ;;  %v8020_v45 = vld [vmem:[#allocation8 + $0xc58] sm:$0xff] }
 0xa50   :  { %5772 = vmatpush2.msra.mxu1 %v7966_v60  ;;  %5861 = vmatpush2.msra.mxu0 %v7967_v28  ;;  %v8021_v2 = vld [vmem:[#allocation8 + $0xe58] sm:$0xff]  ;;  %v8022_v60 = vld [vmem:[#allocation8 + $0xc50] sm:$0xff] }
 0xa51   :  { %5773 = vmatprep.subr.mxu1 %v7968_v21  ;;  %5862 = vmatprep.subr.mxu0 %v7969_v53  ;;  %v8023_v28 = vld [vmem:[#allocation8 + $0xe50] sm:$0xff]  ;;  %v8024_v21 = vld [vmem:[#allocation8 + $0xc48] sm:$0xff] }
 0xa52   :  { %5774 = vmatpush2.msra.mxu1 %v7970_v50  ;;  %5863 = vmatpush2.msra.mxu0 %v7971_v25  ;;  %v8025_v53 = vld [vmem:[#allocation8 + $0xe48] sm:$0xff]  ;;  %v8026_v50 = vld [vmem:[#allocation8 + $0xc40] sm:$0xff] }
 0xa53   :  { %5775 = vmatprep.subr.mxu1 %v7972_v52  ;;  %5864 = vmatprep.subr.mxu0 %v7973_v56  ;;  %v8027_v25 = vld [vmem:[#allocation8 + $0xe40] sm:$0xff]  ;;  %v8028_v52 = vld [vmem:[#allocation8 + $0xc38] sm:$0xff] }
 0xa54   :  { %5776 = vmatpush2.msra.mxu1 %v7974_v61  ;;  %5865 = vmatpush2.msra.mxu0 %v7975_v33  ;;  %v8029_v56 = vld [vmem:[#allocation8 + $0xe38] sm:$0xff]  ;;  %v8030_v61 = vld [vmem:[#allocation8 + $0xc30] sm:$0xff] }
 0xa55   :  { %5777 = vmatprep.subr.mxu1 %v7976_v46  ;;  %5866 = vmatprep.subr.mxu0 %v7977_v7  ;;  %v8031_v33 = vld [vmem:[#allocation8 + $0xe30] sm:$0xff]  ;;  %v8032_v46 = vld [vmem:[#allocation8 + $0xc28] sm:$0xff] }
 0xa56   :  { %5778 = vmatpush2.msra.mxu1 %v7978_v55  ;;  %5867 = vmatpush2.msra.mxu0 %v7979_v54  ;;  %v8033_v7 = vld [vmem:[#allocation8 + $0xe28] sm:$0xff]  ;;  %v8034_v55 = vld [vmem:[#allocation8 + $0xc20] sm:$0xff] }
 0xa57   :  { %5780 = vmatmul.mubr.f32.vlgmr.msra.gmra.mxu1 %v9668_v39  ;;  %5869 = vmatmul.mubr.f32.vlgmr.msra.gmra.mxu0 %v9668_v39  ;;  %v8035_v54 = vld [vmem:[#allocation8 + $0xe20] sm:$0xff] }
 0xa58   :  { %5893 = vmatprep.subr.mxu1 %v7980_v20  ;;  %5982 = vmatprep.subr.mxu0 %v7981_v32  ;;  %v8036_v20 = vld [vmem:[#allocation8 + $0xc18] sm:$0xff] }
 0xa59   :  { %5785 = vmatprep.mubr.f32.mxu1 %v9674_v15  ;;  %5874 = vmatprep.mubr.f32.mxu0 %v9674_v15  ;;  %v8037_v32 = vld [vmem:[#allocation8 + $0xe18] sm:$0xff] }
 0xa5a   :  { %5894 = vmatpush1.msra.mxu1 %v7982_v10  ;;  %5983 = vmatpush1.msra.mxu0 %v7983_v31  ;;  %v8038_v10 = vld [vmem:[#allocation8 + $0xc10] sm:$0xff] }
 0xa5b   :  { %5895 = vmatprep.subr.mxu1 %v7984_v36  ;;  %5984 = vmatprep.subr.mxu0 %v7985_v5  ;;  %v8039_v31 = vld [vmem:[#allocation8 + $0xe10] sm:$0xff]  ;;  %v8040_v36 = vld [vmem:[#allocation8 + $0xc08] sm:$0xff] }
 0xa5c   :  { %5896 = vmatpush1.msra.mxu1 %v7986_v26  ;;  %5985 = vmatpush1.msra.mxu0 %v7987_v17  ;;  %v8041_v5 = vld [vmem:[#allocation8 + $0xe08] sm:$0xff]  ;;  %v8042_v26 = vld [vmem:[#allocation8 + $0xc00] sm:$0xff] }
 0xa5d   :  { %5786 = vmatmul.mubr.f32.gmra.mxu1 %v9676_v58  ;;  %5875 = vmatmul.mubr.f32.gmra.mxu0 %v9676_v58  ;;  %v8043_v17 = vld [vmem:[#allocation8 + $0xe00] sm:$0xff] }
 0xa5e   :  { %5897 = vmatprep.subr.mxu1 %v7988_v16  ;;  %5986 = vmatprep.subr.mxu0 %v7989_v8  ;;  %v8044_v16 = vld [vmem:[#allocation8 + $0xdf8] sm:$0xff] }
 0xa5f   :  { %5791 = vmatprep.mubr.f32.mxu1 %v9680_v37  ;;  %5880 = vmatprep.mubr.f32.mxu0 %v9680_v37  ;;  %v8045_v8 = vld [vmem:[#allocation8 + $0xff8] sm:$0xff] }
 0xa60   :  { %5898 = vmatpush1.msra.mxu1 %v7990_v14  ;;  %5987 = vmatpush1.msra.mxu0 %v7991_v63  ;;  %v8046_v14 = vld [vmem:[#allocation8 + $0xdf0] sm:$0xff] }
 0xa61   :  { %5899 = vmatprep.subr.mxu1 %v7992_v6  ;;  %5988 = vmatprep.subr.mxu0 %v7993_v23  ;;  %v8047_v63 = vld [vmem:[#allocation8 + $0xff0] sm:$0xff]  ;;  %v8048_v6 = vld [vmem:[#allocation8 + $0xde8] sm:$0xff] }
 0xa62   :  { %5900 = vmatpush1.msra.mxu1 %v7994_v19  ;;  %5989 = vmatpush1.msra.mxu0 %v7995_v38  ;;  %v8049_v23 = vld [vmem:[#allocation8 + $0xfe8] sm:$0xff]  ;;  %v8050_v19 = vld [vmem:[#allocation8 + $0xde0] sm:$0xff] }
 0xa63   :  { %5792 = vmatmul.mubr.f32.gmra.mxu1 %v9684_v44  ;;  %5881 = vmatmul.mubr.f32.gmra.mxu0 %v9684_v44  ;;  %v8051_v38 = vld [vmem:[#allocation8 + $0xfe0] sm:$0xff] }
 0xa64   :  { %5901 = vmatprep.subr.mxu1 %v7996_v34  ;;  %5990 = vmatprep.subr.mxu0 %v7997_v43  ;;  %v8052_v34 = vld [vmem:[#allocation8 + $0xdd8] sm:$0xff] }
 0xa65   :  { %5797 = vmatprep.mubr.f32.mxu1 %v9688_v35  ;;  %5886 = vmatprep.mubr.f32.mxu0 %v9688_v35  ;;  %v8053_v43 = vld [vmem:[#allocation8 + $0xfd8] sm:$0xff] }
 0xa66   :  { %5902 = vmatpush1.msra.mxu1 %v7998_v29  ;;  %5991 = vmatpush1.msra.mxu0 %v7999_v9  ;;  %v8054_v29 = vld [vmem:[#allocation8 + $0xdd0] sm:$0xff] }
 0xa67   :  { %5903 = vmatprep.subr.mxu1 %v8000_v0  ;;  %5992 = vmatprep.subr.mxu0 %v8001_v11  ;;  %v8055_v9 = vld [vmem:[#allocation8 + $0xfd0] sm:$0xff]  ;;  %v8056_v0 = vld [vmem:[#allocation8 + $0xdc8] sm:$0xff] }
 0xa68   :  { %5904 = vmatpush1.msra.mxu1 %v8002_v57  ;;  %5993 = vmatpush1.msra.mxu0 %v8003_v1  ;;  %v8057_v11 = vld [vmem:[#allocation8 + $0xfc8] sm:$0xff]  ;;  %v8058_v57 = vld [vmem:[#allocation8 + $0xdc0] sm:$0xff] }
 0xa69   :  { %5798 = vmatmul.mubr.f32.gmra.mxu1 %v9692_v24  ;;  %5887 = vmatmul.mubr.f32.gmra.mxu0 %v9692_v24  ;;  %v8059_v1 = vld [vmem:[#allocation8 + $0xfc0] sm:$0xff] }
 0xa6a   :  { %5905 = vmatprep.subr.mxu1 %v8004_v3  ;;  %5994 = vmatprep.subr.mxu0 %v8005_v18  ;;  %v8060_v3 = vld [vmem:[#allocation8 + $0xdb8] sm:$0xff] }
 0xa6b   :  { %5906 = vmatpush1.msra.mxu1 %v8006_v49  ;;  %5957 = vmatprep.mubr.f32.mxu1 %v9665_v51  ;;  %v8061_v18 = vld [vmem:[#allocation8 + $0xfb8] sm:$0xff]  ;;  %v8062_v49 = vld [vmem:[#allocation8 + $0xdb0] sm:$0xff] }
 0xa6c   :  { %5995 = vmatpush1.msra.mxu0 %v8007_v30  ;;  %6046 = vmatprep.mubr.f32.mxu0 %v9665_v51  ;;  %v8063_v30 = vld [vmem:[#allocation8 + $0xfb0] sm:$0xff] }
 0xa6d   :  { %5907 = vmatprep.subr.mxu1 %v8008_v47  ;;  %5996 = vmatprep.subr.mxu0 %v8009_v48  ;;  %v8064_v47 = vld [vmem:[#allocation8 + $0xda8] sm:$0xff] }
 0xa6e   :  { %5908 = vmatpush1.msra.mxu1 %v8010_v62  ;;  %5997 = vmatpush1.msra.mxu0 %v8011_v59  ;;  %v8065_v48 = vld [vmem:[#allocation8 + $0xfa8] sm:$0xff]  ;;  %v8066_v62 = vld [vmem:[#allocation8 + $0xda0] sm:$0xff] }
 0xa6f   :  { %5909 = vmatprep.subr.mxu1 %v8012_v4  ;;  %5998 = vmatprep.subr.mxu0 %v8013_v40  ;;  %v8067_v59 = vld [vmem:[#allocation8 + $0xfa0] sm:$0xff]  ;;  %v8068_v4 = vld [vmem:[#allocation8 + $0xd98] sm:$0xff] }
 0xa70   :  { %5910 = vmatpush1.msra.mxu1 %v8014_v12  ;;  %5999 = vmatpush1.msra.mxu0 %v8015_v13  ;;  %v8069_v40 = vld [vmem:[#allocation8 + $0xf98] sm:$0xff]  ;;  %v8070_v12 = vld [vmem:[#allocation8 + $0xd90] sm:$0xff] }
 0xa71   :  { %5911 = vmatprep.subr.mxu1 %v8016_v22  ;;  %6000 = vmatprep.subr.mxu0 %v8017_v27  ;;  %v8071_v13 = vld [vmem:[#allocation8 + $0xf90] sm:$0xff]  ;;  %v8072_v22 = vld [vmem:[#allocation8 + $0xd88] sm:$0xff] }
 0xa72   :  { %5912 = vmatpush1.msra.mxu1 %v8018_v42  ;;  %6001 = vmatpush1.msra.mxu0 %v8019_v41  ;;  %v8073_v27 = vld [vmem:[#allocation8 + $0xf88] sm:$0xff]  ;;  %v8074_v42 = vld [vmem:[#allocation8 + $0xd80] sm:$0xff] }
 0xa73   :  { %5913 = vmatprep.subr.mxu1 %v8020_v45  ;;  %6002 = vmatprep.subr.mxu0 %v8021_v2  ;;  %v8075_v41 = vld [vmem:[#allocation8 + $0xf80] sm:$0xff]  ;;  %v8076_v45 = vld [vmem:[#allocation8 + $0xd78] sm:$0xff] }
 0xa74   :  { %5914 = vmatpush1.msra.mxu1 %v8022_v60  ;;  %6003 = vmatpush1.msra.mxu0 %v8023_v28  ;;  %v8077_v2 = vld [vmem:[#allocation8 + $0xf78] sm:$0xff]  ;;  %v8078_v60 = vld [vmem:[#allocation8 + $0xd70] sm:$0xff] }
 0xa75   :  { %5915 = vmatprep.subr.mxu1 %v8024_v21  ;;  %6004 = vmatprep.subr.mxu0 %v8025_v53  ;;  %v8079_v28 = vld [vmem:[#allocation8 + $0xf70] sm:$0xff]  ;;  %v8080_v21 = vld [vmem:[#allocation8 + $0xd68] sm:$0xff] }
 0xa76   :  { %5916 = vmatpush1.msra.mxu1 %v8026_v50  ;;  %6005 = vmatpush1.msra.mxu0 %v8027_v25  ;;  %v8081_v53 = vld [vmem:[#allocation8 + $0xf68] sm:$0xff]  ;;  %v8082_v50 = vld [vmem:[#allocation8 + $0xd60] sm:$0xff] }
 0xa77   :  { %5917 = vmatprep.subr.mxu1 %v8028_v52  ;;  %6006 = vmatprep.subr.mxu0 %v8029_v56  ;;  %v8083_v25 = vld [vmem:[#allocation8 + $0xf60] sm:$0xff]  ;;  %v8084_v52 = vld [vmem:[#allocation8 + $0xd58] sm:$0xff] }
 0xa78   :  { %5918 = vmatpush1.msra.mxu1 %v8030_v61  ;;  %6007 = vmatpush1.msra.mxu0 %v8031_v33  ;;  %v8085_v56 = vld [vmem:[#allocation8 + $0xf58] sm:$0xff]  ;;  %v8086_v61 = vld [vmem:[#allocation8 + $0xd50] sm:$0xff] }
 0xa79   :  { %5919 = vmatprep.subr.mxu1 %v8032_v46  ;;  %6008 = vmatprep.subr.mxu0 %v8033_v7  ;;  %v8087_v33 = vld [vmem:[#allocation8 + $0xf50] sm:$0xff]  ;;  %v8088_v46 = vld [vmem:[#allocation8 + $0xd48] sm:$0xff] }
 0xa7a   :  { %5920 = vmatpush1.msra.mxu1 %v8034_v55  ;;  %6009 = vmatpush1.msra.mxu0 %v8035_v54  ;;  %v8089_v7 = vld [vmem:[#allocation8 + $0xf48] sm:$0xff]  ;;  %v8090_v55 = vld [vmem:[#allocation8 + $0xd40] sm:$0xff] }
 0xa7b   :  { %5921 = vmatprep.subr.mxu1 %v8036_v20  ;;  %6010 = vmatprep.subr.mxu0 %v8037_v32  ;;  %v8091_v54 = vld [vmem:[#allocation8 + $0xf40] sm:$0xff]  ;;  %v8092_v20 = vld [vmem:[#allocation8 + $0xd38] sm:$0xff] }
 0xa7c   :  { %5922 = vmatpush1.msra.mxu1 %v8038_v10  ;;  %6011 = vmatpush1.msra.mxu0 %v8039_v31  ;;  %v8093_v32 = vld [vmem:[#allocation8 + $0xf38] sm:$0xff]  ;;  %v8094_v10 = vld [vmem:[#allocation8 + $0xd30] sm:$0xff] }
 0xa7d   :  { %5923 = vmatprep.subr.mxu1 %v8040_v36  ;;  %6012 = vmatprep.subr.mxu0 %v8041_v5  ;;  %v8095_v31 = vld [vmem:[#allocation8 + $0xf30] sm:$0xff]  ;;  %v8096_v36 = vld [vmem:[#allocation8 + $0xd28] sm:$0xff] }
 0xa7e   :  { %5924 = vmatpush1.msra.mxu1 %v8042_v26  ;;  %6013 = vmatpush1.msra.mxu0 %v8043_v17  ;;  %v8097_v5 = vld [vmem:[#allocation8 + $0xf28] sm:$0xff]  ;;  %v8098_v26 = vld [vmem:[#allocation8 + $0xd20] sm:$0xff] }
 0xa7f   :  { %5925 = vmatprep.subr.mxu1 %v8044_v16  ;;  %6014 = vmatprep.subr.mxu0 %v8045_v8  ;;  %v8099_v17 = vld [vmem:[#allocation8 + $0xf20] sm:$0xff]  ;;  %v8100_v16 = vld [vmem:[#allocation8 + $0xd18] sm:$0xff] }
 0xa80   :  { %5926 = vmatpush2.msra.mxu1 %v8046_v14  ;;  %6015 = vmatpush2.msra.mxu0 %v8047_v63  ;;  %v8101_v8 = vld [vmem:[#allocation8 + $0xf18] sm:$0xff]  ;;  %v8102_v14 = vld [vmem:[#allocation8 + $0xd10] sm:$0xff] }
 0xa81   :  { %5927 = vmatprep.subr.mxu1 %v8048_v6  ;;  %6016 = vmatprep.subr.mxu0 %v8049_v23  ;;  %v8103_v63 = vld [vmem:[#allocation8 + $0xf10] sm:$0xff]  ;;  %v8104_v6 = vld [vmem:[#allocation8 + $0xd08] sm:$0xff] }
 0xa82   :  { %5928 = vmatpush2.msra.mxu1 %v8050_v19  ;;  %6017 = vmatpush2.msra.mxu0 %v8051_v38  ;;  %v8105_v23 = vld [vmem:[#allocation8 + $0xf08] sm:$0xff]  ;;  %v8106_v19 = vld [vmem:[#allocation8 + $0xd00] sm:$0xff] }
 0xa83   :  { %5929 = vmatprep.subr.mxu1 %v8052_v34  ;;  %6018 = vmatprep.subr.mxu0 %v8053_v43  ;;  %v8107_v38 = vld [vmem:[#allocation8 + $0xf00] sm:$0xff]  ;;  %v8108_v34 = vld [vmem:[#allocation8 + $0x10f8] sm:$0xff]  ;;  %v8109_v43 = vld [vmem:[#allocation8 + $0x10f0] sm:$0xff] }
 0xa84   :  { %5930 = vmatpush2.msra.mxu1 %v8054_v29  ;;  %6019 = vmatpush2.msra.mxu0 %v8055_v9  ;;  %v8110_v29 = vld [vmem:[#allocation8 + $0x10e8] sm:$0xff]  ;;  %v8111_v9 = vld [vmem:[#allocation8 + $0x10e0] sm:$0xff] }
 0xa85   :  { %5931 = vmatprep.subr.mxu1 %v8056_v0  ;;  %6020 = vmatprep.subr.mxu0 %v8057_v11  ;;  %v8112_v0 = vld [vmem:[#allocation8 + $0x10d8] sm:$0xff]  ;;  %v8113_v11 = vld [vmem:[#allocation8 + $0x10d0] sm:$0xff] }
 0xa86   :  { %5932 = vmatpush2.msra.mxu1 %v8058_v57  ;;  %6021 = vmatpush2.msra.mxu0 %v8059_v1  ;;  %v8114_v57 = vld [vmem:[#allocation8 + $0x10c8] sm:$0xff]  ;;  %v8115_v1 = vld [vmem:[#allocation8 + $0x10c0] sm:$0xff] }
 0xa87   :  { %5933 = vmatprep.subr.mxu1 %v8060_v3  ;;  %6022 = vmatprep.subr.mxu0 %v8061_v18  ;;  %v8116_v3 = vld [vmem:[#allocation8 + $0x10b8] sm:$0xff]  ;;  %v8117_v18 = vld [vmem:[#allocation8 + $0x10b0] sm:$0xff] }
 0xa88   :  { %5934 = vmatpush2.msra.mxu1 %v8062_v49  ;;  %6023 = vmatpush2.msra.mxu0 %v8063_v30  ;;  %v8118_v49 = vld [vmem:[#allocation8 + $0x10a8] sm:$0xff]  ;;  %v8119_v30 = vld [vmem:[#allocation8 + $0x10a0] sm:$0xff] }
 0xa89   :  { %5935 = vmatprep.subr.mxu1 %v8064_v47  ;;  %6024 = vmatprep.subr.mxu0 %v8065_v48  ;;  %v8120_v47 = vld [vmem:[#allocation8 + $0x1098] sm:$0xff]  ;;  %v8121_v48 = vld [vmem:[#allocation8 + $0x1090] sm:$0xff] }
 0xa8a   :  { %5936 = vmatpush2.msra.mxu1 %v8066_v62  ;;  %6025 = vmatpush2.msra.mxu0 %v8067_v59  ;;  %v8122_v62 = vld [vmem:[#allocation8 + $0x1088] sm:$0xff]  ;;  %v8123_v59 = vld [vmem:[#allocation8 + $0x1080] sm:$0xff] }
 0xa8b   :  { %5937 = vmatprep.subr.mxu1 %v8068_v4  ;;  %6026 = vmatprep.subr.mxu0 %v8069_v40  ;;  %v9747_v4 = vpop.f32.mrf.mxu1  ;;  %v9749_v40 = vpop.f32.mrf.mxu0 }
 0xa8c   :  { %5938 = vmatpush2.msra.mxu1 %v8070_v12  ;;  %6027 = vmatpush2.msra.mxu0 %v8071_v13  ;;  %v8124_v12 = vld [vmem:[#allocation8 + $0x1078] sm:$0xff]  ;;  %v8125_v13 = vld [vmem:[#allocation8 + $0x1070] sm:$0xff] }
 0xa8d   :  { %5939 = vmatprep.subr.mxu1 %v8072_v22  ;;  %6028 = vmatprep.subr.mxu0 %v8073_v27  ;;  %v8126_v22 = vld [vmem:[#allocation8 + $0x1068] sm:$0xff]  ;;  %v8127_v27 = vld [vmem:[#allocation8 + $0x1060] sm:$0xff] }
 0xa8e   :  { %5940 = vmatpush2.msra.mxu1 %v8074_v42  ;;  %6029 = vmatpush2.msra.mxu0 %v8075_v41  ;;  %v9751_v42 = vpop.f32.mrf.mxu1  ;;  %v9753_v41 = vpop.f32.mrf.mxu0 }
 0xa8f   :  { %5941 = vmatprep.subr.mxu1 %v8076_v45  ;;  %6030 = vmatprep.subr.mxu0 %v8077_v2  ;;  %v8129_v45 = vld [vmem:[#allocation8 + $0x1050] sm:$0xff]  ;;  %v8130_v2 = vld [vmem:[#allocation8 + $0x1048] sm:$0xff] }
 0xa90   :  { %5942 = vmatpush2.msra.mxu1 %v8078_v60  ;;  %6031 = vmatpush2.msra.mxu0 %v8079_v28  ;;  %v8131_v60 = vld [vmem:[#allocation8 + $0x1040] sm:$0xff]  ;;  %v9755_v28 = vpop.f32.mrf.mxu1 }
 0xa91   :  { %5943 = vmatprep.subr.mxu1 %v8080_v21  ;;  %6032 = vmatprep.subr.mxu0 %v8081_v53  ;;  %v9757_v21 = vpop.f32.mrf.mxu0  ;;  %v8132_v53 = vld [vmem:[#allocation8 + $0x1038] sm:$0xff] }
 0xa92   :  { %5944 = vmatpush2.msra.mxu1 %v8082_v50  ;;  %6033 = vmatpush2.msra.mxu0 %v8083_v25  ;;  %v8133_v50 = vld [vmem:[#allocation8 + $0x1030] sm:$0xff]  ;;  %v8134_v25 = vld [vmem:[#allocation8 + $0x1028] sm:$0xff] }
 0xa93   :  { %5945 = vmatprep.subr.mxu1 %v8084_v52  ;;  %6034 = vmatprep.subr.mxu0 %v8085_v56  ;;  %v8135_v52 = vld [vmem:[#allocation8 + $0x1020] sm:$0xff]  ;;  %v9759_v56 = vpop.f32.mrf.mxu1 }
 0xa94   :  { %5946 = vmatpush2.msra.mxu1 %v8086_v61  ;;  %6035 = vmatpush2.msra.mxu0 %v8087_v33  ;;  %v9761_v61 = vpop.f32.mrf.mxu0  ;;  %v8136_v33 = vld [vmem:[#allocation8 + $0x1018] sm:$0xff] }
 0xa95   :  { %5947 = vmatprep.subr.mxu1 %v8088_v46  ;;  %6036 = vmatprep.subr.mxu0 %v8089_v7  ;;  %v8137_v46 = vld [vmem:[#allocation8 + $0x1010] sm:$0xff]  ;;  %v8138_v7 = vld [vmem:[#allocation8 + $0x1008] sm:$0xff] }
 0xa96   :  { %5948 = vmatpush2.msra.mxu1 %v8090_v55  ;;  %6037 = vmatpush2.msra.mxu0 %v8091_v54  ;;  %v8139_v55 = vld [vmem:[#allocation8 + $0x1000] sm:$0xff]  ;;  %v9763_v54 = vpop.f32.mrf.mxu1 }
 0xa97   :  { %5949 = vmatprep.subr.mxu1 %v8092_v20  ;;  %6038 = vmatprep.subr.mxu0 %v8093_v32  ;;  %v9765_v20 = vpop.f32.mrf.mxu0  ;;  %v8140_v32 = vld [vmem:[#allocation8 + $0x11f8] sm:$0xff] }
 0xa98   :  { %5950 = vmatpush2.msra.mxu1 %v8094_v10  ;;  %6039 = vmatpush2.msra.mxu0 %v8095_v31  ;;  %v8141_v10 = vld [vmem:[#allocation8 + $0x11f0] sm:$0xff]  ;;  %v8142_v31 = vld [vmem:[#allocation8 + $0x11e8] sm:$0xff] }
 0xa99   :  { %5951 = vmatprep.subr.mxu1 %v8096_v36  ;;  %6040 = vmatprep.subr.mxu0 %v8097_v5  ;;  %v8143_v36 = vld [vmem:[#allocation8 + $0x11e0] sm:$0xff]  ;;  %v9767_v5 = vpop.f32.mrf.mxu1 }
 0xa9a   :  { %5952 = vmatpush2.msra.mxu1 %v8098_v26  ;;  %6041 = vmatpush2.msra.mxu0 %v8099_v17  ;;  %v9769_v26 = vpop.f32.mrf.mxu0  ;;  %v8144_v17 = vld [vmem:[#allocation8 + $0x11d8] sm:$0xff] }
 0xa9b   :  { %5953 = vmatprep.subr.mxu1 %v8100_v16  ;;  %6042 = vmatprep.subr.mxu0 %v8101_v8  ;;  %v8145_v16 = vld [vmem:[#allocation8 + $0x11d0] sm:$0xff]  ;;  %v8146_v8 = vld [vmem:[#allocation8 + $0x11c8] sm:$0xff] }
 0xa9c   :  { %5954 = vmatpush2.msra.mxu1 %v8102_v14  ;;  %6043 = vmatpush2.msra.mxu0 %v8103_v63  ;;  %v8147_v14 = vld [vmem:[#allocation8 + $0x11c0] sm:$0xff]  ;;  %v9771_v63 = vpop.f32.mrf.mxu1 }
 0xa9d   :  { %5955 = vmatprep.subr.mxu1 %v8104_v6  ;;  %6044 = vmatprep.subr.mxu0 %v8105_v23  ;;  %v9773_v6 = vpop.f32.mrf.mxu0  ;;  %v8148_v23 = vld [vmem:[#allocation8 + $0x11b8] sm:$0xff] }
 0xa9e   :  { %5956 = vmatpush2.msra.mxu1 %v8106_v19  ;;  %6045 = vmatpush2.msra.mxu0 %v8107_v38  ;;  %v8149_v19 = vld [vmem:[#allocation8 + $0x11b0] sm:$0xff]  ;;  %v8150_v38 = vld [vmem:[#allocation8 + $0x11a8] sm:$0xff] }
 0xa9f   :  { %5958 = vmatmul.mubr.f32.vlgmr.msra.gmra.mxu1 %v9668_v39  ;;  %6047 = vmatmul.mubr.f32.vlgmr.msra.gmra.mxu0 %v9668_v39 }
 0xaa0   :  { %6071 = vmatprep.subr.mxu1 %v8108_v34  ;;  %5963 = vmatprep.mubr.f32.mxu1 %v9674_v15  ;;  %v8151_v34 = vld [vmem:[#allocation8 + $0x11a0] sm:$0xff] }
 0xaa1   :  { %6052 = vmatprep.mubr.f32.mxu0 %v9674_v15  ;;  %6072 = vmatpush1.msra.mxu1 %v8109_v43  ;;  %v9775_v43 = vpop.f32.mrf.mxu1 }
 0xaa2   :  { %6073 = vmatprep.subr.mxu1 %v8110_v29  ;;  %v9777_v29 = vpop.f32.mrf.mxu0 }
 0xaa3   :  { %6074 = vmatpush1.msra.mxu1 %v8111_v9  ;;  %6053 = vmatmul.mubr.f32.gmra.mxu0 %v9676_v58  ;;  %v8152_v9 = vld [vmem:[#allocation8 + $0x1198] sm:$0xff] }
 0xaa4   :  { %5964 = vmatmul.mubr.f32.gmra.mxu1 %v9676_v58  ;;  %6075 = vmatprep.subr.mxu1 %v8112_v0  ;;  %v8153_v0 = vld [vmem:[#allocation8 + $0x1190] sm:$0xff] }
 0xaa5   :  { %5969 = vmatprep.mubr.f32.mxu1 %v9680_v37  ;;  %6058 = vmatprep.mubr.f32.mxu0 %v9680_v37 }
 0xaa6   :  { %6076 = vmatpush1.msra.mxu1 %v8113_v11  ;;  %v8154_v11 = vld [vmem:[#allocation8 + $0x1188] sm:$0xff] }
 0xaa7   :  { %6077 = vmatprep.subr.mxu1 %v8114_v57  ;;  %6059 = vmatmul.mubr.f32.gmra.mxu0 %v9684_v44 }
 0xaa8   :  { %6078 = vmatpush1.msra.mxu1 %v8115_v1  ;;  %6064 = vmatprep.mubr.f32.mxu0 %v9688_v35 }
 0xaa9   :  { %5970 = vmatmul.mubr.f32.gmra.mxu1 %v9684_v44  ;;  %6079 = vmatprep.subr.mxu1 %v8116_v3  ;;  %v8155_v3 = vld [vmem:[#allocation8 + $0x1180] sm:$0xff] }
 0xaaa   :  { %5975 = vmatprep.mubr.f32.mxu1 %v9688_v35  ;;  %6080 = vmatpush1.msra.mxu1 %v8117_v18  ;;  %v8156_v18 = vld [vmem:[#allocation8 + $0x1178] sm:$0xff] }
 0xaab   :  { %6081 = vmatprep.subr.mxu1 %v8118_v49  ;;  %6065 = vmatmul.mubr.f32.gmra.mxu0 %v9692_v24 }
 0xaac   :  { %6082 = vmatpush1.msra.mxu1 %v8119_v30  ;;  %v8157_v30 = vld [vmem:[#allocation8 + $0x1170] sm:$0xff] }
 0xaad   :  { %5976 = vmatmul.mubr.f32.gmra.mxu1 %v9692_v24  ;;  %6083 = vmatprep.subr.mxu1 %v8120_v47  ;;  %v8158_v47 = vld [vmem:[#allocation8 + $0x1168] sm:$0xff] }
 0xaae   :  { %6084 = vmatpush1.msra.mxu1 %v8121_v48  ;;  %6135 = vmatprep.mubr.f32.mxu1 %v9665_v51  ;;  %v8128_v51 = vld [vmem:[#allocation8 + $0x1058] sm:$0xff] }
 0xaaf   :  { %6085 = vmatprep.subr.mxu1 %v8122_v62  ;;  %v8159_v62 = vld [vmem:[#allocation8 + $0x1160] sm:$0xff] }
 0xab0   :  { %6086 = vmatpush1.msra.mxu1 %v8123_v59  ;;  %v8160_v59 = vld [vmem:[#allocation8 + $0x1158] sm:$0xff] }
 0xab1   :  { %6087 = vmatprep.subr.mxu1 %v8124_v12 }
 0xab2   :  { %6088 = vmatpush1.msra.mxu1 %v8125_v13  ;;  %v8161_v13 = vld [vmem:[#allocation8 + $0x1150] sm:$0xff] }
 0xab3   :  { %6089 = vmatprep.subr.mxu1 %v8126_v22  ;;  %v8162_v22 = vld [vmem:[#allocation8 + $0x1148] sm:$0xff] }
 0xab4   :  { %6090 = vmatpush1.msra.mxu1 %v8127_v27 }
 0xab5   :  { %6091 = vmatprep.subr.mxu1 %v8128_v51 }
 0xab6   :  { %6092 = vmatpush1.msra.mxu1 %v8129_v45  ;;  %v8163_v45 = vld [vmem:[#allocation8 + $0x1140] sm:$0xff] }
 0xab7   :  { %6093 = vmatprep.subr.mxu1 %v8130_v2  ;;  %v8164_v2 = vld [vmem:[#allocation8 + $0x1138] sm:$0xff] }
 0xab8   :  { %6094 = vmatpush1.msra.mxu1 %v8131_v60  ;;  %v8165_v60 = vld [vmem:[#allocation8 + $0x1130] sm:$0xff] }
 0xab9   :  { %6095 = vmatprep.subr.mxu1 %v8132_v53  ;;  %v8166_v53 = vld [vmem:[#allocation8 + $0x1128] sm:$0xff] }
 0xaba   :  { %6096 = vmatpush1.msra.mxu1 %v8133_v50 }
 0xabb   :  { %6097 = vmatprep.subr.mxu1 %v8134_v25 }
 0xabc   :  { %6098 = vmatpush1.msra.mxu1 %v8135_v52  ;;  %v8167_v52 = vld [vmem:[#allocation8 + $0x1120] sm:$0xff] }
 0xabd   :  { %6099 = vmatprep.subr.mxu1 %v8136_v33  ;;  %v8168_v33 = vld [vmem:[#allocation8 + $0x1118] sm:$0xff] }
 0xabe   :  { %6100 = vmatpush1.msra.mxu1 %v8137_v46 }
 0xabf   :  { %6101 = vmatprep.subr.mxu1 %v8138_v7  ;;  %v8169_v7 = vld [vmem:[#allocation8 + $0x1110] sm:$0xff] }
 0xac0   :  { %6102 = vmatpush1.msra.mxu1 %v8139_v55  ;;  %v8170_v55 = vld [vmem:[#allocation8 + $0x1108] sm:$0xff] }
 0xac1   :  { %6103 = vmatprep.subr.mxu1 %v8140_v32 }
 0xac2   :  { %6104 = vmatpush2.msra.mxu1 %v8141_v10  ;;  %v8171_v10 = vld [vmem:[#allocation8 + $0x1100] sm:$0xff] }
 0xac3   :  { %6105 = vmatprep.subr.mxu1 %v8142_v31 }
 0xac4   :  { %6106 = vmatpush2.msra.mxu1 %v8143_v36 }
 0xac5   :  { %6107 = vmatprep.subr.mxu1 %v8144_v17 }
 0xac6   :  { %6108 = vmatpush2.msra.mxu1 %v8145_v16 }
 0xac7   :  { %6109 = vmatprep.subr.mxu1 %v8146_v8 }
 0xac8   :  { %6110 = vmatpush2.msra.mxu1 %v8147_v14 }
 0xac9   :  { %6111 = vmatprep.subr.mxu1 %v8148_v23 }
 0xaca   :  { %6112 = vmatpush2.msra.mxu1 %v8149_v19 }
 0xacb   :  { %6113 = vmatprep.subr.mxu1 %v8150_v38 }
 0xacc   :  { %6114 = vmatpush2.msra.mxu1 %v8151_v34 }
 0xacd   :  { %6115 = vmatprep.subr.mxu1 %v8152_v9 }
 0xace   :  { %6116 = vmatpush2.msra.mxu1 %v8153_v0 }
 0xacf   :  { %6117 = vmatprep.subr.mxu1 %v8154_v11  ;;  %v9779_v57 = vpop.f32.mrf.mxu1  ;;  %v5692_v1 = vpop.f32.mrf.mxu0 }
 0xad0   :  { %6118 = vmatpush2.msra.mxu1 %v8155_v3 }
 0xad1   :  { %6119 = vmatprep.subr.mxu1 %v8156_v18  ;;  %v5694_v49 = vpop.f32.mrf.mxu0  ;;  %v5605_v48 = vpop.f32.mrf.mxu1  ;;  %v6160_v18 = vld [vmem:[#allocation5] sm:$0xff] }
 0xad2   :  { %6120 = vmatpush2.msra.mxu1 %v8157_v30  ;;  %v6163_v30 = vld [vmem:[#allocation5 + $0x18] sm:$0xff] }
 0xad3   :  { %6121 = vmatprep.subr.mxu1 %v8158_v47  ;;  %v6167_v47 = vld [vmem:[#allocation5 + $0x38] sm:$0xff] }
 0xad4   :  { %6122 = vmatpush2.msra.mxu1 %v8159_v62  ;;  %v6170_v62 = vld [vmem:[#allocation5 + $0x50] sm:$0xff] }
 0xad5   :  { %6123 = vmatprep.subr.mxu1 %v8160_v59  ;;  %v5698_v12 = vpop.f32.mrf.mxu0  ;;  %v5609_v27 = vpop.f32.mrf.mxu1  ;;  %v6169_v59 = vld [vmem:[#allocation5 + $0x48] sm:$0xff] }
 0xad6   :  { %6124 = vmatpush2.msra.mxu1 %v8161_v13 }
 0xad7   :  { %6125 = vmatprep.subr.mxu1 %v8162_v22  ;;  %v5700_v51 = vpop.f32.mrf.mxu0  ;;  %v5611_v50 = vpop.f32.mrf.mxu1 }
 0xad8   :  { %6126 = vmatpush2.msra.mxu1 %v8163_v45 }
 0xad9   :  { %6127 = vmatprep.subr.mxu1 %v8164_v2 }
 0xada   :  { %6128 = vmatpush2.msra.mxu1 %v8165_v60 }
 0xadb   :  { %6129 = vmatprep.subr.mxu1 %v8166_v53  ;;  %v5704_v25 = vpop.f32.mrf.mxu0  ;;  %v5615_v32 = vpop.f32.mrf.mxu1  ;;  %v6162_v53 = vld [vmem:[#allocation5 + $0x10] sm:$0xff] }
 0xadc   :  { %6130 = vmatpush2.msra.mxu1 %v8167_v52  ;;  %v6171_v52 = vld [vmem:[#allocation5 + $0x58] sm:$0xff] }
 0xadd   :  { %6131 = vmatprep.subr.mxu1 %v8168_v33  ;;  %v5706_v46 = vpop.f32.mrf.mxu0  ;;  %v5617_v36 = vpop.f32.mrf.mxu1 }
 0xade   :  { %6132 = vmatpush2.msra.mxu1 %v8169_v7 }
 0xadf   :  { %6133 = vmatprep.subr.mxu1 %v8170_v55  ;;  %v10109_v55 = vld [vmem:[#allocation27_spill] sm:$0xff] }
 0xae0   :  { %6134 = vmatpush2.msra.mxu1 %v8171_v10 }
 0xae1   :  { %6136 = vmatmul.mubr.f32.vlgmr.msra.gmra.mxu1 %v9668_v39  ;;  %v5710_v31 = vpop.f32.mrf.mxu0  ;;  %v5621_v16 = vpop.f32.mrf.mxu1 }
 0xae2   :  { %6141 = vmatprep.mubr.f32.mxu1 %v9674_v15  ;;  %v10108_v15 = vmov 0.0  }
 0xae3   :  { %v5712_v17 = vpop.f32.mrf.mxu0  ;;  %v5623_v39 = vpop.f32.mrf.mxu1 }
 0xae4   :  { %6208 = vmatprep.subr.mxu0 %v5712_v17 }
 0xae5   :  { %6142 = vmatmul.mubr.f32.gmra.mxu1 %v9676_v58  ;;  %6209 = vmatpush1.msra.mxu0 %v5710_v31  ;;  %v6161_v58 = vld [vmem:[#allocation5 + $0x8] sm:$0xff] }
 0xae6   :  { %6147 = vmatprep.mubr.f32.mxu1 %v9680_v37  ;;  %6210 = vmatprep.subr.mxu0 %v5706_v46  ;;  %v10110_v31 = vld [vmem:[#allocation36_spill] sm:$0xff] }
 0xae7   :  { %6211 = vmatpush1.msra.mxu0 %v5704_v25  ;;  %6272 = vmatprep.mubr.f32.mxu0 %v6161_v58  ;;  %v6168_v25 = vld [vmem:[#allocation5 + $0x40] sm:$0xff] }
 0xae8   :  { %6212 = vmatprep.subr.mxu0 %v5700_v51 }
 0xae9   :  { %6148 = vmatmul.mubr.f32.gmra.mxu1 %v9684_v44  ;;  %6213 = vmatpush1.msra.mxu0 %v5698_v12 }
 0xaea   :  { %6153 = vmatprep.mubr.f32.mxu1 %v9688_v35  ;;  %6214 = vmatprep.subr.mxu0 %v5694_v49  ;;  %v6164_v49 = vld [vmem:[#allocation5 + $0x20] sm:$0xff] }
 0xaeb   :  { %6215 = vmatpush1.msra.mxu0 %v5692_v1 }
 0xaec   :  { %6216 = vmatprep.subr.mxu0 %v5623_v39  ;;  %v10111_v39 = vld [vmem:[#allocation25_spill] sm:$0xff] }
 0xaed   :  { %6154 = vmatmul.mubr.f32.gmra.mxu1 %v9692_v24  ;;  %6217 = vmatpush1.msra.mxu0 %v5621_v16  ;;  %v6855_v58 = vmul.f32 -1.442695, %v10111_v39 }
 0xaee   :  { %6218 = vmatprep.subr.mxu0 %v5617_v36  ;;  %6361 = vmatprep.mubr.f32.mxu1 %v10108_v15  ;;  %v6854_v36 = vmul.f32 -1.442695, %v10110_v31 }
 0xaef   :  { %6219 = vmatpush1.msra.mxu0 %v5615_v32  ;;  %v6852_v32 = vmul.f32 -1.442695, %v10109_v55 }
 0xaf0   :  { %6220 = vmatprep.subr.mxu0 %v5611_v50  ;;  %v6165_v50 = vld [vmem:[#allocation5 + $0x28] sm:$0xff] }
 0xaf1   :  { %6221 = vmatpush1.msra.mxu0 %v5609_v27  ;;  %6986 = vpow2.f32 %v6852_v32 }
 0xaf2   :  { %6222 = vmatprep.subr.mxu0 %v5605_v48  ;;  %v6166_v48 = vld [vmem:[#allocation5 + $0x30] sm:$0xff]  ;;  %6988 = vpow2.f32 %v6854_v36 }
 0xaf3   :  { %6223 = vmatpush1.msra.mxu0 %v9779_v57  ;;  %6990 = vpow2.f32 %v6855_v58 }
 0xaf4   :  { %6224 = vmatprep.subr.mxu0 %v9777_v29 }
 0xaf5   :  { %6225 = vmatpush1.msra.mxu0 %v9773_v6 }
 0xaf6   :  { %6226 = vmatprep.subr.mxu0 %v9769_v26 }
 0xaf7   :  { %6227 = vmatpush1.msra.mxu0 %v9765_v20 }
 0xaf8   :  { %6228 = vmatprep.subr.mxu0 %v9761_v61 }
 0xaf9   :  { %6229 = vmatpush1.msra.mxu0 %v9757_v21 }
 0xafa   :  { %6230 = vmatprep.subr.mxu0 %v9753_v41 }
 0xafb   :  { %6231 = vmatpush1.msra.mxu0 %v9749_v40 }
 0xafc   :  { %6232 = vmatprep.subr.mxu0 %v9775_v43 }
 0xafd   :  { %6233 = vmatpush1.msra.mxu0 %v9771_v63 }
 0xafe   :  { %6234 = vmatprep.subr.mxu0 %v9767_v5 }
 0xaff   :  { %6235 = vmatpush1.msra.mxu0 %v9763_v54 }
 0xb00   :  { %6236 = vmatprep.subr.mxu0 %v9759_v56 }
 0xb01   :  { %6237 = vmatpush1.msra.mxu0 %v9755_v28 }
 0xb02   :  { %6238 = vmatprep.subr.mxu0 %v9751_v42 }
 0xb03   :  { %6239 = vmatpush1.msra.mxu0 %v9747_v4 }
 0xb17   :  { %v9806_v37 = vpop.f32.mrf.mxu1  ;;  %v5870_v44 = vpop.f32.mrf.mxu0 }
 0xb19   :  { %v5783_v35 = vpop.f32.mrf.mxu1  ;;  %v5872_v24 = vpop.f32.mrf.mxu0 }
 0xb1d   :  { %v5787_v40 = vpop.f32.mrf.mxu1  ;;  %v5876_v41 = vpop.f32.mrf.mxu0 }
 0xb1f   :  { %v5789_v21 = vpop.f32.mrf.mxu1  ;;  %v5878_v61 = vpop.f32.mrf.mxu0 }
 0xb23   :  { %v5793_v54 = vpop.f32.mrf.mxu1  ;;  %v5882_v20 = vpop.f32.mrf.mxu0 }
 0xb25   :  { %v5795_v56 = vpop.f32.mrf.mxu1  ;;  %v5884_v5 = vpop.f32.mrf.mxu0 }
 0xb29   :  { %v5799_v28 = vpop.f32.mrf.mxu1  ;;  %v5888_v26 = vpop.f32.mrf.mxu0 }
 0xb2b   :  { %v5801_v42 = vpop.f32.mrf.mxu1  ;;  %v5890_v8 = vpop.f32.mrf.mxu0 }
 0xb5f   :  { %v5959_v4 = vpop.f32.mrf.mxu1  ;;  %v6048_v14 = vpop.f32.mrf.mxu0 }
 0xb61   :  { %v5961_v63 = vpop.f32.mrf.mxu1  ;;  %v6050_v6 = vpop.f32.mrf.mxu0 }
 0xb63   :  { %v6054_v23 = vpop.f32.mrf.mxu0 }
 0xb64   :  { %v5965_v19 = vpop.f32.mrf.mxu1 }
 0xb65   :  { %v6056_v38 = vpop.f32.mrf.mxu0 }
 0xb66   :  { %v5967_v34 = vpop.f32.mrf.mxu1 }
 0xb67   :  { %v6060_v43 = vpop.f32.mrf.mxu0 }
 0xb69   :  { %v5971_v29 = vpop.f32.mrf.mxu1  ;;  %v6062_v9 = vpop.f32.mrf.mxu0 }
 0xb6b   :  { %v6066_v0 = vpop.f32.mrf.mxu0  ;;  %v5973_v11 = vpop.f32.mrf.mxu1 }
 0xb6d   :  { %v6068_v57 = vpop.f32.mrf.mxu0  ;;  %v5977_v1 = vpop.f32.mrf.mxu1 }
 0xb6e   :  { %6240 = vmatprep.subr.mxu0 %v6068_v57 }
 0xb6f   :  { %6241 = vmatpush2.msra.mxu0 %v6066_v0  ;;  %v5979_v3 = vpop.f32.mrf.mxu1 }
 0xb70   :  { %6242 = vmatprep.subr.mxu0 %v6062_v9 }
 0xb71   :  { %6243 = vmatpush2.msra.mxu0 %v6060_v43 }
 0xb72   :  { %6244 = vmatprep.subr.mxu0 %v6056_v38 }
 0xb73   :  { %6245 = vmatpush2.msra.mxu0 %v6054_v23 }
 0xb74   :  { %6246 = vmatprep.subr.mxu0 %v6050_v6 }
 0xb75   :  { %6247 = vmatpush2.msra.mxu0 %v6048_v14 }
 0xb76   :  { %6248 = vmatprep.subr.mxu0 %v5979_v3 }
 0xb77   :  { %6249 = vmatpush2.msra.mxu0 %v5977_v1 }
 0xb78   :  { %6250 = vmatprep.subr.mxu0 %v5973_v11 }
 0xb79   :  { %6251 = vmatpush2.msra.mxu0 %v5971_v29 }
 0xb7a   :  { %6252 = vmatprep.subr.mxu0 %v5967_v34 }
 0xb7b   :  { %6253 = vmatpush2.msra.mxu0 %v5965_v19 }
 0xb7c   :  { %6254 = vmatprep.subr.mxu0 %v5961_v63 }
 0xb7d   :  { %6255 = vmatpush2.msra.mxu0 %v5959_v4 }
 0xb7e   :  { %6256 = vmatprep.subr.mxu0 %v5890_v8 }
 0xb7f   :  { %6257 = vmatpush2.msra.mxu0 %v5888_v26  ;;  %v10112_v26 = vld [vmem:[#allocation23_spill] sm:$0xff] }
 0xb80   :  { %6258 = vmatprep.subr.mxu0 %v5884_v5 }
 0xb81   :  { %6259 = vmatpush2.msra.mxu0 %v5882_v20 }
 0xb82   :  { %6260 = vmatprep.subr.mxu0 %v5878_v61 }
 0xb83   :  { %6261 = vmatpush2.msra.mxu0 %v5876_v41  ;;  %v6189_v41 = vpop.permute.xlu1 %6188 }
 0xb84   :  { %6262 = vmatprep.subr.mxu0 %v5872_v24 }
 0xb85   :  { %6263 = vmatpush2.msra.mxu0 %v5870_v44 }
 0xb86   :  { %6264 = vmatprep.subr.mxu0 %v5801_v42  ;;  %v6853_v42 = vmul.f32 -1.442695, %v10112_v26 }
 0xb87   :  { %6265 = vmatpush2.msra.mxu0 %v5799_v28  ;;  %v6987_v28 = vpop.eup %6986  ;;  %v6179_v3 = vpop.permute.xlu1 %6178 }
 0xb88   :  { %6266 = vmatprep.subr.mxu0 %v5795_v56  ;;  %v3257_v38 = vadd.f32 1.0, %v6987_v28  ;;  %v6989_v43 = vpop.eup %6988  ;;  %6992 = vpow2.f32 %v6853_v42  ;;  %v10117_v28 = vld [vmem:[#allocation29_spill] sm:$0xff]  ;;  %v10118_v42 = vld [vmem:[#allocation39_spill] sm:$0xff] }
 0xb89   :  { %6267 = vmatpush2.msra.mxu0 %v5793_v54 }
 0xb8a   :  { %6268 = vmatprep.subr.mxu0 %v5789_v21  ;;  %v6194_v21 = vpop.permute.xlu0 %6193  ;;  %6994 = vrcp.f32 %v3257_v38 }
 0xb8b   :  { %6269 = vmatpush2.msra.mxu0 %v5787_v40 }
 0xb8c   :  { %6270 = vmatprep.subr.mxu0 %v5783_v35 }
 0xb8d   :  { %6271 = vmatpush2.msra.mxu0 %v9806_v37 }
 0xb8e   :  { %6273 = vmatmul.mubr.f32.vlgmr.msra.gmra.mxu0 %v6160_v18  ;;  %v6184_v19 = vpop.permute.xlu0 %6183  ;;  %v3259_v18 = vadd.f32 1.0, %v6989_v43 }
 0xb8f   :  { %6278 = vmatprep.mubr.f32.mxu0 %v6164_v49  ;;  %v6991_v49 = vpop.eup %6990 }
 0xb90   :  { %6996 = vrcp.f32 %v3259_v18 }
 0xb92   :  { %6279 = vmatmul.mubr.f32.gmra.mxu0 %v6163_v30 }
 0xb93   :  { %6284 = vmatprep.mubr.f32.mxu0 %v6167_v47 }
 0xb96   :  { %6285 = vmatmul.mubr.f32.gmra.mxu0 %v6166_v48 }
 0xb97   :  { %6290 = vmatprep.mubr.f32.mxu0 %v6170_v62 }
 0xb9a   :  { %6291 = vmatmul.mubr.f32.gmra.mxu0 %v6169_v59 }
 0xba1   :  { %v6137_v12 = vpop.f32.mrf.mxu1 }
 0xba3   :  { %v6139_v13 = vpop.f32.mrf.mxu1 }
 0xba5   :  { %v6143_v22 = vpop.f32.mrf.mxu1 }
 0xba7   :  { %v6145_v27 = vpop.f32.mrf.mxu1 }
 0xba9   :  { %v6149_v51 = vpop.f32.mrf.mxu1 }
 0xbab   :  { %v6151_v45 = vpop.f32.mrf.mxu1 }
 0xbad   :  { %v6155_v2 = vpop.f32.mrf.mxu1 }
 0xbaf   :  { %v6157_v60 = vpop.f32.mrf.mxu1 }
 0xbb0   :  { %6321 = vmatprep.subr.mxu1 %v6157_v60 }
 0xbb1   :  { %6322 = vmatpush1.msra.mxu1 %v6155_v2 }
 0xbb2   :  { %6323 = vmatprep.subr.mxu1 %v6151_v45 }
 0xbb3   :  { %6324 = vmatpush1.msra.mxu1 %v6149_v51 }
 0xbb4   :  { %6325 = vmatprep.subr.mxu1 %v6145_v27  ;;  %v6993_v27 = vpop.eup %6992 }
 0xbb5   :  { %6326 = vmatpush1.msra.mxu1 %v6143_v22  ;;  %v6995_v51 = vpop.eup %6994  ;;  %v3258_v45 = vadd.f32 1.0, %v6993_v27 }
 0xbb6   :  { %6327 = vmatprep.subr.mxu1 %v6139_v13  ;;  %v6997_v2 = vpop.eup %6996 }
 0xbb7   :  { %6328 = vmatpush1.msra.mxu1 %v6137_v12  ;;  %v3260_v12 = vadd.f32 1.0, %v6991_v49 }
 0xbb8   :  { %6896 = vmatmul.mubr.msk.f32.vlgmr.msra.gmra.mxu1 %vm2857_vm1, %v6162_v53  ;;  %6953 = vmatprep.subr.mxu1 %v10108_v15  ;;  %v3302_v53 = vld [vmem:[%s9949_s10 + $0x8] sm:$0xff] }
 0xbb9   :  { %6367 = vmatprep.mubr.f32.mxu1 %v10108_v15  ;;  %6998 = vrcp.f32 %v3260_v12 }
 0xbba   :  { %7000 = vrcp.f32 %v3258_v45 }
 0xbbc   :  { %6897 = vmatmul.mubr.msk.f32.gmra.mxu1 %vm2857_vm1, %v6165_v50  ;;  %v9853_v50 = vld [vmem:[%s9949_s10 + $0x18] sm:$0xff] }
 0xbbd   :  { %6373 = vmatprep.mubr.f32.mxu1 %v10108_v15 }
 0xbc0   :  { %6898 = vmatmul.mubr.msk.f32.gmra.mxu1 %vm2857_vm1, %v6168_v25 }
 0xbc1   :  { %6379 = vmatprep.mubr.f32.mxu1 %v10108_v15 }
 0xbc4   :  { %6899 = vmatmul.mubr.msk.f32.gmra.mxu1 %vm2857_vm1, %v6171_v52  ;;  %v3301_v52 = vld [vmem:[%s9949_s10] sm:$0xff] }
 0xbc5   :  { %6961 = vmatprep.mubr.msk.f32.mxu1 %vm8292_vm2, %v10108_v15 }
 0xbc6   :  { %v6999_v60 = vpop.eup %6998 }
 0xbc7   :  { %v7001_v25 = vpop.eup %7000 }
 0xc4e   :  { %v6274_v33 = vpop.f32.mrf.mxu0 }
 0xc4f   :  { %v6275_v48 = vadd.f32 %v6274_v33, %v6179_v3  ;;  %v9862_v33 = vld [vmem:[%s9949_s10 + $0x10] sm:$0xff] }
 0xc50   :  { %v6276_v46 = vpop.f32.mrf.mxu0 }
 0xc51   :  { %v6277_v30 = vadd.f32 %v6276_v46, %v6179_v3 }
 0xc52   :  { %v6280_v7 = vpop.f32.mrf.mxu0 }
 0xc53   :  { %v6281_v11 = vadd.f32 %v6280_v7, %v6184_v19 }
 0xc54   :  { %v6282_v10 = vpop.f32.mrf.mxu0 }
 0xc55   :  { %v6283_v29 = vadd.f32 %v6282_v10, %v6184_v19 }
 0xc56   :  { %v6286_v17 = vpop.f32.mrf.mxu0 }
 0xc57   :  { %v6287_v54 = vadd.f32 %v6286_v17, %v6189_v41 }
 0xc58   :  { %v6288_v37 = vpop.f32.mrf.mxu0 }
 0xc59   :  { %v6289_v20 = vadd.f32 %v6288_v37, %v6189_v41  ;;  %v6402_v37 = vld [vmem:[#allocation7] sm:$0x3] }
 0xc5a   :  { %v6292_v24 = vpop.f32.mrf.mxu0 }
 0xc5b   :  { %v6293_v63 = vadd.f32 %v6292_v24, %v6194_v21 }
 0xc5c   :  { %v6294_v56 = vpop.f32.mrf.mxu0 }
 0xc5d   :  { %v6295_v6 = vadd.f32 %v6294_v56, %v6194_v21  ;;  %v10115_v21 = vld [vmem:[#allocation38_spill] sm:$0xff] }
 0xc78   :  { %v6363_v16 = vpop.f32.mrf.mxu1 }
 0xc79   :  { %v9843_v13 = vadd.f32 %v6363_v16, %v6275_v48 }
 0xc7a   :  { %v6365_v44 = vpop.f32.mrf.mxu1 }
 0xc7b   :  { %v9839_v62 = vadd.f32 %v6365_v44, %v6277_v30  ;;  %v10121_v30 = vld [vmem:[#allocation20_spill] sm:$0xff] }
 0xc7c   :  { %v6369_v35 = vpop.f32.mrf.mxu1 }
 0xc7d   :  { %v9837_v47 = vadd.f32 %v6369_v35, %v6281_v11  ;;  %v6386_v22 = vadd.f32 %v9839_v62, %v9843_v13  ;;  %v10113_v35 = vld [vmem:[#allocation22_spill] sm:$0xff] }
 0xc7e   :  { %v6371_v40 = vpop.f32.mrf.mxu1 }
 0xc7f   :  { %v9833_v57 = vadd.f32 %v6371_v40, %v6283_v29  ;;  %v10114_v40 = vld [vmem:[#allocation31_spill] sm:$0xff] }
 0xc80   :  { %v6375_v61 = vpop.f32.mrf.mxu1 }
 0xc81   :  { %v9823_v8 = vadd.f32 %v6375_v61, %v6287_v54  ;;  %v6389_v59 = vadd.f32 %v9833_v57, %v9837_v47  ;;  %v10116_v54 = vld [vmem:[#allocation28_spill] sm:$0xff] }
 0xc82   :  { %v6377_v5 = vpop.f32.mrf.mxu1 }
 0xc83   :  { %v9825_v4 = vadd.f32 %v6377_v5, %v6289_v20 }
 0xc84   :  { %v6381_v14 = vpop.f32.mrf.mxu1 }
 0xc85   :  { %v6392_v23 = vadd.f32 %v9825_v4, %v9823_v8  ;;  %v9829_v9 = vadd.f32 %v6381_v14, %v6293_v63  ;;  %v10119_v63 = vld [vmem:[#allocation21_spill] sm:$0xff] }
 0xc86   :  { %v6383_v34 = vpop.f32.mrf.mxu1 }
 0xc87   :  { %v9831_v0 = vadd.f32 %v6383_v34, %v6295_v6  ;;  %6393 = vadd.xlane.f32.xlu1 %v6392_v23  ;;  %v10120_v23 = vld [vmem:[#allocation24_spill] sm:$0xff] }
 0xc89   :  { %v6395_v1 = vadd.f32 %v9831_v0, %v9829_v9 }
 0xc8b   :  { %6396 = vadd.xlane.f32.xlu0 %v6395_v1 }
 0xc8f   :  { %6390 = vadd.xlane.f32.xlu0 %v6389_v59  ;;  %v10122_v59 = vld [vmem:[#allocation33_spill] sm:$0xff] }
 0xc93   :  { %6387 = vadd.xlane.f32.xlu0 %v6386_v22  ;;  %v10123_v22 = vld [vmem:[#allocation30_spill] sm:$0xff] }
 0xc98   :  { %3271 = vperm.xlu1 %6985, %v6995_v51   ;;  %v10124_v51 = vld [vmem:[#allocation17_spill] sm:$0xff] }
 0xc9c   :  { %3281 = vperm.xlu1 %6985, %v6997_v2  }
 0xca0   :  { %3286 = vperm.xlu1 %6985, %v6999_v60  }
 0xca4   :  { %3312 = vperm.xlu1 %6985, %v3302_v53  }
 0xca8   :  { %3322 = vperm.xlu1 %6985, %v9853_v50  }
 0xca9   :  { %3276 = vperm.xlu0 %6984, %v7001_v25   ;;  %v10125_v25 = vld [vmem:[#allocation15_spill] sm:$0xff] }
 0xcac   :  { %6648 = vperm.xlu1 %6985, %v3302_v53  }
 0xcad   :  { %3307 = vperm.xlu0 %6984, %v3301_v52  }
 0xcb1   :  { %3317 = vperm.xlu0 %6984, %v9862_v33  }
 0xcb5   :  { %6643 = vperm.xlu0 %6984, %v3301_v52  }
 0xd10   :  { %v6394_v46 = vpop.xlane.xlu1 %6393 }
 0xd11   :  { %v6400_v10 = vmul.f32 0.00390625, %v6394_v46  ;;  %v10126_v46 = vld [vmem:[#allocation19_spill] sm:$0xff] }
 0xd14   :  { %v3272_v7 = vpop.permute.xlu1 %3271  ;;  %v6397_v55 = vpop.xlane.xlu0 %6396 }
 0xd15   :  { %v6401_v32 = vmul.f32 0.00390625, %v6397_v55  ;;  %v3289_v48 = vmul.f32 %v3272_v7, %v10121_v30  ;;  %v3290_v12 = vmul.f32 %v3272_v7, %v10122_v59 }
 0xd17   :  { %6954 = vmatpush3.msra.mxu1 %v6401_v32  ;;  %v10127_v32 = vld [vmem:[#allocation35_spill] sm:$0xff] }
 0xd18   :  { %v3282_v31 = vpop.permute.xlu1 %3281  ;;  %6955 = vmatprep.subr.mxu1 %v10108_v15  ;;  %v6391_v36 = vpop.xlane.xlu0 %6390 }
 0xd19   :  { %v6399_v17 = vmul.f32 0.00390625, %v6391_v36  ;;  %6956 = vmatpush3.msra.mxu1 %v6400_v10  ;;  %v3293_v52 = vmul.f32 %v3282_v31, %v10125_v25  ;;  %v3294_v55 = vmul.f32 %v3282_v31, %v10126_v46  ;;  %v10128_v36 = vld [vmem:[#allocation32_spill] sm:$0xff] }
 0xd1a   :  { %6957 = vmatprep.subr.mxu1 %v10108_v15 }
 0xd1b   :  { %6958 = vmatpush3.msra.mxu1 %v6399_v17 }
 0xd1c   :  { %v3287_v16 = vpop.permute.xlu1 %3286  ;;  %v6388_v39 = vpop.xlane.xlu0 %6387  ;;  %6959 = vmatprep.subr.mxu1 %v10108_v15 }
 0xd1d   :  { %v6398_v58 = vmul.f32 0.00390625, %v6388_v39  ;;  %v3295_v24 = vmul.f32 %v3287_v16, %v10113_v35  ;;  %v3296_v41 = vmul.f32 %v3287_v16, %v10114_v40  ;;  %v6477_v35 = vld [vmem:[%s9947_s8] sm:$0xff]  ;;  %v6478_v40 = vld [vmem:[%s9947_s8 + $0x8] sm:$0xff] }
 0xd1f   :  { %6960 = vmatpush3.msra.mxu1 %v6398_v58 }
 0xd20   :  { %v3313_v44 = vpop.permute.xlu1 %3312  ;;  %6962 = vmatmul.mubr.msk.f32.vlgmr.msra.gmra.mxu1 %vm2857_vm1, %v6402_v37 }
 0xd21   :  { %v3410_v61 = vadd.f32 %v10115_v21, %v3313_v44  ;;  %v3412_v20 = vadd.f32 %v10116_v54, %v3313_v44  ;;  %6966 = vmatprep.mubr.msk.f32.mxu1 %vm3143_vm3, %v6477_v35  ;;  %v6479_v21 = vld [vmem:[%s9947_s8 + $0x10] sm:$0xff]  ;;  %v6480_v54 = vld [vmem:[%s9947_s8 + $0x18] sm:$0xff] }
 0xd24   :  { %v3323_v56 = vpop.permute.xlu1 %3322  ;;  %v3277_v5 = vpop.permute.xlu0 %3276 }
 0xd25   :  { %v3422_v26 = vadd.f32 %v10117_v28, %v3323_v56  ;;  %v3424_v14 = vadd.f32 %v10118_v42, %v3323_v56  ;;  %v3291_v6 = vmul.f32 %v3277_v5, %v10119_v63  ;;  %v3292_v19 = vmul.f32 %v3277_v5, %v10120_v23  ;;  %v6633_v56 = vld [vmem:[%s9948_s9] sm:$0xff]  ;;  %v6634_v5 = vld [vmem:[%s9948_s9 + $0x8] sm:$0xff]  ;;  %v6635_v28 = vld [vmem:[%s9948_s9 + $0x10] sm:$0xff] }
 0xd27   :  { %v3432_v38 = vadd.f32 %v3422_v26, %v3295_v24  ;;  %v3433_v34 = vadd.f32 %v3424_v14, %v3296_v41  ;;  %v3428_v43 = vadd.f32 %v3410_v61, %v3291_v6  ;;  %v3429_v29 = vadd.f32 %v3412_v20, %v3292_v19  ;;  %v8172_v61 = vld [vmem:[#allocation2 + $0x18] sm:$0xff]  ;;  %v8173_v20 = vld [vmem:[#allocation2 + $0x10] sm:$0xff] }
 0xd28   :  { %v3308_v11 = vpop.permute.xlu0 %3307  ;;  %v6636_v26 = vld [vmem:[%s9948_s9 + $0x18] sm:$0xff]  ;;  %s8293_s9 = smov [#allocation10]  }
 0xd29   :  { %v3440_v1 = vmax.f32 %v3432_v38, 0.0  ;;  %v3441_v3 = vmax.f32 %v3433_v34, 0.0  ;;  %v3436_v18 = vmax.f32 %v3428_v43, 0.0  ;;  %v3437_v49 = vmax.f32 %v3429_v29, 0.0  ;;  %s6792_s19 = sshll.u32 %s8293_s9, 4  ;;  %s6793_s19 = int_to_ptr.vmem [resolvable:$true] %s6792_s19 }
 0xd2a   :  { %v3404_v27 = vadd.f32 %v10123_v22, %v3308_v11  ;;  %v3406_v45 = vadd.f32 %v10124_v51, %v3308_v11  ;;  %s8254_s20 = scalar_lea.vmem %s6793_s19, 2048  ;;  %p8259_p7 = scmp.lt.s32.totalorder %s6793_s19, %s6793_s19 }
 0xd2b   :  { %3448 = vst [vmem:[#allocation10 + $0x30] sm:$0xff] %v3440_v1  ;;  %3449 = vst [vmem:[#allocation10 + $0x38] sm:$0xff] %v3441_v3  ;;  %p8255_p6 = scmp.ne.s32.totalorder %s6793_s19, %s8254_s20  ;;  %p8260_p8 = scmp.lt.s32.totalorder %s8254_s20, %s8254_s20 }
 0xd2c   :  { %3444 = vst [vmem:[#allocation10 + $0x10] sm:$0xff] %v3436_v18  ;;  %3445 = vst [vmem:[#allocation10 + $0x18] sm:$0xff] %v3437_v49  ;;  %v3426_v2 = vadd.f32 %v3404_v27, %v3289_v48  ;;  %v3427_v60 = vadd.f32 %v3406_v45, %v3290_v12  ;;  %v3318_v53 = vpop.permute.xlu0 %3317 }
 0xd2d   :  { %v3416_v10 = vadd.f32 %v10127_v32, %v3318_v53  ;;  %v3418_v17 = vadd.f32 %v10128_v36, %v3318_v53  ;;  %p8261_p9 = por %p8260_p8, %p8259_p7 }
 0xd2e   :  { %v3434_v7 = vmax.f32 %v3426_v2, 0.0  ;;  %v3435_v16 = vmax.f32 %v3427_v60, 0.0  ;;  %v6649_v60 = vpop.permute.xlu1 %6648 }
 0xd2f   :  { %v3430_v39 = vadd.f32 %v3416_v10, %v3293_v52  ;;  %v3431_v58 = vadd.f32 %v3418_v17, %v3294_v55  ;;  %p8262_p10 = pnand %p8261_p9, %p8255_p6 }
 0xd30   :  { %3442 = vst [vmem:[#allocation10] sm:$0xff] %v3434_v7  ;;  %3443 = vst [vmem:[#allocation10 + $0x8] sm:$0xff] %v3435_v16  ;;  %v6644_v53 = vpop.permute.xlu0 %6643 }
 0xd31   :  { %v3438_v37 = vmax.f32 %v3430_v39, 0.0  ;;  %v3439_v44 = vmax.f32 %v3431_v58, 0.0 }
 0xd33   :  { %3446 = vst [vmem:[#allocation10 + $0x20] sm:$0xff] %v3438_v37  ;;  %3447 = vst [vmem:[#allocation10 + $0x28] sm:$0xff] %v3439_v44 }
 0xde0   :  { %v6472_v31 = vpop.f32.mrf.mxu1 }
 0xde1   :  { %v6476_v24 = vmax.f32 %v6472_v31, 0.0 }
 0xde2   :  { %v6963_v41 = vpop.f32.mrf.mxu1 }
 0xde3   :  { %6964 = vmatprep.subr.msk.mxu1 %vm3156_vm4, %v6476_v24 }
 0xde4   :  { %6965 = vmatpush3.msk.msra.mxu1 %vm3156_vm4, %v6476_v24 }
 0xde5   :  { %6967 = vmatmul.mubr.msk.f32.vlgmr.msra.gmra.mxu1 %vm3143_vm3, %v6478_v40  ;;  %6703 = vmatprep.subr.mxu1 %v8172_v61 }
 0xde6   :  { %6969 = vmatprep.mubr.msk.f32.mxu1 %vm3143_vm3, %v6479_v21  ;;  %6704 = vmatpush1.msra.mxu1 %v8173_v20 }
 0xde9   :  { %6970 = vmatmul.mubr.msk.f32.gmra.mxu1 %vm3143_vm3, %v6480_v54 }
 0xdea   :  { %6737 = vmatprep.mubr.f32.mxu1 %v10108_v15 }
 0xded   :  { %6910 = vmatmul.mubr.msk.f32.vlgmr.msra.gmra.mxu1 %vm125_vm0, %v6633_v56 }
 0xdee   :  { %6743 = vmatprep.mubr.f32.mxu1 %v10108_v15 }
 0xdf1   :  { %6911 = vmatmul.mubr.msk.f32.gmra.mxu1 %vm125_vm0, %v6634_v5 }
 0xdf2   :  { %6749 = vmatprep.mubr.f32.mxu1 %v10108_v15 }
 0xdf5   :  { %6912 = vmatmul.mubr.msk.f32.gmra.mxu1 %vm125_vm0, %v6635_v28 }
 0xdf6   :  { %6755 = vmatprep.mubr.f32.mxu1 %v10108_v15 }
 0xdf9   :  { %6913 = vmatmul.mubr.msk.f32.gmra.mxu1 %vm125_vm0, %v6636_v26 }
 0xea5   :  { %v6968_v42 = vpop.f32.mrf.mxu1 }
 0xea6   :  { %v6907_v14 = vmul.f32 -1.442695, %v6968_v42 }
 0xea7   :  { %v6562_v63 = vpop.f32.mrf.mxu1 }
 0xea8   :  { %7002 = vpow2.f32 %v6907_v14  ;;  %v6906_v6 = vmul.f32 -1.442695, %v6562_v63 }
 0xea9   :  { %v6971_v23 = vpop.f32.mrf.mxu1 }
 0xeaa   :  { %7004 = vpow2.f32 %v6906_v6  ;;  %v6909_v19 = vmul.f32 -1.442695, %v6971_v23 }
 0xeab   :  { %v6572_v38 = vpop.f32.mrf.mxu1 }
 0xeac   :  { %7006 = vpow2.f32 %v6909_v19  ;;  %v6908_v34 = vmul.f32 -1.442695, %v6572_v38 }
 0xead   :  { %v6739_v22 = vpop.f32.mrf.mxu1 }
 0xeae   :  { %7008 = vpow2.f32 %v6908_v34  ;;  %v6740_v36 = vadd.f32 %v6739_v22, %v6644_v53 }
 0xeaf   :  { %v6741_v27 = vpop.f32.mrf.mxu1 }
 0xeb0   :  { %v6742_v17 = vadd.f32 %v6741_v27, %v6644_v53 }
 0xeb1   :  { %v6745_v51 = vpop.f32.mrf.mxu1 }
 0xeb2   :  { %v6746_v46 = vadd.f32 %v6745_v51, %v6649_v60 }
 0xeb3   :  { %v6747_v45 = vpop.f32.mrf.mxu1 }
 0xeb4   :  { %v6748_v55 = vadd.f32 %v6747_v45, %v6649_v60 }
 0xeb5   :  { %v7003_v43 = vpop.eup %7002  ;;  %v6751_v2 = vpop.f32.mrf.mxu1 }
 0xeb6   :  { %v6594_v15 = vadd.f32 1.0, %v7003_v43 }
 0xeb7   :  { %v7005_v29 = vpop.eup %7004  ;;  %v6753_v25 = vpop.f32.mrf.mxu1 }
 0xeb8   :  { %7010 = vrcp.f32 %v6594_v15  ;;  %v6593_v11 = vadd.f32 1.0, %v7005_v29 }
 0xeb9   :  { %v7007_v1 = vpop.eup %7006  ;;  %v6757_v7 = vpop.f32.mrf.mxu1 }
 0xeba   :  { %7012 = vrcp.f32 %v6593_v11  ;;  %v6596_v3 = vadd.f32 1.0, %v7007_v1 }
 0xebb   :  { %v7009_v18 = vpop.eup %7008  ;;  %v6759_v41 = vpop.f32.mrf.mxu1 }
 0xebc   :  { %7014 = vrcp.f32 %v6596_v3  ;;  %v6595_v49 = vadd.f32 1.0, %v7009_v18 }
 0xebe   :  { %7016 = vrcp.f32 %v6595_v49 }
 0xec5   :  { %v7011_v30 = vpop.eup %7010 }
 0xec6   :  { %6612 = vperm.xlu1 %6985, %v7011_v30  }
 0xec7   :  { %v7013_v48 = vpop.eup %7012 }
 0xec8   :  { %6607 = vperm.xlu0 %6984, %v7013_v48  }
 0xec9   :  { %v7015_v59 = vpop.eup %7014 }
 0xeca   :  { %6622 = vperm.xlu1 %6985, %v7015_v59  }
 0xecb   :  { %v7017_v12 = vpop.eup %7016 }
 0xecc   :  { %6617 = vperm.xlu0 %6984, %v7017_v12  }
 0xece   :  { %6658 = vperm.xlu1 %6985, %v9853_v50  }
 0xed0   :  { %6653 = vperm.xlu0 %6984, %v9862_v33  }
 0xf41   :  { %v6613_v52 = vpop.permute.xlu1 %6612 }
 0xf42   :  { %v6627_v32 = vmul.f32 %v6613_v52, %v9837_v47  ;;  %v6628_v10 = vmul.f32 %v6613_v52, %v9833_v57 }
 0xf43   :  { %v6608_v50 = vpop.permute.xlu0 %6607 }
 0xf44   :  { %v6764_v33 = vadd.f32 %v6746_v46, %v6627_v32  ;;  %v6765_v16 = vadd.f32 %v6748_v55, %v6628_v10  ;;  %v6625_v39 = vmul.f32 %v6608_v50, %v9843_v13  ;;  %v6626_v58 = vmul.f32 %v6608_v50, %v9839_v62 }
 0xf45   :  { %v6623_v37 = vpop.permute.xlu1 %6622 }
 0xf46   :  { %v6772_v44 = vmax.f32 %v6764_v33, 0.0  ;;  %v6773_v35 = vmax.f32 %v6765_v16, 0.0  ;;  %v6762_v31 = vadd.f32 %v6740_v36, %v6625_v39  ;;  %v6763_v24 = vadd.f32 %v6742_v17, %v6626_v58 }
 0xf47   :  { %v6618_v40 = vpop.permute.xlu0 %6617  ;;  %v6631_v61 = vmul.f32 %v6623_v37, %v9829_v9  ;;  %v6632_v13 = vmul.f32 %v6623_v37, %v9831_v0 }
 0xf48   :  { %6781 = vst [vmem:[#allocation10 + $0x50] sm:$0xff] %v6772_v44  ;;  %6782 = vst [vmem:[#allocation10 + $0x58] sm:$0xff] %v6773_v35  ;;  %v6770_v57 = vmax.f32 %v6762_v31, 0.0  ;;  %v6771_v47 = vmax.f32 %v6763_v24, 0.0  ;;  %v6629_v20 = vmul.f32 %v6618_v40, %v9823_v8  ;;  %v6630_v56 = vmul.f32 %v6618_v40, %v9825_v4 }
 0xf49   :  { %v6659_v21 = vpop.permute.xlu1 %6658 }
 0xf4a   :  { %6779 = vst [vmem:[#allocation10 + $0x40] sm:$0xff] %v6770_v57  ;;  %6780 = vst [vmem:[#allocation10 + $0x48] sm:$0xff] %v6771_v47  ;;  %v6758_v54 = vadd.f32 %v6757_v7, %v6659_v21  ;;  %v6760_v62 = vadd.f32 %v6759_v41, %v6659_v21 }
 0xf4b   :  { %v6654_v5 = vpop.permute.xlu0 %6653 }
 0xf4c   :  { %v6768_v28 = vadd.f32 %v6758_v54, %v6631_v61  ;;  %v6769_v26 = vadd.f32 %v6760_v62, %v6632_v13  ;;  %v6752_v42 = vadd.f32 %v6751_v2, %v6654_v5  ;;  %v6754_v14 = vadd.f32 %v6753_v25, %v6654_v5 }
 0xf4e   :  { %v6776_v63 = vmax.f32 %v6768_v28, 0.0  ;;  %v6777_v6 = vmax.f32 %v6769_v26, 0.0  ;;  %v6766_v23 = vadd.f32 %v6752_v42, %v6629_v20  ;;  %v6767_v19 = vadd.f32 %v6754_v14, %v6630_v56 }
 0xf50   :  { %6785 = vst [vmem:[#allocation10 + $0x70] sm:$0xff] %v6776_v63  ;;  %6786 = vst [vmem:[#allocation10 + $0x78] sm:$0xff] %v6777_v6  ;;  %v6774_v9 = vmax.f32 %v6766_v23, 0.0  ;;  %v6775_v0 = vmax.f32 %v6767_v19, 0.0 }
 0xf52   :  { %6783 = vst [vmem:[#allocation10 + $0x60] sm:$0xff] %v6774_v9  ;;  %6784 = vst [vmem:[#allocation10 + $0x68] sm:$0xff] %v6775_v0 }
 0xf53   :  { %8265 = shalt.err (!%p8262_p10)
}
 0xf54   :  { %6798 = dma.vmem_to_hbm [thread:$0]  %s6793_s19, 2048, %s9951_s12, [#allocation4], %s8286_s13, %s8286_s13, %s8287_s14  }
 0xf55   :  { %8280 = dma.done.wait [#allocation4], 2048  }
 0xf56   :  { %8281 = vsyncadd [#allocation4], 4294965248 }
 0xf57   :  { %6802 = vsyncpa [#allocation3], 1 }
 0xf58   :  { %6803 = vsyncpa [#allocation6], 1 }
 0xf59   :  { %6804 = vsyncpa [#allocation9], 1 }
 0xf5a   :  { %6805 = vsyncpa [#allocation4], 1 }

</bundles_post_ra>
